<compile_context>
chip_gen: v5e
topology: v5e:2x2
jax: 0.10.0
libtpu: 0.0.40
codegen_flags: <defaults>
</compile_context>

<pallas_src>
from functools import partial

import jax
import jax.numpy as jnp
from jax import lax
from jax.experimental import pallas as pl
from jax.experimental.pallas import tpu as pltpu

# ---------------- configuration (small, consistent with the module) ----------------
VOCAB_SIZE = 50
CHAR_SIZE = 30
EMB_DIMS = 32          # opt.embedding_dims
EMB_DIMS_CH = 16       # opt.embedding_dims_char (zero-padded to EMB_DIMS in kernel)
HID = 32               # opt.hidden_dims
HID_CH = 32            # opt.hidden_dims_char (reference attention requires == HID)
NUM_LSTM_LAYERS = 3    # nn.LSTM(num_layers=3)
BATCH = 2
SEQ = 8                # word and char sequence lengths (merged kernel needs equal)
BP = 8                 # padded stacked batch (Q,C,C2 -> 3*BATCH=6 rows, padded to 8)

assert HID == HID_CH


# ------------------------- fused BiLSTM-stack + attention kernel --------------------
def make_fused_kernel(T, NB, H, P, pairs):
    """T: seq len, NB: padded stacked batch, H: hidden, P: #attention problems,
    pairs: list of (q_seq_idx, c_seq_idx) into the stacked batch."""
    G3, G4, G8 = 3 * H, 4 * H, 8 * H
    D = 2 * H

    def kernel(x_ref,
               w0_ref, u0_ref, b0_ref,
               w1_ref, u1_ref, b1_ref,
               w2_ref, u2_ref, b2_ref,
               awT_ref, ab_ref, sel_ref,
               out_ref, ya_ref, yb_ref):

        def run_layer(x2d_bf16, w_ref, u_ref, b_ref, dst_ref):
            # Input projection for ALL timesteps and BOTH directions in one matmul.
            gx = jnp.dot(x2d_bf16, w_ref[0],
                         preferred_element_type=jnp.float32) + b_ref[0]   # (T*NB, 8H)
            U = u_ref[0]                        # (2H, 8H) bf16, blockdiag(Whh_f^T, Whh_r^T)
            c_f = jnp.zeros((NB, H), jnp.float32)
            c_r = jnp.zeros((NB, H), jnp.float32)
            h_cat = jnp.zeros((NB, D), jnp.float32)
            for t in range(T):                  # fully unrolled serial recurrence
                tr = T - 1 - t
                if t == 0:                      # zero initial state: skip the h@U matmul
                    pre_f = gx[0:NB, 0:G4]
                    pre_r = gx[tr * NB:(tr + 1) * NB, G4:G8]
                else:
                    ghh = jnp.dot(h_cat.astype(jnp.bfloat16), U,
                                  preferred_element_type=jnp.float32)     # (NB, 8H)
                    pre_f = ghh[:, 0:G4] + gx[t * NB:(t + 1) * NB, 0:G4]
                    pre_r = ghh[:, G4:G8] + gx[tr * NB:(tr + 1) * NB, G4:G8]
                # gate columns per direction packed [i | f | o | g]
                sf = jax.nn.sigmoid(pre_f[:, 0:G3])
                gf = jnp.tanh(pre_f[:, G3:G4])
                sr = jax.nn.sigmoid(pre_r[:, 0:G3])
                gr = jnp.tanh(pre_r[:, G3:G4])
                c_f = sf[:, H:2 * H] * c_f + sf[:, 0:H] * gf
                c_r = sr[:, H:2 * H] * c_r + sr[:, 0:H] * gr
                h_f = sf[:, 2 * H:G3] * jnp.tanh(c_f)
                h_r = sr[:, 2 * H:G3] * jnp.tanh(c_r)
                h_cat = jnp.concatenate([h_f, h_r], axis=-1)   # feeds next step's dot
                # time-major scratch writes (forward at t, reverse at tr)
                dst_ref[pl.ds(t * NB, NB), 0:H] = h_f
                dst_ref[pl.ds(tr * NB, NB), H:D] = h_r

        # ---- 3-layer BiLSTM (eval-mode: no inter-layer dropout) ----
        run_layer(x_ref[0].astype(jnp.bfloat16), w0_ref, u0_ref, b0_ref, ya_ref)
        run_layer(ya_ref[...].astype(jnp.bfloat16), w1_ref, u1_ref, b1_ref, yb_ref)
        run_layer(yb_ref[...].astype(jnp.bfloat16), w2_ref, u2_ref, b2_ref, ya_ref)

        # ---- fused attention tail ----
        y16 = ya_ref[...].astype(jnp.bfloat16)                  # (T*NB, D) time-major
        # one-hot selection matmul: time-major rows -> per-sequence batch-major slabs
        Yb = jnp.dot(sel_ref[...], y16,
                     preferred_element_type=jnp.float32)        # (NSEQ*T, D)
        # batched context projection + tanh for all sequences at once
        Cp = jnp.tanh(jnp.dot(Yb.astype(jnp.bfloat16), awT_ref[0],
                              preferred_element_type=jnp.float32) + ab_ref[0])
        trans_b = (((1,), (1,)), ((), ()))                      # contract last dims
        for p, (qn, cn) in enumerate(pairs):
            Q = Yb[qn * T:(qn + 1) * T]                         # (T, D)
            C = Cp[cn * T:(cn + 1) * T]                         # (T, D), projected
            Hm = lax.dot_general(Q.astype(jnp.bfloat16), C.astype(jnp.bfloat16),
                                 trans_b,
                                 preferred_element_type=jnp.float32)   # (T, T)
            # shared-exp softmax: one exp serves both row- and column-normalization
            m = jnp.max(jnp.max(Hm, axis=1, keepdims=True), axis=0, keepdims=True)
            Ee = jnp.exp(Hm - m)
            inv_row = pl.reciprocal(jnp.sum(Ee, axis=1, keepdims=True), approx=True)
            inv_col = pl.reciprocal(jnp.sum(Ee, axis=0, keepdims=True), approx=True)
            AQ = Ee * inv_row                                   # softmax(Hm, dim=1)
            ACt = Ee * inv_col                                  # = softmax(Hm.T, dim=1)^T
            MQ = jnp.dot(AQ.astype(jnp.bfloat16), Q.astype(jnp.bfloat16),
                         preferred_element_type=jnp.float32)
            MC = jnp.dot(ACt.T.astype(jnp.bfloat16), MQ.astype(jnp.bfloat16),
                         preferred_element_type=jnp.float32)    # (8,8) transpose only
            # lane-dense (8, 128) unmasked store: [MQ | MC]
            out_ref[0, p] = jnp.concatenate([MQ, MC], axis=-1)

    return kernel


def run_fused(x_all, sel, lstm_params, attn_wT, attn_b, T, P, pairs):
    H = HID
    D = 2 * H
    in_specs = [pl.BlockSpec((1, T * BP, EMB_DIMS), lambda i: (i, 0, 0))]
    args = [x_all]
    for (w, u, b) in lstm_params:
        din = w.shape[1]
        in_specs += [
            pl.BlockSpec((1, din, 8 * H), lambda i: (i, 0, 0)),   # [Wih_f^T | Wih_r^T]
            pl.BlockSpec((1, 2 * H, 8 * H), lambda i: (i, 0, 0)),  # blockdiag Whh^T
            pl.BlockSpec((1, 1, 8 * H), lambda i: (i, 0, 0)),     # fused bias
        ]
        args += [w, u, b]
    in_specs += [
        pl.BlockSpec((1, D, D), lambda i: (i, 0, 0)),             # S1^T / S2^T
        pl.BlockSpec((1, 1, D), lambda i: (i, 0, 0)),             # attention bias
        pl.BlockSpec(sel.shape, lambda i: (0, 0)),                # one-hot selection
    ]
    args += [attn_wT, attn_b, sel]

    return pl.pallas_call(
        make_fused_kernel(T, BP, H, P, pairs),
        out_shape=jax.ShapeDtypeStruct((2, P, T, 2 * D), jnp.float32),
        grid_spec=pltpu.PrefetchScalarGridSpec(
            num_scalar_prefetch=0,
            grid=(2,),                                            # word / char groups
            in_specs=in_specs,
            out_specs=pl.BlockSpec((1, P, T, 2 * D), lambda i: (i, 0, 0, 0)),
            scratch_shapes=[pltpu.VMEM((T * BP, D), jnp.float32),  # ping
                            pltpu.VMEM((T * BP, D), jnp.float32)],  # pong
        ),
        compiler_params=pltpu.CompilerParams(
            dimension_semantics=("parallel",)),                   # megacore on v7x
    )(*args)


# ------------------------------ parameters ------------------------------------------
def init_params(key):
    ks = iter(jax.random.split(key, 64))

    def u(shape, scale):
        return jax.random.uniform(next(ks), shape, jnp.float32, -scale, scale)

    H = HID
    params = {}
    emb = jax.random.normal(next(ks), (VOCAB_SIZE, EMB_DIMS), jnp.float32) * 0.1
    params["emb"] = emb.at[0].set(0.0)                   # padding_idx=0
    emb_ch = jax.random.normal(next(ks), (CHAR_SIZE, EMB_DIMS_CH), jnp.float32) * 0.1
    params["emb_ch"] = emb_ch.at[0].set(0.0)             # padding_idx=0

    k = H ** -0.5

    def repack(w):
        # PyTorch gate row order (i, f, g, o) -> kernel order (i, f, o, g)
        return jnp.concatenate([w[0:H], w[H:2 * H], w[3 * H:4 * H], w[2 * H:3 * H]],
                               axis=0)

    def layer(in_dim):
        # one BiLSTM layer, pre-fused / pre-transposed / repacked, weights in bf16:
        #   w_cat = [Wih_f^T | Wih_r^T]                 (in_dim, 8H)
        #   U     = blockdiag(Whh_f^T, Whh_r^T)         (2H, 8H)
        #   b_cat = [b_ih_f+b_hh_f | b_ih_r+b_hh_r]     (1, 8H)  (f32)
        wih_f, whh_f = u((4 * H, in_dim), k), u((4 * H, H), k)
        wih_r, whh_r = u((4 * H, in_dim), k), u((4 * H, H), k)
        b_f = repack(u((4 * H,), k) + u((4 * H,), k))
        b_r = repack(u((4 * H,), k) + u((4 * H,), k))
        w_cat = jnp.concatenate([repack(wih_f).T, repack(wih_r).T], axis=1)
        U = jnp.zeros((2 * H, 8 * H), jnp.float32)
        U = U.at[0:H, 0:4 * H].set(repack(whh_f).T)
        U = U.at[H:2 * H, 4 * H:8 * H].set(repack(whh_r).T)
        b_cat = jnp.concatenate([b_f, b_r]).reshape(1, 8 * H)
        return w_cat.astype(jnp.bfloat16), U.astype(jnp.bfloat16), b_cat

    word_layers = [layer(EMB_DIMS), layer(2 * H), layer(2 * H)]
    char_layers = [layer(EMB_DIMS_CH), layer(2 * H), layer(2 * H)]
    # zero-pad char layer-0 input projection (16 -> 32 rows); char embeddings are
    # zero-padded to EMB_DIMS in the wrapper, so this is numerically exact.
    w0c = jnp.pad(char_layers[0][0], ((0, EMB_DIMS - EMB_DIMS_CH), (0, 0)))
    char_layers[0] = (w0c,) + char_layers[0][1:]

    params["lstm"] = [
        tuple(jnp.stack([word_layers[l][j], char_layers[l][j]], axis=0)
              for j in range(3))
        for l in range(NUM_LSTM_LAYERS)
    ]

    D = 2 * H
    S1_w, S1_b = u((D, D), 0.1), u((D,), D ** -0.5)      # init_weights(): uniform(-0.1,0.1)
    S2_w, S2_b = u((D, D), 0.1), u((D,), D ** -0.5)
    params["attn_wT"] = jnp.stack([S1_w.T, S2_w.T], axis=0).astype(jnp.bfloat16)
    params["attn_b"] = jnp.stack([S1_b, S2_b], axis=0).reshape(2, 1, D)
    return params


# ------------------------------ encoder forward --------------------------------------
def lstm_encoder_forward(params, input_Q, input_C, input_C2,
                         input_Q_ch, input_C_ch, input_C2_ch, is_train=True):
    # inputs are (seq, batch) int32, like the reference (transposed internally there)
    S, B = input_Q.shape
    word_ids = [input_Q, input_C] + ([input_C2] if is_train else [])
    char_ids = [input_Q_ch, input_C_ch] + ([input_C2_ch] if is_train else [])
    n_seq = len(word_ids) * B
    assert n_seq <= BP and input_Q_ch.shape[0] == S

    # embeddings, time-major, weight-sharing sequences stacked along batch:
    # stacked batch layout = [Q_0..Q_{B-1}, C_0.., C2_0..]
    word_tok = jnp.concatenate(word_ids, axis=1)                 # (S, n_seq)
    char_tok = jnp.concatenate(char_ids, axis=1)
    x_w = jnp.take(params["emb"], word_tok, axis=0)              # (S, n_seq, E)
    x_c = jnp.take(params["emb_ch"], char_tok, axis=0)           # (S, n_seq, E_ch)
    x_w = jnp.pad(x_w, ((0, 0), (0, BP - n_seq), (0, 0)))
    x_c = jnp.pad(x_c, ((0, 0), (0, BP - n_seq), (0, EMB_DIMS - EMB_DIMS_CH)))
    x_all = jnp.stack([x_w, x_c], axis=0).reshape(2, S * BP, EMB_DIMS)
    x_all = x_all.astype(jnp.bfloat16)

    # attention problems: (Q_b, C_b) for all b, plus (Q_b, C2_b) when training
    pairs = [(b, B + b) for b in range(B)]
    if is_train:
        pairs += [(b, 2 * B + b) for b in range(B)]
    P = len(pairs)

    # one-hot selection matrix: row n*S+t picks time-major row t*BP+n
    idx = jnp.arange(n_seq * S)
    sel = jax.nn.one_hot((idx % S) * BP + (idx // S), S * BP, dtype=jnp.bfloat16)

    out = run_fused(x_all, sel, params["lstm"], params["attn_wT"], params["attn_b"],
                    S, P, pairs)                                 # (2, P, S, 2D)
    D = 2 * HID
    mq = out[..., :D]
    mc = out[..., D:]

    def repre(lo, hi):
        rq = jnp.concatenate([mq[0, lo:hi].reshape(B, S * D),
                              mq[1, lo:hi].reshape(B, S * D)], axis=1)
        rc = jnp.concatenate([mc[0, lo:hi].reshape(B, S * D),
                              mc[1, lo:hi].reshape(B, S * D)], axis=1)
        return rq, rc

    repre_Q1, repre_C = repre(0, B)
    if is_train:
        repre_Q2, repre_C2 = repre(B, 2 * B)
        return repre_Q1, repre_C, repre_Q2, repre_C2
    return repre_Q1, repre_C


# ------------------------------ AnswerSelection forward ------------------------------
def pairwise_l1(x1, x2, eps=1e-6):
    # nn.PairwiseDistance(p=1, eps=1e-6), followed by .view(-1, 1)
    return jnp.sum(jnp.abs(x1 - x2 + eps), axis=1, keepdims=True)


@partial(jax.jit, static_argnames=("is_train",))
def answer_selection_forward(params, batch_a, batch_b, batch_c,
                             char1, char2, char3, is_train=True):
    if is_train:
        rq1, rc, rq2, rc2 = lstm_encoder_forward(
            params, batch_a, batch_b, batch_c, char1, char2, char3, True)
        prediction1 = pairwise_l1(rq1, rc)
        prediction2 = pairwise_l1(rq2, rc2)
        return prediction1, prediction2, (rq1, rc, rq2, rc2)
    rq1, rc = lstm_encoder_forward(
        params, batch_a, batch_b, batch_c, char1, char2, char3, False)
    prediction = pairwise_l1(rq1, rc)
    return prediction, (rq1, rc)


# ------------------------------ main -------------------------------------------------
if __name__ == "__main__":
    key = jax.random.PRNGKey(0)
    kp, kq, kc, kc2, kqc, kcc, kc2c = jax.random.split(key, 7)
    params = init_params(kp)

    input_Q = jax.random.randint(kq, (SEQ, BATCH), 0, VOCAB_SIZE, jnp.int32)
    input_C = jax.random.randint(kc, (SEQ, BATCH), 0, VOCAB_SIZE, jnp.int32)
    input_C2 = jax.random.randint(kc2, (SEQ, BATCH), 0, VOCAB_SIZE, jnp.int32)
    input_Q_ch = jax.random.randint(kqc, (SEQ, BATCH), 0, CHAR_SIZE, jnp.int32)
    input_C_ch = jax.random.randint(kcc, (SEQ, BATCH), 0, CHAR_SIZE, jnp.int32)
    input_C2_ch = jax.random.randint(kc2c, (SEQ, BATCH), 0, CHAR_SIZE, jnp.int32)

    pred1, pred2, reprs = answer_selection_forward(
        params, input_Q, input_C, input_C2,
        input_Q_ch, input_C_ch, input_C2_ch, is_train=True)
    pred1, pred2, reprs = jax.block_until_ready((pred1, pred2, reprs))
    repre_Q1, repre_C, repre_Q2, repre_C2 = reprs

    expected = (BATCH, SEQ * 2 * HID + SEQ * 2 * HID_CH)
    assert repre_Q1.shape == expected, repre_Q1.shape
    assert repre_C.shape == expected
    assert repre_Q2.shape == expected
    assert repre_C2.shape == expected
    assert pred1.shape == (BATCH, 1) and pred2.shape == (BATCH, 1)
    assert all(bool(jnp.all(jnp.isfinite(o)))
               for o in (pred1, pred2, repre_Q1, repre_C, repre_Q2, repre_C2))
    print("KERNEL_OK")
</pallas_src>

<mosaic_0001>
module attributes {stable_mosaic.version = 11 : i64} {
  func.func @kernel(%arg0: i32, %arg1: memref<1x64x32xbf16, #tpu.memory_space<vmem>>, %arg2: memref<1x32x256xbf16, #tpu.memory_space<vmem>>, %arg3: memref<1x64x256xbf16, #tpu.memory_space<vmem>>, %arg4: memref<1x1x256xf32, #tpu.memory_space<vmem>>, %arg5: memref<1x64x256xbf16, #tpu.memory_space<vmem>>, %arg6: memref<1x64x256xbf16, #tpu.memory_space<vmem>>, %arg7: memref<1x1x256xf32, #tpu.memory_space<vmem>>, %arg8: memref<1x64x256xbf16, #tpu.memory_space<vmem>>, %arg9: memref<1x64x256xbf16, #tpu.memory_space<vmem>>, %arg10: memref<1x1x256xf32, #tpu.memory_space<vmem>>, %arg11: memref<1x64x64xbf16, #tpu.memory_space<vmem>>, %arg12: memref<1x1x64xf32, #tpu.memory_space<vmem>>, %arg13: memref<48x64xbf16, #tpu.memory_space<vmem>>, %arg14: memref<1x4x8x128xf32, #tpu.memory_space<vmem>>, %arg15: memref<64x64xf32, #tpu.memory_space<vmem>>, %arg16: memref<64x64xf32, #tpu.memory_space<vmem>>) attributes {dimension_semantics = [#tpu.dimension_semantics<parallel>], iteration_bounds = array<i64: 2>, scalar_prefetch = 0 : i64, scratch_operands = 2 : i64, tpu.core_type = #tpu.core_type<tc>, window_params = [{transform_indices = @transform_0, window_bounds = array<i64: 1, 64, 32>}, {transform_indices = @transform_1, window_bounds = array<i64: 1, 32, 256>}, {transform_indices = @transform_2, window_bounds = array<i64: 1, 64, 256>}, {transform_indices = @transform_3, window_bounds = array<i64: 1, 1, 256>}, {transform_indices = @transform_4, window_bounds = array<i64: 1, 64, 256>}, {transform_indices = @transform_5, window_bounds = array<i64: 1, 64, 256>}, {transform_indices = @transform_6, window_bounds = array<i64: 1, 1, 256>}, {transform_indices = @transform_7, window_bounds = array<i64: 1, 64, 256>}, {transform_indices = @transform_8, window_bounds = array<i64: 1, 64, 256>}, {transform_indices = @transform_9, window_bounds = array<i64: 1, 1, 256>}, {transform_indices = @transform_10, window_bounds = array<i64: 1, 64, 64>}, {transform_indices = @transform_11, window_bounds = array<i64: 1, 1, 64>}, {pipeline_mode = #tpu.pipeline_mode<synchronous>, transform_indices = @transform_12, window_bounds = array<i64: 48, 64>}, {transform_indices = @transform_13, window_bounds = array<i64: 1, 4, 8, 128>}]} {
    %c0 = arith.constant 0 : index
    %c0_0 = arith.constant 0 : index
    %c0_1 = arith.constant 0 : index
    %0 = vector.load %arg1[%c0, %c0_0, %c0_1] : memref<1x64x32xbf16, #tpu.memory_space<vmem>>, vector<1x64x32xbf16>
    %1 = vector.shape_cast %0 : vector<1x64x32xbf16> to vector<64x32xbf16>
    %c0_2 = arith.constant 0 : index
    %c0_3 = arith.constant 0 : index
    %c0_4 = arith.constant 0 : index
    %2 = vector.load %arg2[%c0_2, %c0_3, %c0_4] : memref<1x32x256xbf16, #tpu.memory_space<vmem>>, vector<1x32x256xbf16>
    %3 = vector.shape_cast %2 : vector<1x32x256xbf16> to vector<32x256xbf16>
    %cst = arith.constant dense<0.000000e+00> : vector<64x256xf32>
    %4 = tpu.matmul %1, %3, %cst {dimension_numbers = #tpu.dot_dimension_numbers<[1], [0], [0], [1], [0, 0, 1, 1], [], []>} : vector<64x32xbf16>, vector<32x256xbf16>, vector<64x256xf32> -> vector<64x256xf32>
    %c0_5 = arith.constant 0 : index
    %c0_6 = arith.constant 0 : index
    %c0_7 = arith.constant 0 : index
    %5 = vector.load %arg4[%c0_5, %c0_6, %c0_7] : memref<1x1x256xf32, #tpu.memory_space<vmem>>, vector<1x1x256xf32>
    %6 = vector.shape_cast %5 : vector<1x1x256xf32> to vector<1x256xf32>
    %7 = vector.broadcast %6 : vector<1x256xf32> to vector<64x256xf32>
    %8 = arith.addf %4, %7 : vector<64x256xf32>
    %c0_8 = arith.constant 0 : index
    %c0_9 = arith.constant 0 : index
    %c0_10 = arith.constant 0 : index
    %9 = vector.load %arg3[%c0_8, %c0_9, %c0_10] : memref<1x64x256xbf16, #tpu.memory_space<vmem>>, vector<1x64x256xbf16>
    %10 = vector.shape_cast %9 : vector<1x64x256xbf16> to vector<64x256xbf16>
    %cst_11 = arith.constant 0.000000e+00 : f32
    %11 = vector.broadcast %cst_11 : f32 to vector<8x32xf32>
    %cst_12 = arith.constant 0.000000e+00 : f32
    %12 = vector.broadcast %cst_12 : f32 to vector<8x32xf32>
    %13 = vector.extract_strided_slice %8 {offsets = [0, 0], sizes = [8, 128], strides = [1, 1]} : vector<64x256xf32> to vector<8x128xf32>
    %14 = vector.extract_strided_slice %8 {offsets = [56, 128], sizes = [8, 128], strides = [1, 1]} : vector<64x256xf32> to vector<8x128xf32>
    %15 = vector.extract_strided_slice %13 {offsets = [0, 0], sizes = [8, 96], strides = [1, 1]} : vector<8x128xf32> to vector<8x96xf32>
    %16 = arith.negf %15 : vector<8x96xf32>
    %17 = math.exp %16 : vector<8x96xf32>
    %cst_13 = arith.constant 1.000000e+00 : f32
    %18 = vector.broadcast %cst_13 : f32 to vector<8x96xf32>
    %19 = arith.addf %18, %17 : vector<8x96xf32>
    %20 = arith.divf %18, %19 : vector<8x96xf32>
    %21 = vector.extract_strided_slice %13 {offsets = [0, 96], sizes = [8, 32], strides = [1, 1]} : vector<8x128xf32> to vector<8x32xf32>
    %22 = math.tanh %21 : vector<8x32xf32>
    %23 = vector.extract_strided_slice %14 {offsets = [0, 0], sizes = [8, 96], strides = [1, 1]} : vector<8x128xf32> to vector<8x96xf32>
    %24 = arith.negf %23 : vector<8x96xf32>
    %25 = math.exp %24 : vector<8x96xf32>
    %cst_14 = arith.constant 1.000000e+00 : f32
    %26 = vector.broadcast %cst_14 : f32 to vector<8x96xf32>
    %27 = arith.addf %26, %25 : vector<8x96xf32>
    %28 = arith.divf %26, %27 : vector<8x96xf32>
    %29 = vector.extract_strided_slice %14 {offsets = [0, 96], sizes = [8, 32], strides = [1, 1]} : vector<8x128xf32> to vector<8x32xf32>
    %30 = math.tanh %29 : vector<8x32xf32>
    %31 = vector.extract_strided_slice %20 {offsets = [0, 32], sizes = [8, 32], strides = [1, 1]} : vector<8x96xf32> to vector<8x32xf32>
    %32 = arith.mulf %31, %11 : vector<8x32xf32>
    %33 = vector.extract_strided_slice %20 {offsets = [0, 0], sizes = [8, 32], strides = [1, 1]} : vector<8x96xf32> to vector<8x32xf32>
    %34 = arith.mulf %33, %22 : vector<8x32xf32>
    %35 = arith.addf %32, %34 : vector<8x32xf32>
    %36 = vector.extract_strided_slice %28 {offsets = [0, 32], sizes = [8, 32], strides = [1, 1]} : vector<8x96xf32> to vector<8x32xf32>
    %37 = arith.mulf %36, %12 : vector<8x32xf32>
    %38 = vector.extract_strided_slice %28 {offsets = [0, 0], sizes = [8, 32], strides = [1, 1]} : vector<8x96xf32> to vector<8x32xf32>
    %39 = arith.mulf %38, %30 : vector<8x32xf32>
    %40 = arith.addf %37, %39 : vector<8x32xf32>
    %41 = vector.extract_strided_slice %20 {offsets = [0, 64], sizes = [8, 32], strides = [1, 1]} : vector<8x96xf32> to vector<8x32xf32>
    %42 = math.tanh %35 : vector<8x32xf32>
    %43 = arith.mulf %41, %42 : vector<8x32xf32>
    %44 = vector.extract_strided_slice %28 {offsets = [0, 64], sizes = [8, 32], strides = [1, 1]} : vector<8x96xf32> to vector<8x32xf32>
    %45 = math.tanh %40 : vector<8x32xf32>
    %46 = arith.mulf %44, %45 : vector<8x32xf32>
    %47 = tpu.concatenate %43, %46 in 1 : vector<8x32xf32>, vector<8x32xf32> -> vector<8x64xf32>
    %c0_15 = arith.constant 0 : index
    %c0_16 = arith.constant 0 : index
    %48 = vector.load %arg15[%c0_15, %c0_16] : memref<64x64xf32, #tpu.memory_space<vmem>>, vector<8x32xf32>
    tpu.vector_store %arg15[%c0_15, %c0_16], %43 {strides = array<i32>} : memref<64x64xf32, #tpu.memory_space<vmem>>, vector<8x32xf32>,
    %c56 = arith.constant 56 : index
    %c32 = arith.constant 32 : index
    %49 = vector.load %arg15[%c56, %c32] : memref<64x64xf32, #tpu.memory_space<vmem>>, vector<8x32xf32>
    tpu.vector_store %arg15[%c56, %c32], %46 {strides = array<i32>} : memref<64x64xf32, #tpu.memory_space<vmem>>, vector<8x32xf32>,
    %50 = arith.truncf %47 : vector<8x64xf32> to vector<8x64xbf16>
    %cst_17 = arith.constant dense<0.000000e+00> : vector<8x256xf32>
    %51 = tpu.matmul %50, %10, %cst_17 {dimension_numbers = #tpu.dot_dimension_numbers<[1], [0], [0], [1], [0, 0, 1, 1], [], []>} : vector<8x64xbf16>, vector<64x256xbf16>, vector<8x256xf32> -> vector<8x256xf32>
    %52 = vector.extract_strided_slice %51 {offsets = [0, 0], sizes = [8, 128], strides = [1, 1]} : vector<8x256xf32> to vector<8x128xf32>
    %53 = vector.extract_strided_slice %8 {offsets = [8, 0], sizes = [8, 128], strides = [1, 1]} : vector<64x256xf32> to vector<8x128xf32>
    %54 = arith.addf %52, %53 : vector<8x128xf32>
    %55 = vector.extract_strided_slice %51 {offsets = [0, 128], sizes = [8, 128], strides = [1, 1]} : vector<8x256xf32> to vector<8x128xf32>
    %56 = vector.extract_strided_slice %8 {offsets = [48, 128], sizes = [8, 128], strides = [1, 1]} : vector<64x256xf32> to vector<8x128xf32>
    %57 = arith.addf %55, %56 : vector<8x128xf32>
    %58 = vector.extract_strided_slice %54 {offsets = [0, 0], sizes = [8, 96], strides = [1, 1]} : vector<8x128xf32> to vector<8x96xf32>
    %59 = arith.negf %58 : vector<8x96xf32>
    %60 = math.exp %59 : vector<8x96xf32>
    %cst_18 = arith.constant 1.000000e+00 : f32
    %61 = vector.broadcast %cst_18 : f32 to vector<8x96xf32>
    %62 = arith.addf %61, %60 : vector<8x96xf32>
    %63 = arith.divf %61, %62 : vector<8x96xf32>
    %64 = vector.extract_strided_slice %54 {offsets = [0, 96], sizes = [8, 32], strides = [1, 1]} : vector<8x128xf32> to vector<8x32xf32>
    %65 = math.tanh %64 : vector<8x32xf32>
    %66 = vector.extract_strided_slice %57 {offsets = [0, 0], sizes = [8, 96], strides = [1, 1]} : vector<8x128xf32> to vector<8x96xf32>
    %67 = arith.negf %66 : vector<8x96xf32>
    %68 = math.exp %67 : vector<8x96xf32>
    %cst_19 = arith.constant 1.000000e+00 : f32
    %69 = vector.broadcast %cst_19 : f32 to vector<8x96xf32>
    %70 = arith.addf %69, %68 : vector<8x96xf32>
    %71 = arith.divf %69, %70 : vector<8x96xf32>
    %72 = vector.extract_strided_slice %57 {offsets = [0, 96], sizes = [8, 32], strides = [1, 1]} : vector<8x128xf32> to vector<8x32xf32>
    %73 = math.tanh %72 : vector<8x32xf32>
    %74 = vector.extract_strided_slice %63 {offsets = [0, 32], sizes = [8, 32], strides = [1, 1]} : vector<8x96xf32> to vector<8x32xf32>
    %75 = arith.mulf %74, %35 : vector<8x32xf32>
    %76 = vector.extract_strided_slice %63 {offsets = [0, 0], sizes = [8, 32], strides = [1, 1]} : vector<8x96xf32> to vector<8x32xf32>
    %77 = arith.mulf %76, %65 : vector<8x32xf32>
    %78 = arith.addf %75, %77 : vector<8x32xf32>
    %79 = vector.extract_strided_slice %71 {offsets = [0, 32], sizes = [8, 32], strides = [1, 1]} : vector<8x96xf32> to vector<8x32xf32>
    %80 = arith.mulf %79, %40 : vector<8x32xf32>
    %81 = vector.extract_strided_slice %71 {offsets = [0, 0], sizes = [8, 32], strides = [1, 1]} : vector<8x96xf32> to vector<8x32xf32>
    %82 = arith.mulf %81, %73 : vector<8x32xf32>
    %83 = arith.addf %80, %82 : vector<8x32xf32>
    %84 = vector.extract_strided_slice %63 {offsets = [0, 64], sizes = [8, 32], strides = [1, 1]} : vector<8x96xf32> to vector<8x32xf32>
    %85 = math.tanh %78 : vector<8x32xf32>
    %86 = arith.mulf %84, %85 : vector<8x32xf32>
    %87 = vector.extract_strided_slice %71 {offsets = [0, 64], sizes = [8, 32], strides = [1, 1]} : vector<8x96xf32> to vector<8x32xf32>
    %88 = math.tanh %83 : vector<8x32xf32>
    %89 = arith.mulf %87, %88 : vector<8x32xf32>
    %90 = tpu.concatenate %86, %89 in 1 : vector<8x32xf32>, vector<8x32xf32> -> vector<8x64xf32>
    %c8 = arith.constant 8 : index
    %c0_20 = arith.constant 0 : index
    %91 = vector.load %arg15[%c8, %c0_20] : memref<64x64xf32, #tpu.memory_space<vmem>>, vector<8x32xf32>
    tpu.vector_store %arg15[%c8, %c0_20], %86 {strides = array<i32>} : memref<64x64xf32, #tpu.memory_space<vmem>>, vector<8x32xf32>,
    %c48 = arith.constant 48 : index
    %c32_21 = arith.constant 32 : index
    %92 = vector.load %arg15[%c48, %c32_21] : memref<64x64xf32, #tpu.memory_space<vmem>>, vector<8x32xf32>
    tpu.vector_store %arg15[%c48, %c32_21], %89 {strides = array<i32>} : memref<64x64xf32, #tpu.memory_space<vmem>>, vector<8x32xf32>,
    %93 = arith.truncf %90 : vector<8x64xf32> to vector<8x64xbf16>
    %cst_22 = arith.constant dense<0.000000e+00> : vector<8x256xf32>
    %94 = tpu.matmul %93, %10, %cst_22 {dimension_numbers = #tpu.dot_dimension_numbers<[1], [0], [0], [1], [0, 0, 1, 1], [], []>} : vector<8x64xbf16>, vector<64x256xbf16>, vector<8x256xf32> -> vector<8x256xf32>
    %95 = vector.extract_strided_slice %94 {offsets = [0, 0], sizes = [8, 128], strides = [1, 1]} : vector<8x256xf32> to vector<8x128xf32>
    %96 = vector.extract_strided_slice %8 {offsets = [16, 0], sizes = [8, 128], strides = [1, 1]} : vector<64x256xf32> to vector<8x128xf32>
    %97 = arith.addf %95, %96 : vector<8x128xf32>
    %98 = vector.extract_strided_slice %94 {offsets = [0, 128], sizes = [8, 128], strides = [1, 1]} : vector<8x256xf32> to vector<8x128xf32>
    %99 = vector.extract_strided_slice %8 {offsets = [40, 128], sizes = [8, 128], strides = [1, 1]} : vector<64x256xf32> to vector<8x128xf32>
    %100 = arith.addf %98, %99 : vector<8x128xf32>
    %101 = vector.extract_strided_slice %97 {offsets = [0, 0], sizes = [8, 96], strides = [1, 1]} : vector<8x128xf32> to vector<8x96xf32>
    %102 = arith.negf %101 : vector<8x96xf32>
    %103 = math.exp %102 : vector<8x96xf32>
    %cst_23 = arith.constant 1.000000e+00 : f32
    %104 = vector.broadcast %cst_23 : f32 to vector<8x96xf32>
    %105 = arith.addf %104, %103 : vector<8x96xf32>
    %106 = arith.divf %104, %105 : vector<8x96xf32>
    %107 = vector.extract_strided_slice %97 {offsets = [0, 96], sizes = [8, 32], strides = [1, 1]} : vector<8x128xf32> to vector<8x32xf32>
    %108 = math.tanh %107 : vector<8x32xf32>
    %109 = vector.extract_strided_slice %100 {offsets = [0, 0], sizes = [8, 96], strides = [1, 1]} : vector<8x128xf32> to vector<8x96xf32>
    %110 = arith.negf %109 : vector<8x96xf32>
    %111 = math.exp %110 : vector<8x96xf32>
    %cst_24 = arith.constant 1.000000e+00 : f32
    %112 = vector.broadcast %cst_24 : f32 to vector<8x96xf32>
    %113 = arith.addf %112, %111 : vector<8x96xf32>
    %114 = arith.divf %112, %113 : vector<8x96xf32>
    %115 = vector.extract_strided_slice %100 {offsets = [0, 96], sizes = [8, 32], strides = [1, 1]} : vector<8x128xf32> to vector<8x32xf32>
    %116 = math.tanh %115 : vector<8x32xf32>
    %117 = vector.extract_strided_slice %106 {offsets = [0, 32], sizes = [8, 32], strides = [1, 1]} : vector<8x96xf32> to vector<8x32xf32>
    %118 = arith.mulf %117, %78 : vector<8x32xf32>
    %119 = vector.extract_strided_slice %106 {offsets = [0, 0], sizes = [8, 32], strides = [1, 1]} : vector<8x96xf32> to vector<8x32xf32>
    %120 = arith.mulf %119, %108 : vector<8x32xf32>
    %121 = arith.addf %118, %120 : vector<8x32xf32>
    %122 = vector.extract_strided_slice %114 {offsets = [0, 32], sizes = [8, 32], strides = [1, 1]} : vector<8x96xf32> to vector<8x32xf32>
    %123 = arith.mulf %122, %83 : vector<8x32xf32>
    %124 = vector.extract_strided_slice %114 {offsets = [0, 0], sizes = [8, 32], strides = [1, 1]} : vector<8x96xf32> to vector<8x32xf32>
    %125 = arith.mulf %124, %116 : vector<8x32xf32>
    %126 = arith.addf %123, %125 : vector<8x32xf32>
    %127 = vector.extract_strided_slice %106 {offsets = [0, 64], sizes = [8, 32], strides = [1, 1]} : vector<8x96xf32> to vector<8x32xf32>
    %128 = math.tanh %121 : vector<8x32xf32>
    %129 = arith.mulf %127, %128 : vector<8x32xf32>
    %130 = vector.extract_strided_slice %114 {offsets = [0, 64], sizes = [8, 32], strides = [1, 1]} : vector<8x96xf32> to vector<8x32xf32>
    %131 = math.tanh %126 : vector<8x32xf32>
    %132 = arith.mulf %130, %131 : vector<8x32xf32>
    %133 = tpu.concatenate %129, %132 in 1 : vector<8x32xf32>, vector<8x32xf32> -> vector<8x64xf32>
    %c16 = arith.constant 16 : index
    %c0_25 = arith.constant 0 : index
    %134 = vector.load %arg15[%c16, %c0_25] : memref<64x64xf32, #tpu.memory_space<vmem>>, vector<8x32xf32>
    tpu.vector_store %arg15[%c16, %c0_25], %129 {strides = array<i32>} : memref<64x64xf32, #tpu.memory_space<vmem>>, vector<8x32xf32>,
    %c40 = arith.constant 40 : index
    %c32_26 = arith.constant 32 : index
    %135 = vector.load %arg15[%c40, %c32_26] : memref<64x64xf32, #tpu.memory_space<vmem>>, vector<8x32xf32>
    tpu.vector_store %arg15[%c40, %c32_26], %132 {strides = array<i32>} : memref<64x64xf32, #tpu.memory_space<vmem>>, vector<8x32xf32>,
    %136 = arith.truncf %133 : vector<8x64xf32> to vector<8x64xbf16>
    %cst_27 = arith.constant dense<0.000000e+00> : vector<8x256xf32>
    %137 = tpu.matmul %136, %10, %cst_27 {dimension_numbers = #tpu.dot_dimension_numbers<[1], [0], [0], [1], [0, 0, 1, 1], [], []>} : vector<8x64xbf16>, vector<64x256xbf16>, vector<8x256xf32> -> vector<8x256xf32>
    %138 = vector.extract_strided_slice %137 {offsets = [0, 0], sizes = [8, 128], strides = [1, 1]} : vector<8x256xf32> to vector<8x128xf32>
    %139 = vector.extract_strided_slice %8 {offsets = [24, 0], sizes = [8, 128], strides = [1, 1]} : vector<64x256xf32> to vector<8x128xf32>
    %140 = arith.addf %138, %139 : vector<8x128xf32>
    %141 = vector.extract_strided_slice %137 {offsets = [0, 128], sizes = [8, 128], strides = [1, 1]} : vector<8x256xf32> to vector<8x128xf32>
    %142 = vector.extract_strided_slice %8 {offsets = [32, 128], sizes = [8, 128], strides = [1, 1]} : vector<64x256xf32> to vector<8x128xf32>
    %143 = arith.addf %141, %142 : vector<8x128xf32>
    %144 = vector.extract_strided_slice %140 {offsets = [0, 0], sizes = [8, 96], strides = [1, 1]} : vector<8x128xf32> to vector<8x96xf32>
    %145 = arith.negf %144 : vector<8x96xf32>
    %146 = math.exp %145 : vector<8x96xf32>
    %cst_28 = arith.constant 1.000000e+00 : f32
    %147 = vector.broadcast %cst_28 : f32 to vector<8x96xf32>
    %148 = arith.addf %147, %146 : vector<8x96xf32>
    %149 = arith.divf %147, %148 : vector<8x96xf32>
    %150 = vector.extract_strided_slice %140 {offsets = [0, 96], sizes = [8, 32], strides = [1, 1]} : vector<8x128xf32> to vector<8x32xf32>
    %151 = math.tanh %150 : vector<8x32xf32>
    %152 = vector.extract_strided_slice %143 {offsets = [0, 0], sizes = [8, 96], strides = [1, 1]} : vector<8x128xf32> to vector<8x96xf32>
    %153 = arith.negf %152 : vector<8x96xf32>
    %154 = math.exp %153 : vector<8x96xf32>
    %cst_29 = arith.constant 1.000000e+00 : f32
    %155 = vector.broadcast %cst_29 : f32 to vector<8x96xf32>
    %156 = arith.addf %155, %154 : vector<8x96xf32>
    %157 = arith.divf %155, %156 : vector<8x96xf32>
    %158 = vector.extract_strided_slice %143 {offsets = [0, 96], sizes = [8, 32], strides = [1, 1]} : vector<8x128xf32> to vector<8x32xf32>
    %159 = math.tanh %158 : vector<8x32xf32>
    %160 = vector.extract_strided_slice %149 {offsets = [0, 32], sizes = [8, 32], strides = [1, 1]} : vector<8x96xf32> to vector<8x32xf32>
    %161 = arith.mulf %160, %121 : vector<8x32xf32>
    %162 = vector.extract_strided_slice %149 {offsets = [0, 0], sizes = [8, 32], strides = [1, 1]} : vector<8x96xf32> to vector<8x32xf32>
    %163 = arith.mulf %162, %151 : vector<8x32xf32>
    %164 = arith.addf %161, %163 : vector<8x32xf32>
    %165 = vector.extract_strided_slice %157 {offsets = [0, 32], sizes = [8, 32], strides = [1, 1]} : vector<8x96xf32> to vector<8x32xf32>
    %166 = arith.mulf %165, %126 : vector<8x32xf32>
    %167 = vector.extract_strided_slice %157 {offsets = [0, 0], sizes = [8, 32], strides = [1, 1]} : vector<8x96xf32> to vector<8x32xf32>
    %168 = arith.mulf %167, %159 : vector<8x32xf32>
    %169 = arith.addf %166, %168 : vector<8x32xf32>
    %170 = vector.extract_strided_slice %149 {offsets = [0, 64], sizes = [8, 32], strides = [1, 1]} : vector<8x96xf32> to vector<8x32xf32>
    %171 = math.tanh %164 : vector<8x32xf32>
    %172 = arith.mulf %170, %171 : vector<8x32xf32>
    %173 = vector.extract_strided_slice %157 {offsets = [0, 64], sizes = [8, 32], strides = [1, 1]} : vector<8x96xf32> to vector<8x32xf32>
    %174 = math.tanh %169 : vector<8x32xf32>
    %175 = arith.mulf %173, %174 : vector<8x32xf32>
    %176 = tpu.concatenate %172, %175 in 1 : vector<8x32xf32>, vector<8x32xf32> -> vector<8x64xf32>
    %c24 = arith.constant 24 : index
    %c0_30 = arith.constant 0 : index
    %177 = vector.load %arg15[%c24, %c0_30] : memref<64x64xf32, #tpu.memory_space<vmem>>, vector<8x32xf32>
    tpu.vector_store %arg15[%c24, %c0_30], %172 {strides = array<i32>} : memref<64x64xf32, #tpu.memory_space<vmem>>, vector<8x32xf32>,
    %c32_31 = arith.constant 32 : index
    %c32_32 = arith.constant 32 : index
    %178 = vector.load %arg15[%c32_31, %c32_32] : memref<64x64xf32, #tpu.memory_space<vmem>>, vector<8x32xf32>
    tpu.vector_store %arg15[%c32_31, %c32_32], %175 {strides = array<i32>} : memref<64x64xf32, #tpu.memory_space<vmem>>, vector<8x32xf32>,
    %179 = arith.truncf %176 : vector<8x64xf32> to vector<8x64xbf16>
    %cst_33 = arith.constant dense<0.000000e+00> : vector<8x256xf32>
    %180 = tpu.matmul %179, %10, %cst_33 {dimension_numbers = #tpu.dot_dimension_numbers<[1], [0], [0], [1], [0, 0, 1, 1], [], []>} : vector<8x64xbf16>, vector<64x256xbf16>, vector<8x256xf32> -> vector<8x256xf32>
    %181 = vector.extract_strided_slice %180 {offsets = [0, 0], sizes = [8, 128], strides = [1, 1]} : vector<8x256xf32> to vector<8x128xf32>
    %182 = vector.extract_strided_slice %8 {offsets = [32, 0], sizes = [8, 128], strides = [1, 1]} : vector<64x256xf32> to vector<8x128xf32>
    %183 = arith.addf %181, %182 : vector<8x128xf32>
    %184 = vector.extract_strided_slice %180 {offsets = [0, 128], sizes = [8, 128], strides = [1, 1]} : vector<8x256xf32> to vector<8x128xf32>
    %185 = vector.extract_strided_slice %8 {offsets = [24, 128], sizes = [8, 128], strides = [1, 1]} : vector<64x256xf32> to vector<8x128xf32>
    %186 = arith.addf %184, %185 : vector<8x128xf32>
    %187 = vector.extract_strided_slice %183 {offsets = [0, 0], sizes = [8, 96], strides = [1, 1]} : vector<8x128xf32> to vector<8x96xf32>
    %188 = arith.negf %187 : vector<8x96xf32>
    %189 = math.exp %188 : vector<8x96xf32>
    %cst_34 = arith.constant 1.000000e+00 : f32
    %190 = vector.broadcast %cst_34 : f32 to vector<8x96xf32>
    %191 = arith.addf %190, %189 : vector<8x96xf32>
    %192 = arith.divf %190, %191 : vector<8x96xf32>
    %193 = vector.extract_strided_slice %183 {offsets = [0, 96], sizes = [8, 32], strides = [1, 1]} : vector<8x128xf32> to vector<8x32xf32>
    %194 = math.tanh %193 : vector<8x32xf32>
    %195 = vector.extract_strided_slice %186 {offsets = [0, 0], sizes = [8, 96], strides = [1, 1]} : vector<8x128xf32> to vector<8x96xf32>
    %196 = arith.negf %195 : vector<8x96xf32>
    %197 = math.exp %196 : vector<8x96xf32>
    %cst_35 = arith.constant 1.000000e+00 : f32
    %198 = vector.broadcast %cst_35 : f32 to vector<8x96xf32>
    %199 = arith.addf %198, %197 : vector<8x96xf32>
    %200 = arith.divf %198, %199 : vector<8x96xf32>
    %201 = vector.extract_strided_slice %186 {offsets = [0, 96], sizes = [8, 32], strides = [1, 1]} : vector<8x128xf32> to vector<8x32xf32>
    %202 = math.tanh %201 : vector<8x32xf32>
    %203 = vector.extract_strided_slice %192 {offsets = [0, 32], sizes = [8, 32], strides = [1, 1]} : vector<8x96xf32> to vector<8x32xf32>
    %204 = arith.mulf %203, %164 : vector<8x32xf32>
    %205 = vector.extract_strided_slice %192 {offsets = [0, 0], sizes = [8, 32], strides = [1, 1]} : vector<8x96xf32> to vector<8x32xf32>
    %206 = arith.mulf %205, %194 : vector<8x32xf32>
    %207 = arith.addf %204, %206 : vector<8x32xf32>
    %208 = vector.extract_strided_slice %200 {offsets = [0, 32], sizes = [8, 32], strides = [1, 1]} : vector<8x96xf32> to vector<8x32xf32>
    %209 = arith.mulf %208, %169 : vector<8x32xf32>
    %210 = vector.extract_strided_slice %200 {offsets = [0, 0], sizes = [8, 32], strides = [1, 1]} : vector<8x96xf32> to vector<8x32xf32>
    %211 = arith.mulf %210, %202 : vector<8x32xf32>
    %212 = arith.addf %209, %211 : vector<8x32xf32>
    %213 = vector.extract_strided_slice %192 {offsets = [0, 64], sizes = [8, 32], strides = [1, 1]} : vector<8x96xf32> to vector<8x32xf32>
    %214 = math.tanh %207 : vector<8x32xf32>
    %215 = arith.mulf %213, %214 : vector<8x32xf32>
    %216 = vector.extract_strided_slice %200 {offsets = [0, 64], sizes = [8, 32], strides = [1, 1]} : vector<8x96xf32> to vector<8x32xf32>
    %217 = math.tanh %212 : vector<8x32xf32>
    %218 = arith.mulf %216, %217 : vector<8x32xf32>
    %219 = tpu.concatenate %215, %218 in 1 : vector<8x32xf32>, vector<8x32xf32> -> vector<8x64xf32>
    %c32_36 = arith.constant 32 : index
    %c0_37 = arith.constant 0 : index
    %220 = vector.load %arg15[%c32_36, %c0_37] : memref<64x64xf32, #tpu.memory_space<vmem>>, vector<8x32xf32>
    tpu.vector_store %arg15[%c32_36, %c0_37], %215 {strides = array<i32>} : memref<64x64xf32, #tpu.memory_space<vmem>>, vector<8x32xf32>,
    %c24_38 = arith.constant 24 : index
    %c32_39 = arith.constant 32 : index
    %221 = vector.load %arg15[%c24_38, %c32_39] : memref<64x64xf32, #tpu.memory_space<vmem>>, vector<8x32xf32>
    tpu.vector_store %arg15[%c24_38, %c32_39], %218 {strides = array<i32>} : memref<64x64xf32, #tpu.memory_space<vmem>>, vector<8x32xf32>,
    %222 = arith.truncf %219 : vector<8x64xf32> to vector<8x64xbf16>
    %cst_40 = arith.constant dense<0.000000e+00> : vector<8x256xf32>
    %223 = tpu.matmul %222, %10, %cst_40 {dimension_numbers = #tpu.dot_dimension_numbers<[1], [0], [0], [1], [0, 0, 1, 1], [], []>} : vector<8x64xbf16>, vector<64x256xbf16>, vector<8x256xf32> -> vector<8x256xf32>
    %224 = vector.extract_strided_slice %223 {offsets = [0, 0], sizes = [8, 128], strides = [1, 1]} : vector<8x256xf32> to vector<8x128xf32>
    %225 = vector.extract_strided_slice %8 {offsets = [40, 0], sizes = [8, 128], strides = [1, 1]} : vector<64x256xf32> to vector<8x128xf32>
    %226 = arith.addf %224, %225 : vector<8x128xf32>
    %227 = vector.extract_strided_slice %223 {offsets = [0, 128], sizes = [8, 128], strides = [1, 1]} : vector<8x256xf32> to vector<8x128xf32>
    %228 = vector.extract_strided_slice %8 {offsets = [16, 128], sizes = [8, 128], strides = [1, 1]} : vector<64x256xf32> to vector<8x128xf32>
    %229 = arith.addf %227, %228 : vector<8x128xf32>
    %230 = vector.extract_strided_slice %226 {offsets = [0, 0], sizes = [8, 96], strides = [1, 1]} : vector<8x128xf32> to vector<8x96xf32>
    %231 = arith.negf %230 : vector<8x96xf32>
    %232 = math.exp %231 : vector<8x96xf32>
    %cst_41 = arith.constant 1.000000e+00 : f32
    %233 = vector.broadcast %cst_41 : f32 to vector<8x96xf32>
    %234 = arith.addf %233, %232 : vector<8x96xf32>
    %235 = arith.divf %233, %234 : vector<8x96xf32>
    %236 = vector.extract_strided_slice %226 {offsets = [0, 96], sizes = [8, 32], strides = [1, 1]} : vector<8x128xf32> to vector<8x32xf32>
    %237 = math.tanh %236 : vector<8x32xf32>
    %238 = vector.extract_strided_slice %229 {offsets = [0, 0], sizes = [8, 96], strides = [1, 1]} : vector<8x128xf32> to vector<8x96xf32>
    %239 = arith.negf %238 : vector<8x96xf32>
    %240 = math.exp %239 : vector<8x96xf32>
    %cst_42 = arith.constant 1.000000e+00 : f32
    %241 = vector.broadcast %cst_42 : f32 to vector<8x96xf32>
    %242 = arith.addf %241, %240 : vector<8x96xf32>
    %243 = arith.divf %241, %242 : vector<8x96xf32>
    %244 = vector.extract_strided_slice %229 {offsets = [0, 96], sizes = [8, 32], strides = [1, 1]} : vector<8x128xf32> to vector<8x32xf32>
    %245 = math.tanh %244 : vector<8x32xf32>
    %246 = vector.extract_strided_slice %235 {offsets = [0, 32], sizes = [8, 32], strides = [1, 1]} : vector<8x96xf32> to vector<8x32xf32>
    %247 = arith.mulf %246, %207 : vector<8x32xf32>
    %248 = vector.extract_strided_slice %235 {offsets = [0, 0], sizes = [8, 32], strides = [1, 1]} : vector<8x96xf32> to vector<8x32xf32>
    %249 = arith.mulf %248, %237 : vector<8x32xf32>
    %250 = arith.addf %247, %249 : vector<8x32xf32>
    %251 = vector.extract_strided_slice %243 {offsets = [0, 32], sizes = [8, 32], strides = [1, 1]} : vector<8x96xf32> to vector<8x32xf32>
    %252 = arith.mulf %251, %212 : vector<8x32xf32>
    %253 = vector.extract_strided_slice %243 {offsets = [0, 0], sizes = [8, 32], strides = [1, 1]} : vector<8x96xf32> to vector<8x32xf32>
    %254 = arith.mulf %253, %245 : vector<8x32xf32>
    %255 = arith.addf %252, %254 : vector<8x32xf32>
    %256 = vector.extract_strided_slice %235 {offsets = [0, 64], sizes = [8, 32], strides = [1, 1]} : vector<8x96xf32> to vector<8x32xf32>
    %257 = math.tanh %250 : vector<8x32xf32>
    %258 = arith.mulf %256, %257 : vector<8x32xf32>
    %259 = vector.extract_strided_slice %243 {offsets = [0, 64], sizes = [8, 32], strides = [1, 1]} : vector<8x96xf32> to vector<8x32xf32>
    %260 = math.tanh %255 : vector<8x32xf32>
    %261 = arith.mulf %259, %260 : vector<8x32xf32>
    %262 = tpu.concatenate %258, %261 in 1 : vector<8x32xf32>, vector<8x32xf32> -> vector<8x64xf32>
    %c40_43 = arith.constant 40 : index
    %c0_44 = arith.constant 0 : index
    %263 = vector.load %arg15[%c40_43, %c0_44] : memref<64x64xf32, #tpu.memory_space<vmem>>, vector<8x32xf32>
    tpu.vector_store %arg15[%c40_43, %c0_44], %258 {strides = array<i32>} : memref<64x64xf32, #tpu.memory_space<vmem>>, vector<8x32xf32>,
    %c16_45 = arith.constant 16 : index
    %c32_46 = arith.constant 32 : index
    %264 = vector.load %arg15[%c16_45, %c32_46] : memref<64x64xf32, #tpu.memory_space<vmem>>, vector<8x32xf32>
    tpu.vector_store %arg15[%c16_45, %c32_46], %261 {strides = array<i32>} : memref<64x64xf32, #tpu.memory_space<vmem>>, vector<8x32xf32>,
    %265 = arith.truncf %262 : vector<8x64xf32> to vector<8x64xbf16>
    %cst_47 = arith.constant dense<0.000000e+00> : vector<8x256xf32>
    %266 = tpu.matmul %265, %10, %cst_47 {dimension_numbers = #tpu.dot_dimension_numbers<[1], [0], [0], [1], [0, 0, 1, 1], [], []>} : vector<8x64xbf16>, vector<64x256xbf16>, vector<8x256xf32> -> vector<8x256xf32>
    %267 = vector.extract_strided_slice %266 {offsets = [0, 0], sizes = [8, 128], strides = [1, 1]} : vector<8x256xf32> to vector<8x128xf32>
    %268 = vector.extract_strided_slice %8 {offsets = [48, 0], sizes = [8, 128], strides = [1, 1]} : vector<64x256xf32> to vector<8x128xf32>
    %269 = arith.addf %267, %268 : vector<8x128xf32>
    %270 = vector.extract_strided_slice %266 {offsets = [0, 128], sizes = [8, 128], strides = [1, 1]} : vector<8x256xf32> to vector<8x128xf32>
    %271 = vector.extract_strided_slice %8 {offsets = [8, 128], sizes = [8, 128], strides = [1, 1]} : vector<64x256xf32> to vector<8x128xf32>
    %272 = arith.addf %270, %271 : vector<8x128xf32>
    %273 = vector.extract_strided_slice %269 {offsets = [0, 0], sizes = [8, 96], strides = [1, 1]} : vector<8x128xf32> to vector<8x96xf32>
    %274 = arith.negf %273 : vector<8x96xf32>
    %275 = math.exp %274 : vector<8x96xf32>
    %cst_48 = arith.constant 1.000000e+00 : f32
    %276 = vector.broadcast %cst_48 : f32 to vector<8x96xf32>
    %277 = arith.addf %276, %275 : vector<8x96xf32>
    %278 = arith.divf %276, %277 : vector<8x96xf32>
    %279 = vector.extract_strided_slice %269 {offsets = [0, 96], sizes = [8, 32], strides = [1, 1]} : vector<8x128xf32> to vector<8x32xf32>
    %280 = math.tanh %279 : vector<8x32xf32>
    %281 = vector.extract_strided_slice %272 {offsets = [0, 0], sizes = [8, 96], strides = [1, 1]} : vector<8x128xf32> to vector<8x96xf32>
    %282 = arith.negf %281 : vector<8x96xf32>
    %283 = math.exp %282 : vector<8x96xf32>
    %cst_49 = arith.constant 1.000000e+00 : f32
    %284 = vector.broadcast %cst_49 : f32 to vector<8x96xf32>
    %285 = arith.addf %284, %283 : vector<8x96xf32>
    %286 = arith.divf %284, %285 : vector<8x96xf32>
    %287 = vector.extract_strided_slice %272 {offsets = [0, 96], sizes = [8, 32], strides = [1, 1]} : vector<8x128xf32> to vector<8x32xf32>
    %288 = math.tanh %287 : vector<8x32xf32>
    %289 = vector.extract_strided_slice %278 {offsets = [0, 32], sizes = [8, 32], strides = [1, 1]} : vector<8x96xf32> to vector<8x32xf32>
    %290 = arith.mulf %289, %250 : vector<8x32xf32>
    %291 = vector.extract_strided_slice %278 {offsets = [0, 0], sizes = [8, 32], strides = [1, 1]} : vector<8x96xf32> to vector<8x32xf32>
    %292 = arith.mulf %291, %280 : vector<8x32xf32>
    %293 = arith.addf %290, %292 : vector<8x32xf32>
    %294 = vector.extract_strided_slice %286 {offsets = [0, 32], sizes = [8, 32], strides = [1, 1]} : vector<8x96xf32> to vector<8x32xf32>
    %295 = arith.mulf %294, %255 : vector<8x32xf32>
    %296 = vector.extract_strided_slice %286 {offsets = [0, 0], sizes = [8, 32], strides = [1, 1]} : vector<8x96xf32> to vector<8x32xf32>
    %297 = arith.mulf %296, %288 : vector<8x32xf32>
    %298 = arith.addf %295, %297 : vector<8x32xf32>
    %299 = vector.extract_strided_slice %278 {offsets = [0, 64], sizes = [8, 32], strides = [1, 1]} : vector<8x96xf32> to vector<8x32xf32>
    %300 = math.tanh %293 : vector<8x32xf32>
    %301 = arith.mulf %299, %300 : vector<8x32xf32>
    %302 = vector.extract_strided_slice %286 {offsets = [0, 64], sizes = [8, 32], strides = [1, 1]} : vector<8x96xf32> to vector<8x32xf32>
    %303 = math.tanh %298 : vector<8x32xf32>
    %304 = arith.mulf %302, %303 : vector<8x32xf32>
    %305 = tpu.concatenate %301, %304 in 1 : vector<8x32xf32>, vector<8x32xf32> -> vector<8x64xf32>
    %c48_50 = arith.constant 48 : index
    %c0_51 = arith.constant 0 : index
    %306 = vector.load %arg15[%c48_50, %c0_51] : memref<64x64xf32, #tpu.memory_space<vmem>>, vector<8x32xf32>
    tpu.vector_store %arg15[%c48_50, %c0_51], %301 {strides = array<i32>} : memref<64x64xf32, #tpu.memory_space<vmem>>, vector<8x32xf32>,
    %c8_52 = arith.constant 8 : index
    %c32_53 = arith.constant 32 : index
    %307 = vector.load %arg15[%c8_52, %c32_53] : memref<64x64xf32, #tpu.memory_space<vmem>>, vector<8x32xf32>
    tpu.vector_store %arg15[%c8_52, %c32_53], %304 {strides = array<i32>} : memref<64x64xf32, #tpu.memory_space<vmem>>, vector<8x32xf32>,
    %308 = arith.truncf %305 : vector<8x64xf32> to vector<8x64xbf16>
    %cst_54 = arith.constant dense<0.000000e+00> : vector<8x256xf32>
    %309 = tpu.matmul %308, %10, %cst_54 {dimension_numbers = #tpu.dot_dimension_numbers<[1], [0], [0], [1], [0, 0, 1, 1], [], []>} : vector<8x64xbf16>, vector<64x256xbf16>, vector<8x256xf32> -> vector<8x256xf32>
    %310 = vector.extract_strided_slice %309 {offsets = [0, 0], sizes = [8, 128], strides = [1, 1]} : vector<8x256xf32> to vector<8x128xf32>
    %311 = vector.extract_strided_slice %8 {offsets = [56, 0], sizes = [8, 128], strides = [1, 1]} : vector<64x256xf32> to vector<8x128xf32>
    %312 = arith.addf %310, %311 : vector<8x128xf32>
    %313 = vector.extract_strided_slice %309 {offsets = [0, 128], sizes = [8, 128], strides = [1, 1]} : vector<8x256xf32> to vector<8x128xf32>
    %314 = vector.extract_strided_slice %8 {offsets = [0, 128], sizes = [8, 128], strides = [1, 1]} : vector<64x256xf32> to vector<8x128xf32>
    %315 = arith.addf %313, %314 : vector<8x128xf32>
    %316 = vector.extract_strided_slice %312 {offsets = [0, 0], sizes = [8, 96], strides = [1, 1]} : vector<8x128xf32> to vector<8x96xf32>
    %317 = arith.negf %316 : vector<8x96xf32>
    %318 = math.exp %317 : vector<8x96xf32>
    %cst_55 = arith.constant 1.000000e+00 : f32
    %319 = vector.broadcast %cst_55 : f32 to vector<8x96xf32>
    %320 = arith.addf %319, %318 : vector<8x96xf32>
    %321 = arith.divf %319, %320 : vector<8x96xf32>
    %322 = vector.extract_strided_slice %312 {offsets = [0, 96], sizes = [8, 32], strides = [1, 1]} : vector<8x128xf32> to vector<8x32xf32>
    %323 = math.tanh %322 : vector<8x32xf32>
    %324 = vector.extract_strided_slice %315 {offsets = [0, 0], sizes = [8, 96], strides = [1, 1]} : vector<8x128xf32> to vector<8x96xf32>
    %325 = arith.negf %324 : vector<8x96xf32>
    %326 = math.exp %325 : vector<8x96xf32>
    %cst_56 = arith.constant 1.000000e+00 : f32
    %327 = vector.broadcast %cst_56 : f32 to vector<8x96xf32>
    %328 = arith.addf %327, %326 : vector<8x96xf32>
    %329 = arith.divf %327, %328 : vector<8x96xf32>
    %330 = vector.extract_strided_slice %315 {offsets = [0, 96], sizes = [8, 32], strides = [1, 1]} : vector<8x128xf32> to vector<8x32xf32>
    %331 = math.tanh %330 : vector<8x32xf32>
    %332 = vector.extract_strided_slice %321 {offsets = [0, 32], sizes = [8, 32], strides = [1, 1]} : vector<8x96xf32> to vector<8x32xf32>
    %333 = arith.mulf %332, %293 : vector<8x32xf32>
    %334 = vector.extract_strided_slice %321 {offsets = [0, 0], sizes = [8, 32], strides = [1, 1]} : vector<8x96xf32> to vector<8x32xf32>
    %335 = arith.mulf %334, %323 : vector<8x32xf32>
    %336 = arith.addf %333, %335 : vector<8x32xf32>
    %337 = vector.extract_strided_slice %329 {offsets = [0, 32], sizes = [8, 32], strides = [1, 1]} : vector<8x96xf32> to vector<8x32xf32>
    %338 = arith.mulf %337, %298 : vector<8x32xf32>
    %339 = vector.extract_strided_slice %329 {offsets = [0, 0], sizes = [8, 32], strides = [1, 1]} : vector<8x96xf32> to vector<8x32xf32>
    %340 = arith.mulf %339, %331 : vector<8x32xf32>
    %341 = arith.addf %338, %340 : vector<8x32xf32>
    %342 = vector.extract_strided_slice %321 {offsets = [0, 64], sizes = [8, 32], strides = [1, 1]} : vector<8x96xf32> to vector<8x32xf32>
    %343 = math.tanh %336 : vector<8x32xf32>
    %344 = arith.mulf %342, %343 : vector<8x32xf32>
    %345 = vector.extract_strided_slice %329 {offsets = [0, 64], sizes = [8, 32], strides = [1, 1]} : vector<8x96xf32> to vector<8x32xf32>
    %346 = math.tanh %341 : vector<8x32xf32>
    %347 = arith.mulf %345, %346 : vector<8x32xf32>
    %c56_57 = arith.constant 56 : index
    %c0_58 = arith.constant 0 : index
    %348 = vector.load %arg15[%c56_57, %c0_58] : memref<64x64xf32, #tpu.memory_space<vmem>>, vector<8x32xf32>
    tpu.vector_store %arg15[%c56_57, %c0_58], %344 {strides = array<i32>} : memref<64x64xf32, #tpu.memory_space<vmem>>, vector<8x32xf32>,
    %c0_59 = arith.constant 0 : index
    %c32_60 = arith.constant 32 : index
    %349 = vector.load %arg15[%c0_59, %c32_60] : memref<64x64xf32, #tpu.memory_space<vmem>>, vector<8x32xf32>
    tpu.vector_store %arg15[%c0_59, %c32_60], %347 {strides = array<i32>} : memref<64x64xf32, #tpu.memory_space<vmem>>, vector<8x32xf32>,
    %c0_61 = arith.constant 0 : index
    %c0_62 = arith.constant 0 : index
    %350 = vector.load %arg15[%c0_61, %c0_62] : memref<64x64xf32, #tpu.memory_space<vmem>>, vector<64x64xf32>
    %351 = arith.truncf %350 : vector<64x64xf32> to vector<64x64xbf16>
    %c0_63 = arith.constant 0 : index
    %c0_64 = arith.constant 0 : index
    %c0_65 = arith.constant 0 : index
    %352 = vector.load %arg5[%c0_63, %c0_64, %c0_65] : memref<1x64x256xbf16, #tpu.memory_space<vmem>>, vector<1x64x256xbf16>
    %353 = vector.shape_cast %352 : vector<1x64x256xbf16> to vector<64x256xbf16>
    %cst_66 = arith.constant dense<0.000000e+00> : vector<64x256xf32>
    %354 = tpu.matmul %351, %353, %cst_66 {dimension_numbers = #tpu.dot_dimension_numbers<[1], [0], [0], [1], [0, 0, 1, 1], [], []>} : vector<64x64xbf16>, vector<64x256xbf16>, vector<64x256xf32> -> vector<64x256xf32>
    %c0_67 = arith.constant 0 : index
    %c0_68 = arith.constant 0 : index
    %c0_69 = arith.constant 0 : index
    %355 = vector.load %arg7[%c0_67, %c0_68, %c0_69] : memref<1x1x256xf32, #tpu.memory_space<vmem>>, vector<1x1x256xf32>
    %356 = vector.shape_cast %355 : vector<1x1x256xf32> to vector<1x256xf32>
    %357 = vector.broadcast %356 : vector<1x256xf32> to vector<64x256xf32>
    %358 = arith.addf %354, %357 : vector<64x256xf32>
    %c0_70 = arith.constant 0 : index
    %c0_71 = arith.constant 0 : index
    %c0_72 = arith.constant 0 : index
    %359 = vector.load %arg6[%c0_70, %c0_71, %c0_72] : memref<1x64x256xbf16, #tpu.memory_space<vmem>>, vector<1x64x256xbf16>
    %360 = vector.shape_cast %359 : vector<1x64x256xbf16> to vector<64x256xbf16>
    %cst_73 = arith.constant 0.000000e+00 : f32
    %361 = vector.broadcast %cst_73 : f32 to vector<8x32xf32>
    %cst_74 = arith.constant 0.000000e+00 : f32
    %362 = vector.broadcast %cst_74 : f32 to vector<8x32xf32>
    %363 = vector.extract_strided_slice %358 {offsets = [0, 0], sizes = [8, 128], strides = [1, 1]} : vector<64x256xf32> to vector<8x128xf32>
    %364 = vector.extract_strided_slice %358 {offsets = [56, 128], sizes = [8, 128], strides = [1, 1]} : vector<64x256xf32> to vector<8x128xf32>
    %365 = vector.extract_strided_slice %363 {offsets = [0, 0], sizes = [8, 96], strides = [1, 1]} : vector<8x128xf32> to vector<8x96xf32>
    %366 = arith.negf %365 : vector<8x96xf32>
    %367 = math.exp %366 : vector<8x96xf32>
    %cst_75 = arith.constant 1.000000e+00 : f32
    %368 = vector.broadcast %cst_75 : f32 to vector<8x96xf32>
    %369 = arith.addf %368, %367 : vector<8x96xf32>
    %370 = arith.divf %368, %369 : vector<8x96xf32>
    %371 = vector.extract_strided_slice %363 {offsets = [0, 96], sizes = [8, 32], strides = [1, 1]} : vector<8x128xf32> to vector<8x32xf32>
    %372 = math.tanh %371 : vector<8x32xf32>
    %373 = vector.extract_strided_slice %364 {offsets = [0, 0], sizes = [8, 96], strides = [1, 1]} : vector<8x128xf32> to vector<8x96xf32>
    %374 = arith.negf %373 : vector<8x96xf32>
    %375 = math.exp %374 : vector<8x96xf32>
    %cst_76 = arith.constant 1.000000e+00 : f32
    %376 = vector.broadcast %cst_76 : f32 to vector<8x96xf32>
    %377 = arith.addf %376, %375 : vector<8x96xf32>
    %378 = arith.divf %376, %377 : vector<8x96xf32>
    %379 = vector.extract_strided_slice %364 {offsets = [0, 96], sizes = [8, 32], strides = [1, 1]} : vector<8x128xf32> to vector<8x32xf32>
    %380 = math.tanh %379 : vector<8x32xf32>
    %381 = vector.extract_strided_slice %370 {offsets = [0, 32], sizes = [8, 32], strides = [1, 1]} : vector<8x96xf32> to vector<8x32xf32>
    %382 = arith.mulf %381, %361 : vector<8x32xf32>
    %383 = vector.extract_strided_slice %370 {offsets = [0, 0], sizes = [8, 32], strides = [1, 1]} : vector<8x96xf32> to vector<8x32xf32>
    %384 = arith.mulf %383, %372 : vector<8x32xf32>
    %385 = arith.addf %382, %384 : vector<8x32xf32>
    %386 = vector.extract_strided_slice %378 {offsets = [0, 32], sizes = [8, 32], strides = [1, 1]} : vector<8x96xf32> to vector<8x32xf32>
    %387 = arith.mulf %386, %362 : vector<8x32xf32>
    %388 = vector.extract_strided_slice %378 {offsets = [0, 0], sizes = [8, 32], strides = [1, 1]} : vector<8x96xf32> to vector<8x32xf32>
    %389 = arith.mulf %388, %380 : vector<8x32xf32>
    %390 = arith.addf %387, %389 : vector<8x32xf32>
    %391 = vector.extract_strided_slice %370 {offsets = [0, 64], sizes = [8, 32], strides = [1, 1]} : vector<8x96xf32> to vector<8x32xf32>
    %392 = math.tanh %385 : vector<8x32xf32>
    %393 = arith.mulf %391, %392 : vector<8x32xf32>
    %394 = vector.extract_strided_slice %378 {offsets = [0, 64], sizes = [8, 32], strides = [1, 1]} : vector<8x96xf32> to vector<8x32xf32>
    %395 = math.tanh %390 : vector<8x32xf32>
    %396 = arith.mulf %394, %395 : vector<8x32xf32>
    %397 = tpu.concatenate %393, %396 in 1 : vector<8x32xf32>, vector<8x32xf32> -> vector<8x64xf32>
    %c0_77 = arith.constant 0 : index
    %c0_78 = arith.constant 0 : index
    %398 = vector.load %arg16[%c0_77, %c0_78] : memref<64x64xf32, #tpu.memory_space<vmem>>, vector<8x32xf32>
    tpu.vector_store %arg16[%c0_77, %c0_78], %393 {strides = array<i32>} : memref<64x64xf32, #tpu.memory_space<vmem>>, vector<8x32xf32>,
    %c56_79 = arith.constant 56 : index
    %c32_80 = arith.constant 32 : index
    %399 = vector.load %arg16[%c56_79, %c32_80] : memref<64x64xf32, #tpu.memory_space<vmem>>, vector<8x32xf32>
    tpu.vector_store %arg16[%c56_79, %c32_80], %396 {strides = array<i32>} : memref<64x64xf32, #tpu.memory_space<vmem>>, vector<8x32xf32>,
    %400 = arith.truncf %397 : vector<8x64xf32> to vector<8x64xbf16>
    %cst_81 = arith.constant dense<0.000000e+00> : vector<8x256xf32>
    %401 = tpu.matmul %400, %360, %cst_81 {dimension_numbers = #tpu.dot_dimension_numbers<[1], [0], [0], [1], [0, 0, 1, 1], [], []>} : vector<8x64xbf16>, vector<64x256xbf16>, vector<8x256xf32> -> vector<8x256xf32>
    %402 = vector.extract_strided_slice %401 {offsets = [0, 0], sizes = [8, 128], strides = [1, 1]} : vector<8x256xf32> to vector<8x128xf32>
    %403 = vector.extract_strided_slice %358 {offsets = [8, 0], sizes = [8, 128], strides = [1, 1]} : vector<64x256xf32> to vector<8x128xf32>
    %404 = arith.addf %402, %403 : vector<8x128xf32>
    %405 = vector.extract_strided_slice %401 {offsets = [0, 128], sizes = [8, 128], strides = [1, 1]} : vector<8x256xf32> to vector<8x128xf32>
    %406 = vector.extract_strided_slice %358 {offsets = [48, 128], sizes = [8, 128], strides = [1, 1]} : vector<64x256xf32> to vector<8x128xf32>
    %407 = arith.addf %405, %406 : vector<8x128xf32>
    %408 = vector.extract_strided_slice %404 {offsets = [0, 0], sizes = [8, 96], strides = [1, 1]} : vector<8x128xf32> to vector<8x96xf32>
    %409 = arith.negf %408 : vector<8x96xf32>
    %410 = math.exp %409 : vector<8x96xf32>
    %cst_82 = arith.constant 1.000000e+00 : f32
    %411 = vector.broadcast %cst_82 : f32 to vector<8x96xf32>
    %412 = arith.addf %411, %410 : vector<8x96xf32>
    %413 = arith.divf %411, %412 : vector<8x96xf32>
    %414 = vector.extract_strided_slice %404 {offsets = [0, 96], sizes = [8, 32], strides = [1, 1]} : vector<8x128xf32> to vector<8x32xf32>
    %415 = math.tanh %414 : vector<8x32xf32>
    %416 = vector.extract_strided_slice %407 {offsets = [0, 0], sizes = [8, 96], strides = [1, 1]} : vector<8x128xf32> to vector<8x96xf32>
    %417 = arith.negf %416 : vector<8x96xf32>
    %418 = math.exp %417 : vector<8x96xf32>
    %cst_83 = arith.constant 1.000000e+00 : f32
    %419 = vector.broadcast %cst_83 : f32 to vector<8x96xf32>
    %420 = arith.addf %419, %418 : vector<8x96xf32>
    %421 = arith.divf %419, %420 : vector<8x96xf32>
    %422 = vector.extract_strided_slice %407 {offsets = [0, 96], sizes = [8, 32], strides = [1, 1]} : vector<8x128xf32> to vector<8x32xf32>
    %423 = math.tanh %422 : vector<8x32xf32>
    %424 = vector.extract_strided_slice %413 {offsets = [0, 32], sizes = [8, 32], strides = [1, 1]} : vector<8x96xf32> to vector<8x32xf32>
    %425 = arith.mulf %424, %385 : vector<8x32xf32>
    %426 = vector.extract_strided_slice %413 {offsets = [0, 0], sizes = [8, 32], strides = [1, 1]} : vector<8x96xf32> to vector<8x32xf32>
    %427 = arith.mulf %426, %415 : vector<8x32xf32>
    %428 = arith.addf %425, %427 : vector<8x32xf32>
    %429 = vector.extract_strided_slice %421 {offsets = [0, 32], sizes = [8, 32], strides = [1, 1]} : vector<8x96xf32> to vector<8x32xf32>
    %430 = arith.mulf %429, %390 : vector<8x32xf32>
    %431 = vector.extract_strided_slice %421 {offsets = [0, 0], sizes = [8, 32], strides = [1, 1]} : vector<8x96xf32> to vector<8x32xf32>
    %432 = arith.mulf %431, %423 : vector<8x32xf32>
    %433 = arith.addf %430, %432 : vector<8x32xf32>
    %434 = vector.extract_strided_slice %413 {offsets = [0, 64], sizes = [8, 32], strides = [1, 1]} : vector<8x96xf32> to vector<8x32xf32>
    %435 = math.tanh %428 : vector<8x32xf32>
    %436 = arith.mulf %434, %435 : vector<8x32xf32>
    %437 = vector.extract_strided_slice %421 {offsets = [0, 64], sizes = [8, 32], strides = [1, 1]} : vector<8x96xf32> to vector<8x32xf32>
    %438 = math.tanh %433 : vector<8x32xf32>
    %439 = arith.mulf %437, %438 : vector<8x32xf32>
    %440 = tpu.concatenate %436, %439 in 1 : vector<8x32xf32>, vector<8x32xf32> -> vector<8x64xf32>
    %c8_84 = arith.constant 8 : index
    %c0_85 = arith.constant 0 : index
    %441 = vector.load %arg16[%c8_84, %c0_85] : memref<64x64xf32, #tpu.memory_space<vmem>>, vector<8x32xf32>
    tpu.vector_store %arg16[%c8_84, %c0_85], %436 {strides = array<i32>} : memref<64x64xf32, #tpu.memory_space<vmem>>, vector<8x32xf32>,
    %c48_86 = arith.constant 48 : index
    %c32_87 = arith.constant 32 : index
    %442 = vector.load %arg16[%c48_86, %c32_87] : memref<64x64xf32, #tpu.memory_space<vmem>>, vector<8x32xf32>
    tpu.vector_store %arg16[%c48_86, %c32_87], %439 {strides = array<i32>} : memref<64x64xf32, #tpu.memory_space<vmem>>, vector<8x32xf32>,
    %443 = arith.truncf %440 : vector<8x64xf32> to vector<8x64xbf16>
    %cst_88 = arith.constant dense<0.000000e+00> : vector<8x256xf32>
    %444 = tpu.matmul %443, %360, %cst_88 {dimension_numbers = #tpu.dot_dimension_numbers<[1], [0], [0], [1], [0, 0, 1, 1], [], []>} : vector<8x64xbf16>, vector<64x256xbf16>, vector<8x256xf32> -> vector<8x256xf32>
    %445 = vector.extract_strided_slice %444 {offsets = [0, 0], sizes = [8, 128], strides = [1, 1]} : vector<8x256xf32> to vector<8x128xf32>
    %446 = vector.extract_strided_slice %358 {offsets = [16, 0], sizes = [8, 128], strides = [1, 1]} : vector<64x256xf32> to vector<8x128xf32>
    %447 = arith.addf %445, %446 : vector<8x128xf32>
    %448 = vector.extract_strided_slice %444 {offsets = [0, 128], sizes = [8, 128], strides = [1, 1]} : vector<8x256xf32> to vector<8x128xf32>
    %449 = vector.extract_strided_slice %358 {offsets = [40, 128], sizes = [8, 128], strides = [1, 1]} : vector<64x256xf32> to vector<8x128xf32>
    %450 = arith.addf %448, %449 : vector<8x128xf32>
    %451 = vector.extract_strided_slice %447 {offsets = [0, 0], sizes = [8, 96], strides = [1, 1]} : vector<8x128xf32> to vector<8x96xf32>
    %452 = arith.negf %451 : vector<8x96xf32>
    %453 = math.exp %452 : vector<8x96xf32>
    %cst_89 = arith.constant 1.000000e+00 : f32
    %454 = vector.broadcast %cst_89 : f32 to vector<8x96xf32>
    %455 = arith.addf %454, %453 : vector<8x96xf32>
    %456 = arith.divf %454, %455 : vector<8x96xf32>
    %457 = vector.extract_strided_slice %447 {offsets = [0, 96], sizes = [8, 32], strides = [1, 1]} : vector<8x128xf32> to vector<8x32xf32>
    %458 = math.tanh %457 : vector<8x32xf32>
    %459 = vector.extract_strided_slice %450 {offsets = [0, 0], sizes = [8, 96], strides = [1, 1]} : vector<8x128xf32> to vector<8x96xf32>
    %460 = arith.negf %459 : vector<8x96xf32>
    %461 = math.exp %460 : vector<8x96xf32>
    %cst_90 = arith.constant 1.000000e+00 : f32
    %462 = vector.broadcast %cst_90 : f32 to vector<8x96xf32>
    %463 = arith.addf %462, %461 : vector<8x96xf32>
    %464 = arith.divf %462, %463 : vector<8x96xf32>
    %465 = vector.extract_strided_slice %450 {offsets = [0, 96], sizes = [8, 32], strides = [1, 1]} : vector<8x128xf32> to vector<8x32xf32>
    %466 = math.tanh %465 : vector<8x32xf32>
    %467 = vector.extract_strided_slice %456 {offsets = [0, 32], sizes = [8, 32], strides = [1, 1]} : vector<8x96xf32> to vector<8x32xf32>
    %468 = arith.mulf %467, %428 : vector<8x32xf32>
    %469 = vector.extract_strided_slice %456 {offsets = [0, 0], sizes = [8, 32], strides = [1, 1]} : vector<8x96xf32> to vector<8x32xf32>
    %470 = arith.mulf %469, %458 : vector<8x32xf32>
    %471 = arith.addf %468, %470 : vector<8x32xf32>
    %472 = vector.extract_strided_slice %464 {offsets = [0, 32], sizes = [8, 32], strides = [1, 1]} : vector<8x96xf32> to vector<8x32xf32>
    %473 = arith.mulf %472, %433 : vector<8x32xf32>
    %474 = vector.extract_strided_slice %464 {offsets = [0, 0], sizes = [8, 32], strides = [1, 1]} : vector<8x96xf32> to vector<8x32xf32>
    %475 = arith.mulf %474, %466 : vector<8x32xf32>
    %476 = arith.addf %473, %475 : vector<8x32xf32>
    %477 = vector.extract_strided_slice %456 {offsets = [0, 64], sizes = [8, 32], strides = [1, 1]} : vector<8x96xf32> to vector<8x32xf32>
    %478 = math.tanh %471 : vector<8x32xf32>
    %479 = arith.mulf %477, %478 : vector<8x32xf32>
    %480 = vector.extract_strided_slice %464 {offsets = [0, 64], sizes = [8, 32], strides = [1, 1]} : vector<8x96xf32> to vector<8x32xf32>
    %481 = math.tanh %476 : vector<8x32xf32>
    %482 = arith.mulf %480, %481 : vector<8x32xf32>
    %483 = tpu.concatenate %479, %482 in 1 : vector<8x32xf32>, vector<8x32xf32> -> vector<8x64xf32>
    %c16_91 = arith.constant 16 : index
    %c0_92 = arith.constant 0 : index
    %484 = vector.load %arg16[%c16_91, %c0_92] : memref<64x64xf32, #tpu.memory_space<vmem>>, vector<8x32xf32>
    tpu.vector_store %arg16[%c16_91, %c0_92], %479 {strides = array<i32>} : memref<64x64xf32, #tpu.memory_space<vmem>>, vector<8x32xf32>,
    %c40_93 = arith.constant 40 : index
    %c32_94 = arith.constant 32 : index
    %485 = vector.load %arg16[%c40_93, %c32_94] : memref<64x64xf32, #tpu.memory_space<vmem>>, vector<8x32xf32>
    tpu.vector_store %arg16[%c40_93, %c32_94], %482 {strides = array<i32>} : memref<64x64xf32, #tpu.memory_space<vmem>>, vector<8x32xf32>,
    %486 = arith.truncf %483 : vector<8x64xf32> to vector<8x64xbf16>
    %cst_95 = arith.constant dense<0.000000e+00> : vector<8x256xf32>
    %487 = tpu.matmul %486, %360, %cst_95 {dimension_numbers = #tpu.dot_dimension_numbers<[1], [0], [0], [1], [0, 0, 1, 1], [], []>} : vector<8x64xbf16>, vector<64x256xbf16>, vector<8x256xf32> -> vector<8x256xf32>
    %488 = vector.extract_strided_slice %487 {offsets = [0, 0], sizes = [8, 128], strides = [1, 1]} : vector<8x256xf32> to vector<8x128xf32>
    %489 = vector.extract_strided_slice %358 {offsets = [24, 0], sizes = [8, 128], strides = [1, 1]} : vector<64x256xf32> to vector<8x128xf32>
    %490 = arith.addf %488, %489 : vector<8x128xf32>
    %491 = vector.extract_strided_slice %487 {offsets = [0, 128], sizes = [8, 128], strides = [1, 1]} : vector<8x256xf32> to vector<8x128xf32>
    %492 = vector.extract_strided_slice %358 {offsets = [32, 128], sizes = [8, 128], strides = [1, 1]} : vector<64x256xf32> to vector<8x128xf32>
    %493 = arith.addf %491, %492 : vector<8x128xf32>
    %494 = vector.extract_strided_slice %490 {offsets = [0, 0], sizes = [8, 96], strides = [1, 1]} : vector<8x128xf32> to vector<8x96xf32>
    %495 = arith.negf %494 : vector<8x96xf32>
    %496 = math.exp %495 : vector<8x96xf32>
    %cst_96 = arith.constant 1.000000e+00 : f32
    %497 = vector.broadcast %cst_96 : f32 to vector<8x96xf32>
    %498 = arith.addf %497, %496 : vector<8x96xf32>
    %499 = arith.divf %497, %498 : vector<8x96xf32>
    %500 = vector.extract_strided_slice %490 {offsets = [0, 96], sizes = [8, 32], strides = [1, 1]} : vector<8x128xf32> to vector<8x32xf32>
    %501 = math.tanh %500 : vector<8x32xf32>
    %502 = vector.extract_strided_slice %493 {offsets = [0, 0], sizes = [8, 96], strides = [1, 1]} : vector<8x128xf32> to vector<8x96xf32>
    %503 = arith.negf %502 : vector<8x96xf32>
    %504 = math.exp %503 : vector<8x96xf32>
    %cst_97 = arith.constant 1.000000e+00 : f32
    %505 = vector.broadcast %cst_97 : f32 to vector<8x96xf32>
    %506 = arith.addf %505, %504 : vector<8x96xf32>
    %507 = arith.divf %505, %506 : vector<8x96xf32>
    %508 = vector.extract_strided_slice %493 {offsets = [0, 96], sizes = [8, 32], strides = [1, 1]} : vector<8x128xf32> to vector<8x32xf32>
    %509 = math.tanh %508 : vector<8x32xf32>
    %510 = vector.extract_strided_slice %499 {offsets = [0, 32], sizes = [8, 32], strides = [1, 1]} : vector<8x96xf32> to vector<8x32xf32>
    %511 = arith.mulf %510, %471 : vector<8x32xf32>
    %512 = vector.extract_strided_slice %499 {offsets = [0, 0], sizes = [8, 32], strides = [1, 1]} : vector<8x96xf32> to vector<8x32xf32>
    %513 = arith.mulf %512, %501 : vector<8x32xf32>
    %514 = arith.addf %511, %513 : vector<8x32xf32>
    %515 = vector.extract_strided_slice %507 {offsets = [0, 32], sizes = [8, 32], strides = [1, 1]} : vector<8x96xf32> to vector<8x32xf32>
    %516 = arith.mulf %515, %476 : vector<8x32xf32>
    %517 = vector.extract_strided_slice %507 {offsets = [0, 0], sizes = [8, 32], strides = [1, 1]} : vector<8x96xf32> to vector<8x32xf32>
    %518 = arith.mulf %517, %509 : vector<8x32xf32>
    %519 = arith.addf %516, %518 : vector<8x32xf32>
    %520 = vector.extract_strided_slice %499 {offsets = [0, 64], sizes = [8, 32], strides = [1, 1]} : vector<8x96xf32> to vector<8x32xf32>
    %521 = math.tanh %514 : vector<8x32xf32>
    %522 = arith.mulf %520, %521 : vector<8x32xf32>
    %523 = vector.extract_strided_slice %507 {offsets = [0, 64], sizes = [8, 32], strides = [1, 1]} : vector<8x96xf32> to vector<8x32xf32>
    %524 = math.tanh %519 : vector<8x32xf32>
    %525 = arith.mulf %523, %524 : vector<8x32xf32>
    %526 = tpu.concatenate %522, %525 in 1 : vector<8x32xf32>, vector<8x32xf32> -> vector<8x64xf32>
    %c24_98 = arith.constant 24 : index
    %c0_99 = arith.constant 0 : index
    %527 = vector.load %arg16[%c24_98, %c0_99] : memref<64x64xf32, #tpu.memory_space<vmem>>, vector<8x32xf32>
    tpu.vector_store %arg16[%c24_98, %c0_99], %522 {strides = array<i32>} : memref<64x64xf32, #tpu.memory_space<vmem>>, vector<8x32xf32>,
    %c32_100 = arith.constant 32 : index
    %c32_101 = arith.constant 32 : index
    %528 = vector.load %arg16[%c32_100, %c32_101] : memref<64x64xf32, #tpu.memory_space<vmem>>, vector<8x32xf32>
    tpu.vector_store %arg16[%c32_100, %c32_101], %525 {strides = array<i32>} : memref<64x64xf32, #tpu.memory_space<vmem>>, vector<8x32xf32>,
    %529 = arith.truncf %526 : vector<8x64xf32> to vector<8x64xbf16>
    %cst_102 = arith.constant dense<0.000000e+00> : vector<8x256xf32>
    %530 = tpu.matmul %529, %360, %cst_102 {dimension_numbers = #tpu.dot_dimension_numbers<[1], [0], [0], [1], [0, 0, 1, 1], [], []>} : vector<8x64xbf16>, vector<64x256xbf16>, vector<8x256xf32> -> vector<8x256xf32>
    %531 = vector.extract_strided_slice %530 {offsets = [0, 0], sizes = [8, 128], strides = [1, 1]} : vector<8x256xf32> to vector<8x128xf32>
    %532 = vector.extract_strided_slice %358 {offsets = [32, 0], sizes = [8, 128], strides = [1, 1]} : vector<64x256xf32> to vector<8x128xf32>
    %533 = arith.addf %531, %532 : vector<8x128xf32>
    %534 = vector.extract_strided_slice %530 {offsets = [0, 128], sizes = [8, 128], strides = [1, 1]} : vector<8x256xf32> to vector<8x128xf32>
    %535 = vector.extract_strided_slice %358 {offsets = [24, 128], sizes = [8, 128], strides = [1, 1]} : vector<64x256xf32> to vector<8x128xf32>
    %536 = arith.addf %534, %535 : vector<8x128xf32>
    %537 = vector.extract_strided_slice %533 {offsets = [0, 0], sizes = [8, 96], strides = [1, 1]} : vector<8x128xf32> to vector<8x96xf32>
    %538 = arith.negf %537 : vector<8x96xf32>
    %539 = math.exp %538 : vector<8x96xf32>
    %cst_103 = arith.constant 1.000000e+00 : f32
    %540 = vector.broadcast %cst_103 : f32 to vector<8x96xf32>
    %541 = arith.addf %540, %539 : vector<8x96xf32>
    %542 = arith.divf %540, %541 : vector<8x96xf32>
    %543 = vector.extract_strided_slice %533 {offsets = [0, 96], sizes = [8, 32], strides = [1, 1]} : vector<8x128xf32> to vector<8x32xf32>
    %544 = math.tanh %543 : vector<8x32xf32>
    %545 = vector.extract_strided_slice %536 {offsets = [0, 0], sizes = [8, 96], strides = [1, 1]} : vector<8x128xf32> to vector<8x96xf32>
    %546 = arith.negf %545 : vector<8x96xf32>
    %547 = math.exp %546 : vector<8x96xf32>
    %cst_104 = arith.constant 1.000000e+00 : f32
    %548 = vector.broadcast %cst_104 : f32 to vector<8x96xf32>
    %549 = arith.addf %548, %547 : vector<8x96xf32>
    %550 = arith.divf %548, %549 : vector<8x96xf32>
    %551 = vector.extract_strided_slice %536 {offsets = [0, 96], sizes = [8, 32], strides = [1, 1]} : vector<8x128xf32> to vector<8x32xf32>
    %552 = math.tanh %551 : vector<8x32xf32>
    %553 = vector.extract_strided_slice %542 {offsets = [0, 32], sizes = [8, 32], strides = [1, 1]} : vector<8x96xf32> to vector<8x32xf32>
    %554 = arith.mulf %553, %514 : vector<8x32xf32>
    %555 = vector.extract_strided_slice %542 {offsets = [0, 0], sizes = [8, 32], strides = [1, 1]} : vector<8x96xf32> to vector<8x32xf32>
    %556 = arith.mulf %555, %544 : vector<8x32xf32>
    %557 = arith.addf %554, %556 : vector<8x32xf32>
    %558 = vector.extract_strided_slice %550 {offsets = [0, 32], sizes = [8, 32], strides = [1, 1]} : vector<8x96xf32> to vector<8x32xf32>
    %559 = arith.mulf %558, %519 : vector<8x32xf32>
    %560 = vector.extract_strided_slice %550 {offsets = [0, 0], sizes = [8, 32], strides = [1, 1]} : vector<8x96xf32> to vector<8x32xf32>
    %561 = arith.mulf %560, %552 : vector<8x32xf32>
    %562 = arith.addf %559, %561 : vector<8x32xf32>
    %563 = vector.extract_strided_slice %542 {offsets = [0, 64], sizes = [8, 32], strides = [1, 1]} : vector<8x96xf32> to vector<8x32xf32>
    %564 = math.tanh %557 : vector<8x32xf32>
    %565 = arith.mulf %563, %564 : vector<8x32xf32>
    %566 = vector.extract_strided_slice %550 {offsets = [0, 64], sizes = [8, 32], strides = [1, 1]} : vector<8x96xf32> to vector<8x32xf32>
    %567 = math.tanh %562 : vector<8x32xf32>
    %568 = arith.mulf %566, %567 : vector<8x32xf32>
    %569 = tpu.concatenate %565, %568 in 1 : vector<8x32xf32>, vector<8x32xf32> -> vector<8x64xf32>
    %c32_105 = arith.constant 32 : index
    %c0_106 = arith.constant 0 : index
    %570 = vector.load %arg16[%c32_105, %c0_106] : memref<64x64xf32, #tpu.memory_space<vmem>>, vector<8x32xf32>
    tpu.vector_store %arg16[%c32_105, %c0_106], %565 {strides = array<i32>} : memref<64x64xf32, #tpu.memory_space<vmem>>, vector<8x32xf32>,
    %c24_107 = arith.constant 24 : index
    %c32_108 = arith.constant 32 : index
    %571 = vector.load %arg16[%c24_107, %c32_108] : memref<64x64xf32, #tpu.memory_space<vmem>>, vector<8x32xf32>
    tpu.vector_store %arg16[%c24_107, %c32_108], %568 {strides = array<i32>} : memref<64x64xf32, #tpu.memory_space<vmem>>, vector<8x32xf32>,
    %572 = arith.truncf %569 : vector<8x64xf32> to vector<8x64xbf16>
    %cst_109 = arith.constant dense<0.000000e+00> : vector<8x256xf32>
    %573 = tpu.matmul %572, %360, %cst_109 {dimension_numbers = #tpu.dot_dimension_numbers<[1], [0], [0], [1], [0, 0, 1, 1], [], []>} : vector<8x64xbf16>, vector<64x256xbf16>, vector<8x256xf32> -> vector<8x256xf32>
    %574 = vector.extract_strided_slice %573 {offsets = [0, 0], sizes = [8, 128], strides = [1, 1]} : vector<8x256xf32> to vector<8x128xf32>
    %575 = vector.extract_strided_slice %358 {offsets = [40, 0], sizes = [8, 128], strides = [1, 1]} : vector<64x256xf32> to vector<8x128xf32>
    %576 = arith.addf %574, %575 : vector<8x128xf32>
    %577 = vector.extract_strided_slice %573 {offsets = [0, 128], sizes = [8, 128], strides = [1, 1]} : vector<8x256xf32> to vector<8x128xf32>
    %578 = vector.extract_strided_slice %358 {offsets = [16, 128], sizes = [8, 128], strides = [1, 1]} : vector<64x256xf32> to vector<8x128xf32>
    %579 = arith.addf %577, %578 : vector<8x128xf32>
    %580 = vector.extract_strided_slice %576 {offsets = [0, 0], sizes = [8, 96], strides = [1, 1]} : vector<8x128xf32> to vector<8x96xf32>
    %581 = arith.negf %580 : vector<8x96xf32>
    %582 = math.exp %581 : vector<8x96xf32>
    %cst_110 = arith.constant 1.000000e+00 : f32
    %583 = vector.broadcast %cst_110 : f32 to vector<8x96xf32>
    %584 = arith.addf %583, %582 : vector<8x96xf32>
    %585 = arith.divf %583, %584 : vector<8x96xf32>
    %586 = vector.extract_strided_slice %576 {offsets = [0, 96], sizes = [8, 32], strides = [1, 1]} : vector<8x128xf32> to vector<8x32xf32>
    %587 = math.tanh %586 : vector<8x32xf32>
    %588 = vector.extract_strided_slice %579 {offsets = [0, 0], sizes = [8, 96], strides = [1, 1]} : vector<8x128xf32> to vector<8x96xf32>
    %589 = arith.negf %588 : vector<8x96xf32>
    %590 = math.exp %589 : vector<8x96xf32>
    %cst_111 = arith.constant 1.000000e+00 : f32
    %591 = vector.broadcast %cst_111 : f32 to vector<8x96xf32>
    %592 = arith.addf %591, %590 : vector<8x96xf32>
    %593 = arith.divf %591, %592 : vector<8x96xf32>
    %594 = vector.extract_strided_slice %579 {offsets = [0, 96], sizes = [8, 32], strides = [1, 1]} : vector<8x128xf32> to vector<8x32xf32>
    %595 = math.tanh %594 : vector<8x32xf32>
    %596 = vector.extract_strided_slice %585 {offsets = [0, 32], sizes = [8, 32], strides = [1, 1]} : vector<8x96xf32> to vector<8x32xf32>
    %597 = arith.mulf %596, %557 : vector<8x32xf32>
    %598 = vector.extract_strided_slice %585 {offsets = [0, 0], sizes = [8, 32], strides = [1, 1]} : vector<8x96xf32> to vector<8x32xf32>
    %599 = arith.mulf %598, %587 : vector<8x32xf32>
    %600 = arith.addf %597, %599 : vector<8x32xf32>
    %601 = vector.extract_strided_slice %593 {offsets = [0, 32], sizes = [8, 32], strides = [1, 1]} : vector<8x96xf32> to vector<8x32xf32>
    %602 = arith.mulf %601, %562 : vector<8x32xf32>
    %603 = vector.extract_strided_slice %593 {offsets = [0, 0], sizes = [8, 32], strides = [1, 1]} : vector<8x96xf32> to vector<8x32xf32>
    %604 = arith.mulf %603, %595 : vector<8x32xf32>
    %605 = arith.addf %602, %604 : vector<8x32xf32>
    %606 = vector.extract_strided_slice %585 {offsets = [0, 64], sizes = [8, 32], strides = [1, 1]} : vector<8x96xf32> to vector<8x32xf32>
    %607 = math.tanh %600 : vector<8x32xf32>
    %608 = arith.mulf %606, %607 : vector<8x32xf32>
    %609 = vector.extract_strided_slice %593 {offsets = [0, 64], sizes = [8, 32], strides = [1, 1]} : vector<8x96xf32> to vector<8x32xf32>
    %610 = math.tanh %605 : vector<8x32xf32>
    %611 = arith.mulf %609, %610 : vector<8x32xf32>
    %612 = tpu.concatenate %608, %611 in 1 : vector<8x32xf32>, vector<8x32xf32> -> vector<8x64xf32>
    %c40_112 = arith.constant 40 : index
    %c0_113 = arith.constant 0 : index
    %613 = vector.load %arg16[%c40_112, %c0_113] : memref<64x64xf32, #tpu.memory_space<vmem>>, vector<8x32xf32>
    tpu.vector_store %arg16[%c40_112, %c0_113], %608 {strides = array<i32>} : memref<64x64xf32, #tpu.memory_space<vmem>>, vector<8x32xf32>,
    %c16_114 = arith.constant 16 : index
    %c32_115 = arith.constant 32 : index
    %614 = vector.load %arg16[%c16_114, %c32_115] : memref<64x64xf32, #tpu.memory_space<vmem>>, vector<8x32xf32>
    tpu.vector_store %arg16[%c16_114, %c32_115], %611 {strides = array<i32>} : memref<64x64xf32, #tpu.memory_space<vmem>>, vector<8x32xf32>,
    %615 = arith.truncf %612 : vector<8x64xf32> to vector<8x64xbf16>
    %cst_116 = arith.constant dense<0.000000e+00> : vector<8x256xf32>
    %616 = tpu.matmul %615, %360, %cst_116 {dimension_numbers = #tpu.dot_dimension_numbers<[1], [0], [0], [1], [0, 0, 1, 1], [], []>} : vector<8x64xbf16>, vector<64x256xbf16>, vector<8x256xf32> -> vector<8x256xf32>
    %617 = vector.extract_strided_slice %616 {offsets = [0, 0], sizes = [8, 128], strides = [1, 1]} : vector<8x256xf32> to vector<8x128xf32>
    %618 = vector.extract_strided_slice %358 {offsets = [48, 0], sizes = [8, 128], strides = [1, 1]} : vector<64x256xf32> to vector<8x128xf32>
    %619 = arith.addf %617, %618 : vector<8x128xf32>
    %620 = vector.extract_strided_slice %616 {offsets = [0, 128], sizes = [8, 128], strides = [1, 1]} : vector<8x256xf32> to vector<8x128xf32>
    %621 = vector.extract_strided_slice %358 {offsets = [8, 128], sizes = [8, 128], strides = [1, 1]} : vector<64x256xf32> to vector<8x128xf32>
    %622 = arith.addf %620, %621 : vector<8x128xf32>
    %623 = vector.extract_strided_slice %619 {offsets = [0, 0], sizes = [8, 96], strides = [1, 1]} : vector<8x128xf32> to vector<8x96xf32>
    %624 = arith.negf %623 : vector<8x96xf32>
    %625 = math.exp %624 : vector<8x96xf32>
    %cst_117 = arith.constant 1.000000e+00 : f32
    %626 = vector.broadcast %cst_117 : f32 to vector<8x96xf32>
    %627 = arith.addf %626, %625 : vector<8x96xf32>
    %628 = arith.divf %626, %627 : vector<8x96xf32>
    %629 = vector.extract_strided_slice %619 {offsets = [0, 96], sizes = [8, 32], strides = [1, 1]} : vector<8x128xf32> to vector<8x32xf32>
    %630 = math.tanh %629 : vector<8x32xf32>
    %631 = vector.extract_strided_slice %622 {offsets = [0, 0], sizes = [8, 96], strides = [1, 1]} : vector<8x128xf32> to vector<8x96xf32>
    %632 = arith.negf %631 : vector<8x96xf32>
    %633 = math.exp %632 : vector<8x96xf32>
    %cst_118 = arith.constant 1.000000e+00 : f32
    %634 = vector.broadcast %cst_118 : f32 to vector<8x96xf32>
    %635 = arith.addf %634, %633 : vector<8x96xf32>
    %636 = arith.divf %634, %635 : vector<8x96xf32>
    %637 = vector.extract_strided_slice %622 {offsets = [0, 96], sizes = [8, 32], strides = [1, 1]} : vector<8x128xf32> to vector<8x32xf32>
    %638 = math.tanh %637 : vector<8x32xf32>
    %639 = vector.extract_strided_slice %628 {offsets = [0, 32], sizes = [8, 32], strides = [1, 1]} : vector<8x96xf32> to vector<8x32xf32>
    %640 = arith.mulf %639, %600 : vector<8x32xf32>
    %641 = vector.extract_strided_slice %628 {offsets = [0, 0], sizes = [8, 32], strides = [1, 1]} : vector<8x96xf32> to vector<8x32xf32>
    %642 = arith.mulf %641, %630 : vector<8x32xf32>
    %643 = arith.addf %640, %642 : vector<8x32xf32>
    %644 = vector.extract_strided_slice %636 {offsets = [0, 32], sizes = [8, 32], strides = [1, 1]} : vector<8x96xf32> to vector<8x32xf32>
    %645 = arith.mulf %644, %605 : vector<8x32xf32>
    %646 = vector.extract_strided_slice %636 {offsets = [0, 0], sizes = [8, 32], strides = [1, 1]} : vector<8x96xf32> to vector<8x32xf32>
    %647 = arith.mulf %646, %638 : vector<8x32xf32>
    %648 = arith.addf %645, %647 : vector<8x32xf32>
    %649 = vector.extract_strided_slice %628 {offsets = [0, 64], sizes = [8, 32], strides = [1, 1]} : vector<8x96xf32> to vector<8x32xf32>
    %650 = math.tanh %643 : vector<8x32xf32>
    %651 = arith.mulf %649, %650 : vector<8x32xf32>
    %652 = vector.extract_strided_slice %636 {offsets = [0, 64], sizes = [8, 32], strides = [1, 1]} : vector<8x96xf32> to vector<8x32xf32>
    %653 = math.tanh %648 : vector<8x32xf32>
    %654 = arith.mulf %652, %653 : vector<8x32xf32>
    %655 = tpu.concatenate %651, %654 in 1 : vector<8x32xf32>, vector<8x32xf32> -> vector<8x64xf32>
    %c48_119 = arith.constant 48 : index
    %c0_120 = arith.constant 0 : index
    %656 = vector.load %arg16[%c48_119, %c0_120] : memref<64x64xf32, #tpu.memory_space<vmem>>, vector<8x32xf32>
    tpu.vector_store %arg16[%c48_119, %c0_120], %651 {strides = array<i32>} : memref<64x64xf32, #tpu.memory_space<vmem>>, vector<8x32xf32>,
    %c8_121 = arith.constant 8 : index
    %c32_122 = arith.constant 32 : index
    %657 = vector.load %arg16[%c8_121, %c32_122] : memref<64x64xf32, #tpu.memory_space<vmem>>, vector<8x32xf32>
    tpu.vector_store %arg16[%c8_121, %c32_122], %654 {strides = array<i32>} : memref<64x64xf32, #tpu.memory_space<vmem>>, vector<8x32xf32>,
    %658 = arith.truncf %655 : vector<8x64xf32> to vector<8x64xbf16>
    %cst_123 = arith.constant dense<0.000000e+00> : vector<8x256xf32>
    %659 = tpu.matmul %658, %360, %cst_123 {dimension_numbers = #tpu.dot_dimension_numbers<[1], [0], [0], [1], [0, 0, 1, 1], [], []>} : vector<8x64xbf16>, vector<64x256xbf16>, vector<8x256xf32> -> vector<8x256xf32>
    %660 = vector.extract_strided_slice %659 {offsets = [0, 0], sizes = [8, 128], strides = [1, 1]} : vector<8x256xf32> to vector<8x128xf32>
    %661 = vector.extract_strided_slice %358 {offsets = [56, 0], sizes = [8, 128], strides = [1, 1]} : vector<64x256xf32> to vector<8x128xf32>
    %662 = arith.addf %660, %661 : vector<8x128xf32>
    %663 = vector.extract_strided_slice %659 {offsets = [0, 128], sizes = [8, 128], strides = [1, 1]} : vector<8x256xf32> to vector<8x128xf32>
    %664 = vector.extract_strided_slice %358 {offsets = [0, 128], sizes = [8, 128], strides = [1, 1]} : vector<64x256xf32> to vector<8x128xf32>
    %665 = arith.addf %663, %664 : vector<8x128xf32>
    %666 = vector.extract_strided_slice %662 {offsets = [0, 0], sizes = [8, 96], strides = [1, 1]} : vector<8x128xf32> to vector<8x96xf32>
    %667 = arith.negf %666 : vector<8x96xf32>
    %668 = math.exp %667 : vector<8x96xf32>
    %cst_124 = arith.constant 1.000000e+00 : f32
    %669 = vector.broadcast %cst_124 : f32 to vector<8x96xf32>
    %670 = arith.addf %669, %668 : vector<8x96xf32>
    %671 = arith.divf %669, %670 : vector<8x96xf32>
    %672 = vector.extract_strided_slice %662 {offsets = [0, 96], sizes = [8, 32], strides = [1, 1]} : vector<8x128xf32> to vector<8x32xf32>
    %673 = math.tanh %672 : vector<8x32xf32>
    %674 = vector.extract_strided_slice %665 {offsets = [0, 0], sizes = [8, 96], strides = [1, 1]} : vector<8x128xf32> to vector<8x96xf32>
    %675 = arith.negf %674 : vector<8x96xf32>
    %676 = math.exp %675 : vector<8x96xf32>
    %cst_125 = arith.constant 1.000000e+00 : f32
    %677 = vector.broadcast %cst_125 : f32 to vector<8x96xf32>
    %678 = arith.addf %677, %676 : vector<8x96xf32>
    %679 = arith.divf %677, %678 : vector<8x96xf32>
    %680 = vector.extract_strided_slice %665 {offsets = [0, 96], sizes = [8, 32], strides = [1, 1]} : vector<8x128xf32> to vector<8x32xf32>
    %681 = math.tanh %680 : vector<8x32xf32>
    %682 = vector.extract_strided_slice %671 {offsets = [0, 32], sizes = [8, 32], strides = [1, 1]} : vector<8x96xf32> to vector<8x32xf32>
    %683 = arith.mulf %682, %643 : vector<8x32xf32>
    %684 = vector.extract_strided_slice %671 {offsets = [0, 0], sizes = [8, 32], strides = [1, 1]} : vector<8x96xf32> to vector<8x32xf32>
    %685 = arith.mulf %684, %673 : vector<8x32xf32>
    %686 = arith.addf %683, %685 : vector<8x32xf32>
    %687 = vector.extract_strided_slice %679 {offsets = [0, 32], sizes = [8, 32], strides = [1, 1]} : vector<8x96xf32> to vector<8x32xf32>
    %688 = arith.mulf %687, %648 : vector<8x32xf32>
    %689 = vector.extract_strided_slice %679 {offsets = [0, 0], sizes = [8, 32], strides = [1, 1]} : vector<8x96xf32> to vector<8x32xf32>
    %690 = arith.mulf %689, %681 : vector<8x32xf32>
    %691 = arith.addf %688, %690 : vector<8x32xf32>
    %692 = vector.extract_strided_slice %671 {offsets = [0, 64], sizes = [8, 32], strides = [1, 1]} : vector<8x96xf32> to vector<8x32xf32>
    %693 = math.tanh %686 : vector<8x32xf32>
    %694 = arith.mulf %692, %693 : vector<8x32xf32>
    %695 = vector.extract_strided_slice %679 {offsets = [0, 64], sizes = [8, 32], strides = [1, 1]} : vector<8x96xf32> to vector<8x32xf32>
    %696 = math.tanh %691 : vector<8x32xf32>
    %697 = arith.mulf %695, %696 : vector<8x32xf32>
    %c56_126 = arith.constant 56 : index
    %c0_127 = arith.constant 0 : index
    %698 = vector.load %arg16[%c56_126, %c0_127] : memref<64x64xf32, #tpu.memory_space<vmem>>, vector<8x32xf32>
    tpu.vector_store %arg16[%c56_126, %c0_127], %694 {strides = array<i32>} : memref<64x64xf32, #tpu.memory_space<vmem>>, vector<8x32xf32>,
    %c0_128 = arith.constant 0 : index
    %c32_129 = arith.constant 32 : index
    %699 = vector.load %arg16[%c0_128, %c32_129] : memref<64x64xf32, #tpu.memory_space<vmem>>, vector<8x32xf32>
    tpu.vector_store %arg16[%c0_128, %c32_129], %697 {strides = array<i32>} : memref<64x64xf32, #tpu.memory_space<vmem>>, vector<8x32xf32>,
    %c0_130 = arith.constant 0 : index
    %c0_131 = arith.constant 0 : index
    %700 = vector.load %arg16[%c0_130, %c0_131] : memref<64x64xf32, #tpu.memory_space<vmem>>, vector<64x64xf32>
    %701 = arith.truncf %700 : vector<64x64xf32> to vector<64x64xbf16>
    %c0_132 = arith.constant 0 : index
    %c0_133 = arith.constant 0 : index
    %c0_134 = arith.constant 0 : index
    %702 = vector.load %arg8[%c0_132, %c0_133, %c0_134] : memref<1x64x256xbf16, #tpu.memory_space<vmem>>, vector<1x64x256xbf16>
    %703 = vector.shape_cast %702 : vector<1x64x256xbf16> to vector<64x256xbf16>
    %cst_135 = arith.constant dense<0.000000e+00> : vector<64x256xf32>
    %704 = tpu.matmul %701, %703, %cst_135 {dimension_numbers = #tpu.dot_dimension_numbers<[1], [0], [0], [1], [0, 0, 1, 1], [], []>} : vector<64x64xbf16>, vector<64x256xbf16>, vector<64x256xf32> -> vector<64x256xf32>
    %c0_136 = arith.constant 0 : index
    %c0_137 = arith.constant 0 : index
    %c0_138 = arith.constant 0 : index
    %705 = vector.load %arg10[%c0_136, %c0_137, %c0_138] : memref<1x1x256xf32, #tpu.memory_space<vmem>>, vector<1x1x256xf32>
    %706 = vector.shape_cast %705 : vector<1x1x256xf32> to vector<1x256xf32>
    %707 = vector.broadcast %706 : vector<1x256xf32> to vector<64x256xf32>
    %708 = arith.addf %704, %707 : vector<64x256xf32>
    %c0_139 = arith.constant 0 : index
    %c0_140 = arith.constant 0 : index
    %c0_141 = arith.constant 0 : index
    %709 = vector.load %arg9[%c0_139, %c0_140, %c0_141] : memref<1x64x256xbf16, #tpu.memory_space<vmem>>, vector<1x64x256xbf16>
    %710 = vector.shape_cast %709 : vector<1x64x256xbf16> to vector<64x256xbf16>
    %cst_142 = arith.constant 0.000000e+00 : f32
    %711 = vector.broadcast %cst_142 : f32 to vector<8x32xf32>
    %cst_143 = arith.constant 0.000000e+00 : f32
    %712 = vector.broadcast %cst_143 : f32 to vector<8x32xf32>
    %713 = vector.extract_strided_slice %708 {offsets = [0, 0], sizes = [8, 128], strides = [1, 1]} : vector<64x256xf32> to vector<8x128xf32>
    %714 = vector.extract_strided_slice %708 {offsets = [56, 128], sizes = [8, 128], strides = [1, 1]} : vector<64x256xf32> to vector<8x128xf32>
    %715 = vector.extract_strided_slice %713 {offsets = [0, 0], sizes = [8, 96], strides = [1, 1]} : vector<8x128xf32> to vector<8x96xf32>
    %716 = arith.negf %715 : vector<8x96xf32>
    %717 = math.exp %716 : vector<8x96xf32>
    %cst_144 = arith.constant 1.000000e+00 : f32
    %718 = vector.broadcast %cst_144 : f32 to vector<8x96xf32>
    %719 = arith.addf %718, %717 : vector<8x96xf32>
    %720 = arith.divf %718, %719 : vector<8x96xf32>
    %721 = vector.extract_strided_slice %713 {offsets = [0, 96], sizes = [8, 32], strides = [1, 1]} : vector<8x128xf32> to vector<8x32xf32>
    %722 = math.tanh %721 : vector<8x32xf32>
    %723 = vector.extract_strided_slice %714 {offsets = [0, 0], sizes = [8, 96], strides = [1, 1]} : vector<8x128xf32> to vector<8x96xf32>
    %724 = arith.negf %723 : vector<8x96xf32>
    %725 = math.exp %724 : vector<8x96xf32>
    %cst_145 = arith.constant 1.000000e+00 : f32
    %726 = vector.broadcast %cst_145 : f32 to vector<8x96xf32>
    %727 = arith.addf %726, %725 : vector<8x96xf32>
    %728 = arith.divf %726, %727 : vector<8x96xf32>
    %729 = vector.extract_strided_slice %714 {offsets = [0, 96], sizes = [8, 32], strides = [1, 1]} : vector<8x128xf32> to vector<8x32xf32>
    %730 = math.tanh %729 : vector<8x32xf32>
    %731 = vector.extract_strided_slice %720 {offsets = [0, 32], sizes = [8, 32], strides = [1, 1]} : vector<8x96xf32> to vector<8x32xf32>
    %732 = arith.mulf %731, %711 : vector<8x32xf32>
    %733 = vector.extract_strided_slice %720 {offsets = [0, 0], sizes = [8, 32], strides = [1, 1]} : vector<8x96xf32> to vector<8x32xf32>
    %734 = arith.mulf %733, %722 : vector<8x32xf32>
    %735 = arith.addf %732, %734 : vector<8x32xf32>
    %736 = vector.extract_strided_slice %728 {offsets = [0, 32], sizes = [8, 32], strides = [1, 1]} : vector<8x96xf32> to vector<8x32xf32>
    %737 = arith.mulf %736, %712 : vector<8x32xf32>
    %738 = vector.extract_strided_slice %728 {offsets = [0, 0], sizes = [8, 32], strides = [1, 1]} : vector<8x96xf32> to vector<8x32xf32>
    %739 = arith.mulf %738, %730 : vector<8x32xf32>
    %740 = arith.addf %737, %739 : vector<8x32xf32>
    %741 = vector.extract_strided_slice %720 {offsets = [0, 64], sizes = [8, 32], strides = [1, 1]} : vector<8x96xf32> to vector<8x32xf32>
    %742 = math.tanh %735 : vector<8x32xf32>
    %743 = arith.mulf %741, %742 : vector<8x32xf32>
    %744 = vector.extract_strided_slice %728 {offsets = [0, 64], sizes = [8, 32], strides = [1, 1]} : vector<8x96xf32> to vector<8x32xf32>
    %745 = math.tanh %740 : vector<8x32xf32>
    %746 = arith.mulf %744, %745 : vector<8x32xf32>
    %747 = tpu.concatenate %743, %746 in 1 : vector<8x32xf32>, vector<8x32xf32> -> vector<8x64xf32>
    %c0_146 = arith.constant 0 : index
    %c0_147 = arith.constant 0 : index
    %748 = vector.load %arg15[%c0_146, %c0_147] : memref<64x64xf32, #tpu.memory_space<vmem>>, vector<8x32xf32>
    tpu.vector_store %arg15[%c0_146, %c0_147], %743 {strides = array<i32>} : memref<64x64xf32, #tpu.memory_space<vmem>>, vector<8x32xf32>,
    %c56_148 = arith.constant 56 : index
    %c32_149 = arith.constant 32 : index
    %749 = vector.load %arg15[%c56_148, %c32_149] : memref<64x64xf32, #tpu.memory_space<vmem>>, vector<8x32xf32>
    tpu.vector_store %arg15[%c56_148, %c32_149], %746 {strides = array<i32>} : memref<64x64xf32, #tpu.memory_space<vmem>>, vector<8x32xf32>,
    %750 = arith.truncf %747 : vector<8x64xf32> to vector<8x64xbf16>
    %cst_150 = arith.constant dense<0.000000e+00> : vector<8x256xf32>
    %751 = tpu.matmul %750, %710, %cst_150 {dimension_numbers = #tpu.dot_dimension_numbers<[1], [0], [0], [1], [0, 0, 1, 1], [], []>} : vector<8x64xbf16>, vector<64x256xbf16>, vector<8x256xf32> -> vector<8x256xf32>
    %752 = vector.extract_strided_slice %751 {offsets = [0, 0], sizes = [8, 128], strides = [1, 1]} : vector<8x256xf32> to vector<8x128xf32>
    %753 = vector.extract_strided_slice %708 {offsets = [8, 0], sizes = [8, 128], strides = [1, 1]} : vector<64x256xf32> to vector<8x128xf32>
    %754 = arith.addf %752, %753 : vector<8x128xf32>
    %755 = vector.extract_strided_slice %751 {offsets = [0, 128], sizes = [8, 128], strides = [1, 1]} : vector<8x256xf32> to vector<8x128xf32>
    %756 = vector.extract_strided_slice %708 {offsets = [48, 128], sizes = [8, 128], strides = [1, 1]} : vector<64x256xf32> to vector<8x128xf32>
    %757 = arith.addf %755, %756 : vector<8x128xf32>
    %758 = vector.extract_strided_slice %754 {offsets = [0, 0], sizes = [8, 96], strides = [1, 1]} : vector<8x128xf32> to vector<8x96xf32>
    %759 = arith.negf %758 : vector<8x96xf32>
    %760 = math.exp %759 : vector<8x96xf32>
    %cst_151 = arith.constant 1.000000e+00 : f32
    %761 = vector.broadcast %cst_151 : f32 to vector<8x96xf32>
    %762 = arith.addf %761, %760 : vector<8x96xf32>
    %763 = arith.divf %761, %762 : vector<8x96xf32>
    %764 = vector.extract_strided_slice %754 {offsets = [0, 96], sizes = [8, 32], strides = [1, 1]} : vector<8x128xf32> to vector<8x32xf32>
    %765 = math.tanh %764 : vector<8x32xf32>
    %766 = vector.extract_strided_slice %757 {offsets = [0, 0], sizes = [8, 96], strides = [1, 1]} : vector<8x128xf32> to vector<8x96xf32>
    %767 = arith.negf %766 : vector<8x96xf32>
    %768 = math.exp %767 : vector<8x96xf32>
    %cst_152 = arith.constant 1.000000e+00 : f32
    %769 = vector.broadcast %cst_152 : f32 to vector<8x96xf32>
    %770 = arith.addf %769, %768 : vector<8x96xf32>
    %771 = arith.divf %769, %770 : vector<8x96xf32>
    %772 = vector.extract_strided_slice %757 {offsets = [0, 96], sizes = [8, 32], strides = [1, 1]} : vector<8x128xf32> to vector<8x32xf32>
    %773 = math.tanh %772 : vector<8x32xf32>
    %774 = vector.extract_strided_slice %763 {offsets = [0, 32], sizes = [8, 32], strides = [1, 1]} : vector<8x96xf32> to vector<8x32xf32>
    %775 = arith.mulf %774, %735 : vector<8x32xf32>
    %776 = vector.extract_strided_slice %763 {offsets = [0, 0], sizes = [8, 32], strides = [1, 1]} : vector<8x96xf32> to vector<8x32xf32>
    %777 = arith.mulf %776, %765 : vector<8x32xf32>
    %778 = arith.addf %775, %777 : vector<8x32xf32>
    %779 = vector.extract_strided_slice %771 {offsets = [0, 32], sizes = [8, 32], strides = [1, 1]} : vector<8x96xf32> to vector<8x32xf32>
    %780 = arith.mulf %779, %740 : vector<8x32xf32>
    %781 = vector.extract_strided_slice %771 {offsets = [0, 0], sizes = [8, 32], strides = [1, 1]} : vector<8x96xf32> to vector<8x32xf32>
    %782 = arith.mulf %781, %773 : vector<8x32xf32>
    %783 = arith.addf %780, %782 : vector<8x32xf32>
    %784 = vector.extract_strided_slice %763 {offsets = [0, 64], sizes = [8, 32], strides = [1, 1]} : vector<8x96xf32> to vector<8x32xf32>
    %785 = math.tanh %778 : vector<8x32xf32>
    %786 = arith.mulf %784, %785 : vector<8x32xf32>
    %787 = vector.extract_strided_slice %771 {offsets = [0, 64], sizes = [8, 32], strides = [1, 1]} : vector<8x96xf32> to vector<8x32xf32>
    %788 = math.tanh %783 : vector<8x32xf32>
    %789 = arith.mulf %787, %788 : vector<8x32xf32>
    %790 = tpu.concatenate %786, %789 in 1 : vector<8x32xf32>, vector<8x32xf32> -> vector<8x64xf32>
    %c8_153 = arith.constant 8 : index
    %c0_154 = arith.constant 0 : index
    %791 = vector.load %arg15[%c8_153, %c0_154] : memref<64x64xf32, #tpu.memory_space<vmem>>, vector<8x32xf32>
    tpu.vector_store %arg15[%c8_153, %c0_154], %786 {strides = array<i32>} : memref<64x64xf32, #tpu.memory_space<vmem>>, vector<8x32xf32>,
    %c48_155 = arith.constant 48 : index
    %c32_156 = arith.constant 32 : index
    %792 = vector.load %arg15[%c48_155, %c32_156] : memref<64x64xf32, #tpu.memory_space<vmem>>, vector<8x32xf32>
    tpu.vector_store %arg15[%c48_155, %c32_156], %789 {strides = array<i32>} : memref<64x64xf32, #tpu.memory_space<vmem>>, vector<8x32xf32>,
    %793 = arith.truncf %790 : vector<8x64xf32> to vector<8x64xbf16>
    %cst_157 = arith.constant dense<0.000000e+00> : vector<8x256xf32>
    %794 = tpu.matmul %793, %710, %cst_157 {dimension_numbers = #tpu.dot_dimension_numbers<[1], [0], [0], [1], [0, 0, 1, 1], [], []>} : vector<8x64xbf16>, vector<64x256xbf16>, vector<8x256xf32> -> vector<8x256xf32>
    %795 = vector.extract_strided_slice %794 {offsets = [0, 0], sizes = [8, 128], strides = [1, 1]} : vector<8x256xf32> to vector<8x128xf32>
    %796 = vector.extract_strided_slice %708 {offsets = [16, 0], sizes = [8, 128], strides = [1, 1]} : vector<64x256xf32> to vector<8x128xf32>
    %797 = arith.addf %795, %796 : vector<8x128xf32>
    %798 = vector.extract_strided_slice %794 {offsets = [0, 128], sizes = [8, 128], strides = [1, 1]} : vector<8x256xf32> to vector<8x128xf32>
    %799 = vector.extract_strided_slice %708 {offsets = [40, 128], sizes = [8, 128], strides = [1, 1]} : vector<64x256xf32> to vector<8x128xf32>
    %800 = arith.addf %798, %799 : vector<8x128xf32>
    %801 = vector.extract_strided_slice %797 {offsets = [0, 0], sizes = [8, 96], strides = [1, 1]} : vector<8x128xf32> to vector<8x96xf32>
    %802 = arith.negf %801 : vector<8x96xf32>
    %803 = math.exp %802 : vector<8x96xf32>
    %cst_158 = arith.constant 1.000000e+00 : f32
    %804 = vector.broadcast %cst_158 : f32 to vector<8x96xf32>
    %805 = arith.addf %804, %803 : vector<8x96xf32>
    %806 = arith.divf %804, %805 : vector<8x96xf32>
    %807 = vector.extract_strided_slice %797 {offsets = [0, 96], sizes = [8, 32], strides = [1, 1]} : vector<8x128xf32> to vector<8x32xf32>
    %808 = math.tanh %807 : vector<8x32xf32>
    %809 = vector.extract_strided_slice %800 {offsets = [0, 0], sizes = [8, 96], strides = [1, 1]} : vector<8x128xf32> to vector<8x96xf32>
    %810 = arith.negf %809 : vector<8x96xf32>
    %811 = math.exp %810 : vector<8x96xf32>
    %cst_159 = arith.constant 1.000000e+00 : f32
    %812 = vector.broadcast %cst_159 : f32 to vector<8x96xf32>
    %813 = arith.addf %812, %811 : vector<8x96xf32>
    %814 = arith.divf %812, %813 : vector<8x96xf32>
    %815 = vector.extract_strided_slice %800 {offsets = [0, 96], sizes = [8, 32], strides = [1, 1]} : vector<8x128xf32> to vector<8x32xf32>
    %816 = math.tanh %815 : vector<8x32xf32>
    %817 = vector.extract_strided_slice %806 {offsets = [0, 32], sizes = [8, 32], strides = [1, 1]} : vector<8x96xf32> to vector<8x32xf32>
    %818 = arith.mulf %817, %778 : vector<8x32xf32>
    %819 = vector.extract_strided_slice %806 {offsets = [0, 0], sizes = [8, 32], strides = [1, 1]} : vector<8x96xf32> to vector<8x32xf32>
    %820 = arith.mulf %819, %808 : vector<8x32xf32>
    %821 = arith.addf %818, %820 : vector<8x32xf32>
    %822 = vector.extract_strided_slice %814 {offsets = [0, 32], sizes = [8, 32], strides = [1, 1]} : vector<8x96xf32> to vector<8x32xf32>
    %823 = arith.mulf %822, %783 : vector<8x32xf32>
    %824 = vector.extract_strided_slice %814 {offsets = [0, 0], sizes = [8, 32], strides = [1, 1]} : vector<8x96xf32> to vector<8x32xf32>
    %825 = arith.mulf %824, %816 : vector<8x32xf32>
    %826 = arith.addf %823, %825 : vector<8x32xf32>
    %827 = vector.extract_strided_slice %806 {offsets = [0, 64], sizes = [8, 32], strides = [1, 1]} : vector<8x96xf32> to vector<8x32xf32>
    %828 = math.tanh %821 : vector<8x32xf32>
    %829 = arith.mulf %827, %828 : vector<8x32xf32>
    %830 = vector.extract_strided_slice %814 {offsets = [0, 64], sizes = [8, 32], strides = [1, 1]} : vector<8x96xf32> to vector<8x32xf32>
    %831 = math.tanh %826 : vector<8x32xf32>
    %832 = arith.mulf %830, %831 : vector<8x32xf32>
    %833 = tpu.concatenate %829, %832 in 1 : vector<8x32xf32>, vector<8x32xf32> -> vector<8x64xf32>
    %c16_160 = arith.constant 16 : index
    %c0_161 = arith.constant 0 : index
    %834 = vector.load %arg15[%c16_160, %c0_161] : memref<64x64xf32, #tpu.memory_space<vmem>>, vector<8x32xf32>
    tpu.vector_store %arg15[%c16_160, %c0_161], %829 {strides = array<i32>} : memref<64x64xf32, #tpu.memory_space<vmem>>, vector<8x32xf32>,
    %c40_162 = arith.constant 40 : index
    %c32_163 = arith.constant 32 : index
    %835 = vector.load %arg15[%c40_162, %c32_163] : memref<64x64xf32, #tpu.memory_space<vmem>>, vector<8x32xf32>
    tpu.vector_store %arg15[%c40_162, %c32_163], %832 {strides = array<i32>} : memref<64x64xf32, #tpu.memory_space<vmem>>, vector<8x32xf32>,
    %836 = arith.truncf %833 : vector<8x64xf32> to vector<8x64xbf16>
    %cst_164 = arith.constant dense<0.000000e+00> : vector<8x256xf32>
    %837 = tpu.matmul %836, %710, %cst_164 {dimension_numbers = #tpu.dot_dimension_numbers<[1], [0], [0], [1], [0, 0, 1, 1], [], []>} : vector<8x64xbf16>, vector<64x256xbf16>, vector<8x256xf32> -> vector<8x256xf32>
    %838 = vector.extract_strided_slice %837 {offsets = [0, 0], sizes = [8, 128], strides = [1, 1]} : vector<8x256xf32> to vector<8x128xf32>
    %839 = vector.extract_strided_slice %708 {offsets = [24, 0], sizes = [8, 128], strides = [1, 1]} : vector<64x256xf32> to vector<8x128xf32>
    %840 = arith.addf %838, %839 : vector<8x128xf32>
    %841 = vector.extract_strided_slice %837 {offsets = [0, 128], sizes = [8, 128], strides = [1, 1]} : vector<8x256xf32> to vector<8x128xf32>
    %842 = vector.extract_strided_slice %708 {offsets = [32, 128], sizes = [8, 128], strides = [1, 1]} : vector<64x256xf32> to vector<8x128xf32>
    %843 = arith.addf %841, %842 : vector<8x128xf32>
    %844 = vector.extract_strided_slice %840 {offsets = [0, 0], sizes = [8, 96], strides = [1, 1]} : vector<8x128xf32> to vector<8x96xf32>
    %845 = arith.negf %844 : vector<8x96xf32>
    %846 = math.exp %845 : vector<8x96xf32>
    %cst_165 = arith.constant 1.000000e+00 : f32
    %847 = vector.broadcast %cst_165 : f32 to vector<8x96xf32>
    %848 = arith.addf %847, %846 : vector<8x96xf32>
    %849 = arith.divf %847, %848 : vector<8x96xf32>
    %850 = vector.extract_strided_slice %840 {offsets = [0, 96], sizes = [8, 32], strides = [1, 1]} : vector<8x128xf32> to vector<8x32xf32>
    %851 = math.tanh %850 : vector<8x32xf32>
    %852 = vector.extract_strided_slice %843 {offsets = [0, 0], sizes = [8, 96], strides = [1, 1]} : vector<8x128xf32> to vector<8x96xf32>
    %853 = arith.negf %852 : vector<8x96xf32>
    %854 = math.exp %853 : vector<8x96xf32>
    %cst_166 = arith.constant 1.000000e+00 : f32
    %855 = vector.broadcast %cst_166 : f32 to vector<8x96xf32>
    %856 = arith.addf %855, %854 : vector<8x96xf32>
    %857 = arith.divf %855, %856 : vector<8x96xf32>
    %858 = vector.extract_strided_slice %843 {offsets = [0, 96], sizes = [8, 32], strides = [1, 1]} : vector<8x128xf32> to vector<8x32xf32>
    %859 = math.tanh %858 : vector<8x32xf32>
    %860 = vector.extract_strided_slice %849 {offsets = [0, 32], sizes = [8, 32], strides = [1, 1]} : vector<8x96xf32> to vector<8x32xf32>
    %861 = arith.mulf %860, %821 : vector<8x32xf32>
    %862 = vector.extract_strided_slice %849 {offsets = [0, 0], sizes = [8, 32], strides = [1, 1]} : vector<8x96xf32> to vector<8x32xf32>
    %863 = arith.mulf %862, %851 : vector<8x32xf32>
    %864 = arith.addf %861, %863 : vector<8x32xf32>
    %865 = vector.extract_strided_slice %857 {offsets = [0, 32], sizes = [8, 32], strides = [1, 1]} : vector<8x96xf32> to vector<8x32xf32>
    %866 = arith.mulf %865, %826 : vector<8x32xf32>
    %867 = vector.extract_strided_slice %857 {offsets = [0, 0], sizes = [8, 32], strides = [1, 1]} : vector<8x96xf32> to vector<8x32xf32>
    %868 = arith.mulf %867, %859 : vector<8x32xf32>
    %869 = arith.addf %866, %868 : vector<8x32xf32>
    %870 = vector.extract_strided_slice %849 {offsets = [0, 64], sizes = [8, 32], strides = [1, 1]} : vector<8x96xf32> to vector<8x32xf32>
    %871 = math.tanh %864 : vector<8x32xf32>
    %872 = arith.mulf %870, %871 : vector<8x32xf32>
    %873 = vector.extract_strided_slice %857 {offsets = [0, 64], sizes = [8, 32], strides = [1, 1]} : vector<8x96xf32> to vector<8x32xf32>
    %874 = math.tanh %869 : vector<8x32xf32>
    %875 = arith.mulf %873, %874 : vector<8x32xf32>
    %876 = tpu.concatenate %872, %875 in 1 : vector<8x32xf32>, vector<8x32xf32> -> vector<8x64xf32>
    %c24_167 = arith.constant 24 : index
    %c0_168 = arith.constant 0 : index
    %877 = vector.load %arg15[%c24_167, %c0_168] : memref<64x64xf32, #tpu.memory_space<vmem>>, vector<8x32xf32>
    tpu.vector_store %arg15[%c24_167, %c0_168], %872 {strides = array<i32>} : memref<64x64xf32, #tpu.memory_space<vmem>>, vector<8x32xf32>,
    %c32_169 = arith.constant 32 : index
    %c32_170 = arith.constant 32 : index
    %878 = vector.load %arg15[%c32_169, %c32_170] : memref<64x64xf32, #tpu.memory_space<vmem>>, vector<8x32xf32>
    tpu.vector_store %arg15[%c32_169, %c32_170], %875 {strides = array<i32>} : memref<64x64xf32, #tpu.memory_space<vmem>>, vector<8x32xf32>,
    %879 = arith.truncf %876 : vector<8x64xf32> to vector<8x64xbf16>
    %cst_171 = arith.constant dense<0.000000e+00> : vector<8x256xf32>
    %880 = tpu.matmul %879, %710, %cst_171 {dimension_numbers = #tpu.dot_dimension_numbers<[1], [0], [0], [1], [0, 0, 1, 1], [], []>} : vector<8x64xbf16>, vector<64x256xbf16>, vector<8x256xf32> -> vector<8x256xf32>
    %881 = vector.extract_strided_slice %880 {offsets = [0, 0], sizes = [8, 128], strides = [1, 1]} : vector<8x256xf32> to vector<8x128xf32>
    %882 = vector.extract_strided_slice %708 {offsets = [32, 0], sizes = [8, 128], strides = [1, 1]} : vector<64x256xf32> to vector<8x128xf32>
    %883 = arith.addf %881, %882 : vector<8x128xf32>
    %884 = vector.extract_strided_slice %880 {offsets = [0, 128], sizes = [8, 128], strides = [1, 1]} : vector<8x256xf32> to vector<8x128xf32>
    %885 = vector.extract_strided_slice %708 {offsets = [24, 128], sizes = [8, 128], strides = [1, 1]} : vector<64x256xf32> to vector<8x128xf32>
    %886 = arith.addf %884, %885 : vector<8x128xf32>
    %887 = vector.extract_strided_slice %883 {offsets = [0, 0], sizes = [8, 96], strides = [1, 1]} : vector<8x128xf32> to vector<8x96xf32>
    %888 = arith.negf %887 : vector<8x96xf32>
    %889 = math.exp %888 : vector<8x96xf32>
    %cst_172 = arith.constant 1.000000e+00 : f32
    %890 = vector.broadcast %cst_172 : f32 to vector<8x96xf32>
    %891 = arith.addf %890, %889 : vector<8x96xf32>
    %892 = arith.divf %890, %891 : vector<8x96xf32>
    %893 = vector.extract_strided_slice %883 {offsets = [0, 96], sizes = [8, 32], strides = [1, 1]} : vector<8x128xf32> to vector<8x32xf32>
    %894 = math.tanh %893 : vector<8x32xf32>
    %895 = vector.extract_strided_slice %886 {offsets = [0, 0], sizes = [8, 96], strides = [1, 1]} : vector<8x128xf32> to vector<8x96xf32>
    %896 = arith.negf %895 : vector<8x96xf32>
    %897 = math.exp %896 : vector<8x96xf32>
    %cst_173 = arith.constant 1.000000e+00 : f32
    %898 = vector.broadcast %cst_173 : f32 to vector<8x96xf32>
    %899 = arith.addf %898, %897 : vector<8x96xf32>
    %900 = arith.divf %898, %899 : vector<8x96xf32>
    %901 = vector.extract_strided_slice %886 {offsets = [0, 96], sizes = [8, 32], strides = [1, 1]} : vector<8x128xf32> to vector<8x32xf32>
    %902 = math.tanh %901 : vector<8x32xf32>
    %903 = vector.extract_strided_slice %892 {offsets = [0, 32], sizes = [8, 32], strides = [1, 1]} : vector<8x96xf32> to vector<8x32xf32>
    %904 = arith.mulf %903, %864 : vector<8x32xf32>
    %905 = vector.extract_strided_slice %892 {offsets = [0, 0], sizes = [8, 32], strides = [1, 1]} : vector<8x96xf32> to vector<8x32xf32>
    %906 = arith.mulf %905, %894 : vector<8x32xf32>
    %907 = arith.addf %904, %906 : vector<8x32xf32>
    %908 = vector.extract_strided_slice %900 {offsets = [0, 32], sizes = [8, 32], strides = [1, 1]} : vector<8x96xf32> to vector<8x32xf32>
    %909 = arith.mulf %908, %869 : vector<8x32xf32>
    %910 = vector.extract_strided_slice %900 {offsets = [0, 0], sizes = [8, 32], strides = [1, 1]} : vector<8x96xf32> to vector<8x32xf32>
    %911 = arith.mulf %910, %902 : vector<8x32xf32>
    %912 = arith.addf %909, %911 : vector<8x32xf32>
    %913 = vector.extract_strided_slice %892 {offsets = [0, 64], sizes = [8, 32], strides = [1, 1]} : vector<8x96xf32> to vector<8x32xf32>
    %914 = math.tanh %907 : vector<8x32xf32>
    %915 = arith.mulf %913, %914 : vector<8x32xf32>
    %916 = vector.extract_strided_slice %900 {offsets = [0, 64], sizes = [8, 32], strides = [1, 1]} : vector<8x96xf32> to vector<8x32xf32>
    %917 = math.tanh %912 : vector<8x32xf32>
    %918 = arith.mulf %916, %917 : vector<8x32xf32>
    %919 = tpu.concatenate %915, %918 in 1 : vector<8x32xf32>, vector<8x32xf32> -> vector<8x64xf32>
    %c32_174 = arith.constant 32 : index
    %c0_175 = arith.constant 0 : index
    %920 = vector.load %arg15[%c32_174, %c0_175] : memref<64x64xf32, #tpu.memory_space<vmem>>, vector<8x32xf32>
    tpu.vector_store %arg15[%c32_174, %c0_175], %915 {strides = array<i32>} : memref<64x64xf32, #tpu.memory_space<vmem>>, vector<8x32xf32>,
    %c24_176 = arith.constant 24 : index
    %c32_177 = arith.constant 32 : index
    %921 = vector.load %arg15[%c24_176, %c32_177] : memref<64x64xf32, #tpu.memory_space<vmem>>, vector<8x32xf32>
    tpu.vector_store %arg15[%c24_176, %c32_177], %918 {strides = array<i32>} : memref<64x64xf32, #tpu.memory_space<vmem>>, vector<8x32xf32>,
    %922 = arith.truncf %919 : vector<8x64xf32> to vector<8x64xbf16>
    %cst_178 = arith.constant dense<0.000000e+00> : vector<8x256xf32>
    %923 = tpu.matmul %922, %710, %cst_178 {dimension_numbers = #tpu.dot_dimension_numbers<[1], [0], [0], [1], [0, 0, 1, 1], [], []>} : vector<8x64xbf16>, vector<64x256xbf16>, vector<8x256xf32> -> vector<8x256xf32>
    %924 = vector.extract_strided_slice %923 {offsets = [0, 0], sizes = [8, 128], strides = [1, 1]} : vector<8x256xf32> to vector<8x128xf32>
    %925 = vector.extract_strided_slice %708 {offsets = [40, 0], sizes = [8, 128], strides = [1, 1]} : vector<64x256xf32> to vector<8x128xf32>
    %926 = arith.addf %924, %925 : vector<8x128xf32>
    %927 = vector.extract_strided_slice %923 {offsets = [0, 128], sizes = [8, 128], strides = [1, 1]} : vector<8x256xf32> to vector<8x128xf32>
    %928 = vector.extract_strided_slice %708 {offsets = [16, 128], sizes = [8, 128], strides = [1, 1]} : vector<64x256xf32> to vector<8x128xf32>
    %929 = arith.addf %927, %928 : vector<8x128xf32>
    %930 = vector.extract_strided_slice %926 {offsets = [0, 0], sizes = [8, 96], strides = [1, 1]} : vector<8x128xf32> to vector<8x96xf32>
    %931 = arith.negf %930 : vector<8x96xf32>
    %932 = math.exp %931 : vector<8x96xf32>
    %cst_179 = arith.constant 1.000000e+00 : f32
    %933 = vector.broadcast %cst_179 : f32 to vector<8x96xf32>
    %934 = arith.addf %933, %932 : vector<8x96xf32>
    %935 = arith.divf %933, %934 : vector<8x96xf32>
    %936 = vector.extract_strided_slice %926 {offsets = [0, 96], sizes = [8, 32], strides = [1, 1]} : vector<8x128xf32> to vector<8x32xf32>
    %937 = math.tanh %936 : vector<8x32xf32>
    %938 = vector.extract_strided_slice %929 {offsets = [0, 0], sizes = [8, 96], strides = [1, 1]} : vector<8x128xf32> to vector<8x96xf32>
    %939 = arith.negf %938 : vector<8x96xf32>
    %940 = math.exp %939 : vector<8x96xf32>
    %cst_180 = arith.constant 1.000000e+00 : f32
    %941 = vector.broadcast %cst_180 : f32 to vector<8x96xf32>
    %942 = arith.addf %941, %940 : vector<8x96xf32>
    %943 = arith.divf %941, %942 : vector<8x96xf32>
    %944 = vector.extract_strided_slice %929 {offsets = [0, 96], sizes = [8, 32], strides = [1, 1]} : vector<8x128xf32> to vector<8x32xf32>
    %945 = math.tanh %944 : vector<8x32xf32>
    %946 = vector.extract_strided_slice %935 {offsets = [0, 32], sizes = [8, 32], strides = [1, 1]} : vector<8x96xf32> to vector<8x32xf32>
    %947 = arith.mulf %946, %907 : vector<8x32xf32>
    %948 = vector.extract_strided_slice %935 {offsets = [0, 0], sizes = [8, 32], strides = [1, 1]} : vector<8x96xf32> to vector<8x32xf32>
    %949 = arith.mulf %948, %937 : vector<8x32xf32>
    %950 = arith.addf %947, %949 : vector<8x32xf32>
    %951 = vector.extract_strided_slice %943 {offsets = [0, 32], sizes = [8, 32], strides = [1, 1]} : vector<8x96xf32> to vector<8x32xf32>
    %952 = arith.mulf %951, %912 : vector<8x32xf32>
    %953 = vector.extract_strided_slice %943 {offsets = [0, 0], sizes = [8, 32], strides = [1, 1]} : vector<8x96xf32> to vector<8x32xf32>
    %954 = arith.mulf %953, %945 : vector<8x32xf32>
    %955 = arith.addf %952, %954 : vector<8x32xf32>
    %956 = vector.extract_strided_slice %935 {offsets = [0, 64], sizes = [8, 32], strides = [1, 1]} : vector<8x96xf32> to vector<8x32xf32>
    %957 = math.tanh %950 : vector<8x32xf32>
    %958 = arith.mulf %956, %957 : vector<8x32xf32>
    %959 = vector.extract_strided_slice %943 {offsets = [0, 64], sizes = [8, 32], strides = [1, 1]} : vector<8x96xf32> to vector<8x32xf32>
    %960 = math.tanh %955 : vector<8x32xf32>
    %961 = arith.mulf %959, %960 : vector<8x32xf32>
    %962 = tpu.concatenate %958, %961 in 1 : vector<8x32xf32>, vector<8x32xf32> -> vector<8x64xf32>
    %c40_181 = arith.constant 40 : index
    %c0_182 = arith.constant 0 : index
    %963 = vector.load %arg15[%c40_181, %c0_182] : memref<64x64xf32, #tpu.memory_space<vmem>>, vector<8x32xf32>
    tpu.vector_store %arg15[%c40_181, %c0_182], %958 {strides = array<i32>} : memref<64x64xf32, #tpu.memory_space<vmem>>, vector<8x32xf32>,
    %c16_183 = arith.constant 16 : index
    %c32_184 = arith.constant 32 : index
    %964 = vector.load %arg15[%c16_183, %c32_184] : memref<64x64xf32, #tpu.memory_space<vmem>>, vector<8x32xf32>
    tpu.vector_store %arg15[%c16_183, %c32_184], %961 {strides = array<i32>} : memref<64x64xf32, #tpu.memory_space<vmem>>, vector<8x32xf32>,
    %965 = arith.truncf %962 : vector<8x64xf32> to vector<8x64xbf16>
    %cst_185 = arith.constant dense<0.000000e+00> : vector<8x256xf32>
    %966 = tpu.matmul %965, %710, %cst_185 {dimension_numbers = #tpu.dot_dimension_numbers<[1], [0], [0], [1], [0, 0, 1, 1], [], []>} : vector<8x64xbf16>, vector<64x256xbf16>, vector<8x256xf32> -> vector<8x256xf32>
    %967 = vector.extract_strided_slice %966 {offsets = [0, 0], sizes = [8, 128], strides = [1, 1]} : vector<8x256xf32> to vector<8x128xf32>
    %968 = vector.extract_strided_slice %708 {offsets = [48, 0], sizes = [8, 128], strides = [1, 1]} : vector<64x256xf32> to vector<8x128xf32>
    %969 = arith.addf %967, %968 : vector<8x128xf32>
    %970 = vector.extract_strided_slice %966 {offsets = [0, 128], sizes = [8, 128], strides = [1, 1]} : vector<8x256xf32> to vector<8x128xf32>
    %971 = vector.extract_strided_slice %708 {offsets = [8, 128], sizes = [8, 128], strides = [1, 1]} : vector<64x256xf32> to vector<8x128xf32>
    %972 = arith.addf %970, %971 : vector<8x128xf32>
    %973 = vector.extract_strided_slice %969 {offsets = [0, 0], sizes = [8, 96], strides = [1, 1]} : vector<8x128xf32> to vector<8x96xf32>
    %974 = arith.negf %973 : vector<8x96xf32>
    %975 = math.exp %974 : vector<8x96xf32>
    %cst_186 = arith.constant 1.000000e+00 : f32
    %976 = vector.broadcast %cst_186 : f32 to vector<8x96xf32>
    %977 = arith.addf %976, %975 : vector<8x96xf32>
    %978 = arith.divf %976, %977 : vector<8x96xf32>
    %979 = vector.extract_strided_slice %969 {offsets = [0, 96], sizes = [8, 32], strides = [1, 1]} : vector<8x128xf32> to vector<8x32xf32>
    %980 = math.tanh %979 : vector<8x32xf32>
    %981 = vector.extract_strided_slice %972 {offsets = [0, 0], sizes = [8, 96], strides = [1, 1]} : vector<8x128xf32> to vector<8x96xf32>
    %982 = arith.negf %981 : vector<8x96xf32>
    %983 = math.exp %982 : vector<8x96xf32>
    %cst_187 = arith.constant 1.000000e+00 : f32
    %984 = vector.broadcast %cst_187 : f32 to vector<8x96xf32>
    %985 = arith.addf %984, %983 : vector<8x96xf32>
    %986 = arith.divf %984, %985 : vector<8x96xf32>
    %987 = vector.extract_strided_slice %972 {offsets = [0, 96], sizes = [8, 32], strides = [1, 1]} : vector<8x128xf32> to vector<8x32xf32>
    %988 = math.tanh %987 : vector<8x32xf32>
    %989 = vector.extract_strided_slice %978 {offsets = [0, 32], sizes = [8, 32], strides = [1, 1]} : vector<8x96xf32> to vector<8x32xf32>
    %990 = arith.mulf %989, %950 : vector<8x32xf32>
    %991 = vector.extract_strided_slice %978 {offsets = [0, 0], sizes = [8, 32], strides = [1, 1]} : vector<8x96xf32> to vector<8x32xf32>
    %992 = arith.mulf %991, %980 : vector<8x32xf32>
    %993 = arith.addf %990, %992 : vector<8x32xf32>
    %994 = vector.extract_strided_slice %986 {offsets = [0, 32], sizes = [8, 32], strides = [1, 1]} : vector<8x96xf32> to vector<8x32xf32>
    %995 = arith.mulf %994, %955 : vector<8x32xf32>
    %996 = vector.extract_strided_slice %986 {offsets = [0, 0], sizes = [8, 32], strides = [1, 1]} : vector<8x96xf32> to vector<8x32xf32>
    %997 = arith.mulf %996, %988 : vector<8x32xf32>
    %998 = arith.addf %995, %997 : vector<8x32xf32>
    %999 = vector.extract_strided_slice %978 {offsets = [0, 64], sizes = [8, 32], strides = [1, 1]} : vector<8x96xf32> to vector<8x32xf32>
    %1000 = math.tanh %993 : vector<8x32xf32>
    %1001 = arith.mulf %999, %1000 : vector<8x32xf32>
    %1002 = vector.extract_strided_slice %986 {offsets = [0, 64], sizes = [8, 32], strides = [1, 1]} : vector<8x96xf32> to vector<8x32xf32>
    %1003 = math.tanh %998 : vector<8x32xf32>
    %1004 = arith.mulf %1002, %1003 : vector<8x32xf32>
    %1005 = tpu.concatenate %1001, %1004 in 1 : vector<8x32xf32>, vector<8x32xf32> -> vector<8x64xf32>
    %c48_188 = arith.constant 48 : index
    %c0_189 = arith.constant 0 : index
    %1006 = vector.load %arg15[%c48_188, %c0_189] : memref<64x64xf32, #tpu.memory_space<vmem>>, vector<8x32xf32>
    tpu.vector_store %arg15[%c48_188, %c0_189], %1001 {strides = array<i32>} : memref<64x64xf32, #tpu.memory_space<vmem>>, vector<8x32xf32>,
    %c8_190 = arith.constant 8 : index
    %c32_191 = arith.constant 32 : index
    %1007 = vector.load %arg15[%c8_190, %c32_191] : memref<64x64xf32, #tpu.memory_space<vmem>>, vector<8x32xf32>
    tpu.vector_store %arg15[%c8_190, %c32_191], %1004 {strides = array<i32>} : memref<64x64xf32, #tpu.memory_space<vmem>>, vector<8x32xf32>,
    %1008 = arith.truncf %1005 : vector<8x64xf32> to vector<8x64xbf16>
    %cst_192 = arith.constant dense<0.000000e+00> : vector<8x256xf32>
    %1009 = tpu.matmul %1008, %710, %cst_192 {dimension_numbers = #tpu.dot_dimension_numbers<[1], [0], [0], [1], [0, 0, 1, 1], [], []>} : vector<8x64xbf16>, vector<64x256xbf16>, vector<8x256xf32> -> vector<8x256xf32>
    %1010 = vector.extract_strided_slice %1009 {offsets = [0, 0], sizes = [8, 128], strides = [1, 1]} : vector<8x256xf32> to vector<8x128xf32>
    %1011 = vector.extract_strided_slice %708 {offsets = [56, 0], sizes = [8, 128], strides = [1, 1]} : vector<64x256xf32> to vector<8x128xf32>
    %1012 = arith.addf %1010, %1011 : vector<8x128xf32>
    %1013 = vector.extract_strided_slice %1009 {offsets = [0, 128], sizes = [8, 128], strides = [1, 1]} : vector<8x256xf32> to vector<8x128xf32>
    %1014 = vector.extract_strided_slice %708 {offsets = [0, 128], sizes = [8, 128], strides = [1, 1]} : vector<64x256xf32> to vector<8x128xf32>
    %1015 = arith.addf %1013, %1014 : vector<8x128xf32>
    %1016 = vector.extract_strided_slice %1012 {offsets = [0, 0], sizes = [8, 96], strides = [1, 1]} : vector<8x128xf32> to vector<8x96xf32>
    %1017 = arith.negf %1016 : vector<8x96xf32>
    %1018 = math.exp %1017 : vector<8x96xf32>
    %cst_193 = arith.constant 1.000000e+00 : f32
    %1019 = vector.broadcast %cst_193 : f32 to vector<8x96xf32>
    %1020 = arith.addf %1019, %1018 : vector<8x96xf32>
    %1021 = arith.divf %1019, %1020 : vector<8x96xf32>
    %1022 = vector.extract_strided_slice %1012 {offsets = [0, 96], sizes = [8, 32], strides = [1, 1]} : vector<8x128xf32> to vector<8x32xf32>
    %1023 = math.tanh %1022 : vector<8x32xf32>
    %1024 = vector.extract_strided_slice %1015 {offsets = [0, 0], sizes = [8, 96], strides = [1, 1]} : vector<8x128xf32> to vector<8x96xf32>
    %1025 = arith.negf %1024 : vector<8x96xf32>
    %1026 = math.exp %1025 : vector<8x96xf32>
    %cst_194 = arith.constant 1.000000e+00 : f32
    %1027 = vector.broadcast %cst_194 : f32 to vector<8x96xf32>
    %1028 = arith.addf %1027, %1026 : vector<8x96xf32>
    %1029 = arith.divf %1027, %1028 : vector<8x96xf32>
    %1030 = vector.extract_strided_slice %1015 {offsets = [0, 96], sizes = [8, 32], strides = [1, 1]} : vector<8x128xf32> to vector<8x32xf32>
    %1031 = math.tanh %1030 : vector<8x32xf32>
    %1032 = vector.extract_strided_slice %1021 {offsets = [0, 32], sizes = [8, 32], strides = [1, 1]} : vector<8x96xf32> to vector<8x32xf32>
    %1033 = arith.mulf %1032, %993 : vector<8x32xf32>
    %1034 = vector.extract_strided_slice %1021 {offsets = [0, 0], sizes = [8, 32], strides = [1, 1]} : vector<8x96xf32> to vector<8x32xf32>
    %1035 = arith.mulf %1034, %1023 : vector<8x32xf32>
    %1036 = arith.addf %1033, %1035 : vector<8x32xf32>
    %1037 = vector.extract_strided_slice %1029 {offsets = [0, 32], sizes = [8, 32], strides = [1, 1]} : vector<8x96xf32> to vector<8x32xf32>
    %1038 = arith.mulf %1037, %998 : vector<8x32xf32>
    %1039 = vector.extract_strided_slice %1029 {offsets = [0, 0], sizes = [8, 32], strides = [1, 1]} : vector<8x96xf32> to vector<8x32xf32>
    %1040 = arith.mulf %1039, %1031 : vector<8x32xf32>
    %1041 = arith.addf %1038, %1040 : vector<8x32xf32>
    %1042 = vector.extract_strided_slice %1021 {offsets = [0, 64], sizes = [8, 32], strides = [1, 1]} : vector<8x96xf32> to vector<8x32xf32>
    %1043 = math.tanh %1036 : vector<8x32xf32>
    %1044 = arith.mulf %1042, %1043 : vector<8x32xf32>
    %1045 = vector.extract_strided_slice %1029 {offsets = [0, 64], sizes = [8, 32], strides = [1, 1]} : vector<8x96xf32> to vector<8x32xf32>
    %1046 = math.tanh %1041 : vector<8x32xf32>
    %1047 = arith.mulf %1045, %1046 : vector<8x32xf32>
    %c56_195 = arith.constant 56 : index
    %c0_196 = arith.constant 0 : index
    %1048 = vector.load %arg15[%c56_195, %c0_196] : memref<64x64xf32, #tpu.memory_space<vmem>>, vector<8x32xf32>
    tpu.vector_store %arg15[%c56_195, %c0_196], %1044 {strides = array<i32>} : memref<64x64xf32, #tpu.memory_space<vmem>>, vector<8x32xf32>,
    %c0_197 = arith.constant 0 : index
    %c32_198 = arith.constant 32 : index
    %1049 = vector.load %arg15[%c0_197, %c32_198] : memref<64x64xf32, #tpu.memory_space<vmem>>, vector<8x32xf32>
    tpu.vector_store %arg15[%c0_197, %c32_198], %1047 {strides = array<i32>} : memref<64x64xf32, #tpu.memory_space<vmem>>, vector<8x32xf32>,
    %c0_199 = arith.constant 0 : index
    %c0_200 = arith.constant 0 : index
    %1050 = vector.load %arg15[%c0_199, %c0_200] : memref<64x64xf32, #tpu.memory_space<vmem>>, vector<64x64xf32>
    %1051 = arith.truncf %1050 : vector<64x64xf32> to vector<64x64xbf16>
    %c0_201 = arith.constant 0 : index
    %c0_202 = arith.constant 0 : index
    %1052 = vector.load %arg13[%c0_201, %c0_202] : memref<48x64xbf16, #tpu.memory_space<vmem>>, vector<48x64xbf16>
    %cst_203 = arith.constant dense<0.000000e+00> : vector<48x64xf32>
    %1053 = tpu.matmul %1052, %1051, %cst_203 {dimension_numbers = #tpu.dot_dimension_numbers<[1], [0], [0], [1], [0, 0, 1, 1], [], []>} : vector<48x64xbf16>, vector<64x64xbf16>, vector<48x64xf32> -> vector<48x64xf32>
    %1054 = arith.truncf %1053 : vector<48x64xf32> to vector<48x64xbf16>
    %c0_204 = arith.constant 0 : index
    %c0_205 = arith.constant 0 : index
    %c0_206 = arith.constant 0 : index
    %1055 = vector.load %arg11[%c0_204, %c0_205, %c0_206] : memref<1x64x64xbf16, #tpu.memory_space<vmem>>, vector<1x64x64xbf16>
    %1056 = vector.shape_cast %1055 : vector<1x64x64xbf16> to vector<64x64xbf16>
    %cst_207 = arith.constant dense<0.000000e+00> : vector<48x64xf32>
    %1057 = tpu.matmul %1054, %1056, %cst_207 {dimension_numbers = #tpu.dot_dimension_numbers<[1], [0], [0], [1], [0, 0, 1, 1], [], []>} : vector<48x64xbf16>, vector<64x64xbf16>, vector<48x64xf32> -> vector<48x64xf32>
    %c0_208 = arith.constant 0 : index
    %c0_209 = arith.constant 0 : index
    %c0_210 = arith.constant 0 : index
    %1058 = vector.load %arg12[%c0_208, %c0_209, %c0_210] : memref<1x1x64xf32, #tpu.memory_space<vmem>>, vector<1x1x64xf32>
    %1059 = vector.shape_cast %1058 : vector<1x1x64xf32> to vector<1x64xf32>
    %1060 = vector.broadcast %1059 : vector<1x64xf32> to vector<48x64xf32>
    %1061 = arith.addf %1057, %1060 : vector<48x64xf32>
    %1062 = math.tanh %1061 : vector<48x64xf32>
    %1063 = vector.extract_strided_slice %1053 {offsets = [0, 0], sizes = [8, 64], strides = [1, 1]} : vector<48x64xf32> to vector<8x64xf32>
    %1064 = vector.extract_strided_slice %1062 {offsets = [16, 0], sizes = [8, 64], strides = [1, 1]} : vector<48x64xf32> to vector<8x64xf32>
    %1065 = arith.truncf %1063 : vector<8x64xf32> to vector<8x64xbf16>
    %1066 = arith.truncf %1064 : vector<8x64xf32> to vector<8x64xbf16>
    %cst_211 = arith.constant dense<0.000000e+00> : vector<8x8xf32>
    %1067 = tpu.matmul %1065, %1066, %cst_211 {dimension_numbers = #tpu.dot_dimension_numbers<[1], [1], [0], [0], [0, 0, 1, 0], [], []>} : vector<8x64xbf16>, vector<8x64xbf16>, vector<8x8xf32> -> vector<8x8xf32>
    %cst_212 = arith.constant dense<0xFF800000> : vector<8xf32>
    %1068 = vector.multi_reduction <maximumf>, %1067, %cst_212 [1] : vector<8x8xf32> to vector<8xf32>
    %1069 = vector.shape_cast %1068 : vector<8xf32> to vector<8x1xf32>
    %cst_213 = arith.constant dense<0xFF800000> : vector<1xf32>
    %1070 = vector.multi_reduction <maximumf>, %1069, %cst_213 [0] : vector<8x1xf32> to vector<1xf32>
    %1071 = vector.shape_cast %1070 : vector<1xf32> to vector<1x1xf32>
    %1072 = vector.broadcast %1071 : vector<1x1xf32> to vector<8x8xf32>
    %1073 = arith.subf %1067, %1072 : vector<8x8xf32>
    %1074 = math.exp %1073 : vector<8x8xf32>
    %cst_214 = arith.constant dense<0.000000e+00> : vector<8xf32>
    %1075 = vector.multi_reduction <add>, %1074, %cst_214 [1] : vector<8x8xf32> to vector<8xf32>
    %1076 = vector.shape_cast %1075 : vector<8xf32> to vector<8x1xf32>
    %1077 = tpu.reciprocal %1076 {approx = true} : vector<8x1xf32> -> vector<8x1xf32>
    %cst_215 = arith.constant dense<0.000000e+00> : vector<8xf32>
    %1078 = vector.multi_reduction <add>, %1074, %cst_215 [0] : vector<8x8xf32> to vector<8xf32>
    %1079 = vector.shape_cast %1078 : vector<8xf32> to vector<1x8xf32>
    %1080 = tpu.reciprocal %1079 {approx = true} : vector<1x8xf32> -> vector<1x8xf32>
    %1081 = vector.broadcast %1077 : vector<8x1xf32> to vector<8x8xf32>
    %1082 = arith.mulf %1074, %1081 : vector<8x8xf32>
    %1083 = vector.broadcast %1080 : vector<1x8xf32> to vector<8x8xf32>
    %1084 = arith.mulf %1074, %1083 : vector<8x8xf32>
    %1085 = arith.truncf %1082 : vector<8x8xf32> to vector<8x8xbf16>
    %1086 = arith.truncf %1063 : vector<8x64xf32> to vector<8x64xbf16>
    %cst_216 = arith.constant dense<0.000000e+00> : vector<8x64xf32>
    %1087 = tpu.matmul %1085, %1086, %cst_216 {dimension_numbers = #tpu.dot_dimension_numbers<[1], [0], [0], [1], [0, 0, 1, 1], [], []>} : vector<8x8xbf16>, vector<8x64xbf16>, vector<8x64xf32> -> vector<8x64xf32>
    %1088 = tpu.transpose %1084, [1, 0] : vector<8x8xf32> -> vector<8x8xf32>
    %1089 = arith.truncf %1088 : vector<8x8xf32> to vector<8x8xbf16>
    %1090 = arith.truncf %1087 : vector<8x64xf32> to vector<8x64xbf16>
    %cst_217 = arith.constant dense<0.000000e+00> : vector<8x64xf32>
    %1091 = tpu.matmul %1089, %1090, %cst_217 {dimension_numbers = #tpu.dot_dimension_numbers<[1], [0], [0], [1], [0, 0, 1, 1], [], []>} : vector<8x8xbf16>, vector<8x64xbf16>, vector<8x64xf32> -> vector<8x64xf32>
    %1092 = tpu.concatenate %1087, %1091 in 1 : vector<8x64xf32>, vector<8x64xf32> -> vector<8x128xf32>
    %c0_218 = arith.constant 0 : index
    %c0_219 = arith.constant 0 : index
    %c0_220 = arith.constant 0 : index
    %c0_221 = arith.constant 0 : index
    %1093 = vector.load %arg14[%c0_218, %c0_219, %c0_220, %c0_221] : memref<1x4x8x128xf32, #tpu.memory_space<vmem>>, vector<1x1x8x128xf32>
    %1094 = vector.shape_cast %1093 : vector<1x1x8x128xf32> to vector<8x128xf32>
    %1095 = vector.shape_cast %1092 : vector<8x128xf32> to vector<1x1x8x128xf32>
    tpu.vector_store %arg14[%c0_218, %c0_219, %c0_220, %c0_221], %1095 {strides = array<i32>} : memref<1x4x8x128xf32, #tpu.memory_space<vmem>>, vector<1x1x8x128xf32>,
    %1096 = vector.extract_strided_slice %1053 {offsets = [8, 0], sizes = [8, 64], strides = [1, 1]} : vector<48x64xf32> to vector<8x64xf32>
    %1097 = vector.extract_strided_slice %1062 {offsets = [24, 0], sizes = [8, 64], strides = [1, 1]} : vector<48x64xf32> to vector<8x64xf32>
    %1098 = arith.truncf %1096 : vector<8x64xf32> to vector<8x64xbf16>
    %1099 = arith.truncf %1097 : vector<8x64xf32> to vector<8x64xbf16>
    %cst_222 = arith.constant dense<0.000000e+00> : vector<8x8xf32>
    %1100 = tpu.matmul %1098, %1099, %cst_222 {dimension_numbers = #tpu.dot_dimension_numbers<[1], [1], [0], [0], [0, 0, 1, 0], [], []>} : vector<8x64xbf16>, vector<8x64xbf16>, vector<8x8xf32> -> vector<8x8xf32>
    %cst_223 = arith.constant dense<0xFF800000> : vector<8xf32>
    %1101 = vector.multi_reduction <maximumf>, %1100, %cst_223 [1] : vector<8x8xf32> to vector<8xf32>
    %1102 = vector.shape_cast %1101 : vector<8xf32> to vector<8x1xf32>
    %cst_224 = arith.constant dense<0xFF800000> : vector<1xf32>
    %1103 = vector.multi_reduction <maximumf>, %1102, %cst_224 [0] : vector<8x1xf32> to vector<1xf32>
    %1104 = vector.shape_cast %1103 : vector<1xf32> to vector<1x1xf32>
    %1105 = vector.broadcast %1104 : vector<1x1xf32> to vector<8x8xf32>
    %1106 = arith.subf %1100, %1105 : vector<8x8xf32>
    %1107 = math.exp %1106 : vector<8x8xf32>
    %cst_225 = arith.constant dense<0.000000e+00> : vector<8xf32>
    %1108 = vector.multi_reduction <add>, %1107, %cst_225 [1] : vector<8x8xf32> to vector<8xf32>
    %1109 = vector.shape_cast %1108 : vector<8xf32> to vector<8x1xf32>
    %1110 = tpu.reciprocal %1109 {approx = true} : vector<8x1xf32> -> vector<8x1xf32>
    %cst_226 = arith.constant dense<0.000000e+00> : vector<8xf32>
    %1111 = vector.multi_reduction <add>, %1107, %cst_226 [0] : vector<8x8xf32> to vector<8xf32>
    %1112 = vector.shape_cast %1111 : vector<8xf32> to vector<1x8xf32>
    %1113 = tpu.reciprocal %1112 {approx = true} : vector<1x8xf32> -> vector<1x8xf32>
    %1114 = vector.broadcast %1110 : vector<8x1xf32> to vector<8x8xf32>
    %1115 = arith.mulf %1107, %1114 : vector<8x8xf32>
    %1116 = vector.broadcast %1113 : vector<1x8xf32> to vector<8x8xf32>
    %1117 = arith.mulf %1107, %1116 : vector<8x8xf32>
    %1118 = arith.truncf %1115 : vector<8x8xf32> to vector<8x8xbf16>
    %1119 = arith.truncf %1096 : vector<8x64xf32> to vector<8x64xbf16>
    %cst_227 = arith.constant dense<0.000000e+00> : vector<8x64xf32>
    %1120 = tpu.matmul %1118, %1119, %cst_227 {dimension_numbers = #tpu.dot_dimension_numbers<[1], [0], [0], [1], [0, 0, 1, 1], [], []>} : vector<8x8xbf16>, vector<8x64xbf16>, vector<8x64xf32> -> vector<8x64xf32>
    %1121 = tpu.transpose %1117, [1, 0] : vector<8x8xf32> -> vector<8x8xf32>
    %1122 = arith.truncf %1121 : vector<8x8xf32> to vector<8x8xbf16>
    %1123 = arith.truncf %1120 : vector<8x64xf32> to vector<8x64xbf16>
    %cst_228 = arith.constant dense<0.000000e+00> : vector<8x64xf32>
    %1124 = tpu.matmul %1122, %1123, %cst_228 {dimension_numbers = #tpu.dot_dimension_numbers<[1], [0], [0], [1], [0, 0, 1, 1], [], []>} : vector<8x8xbf16>, vector<8x64xbf16>, vector<8x64xf32> -> vector<8x64xf32>
    %1125 = tpu.concatenate %1120, %1124 in 1 : vector<8x64xf32>, vector<8x64xf32> -> vector<8x128xf32>
    %c0_229 = arith.constant 0 : index
    %c1 = arith.constant 1 : index
    %c0_230 = arith.constant 0 : index
    %c0_231 = arith.constant 0 : index
    %1126 = vector.load %arg14[%c0_229, %c1, %c0_230, %c0_231] : memref<1x4x8x128xf32, #tpu.memory_space<vmem>>, vector<1x1x8x128xf32>
    %1127 = vector.shape_cast %1126 : vector<1x1x8x128xf32> to vector<8x128xf32>
    %1128 = vector.shape_cast %1125 : vector<8x128xf32> to vector<1x1x8x128xf32>
    tpu.vector_store %arg14[%c0_229, %c1, %c0_230, %c0_231], %1128 {strides = array<i32>} : memref<1x4x8x128xf32, #tpu.memory_space<vmem>>, vector<1x1x8x128xf32>,
    %1129 = vector.extract_strided_slice %1053 {offsets = [0, 0], sizes = [8, 64], strides = [1, 1]} : vector<48x64xf32> to vector<8x64xf32>
    %1130 = vector.extract_strided_slice %1062 {offsets = [32, 0], sizes = [8, 64], strides = [1, 1]} : vector<48x64xf32> to vector<8x64xf32>
    %1131 = arith.truncf %1129 : vector<8x64xf32> to vector<8x64xbf16>
    %1132 = arith.truncf %1130 : vector<8x64xf32> to vector<8x64xbf16>
    %cst_232 = arith.constant dense<0.000000e+00> : vector<8x8xf32>
    %1133 = tpu.matmul %1131, %1132, %cst_232 {dimension_numbers = #tpu.dot_dimension_numbers<[1], [1], [0], [0], [0, 0, 1, 0], [], []>} : vector<8x64xbf16>, vector<8x64xbf16>, vector<8x8xf32> -> vector<8x8xf32>
    %cst_233 = arith.constant dense<0xFF800000> : vector<8xf32>
    %1134 = vector.multi_reduction <maximumf>, %1133, %cst_233 [1] : vector<8x8xf32> to vector<8xf32>
    %1135 = vector.shape_cast %1134 : vector<8xf32> to vector<8x1xf32>
    %cst_234 = arith.constant dense<0xFF800000> : vector<1xf32>
    %1136 = vector.multi_reduction <maximumf>, %1135, %cst_234 [0] : vector<8x1xf32> to vector<1xf32>
    %1137 = vector.shape_cast %1136 : vector<1xf32> to vector<1x1xf32>
    %1138 = vector.broadcast %1137 : vector<1x1xf32> to vector<8x8xf32>
    %1139 = arith.subf %1133, %1138 : vector<8x8xf32>
    %1140 = math.exp %1139 : vector<8x8xf32>
    %cst_235 = arith.constant dense<0.000000e+00> : vector<8xf32>
    %1141 = vector.multi_reduction <add>, %1140, %cst_235 [1] : vector<8x8xf32> to vector<8xf32>
    %1142 = vector.shape_cast %1141 : vector<8xf32> to vector<8x1xf32>
    %1143 = tpu.reciprocal %1142 {approx = true} : vector<8x1xf32> -> vector<8x1xf32>
    %cst_236 = arith.constant dense<0.000000e+00> : vector<8xf32>
    %1144 = vector.multi_reduction <add>, %1140, %cst_236 [0] : vector<8x8xf32> to vector<8xf32>
    %1145 = vector.shape_cast %1144 : vector<8xf32> to vector<1x8xf32>
    %1146 = tpu.reciprocal %1145 {approx = true} : vector<1x8xf32> -> vector<1x8xf32>
    %1147 = vector.broadcast %1143 : vector<8x1xf32> to vector<8x8xf32>
    %1148 = arith.mulf %1140, %1147 : vector<8x8xf32>
    %1149 = vector.broadcast %1146 : vector<1x8xf32> to vector<8x8xf32>
    %1150 = arith.mulf %1140, %1149 : vector<8x8xf32>
    %1151 = arith.truncf %1148 : vector<8x8xf32> to vector<8x8xbf16>
    %1152 = arith.truncf %1129 : vector<8x64xf32> to vector<8x64xbf16>
    %cst_237 = arith.constant dense<0.000000e+00> : vector<8x64xf32>
    %1153 = tpu.matmul %1151, %1152, %cst_237 {dimension_numbers = #tpu.dot_dimension_numbers<[1], [0], [0], [1], [0, 0, 1, 1], [], []>} : vector<8x8xbf16>, vector<8x64xbf16>, vector<8x64xf32> -> vector<8x64xf32>
    %1154 = tpu.transpose %1150, [1, 0] : vector<8x8xf32> -> vector<8x8xf32>
    %1155 = arith.truncf %1154 : vector<8x8xf32> to vector<8x8xbf16>
    %1156 = arith.truncf %1153 : vector<8x64xf32> to vector<8x64xbf16>
    %cst_238 = arith.constant dense<0.000000e+00> : vector<8x64xf32>
    %1157 = tpu.matmul %1155, %1156, %cst_238 {dimension_numbers = #tpu.dot_dimension_numbers<[1], [0], [0], [1], [0, 0, 1, 1], [], []>} : vector<8x8xbf16>, vector<8x64xbf16>, vector<8x64xf32> -> vector<8x64xf32>
    %1158 = tpu.concatenate %1153, %1157 in 1 : vector<8x64xf32>, vector<8x64xf32> -> vector<8x128xf32>
    %c0_239 = arith.constant 0 : index
    %c2 = arith.constant 2 : index
    %c0_240 = arith.constant 0 : index
    %c0_241 = arith.constant 0 : index
    %1159 = vector.load %arg14[%c0_239, %c2, %c0_240, %c0_241] : memref<1x4x8x128xf32, #tpu.memory_space<vmem>>, vector<1x1x8x128xf32>
    %1160 = vector.shape_cast %1159 : vector<1x1x8x128xf32> to vector<8x128xf32>
    %1161 = vector.shape_cast %1158 : vector<8x128xf32> to vector<1x1x8x128xf32>
    tpu.vector_store %arg14[%c0_239, %c2, %c0_240, %c0_241], %1161 {strides = array<i32>} : memref<1x4x8x128xf32, #tpu.memory_space<vmem>>, vector<1x1x8x128xf32>,
    %1162 = vector.extract_strided_slice %1053 {offsets = [8, 0], sizes = [8, 64], strides = [1, 1]} : vector<48x64xf32> to vector<8x64xf32>
    %1163 = vector.extract_strided_slice %1062 {offsets = [40, 0], sizes = [8, 64], strides = [1, 1]} : vector<48x64xf32> to vector<8x64xf32>
    %1164 = arith.truncf %1162 : vector<8x64xf32> to vector<8x64xbf16>
    %1165 = arith.truncf %1163 : vector<8x64xf32> to vector<8x64xbf16>
    %cst_242 = arith.constant dense<0.000000e+00> : vector<8x8xf32>
    %1166 = tpu.matmul %1164, %1165, %cst_242 {dimension_numbers = #tpu.dot_dimension_numbers<[1], [1], [0], [0], [0, 0, 1, 0], [], []>} : vector<8x64xbf16>, vector<8x64xbf16>, vector<8x8xf32> -> vector<8x8xf32>
    %cst_243 = arith.constant dense<0xFF800000> : vector<8xf32>
    %1167 = vector.multi_reduction <maximumf>, %1166, %cst_243 [1] : vector<8x8xf32> to vector<8xf32>
    %1168 = vector.shape_cast %1167 : vector<8xf32> to vector<8x1xf32>
    %cst_244 = arith.constant dense<0xFF800000> : vector<1xf32>
    %1169 = vector.multi_reduction <maximumf>, %1168, %cst_244 [0] : vector<8x1xf32> to vector<1xf32>
    %1170 = vector.shape_cast %1169 : vector<1xf32> to vector<1x1xf32>
    %1171 = vector.broadcast %1170 : vector<1x1xf32> to vector<8x8xf32>
    %1172 = arith.subf %1166, %1171 : vector<8x8xf32>
    %1173 = math.exp %1172 : vector<8x8xf32>
    %cst_245 = arith.constant dense<0.000000e+00> : vector<8xf32>
    %1174 = vector.multi_reduction <add>, %1173, %cst_245 [1] : vector<8x8xf32> to vector<8xf32>
    %1175 = vector.shape_cast %1174 : vector<8xf32> to vector<8x1xf32>
    %1176 = tpu.reciprocal %1175 {approx = true} : vector<8x1xf32> -> vector<8x1xf32>
    %cst_246 = arith.constant dense<0.000000e+00> : vector<8xf32>
    %1177 = vector.multi_reduction <add>, %1173, %cst_246 [0] : vector<8x8xf32> to vector<8xf32>
    %1178 = vector.shape_cast %1177 : vector<8xf32> to vector<1x8xf32>
    %1179 = tpu.reciprocal %1178 {approx = true} : vector<1x8xf32> -> vector<1x8xf32>
    %1180 = vector.broadcast %1176 : vector<8x1xf32> to vector<8x8xf32>
    %1181 = arith.mulf %1173, %1180 : vector<8x8xf32>
    %1182 = vector.broadcast %1179 : vector<1x8xf32> to vector<8x8xf32>
    %1183 = arith.mulf %1173, %1182 : vector<8x8xf32>
    %1184 = arith.truncf %1181 : vector<8x8xf32> to vector<8x8xbf16>
    %1185 = arith.truncf %1162 : vector<8x64xf32> to vector<8x64xbf16>
    %cst_247 = arith.constant dense<0.000000e+00> : vector<8x64xf32>
    %1186 = tpu.matmul %1184, %1185, %cst_247 {dimension_numbers = #tpu.dot_dimension_numbers<[1], [0], [0], [1], [0, 0, 1, 1], [], []>} : vector<8x8xbf16>, vector<8x64xbf16>, vector<8x64xf32> -> vector<8x64xf32>
    %1187 = tpu.transpose %1183, [1, 0] : vector<8x8xf32> -> vector<8x8xf32>
    %1188 = arith.truncf %1187 : vector<8x8xf32> to vector<8x8xbf16>
    %1189 = arith.truncf %1186 : vector<8x64xf32> to vector<8x64xbf16>
    %cst_248 = arith.constant dense<0.000000e+00> : vector<8x64xf32>
    %1190 = tpu.matmul %1188, %1189, %cst_248 {dimension_numbers = #tpu.dot_dimension_numbers<[1], [0], [0], [1], [0, 0, 1, 1], [], []>} : vector<8x8xbf16>, vector<8x64xbf16>, vector<8x64xf32> -> vector<8x64xf32>
    %1191 = tpu.concatenate %1186, %1190 in 1 : vector<8x64xf32>, vector<8x64xf32> -> vector<8x128xf32>
    %c0_249 = arith.constant 0 : index
    %c3 = arith.constant 3 : index
    %c0_250 = arith.constant 0 : index
    %c0_251 = arith.constant 0 : index
    %1192 = vector.load %arg14[%c0_249, %c3, %c0_250, %c0_251] : memref<1x4x8x128xf32, #tpu.memory_space<vmem>>, vector<1x1x8x128xf32>
    %1193 = vector.shape_cast %1192 : vector<1x1x8x128xf32> to vector<8x128xf32>
    %1194 = vector.shape_cast %1191 : vector<8x128xf32> to vector<1x1x8x128xf32>
    tpu.vector_store %arg14[%c0_249, %c3, %c0_250, %c0_251], %1194 {strides = array<i32>} : memref<1x4x8x128xf32, #tpu.memory_space<vmem>>, vector<1x1x8x128xf32>,
    return
  }
  func.func @transform_0(%arg0: i32) -> (i32, i32, i32) {
    %c0_i32 = arith.constant 0 : i32
    %c0_i32_0 = arith.constant 0 : i32
    %c0_i32_1 = arith.constant 0 : i32
    return %arg0, %c0_i32, %c0_i32_0 : i32, i32, i32
  }
  func.func @transform_1(%arg0: i32) -> (i32, i32, i32) {
    %c0_i32 = arith.constant 0 : i32
    %c0_i32_0 = arith.constant 0 : i32
    %c0_i32_1 = arith.constant 0 : i32
    return %arg0, %c0_i32, %c0_i32_0 : i32, i32, i32
  }
  func.func @transform_2(%arg0: i32) -> (i32, i32, i32) {
    %c0_i32 = arith.constant 0 : i32
    %c0_i32_0 = arith.constant 0 : i32
    %c0_i32_1 = arith.constant 0 : i32
    return %arg0, %c0_i32, %c0_i32_0 : i32, i32, i32
  }
  func.func @transform_3(%arg0: i32) -> (i32, i32, i32) {
    %c0_i32 = arith.constant 0 : i32
    %c0_i32_0 = arith.constant 0 : i32
    %c0_i32_1 = arith.constant 0 : i32
    return %arg0, %c0_i32, %c0_i32_0 : i32, i32, i32
  }
  func.func @transform_4(%arg0: i32) -> (i32, i32, i32) {
    %c0_i32 = arith.constant 0 : i32
    %c0_i32_0 = arith.constant 0 : i32
    %c0_i32_1 = arith.constant 0 : i32
    return %arg0, %c0_i32, %c0_i32_0 : i32, i32, i32
  }
  func.func @transform_5(%arg0: i32) -> (i32, i32, i32) {
    %c0_i32 = arith.constant 0 : i32
    %c0_i32_0 = arith.constant 0 : i32
    %c0_i32_1 = arith.constant 0 : i32
    return %arg0, %c0_i32, %c0_i32_0 : i32, i32, i32
  }
  func.func @transform_6(%arg0: i32) -> (i32, i32, i32) {
    %c0_i32 = arith.constant 0 : i32
    %c0_i32_0 = arith.constant 0 : i32
    %c0_i32_1 = arith.constant 0 : i32
    return %arg0, %c0_i32, %c0_i32_0 : i32, i32, i32
  }
  func.func @transform_7(%arg0: i32) -> (i32, i32, i32) {
    %c0_i32 = arith.constant 0 : i32
    %c0_i32_0 = arith.constant 0 : i32
    %c0_i32_1 = arith.constant 0 : i32
    return %arg0, %c0_i32, %c0_i32_0 : i32, i32, i32
  }
  func.func @transform_8(%arg0: i32) -> (i32, i32, i32) {
    %c0_i32 = arith.constant 0 : i32
    %c0_i32_0 = arith.constant 0 : i32
    %c0_i32_1 = arith.constant 0 : i32
    return %arg0, %c0_i32, %c0_i32_0 : i32, i32, i32
  }
  func.func @transform_9(%arg0: i32) -> (i32, i32, i32) {
    %c0_i32 = arith.constant 0 : i32
    %c0_i32_0 = arith.constant 0 : i32
    %c0_i32_1 = arith.constant 0 : i32
    return %arg0, %c0_i32, %c0_i32_0 : i32, i32, i32
  }
  func.func @transform_10(%arg0: i32) -> (i32, i32, i32) {
    %c0_i32 = arith.constant 0 : i32
    %c0_i32_0 = arith.constant 0 : i32
    %c0_i32_1 = arith.constant 0 : i32
    return %arg0, %c0_i32, %c0_i32_0 : i32, i32, i32
  }
  func.func @transform_11(%arg0: i32) -> (i32, i32, i32) {
    %c0_i32 = arith.constant 0 : i32
    %c0_i32_0 = arith.constant 0 : i32
    %c0_i32_1 = arith.constant 0 : i32
    return %arg0, %c0_i32, %c0_i32_0 : i32, i32, i32
  }
  func.func @transform_12(%arg0: i32) -> (i32, i32) {
    %c0_i32 = arith.constant 0 : i32
    %c0_i32_0 = arith.constant 0 : i32
    %c0_i32_1 = arith.constant 0 : i32
    return %c0_i32, %c0_i32_0 : i32, i32
  }
  func.func @transform_13(%arg0: i32) -> (i32, i32, i32, i32) {
    %c0_i32 = arith.constant 0 : i32
    %c0_i32_0 = arith.constant 0 : i32
    %c0_i32_1 = arith.constant 0 : i32
    %c0_i32_2 = arith.constant 0 : i32
    return %arg0, %c0_i32, %c0_i32_0, %c0_i32_1 : i32, i32, i32, i32
  }
}

</mosaic_0001>

<bundles_post_ra>
// kernel: squeeze.15
= control target key start
LH: loop header
LB: loop body
LE: loop exit
PB: predicated region body
PF: predicated region fallthrough
CT: control target
= control target key end

     0   :  { %vm3_vm0 = vcmask 523264   ;;  %vm11_vm1 = vcmask 1048064   ;;  %s77_s0 = inlined_call_operand.vmem [shape: f32[1,2,8,64], index: 0, kind: input, shape index: {}]   ;;  %s78_s1 = inlined_call_operand.vmem [shape: f32[2,512], index: 1, kind: output, shape index: {}]  }
   0x1   :  { %v43_v0 = vld.sshfl [vmem:[%s77_s0 + $0x1] sm:$0xff pattern:$0xe6c4a280]   ;;  %v2_v1 = vld [vmem:[%s77_s0] ss:$2 sm:$0xff]   ;;  %s48_s0 = smov 64  }
   0x2   :  { %9 = vrot.lane.b32.xlu0 %v43_v0, %s48_s0  ;;  %4 = vst.msk [vmem:[#allocation0] ss:$8 sm:$0xf] %vm3_vm0, %v2_v1  }
   0x3   :  { %6 = vst.msk [vmem:[#allocation0 - $0x1f] ss:$8 sm:$0xf0] %vm3_vm0, %v2_v1  }
  0x74   :  { %v10_v2 = vpop.permute.xlu0 %9  }
  0x75   :  { %12 = vst.msk [vmem:[#allocation0] sm:$0x3] %vm11_vm1, %v10_v2  }
  0x76   :  { %14 = vst.msk [vmem:[#allocation0 + $0x6] sm:$0xc] %vm11_vm1, %v10_v2  }
  0x77   :  { %16 = vst.msk [vmem:[#allocation0 + $0xc] sm:$0x30] %vm11_vm1, %v10_v2  }
  0x78   :  { %18 = vst.msk [vmem:[#allocation0 + $0x12] sm:$0xc0] %vm11_vm1, %v10_v2  }
  0x7c   :  { %v21_v3 = vld [vmem:[#allocation0] sm:$0x3] }
  0x7d   :  { %24 = vst [vmem:[%s78_s1] sm:$0x3] %v21_v3  ;;  %v26_v4 = vld [vmem:[#allocation0 + $0x8] sm:$0x3] }
  0x7e   :  { %44 = vst [vmem:[%s78_s1 + $0x2] sm:$0x3] %v26_v4  ;;  %v32_v5 = vld [vmem:[#allocation0 + $0x10] sm:$0x3] }
  0x7f   :  { %45 = vst [vmem:[%s78_s1 + $0x4] sm:$0x3] %v32_v5  ;;  %v38_v6 = vld [vmem:[#allocation0 + $0x18] sm:$0x3] }
  0x80   :  { %46 = vst [vmem:[%s78_s1 + $0x6] sm:$0x3] %v38_v6 }

// kernel: answer_selection_forward.1
= control target key start
LH: loop header
LB: loop body
LE: loop exit
PB: predicated region body
PF: predicated region fallthrough
CT: control target
= control target key end

     0   :  { %s5673_s25 = smov 0   ;;  %s6773_s0 = inlined_call_operand.vmem [shape: bf16[2,64,32], index: 0, kind: input, shape index: {}]   ;;  %s6774_s1 = inlined_call_operand.vmem [shape: bf16[2,32,256], index: 1, kind: input, shape index: {}]   ;;  %s6775_s2 = inlined_call_operand.vmem [shape: bf16[2,64,256], index: 2, kind: input, shape index: {}]   ;;  %s6776_s3 = inlined_call_operand.vmem [shape: f32[2,1,256], index: 3, kind: input, shape index: {}]   ;;  %s6777_s4 = inlined_call_operand.vmem [shape: bf16[2,64,256], index: 4, kind: input, shape index: {}]   ;;  %s6778_s5 = inlined_call_operand.vmem [shape: bf16[2,64,256], index: 5, kind: input, shape index: {}]   ;;  %s6779_s6 = inlined_call_operand.vmem [shape: f32[2,1,256], index: 6, kind: input, shape index: {}]   ;;  %s6780_s7 = inlined_call_operand.vmem [shape: bf16[2,64,256], index: 7, kind: input, shape index: {}]   ;;  %s6781_s8 = inlined_call_operand.vmem [shape: bf16[2,64,256], index: 8, kind: input, shape index: {}]   ;;  %s6782_s9 = inlined_call_operand.vmem [shape: f32[2,1,256], index: 9, kind: input, shape index: {}]   ;;  %s6783_s10 = inlined_call_operand.vmem [shape: bf16[2,64,64], index: 10, kind: input, shape index: {}]   ;;  %s6784_s11 = inlined_call_operand.vmem [shape: f32[2,1,64], index: 11, kind: input, shape index: {}]   ;;  %s6785_s12 = inlined_call_operand.vmem [shape: bf16[48,64], index: 12, kind: input, shape index: {}]   ;;  %s6786_s13 = inlined_call_operand.vmem [shape: f32[2,4,8,128], index: 13, kind: output, shape index: {}]  }
   0x1 LB: > { %s4716_s26 = sadd.s32 4294967295, %s5598_s25   ;;  %p4720_p0 = scmp.ge.s32.totalorder %s5598_s25, 1  ;;  %s5598_s25 = sphi %s5673_s25, %s23_s25  }
   0x2   : > { %p492_p1 = scmp.lt.s32.totalorder %s5598_s25, 3 }
   0x4   : > { %p493_p2 = pnand %p4720_p0, %p492_p1 }
   0x5   : > { %p586_p3 = scmp.lt.s32.totalorder (!%p493_p2), %s4716_s26, 1  ;;  %s5600_s21 = smov (!%p493_p2), 32  }
   0x6   : > { %496 = sbr.rel (%p493_p2) target bundleno = 16427 (0x402b), region = 72  ;;  %s5601_s22 = smov (!%p493_p2), 64  }
   0x7   : > { %s5602_s23 = smov (!%p493_p2), 96  }
   0xb   : > { %s6788_s26 = smov (!%p586_p3, %s4716_s26), 1  ;;  %vm705_vm0 = vcmask 261120   ;;  %vm868_vm9 = vcmask 523520   ;;  %vm911_vm10 = vcmask 523264  }
   0xc   : > { %s5684_s27 = sshll.u32 %s6788_s26, 5  ;;  %s5703_s17 = sshll.u32 %s6788_s26, 1 }
   0xd   : > { %s595_s30 = scalar_lea.vmem %s6774_s1, %s5684_s27  ;;  %s590_s16 = scalar_lea.vmem %s6773_s0, %s5684_s27 }
   0xe   : > { %v4768_v0 = vld [vmem:[%s595_s30 + $0x10] sm:$0xf]  ;;  %v5115_v1 = vld [vmem:[%s595_s30 + $0x14] sm:$0xf0]  ;;  %v5114_v2 = vld [vmem:[%s595_s30 + $0x14] sm:$0xf]  ;;  %s604_s20 = scalar_lea.vmem %s6776_s3, %s5703_s17  ;;  %s637_s14 = scalar_lea.vmem %s6783_s10, %s5684_s27 }
   0xf   : > { %v4769_v3 = vor.u32 %v5115_v1, %v4768_v0  ;;  %v4770_v4 = vld [vmem:[%s595_s30 + $0x18] sm:$0xf0]  ;;  %v4760_v5 = vld [vmem:[%s595_s30] sm:$0xf]  ;;  %v5113_v6 = vld [vmem:[%s595_s30 + $0x4] sm:$0xf0]  ;;  %s640_s28 = scalar_lea.vmem %s6784_s11, %s6788_s26 }
  0x10   : > { %v4773_v7 = vor.u32 %v5114_v2, %v4770_v4  ;;  %v5112_v8 = vld [vmem:[%s595_s30 + $0x4] sm:$0xf]  ;;  %v4762_v9 = vld [vmem:[%s595_s30 + $0x8] sm:$0xf0]  ;;  %v4761_v10 = vor.u32 %v5113_v6, %v4760_v5  ;;  %v5110_v14 = vld [vmem:[%s590_s16 + $0x10] sm:$0xff]  ;;  %s5748_s24 = sshll.u32 %s6788_s26, 6 }
  0x11   : > { %724 = vmatpush.bf16.msra.mxu0 %v4769_v3  ;;  %v4765_v11 = vor.u32 %v5112_v8, %v4762_v9  ;;  %v5108_v12 = vld [vmem:[%s590_s16] sm:$0xff]  ;;  %v5109_v13 = vld [vmem:[%s590_s16 + $0x8] sm:$0xff]  ;;  %v5111_v15 = vld [vmem:[%s590_s16 + $0x18] sm:$0xff]  ;;  %s5754_s30 = scalar_lea.vmem %s6775_s2, %s5748_s24  ;;  %s609_s16 = scalar_lea.vmem %s6777_s4, %s5748_s24 }
  0x12   : > { %753 = vmatpush.bf16.msra.mxu1 %v4773_v7  ;;  %v659_v16 = vld [vmem:[%s604_s20] sm:$0x3]  ;;  %s618_s20 = scalar_lea.vmem %s6779_s6, %s5703_s17  ;;  %s6420_s29 = scalar_lea.vmem %s6781_s8, %s5748_s24 }
  0x13   : > { %v5709_v17 = vperm.slane %v659_v16, 0  ;;  %v5711_v18 = vperm.slane %v659_v16, 1  ;;  %v5122_v16 = vld [vmem:[%s5754_s30 + $0x34] sm:$0xf] }
  0x15   : > { %725 = vmatpush.bf16.msra.mxu0 %v4761_v10 }
  0x16   : > { %754 = vmatpush.bf16.msra.mxu1 %v4765_v11 }
  0x18   : > { %4774 = vmatmul.msk.bf16.vlgmr.msra.gmra.mxu0 %vm705_vm0, %v5108_v12 }
  0x19   : > { %4778 = vmatmul.msk.bf16.vlgmr.msra.gmra.mxu1 %vm705_vm0, %v5108_v12 }
  0x28   : > { %4775 = vmatmul.msk.bf16.gmra.mxu0 %vm705_vm0, %v5109_v13 }
  0x29   : > { %4779 = vmatmul.msk.bf16.gmra.mxu1 %vm705_vm0, %v5109_v13 }
  0x38   : > { %4776 = vmatmul.msk.bf16.gmra.mxu0 %vm705_vm0, %v5110_v14 }
  0x39   : > { %4780 = vmatmul.msk.bf16.gmra.mxu1 %vm705_vm0, %v5110_v14  ;;  %v4810_v14 = vld [vmem:[%s5754_s30 + $0x30] sm:$0xf] }
  0x48   : > { %4777 = vmatmul.msk.bf16.gmra.mxu0 %vm705_vm0, %v5111_v15 }
  0x49   : > { %4781 = vmatmul.msk.bf16.gmra.mxu1 %vm705_vm0, %v5111_v15  ;;  %v5123_v15 = vld [vmem:[%s5754_s30 + $0x34] sm:$0xf0] }
  0x95   : > { %v727_v19 = vpop.f32.mrf.mxu0 }
  0x96   : > { %v728_v20 = vadd.f32 %v727_v19, %v5709_v17  ;;  %v756_v21 = vpop.f32.mrf.mxu1  ;;  %v5759_v19 = vor.u32 %v5123_v15, %v4810_v14 }
  0x97   : > { %v5715_v22 = vadd.f32 %v756_v21, %v5711_v18  ;;  %v4802_v21 = vld [vmem:[%s5754_s30 + $0x20] sm:$0xf] }
  0x98   : > { %5176 = vtanh.f32 %v728_v20  ;;  %v4782_v36 = vmul.f32 -1.442695, %v728_v20  ;;  %v4812_v20 = vld [vmem:[%s5754_s30 + $0x38] sm:$0xf0]  ;;  %919 = vmatpush.bf16.msra.mxu2 %v5759_v19  ;;  %1387 = vmatpush.bf16.msrb.mxu0 %v5759_v19 }
  0x9e   : > { %v5177_v23 = vpop.eup %5176  ;;  %v5717_v24 = vpop.f32.mrf.mxu1 }
  0x9f   : > { %826 = vrot.lane.b32.xlu0 %v5177_v23, %s5600_s21  ;;  %v5121_v23 = vld [vmem:[%s5754_s30 + $0x24] sm:$0xf0] }
  0xa6   : > { %v761_v25 = vpop.f32.mrf.mxu1 }
  0xa7   : > { %v5721_v26 = vadd.f32 %v761_v25, %v5711_v18  ;;  %v5764_v25 = vor.u32 %v5122_v16, %v4812_v20 }
  0xa9   : > { %932 = vmatpush.bf16.msra.mxu3 %v5764_v25  ;;  %1400 = vmatpush.bf16.msrb.mxu1 %v5764_v25 }
  0xae   : > { %v5723_v27 = vpop.f32.mrf.mxu1 }
  0xb6   : > { %v766_v28 = vpop.f32.mrf.mxu1 }
  0xb7   : > { %v5726_v29 = vadd.f32 %v766_v28, %v5711_v18  ;;  %v5120_v28 = vld [vmem:[%s5754_s30 + $0x24] sm:$0xf] }
  0xbe   : > { %v5728_v30 = vpop.f32.mrf.mxu1 }
  0xc6   : > { %v771_v31 = vpop.f32.mrf.mxu1 }
  0xc7   : > { %v5731_v32 = vadd.f32 %v771_v31, %v5711_v18  ;;  %v4804_v31 = vld [vmem:[%s5754_s30 + $0x28] sm:$0xf0] }
  0xce   : > { %v773_v33 = vpop.f32.mrf.mxu1 }
  0xcf   : > { %v774_v34 = vadd.f32 %v773_v33, %v5711_v18  ;;  %v5769_v33 = vor.u32 %v5121_v23, %v4802_v21 }
  0xd1   : > { %5178 = vtanh.f32 %v774_v34  ;;  %v4783_v51 = vmul.f32 -1.442695, %v774_v34  ;;  %v5773_v34 = vor.u32 %v5120_v28, %v4804_v31  ;;  %920 = vmatpush.bf16.msra.mxu2 %v5769_v33  ;;  %1388 = vmatpush.bf16.msrb.mxu0 %v5769_v33 }
  0xd2   : > { %5180 = vpow2.f32 %v4782_v36  ;;  %v5119_v36 = vld [vmem:[%s5754_s30 + $0x14] sm:$0xf0] }
  0xd3   : > { %933 = vmatpush.bf16.msra.mxu3 %v5773_v34  ;;  %1401 = vmatpush.bf16.msrb.mxu1 %v5773_v34 }
  0xd7   : > { %v5179_v35 = vpop.eup %5178 }
  0xd8   : > { %837 = vrot.lane.b32.xlu0 %v5179_v35, %s5600_s21  ;;  %v5181_v37 = vpop.eup %5180  ;;  %v4794_v35 = vld [vmem:[%s5754_s30 + $0x10] sm:$0xf] }
  0xd9   : > { %v787_v38 = vadd.f32 1.0, %v5181_v37  ;;  %v5118_v37 = vld [vmem:[%s5754_s30 + $0x14] sm:$0xf] }
  0xdb   : > { %5182 = vrcp.f32 %v787_v38  ;;  %vm793_vm1 = vweird.f32 %v787_v38  ;;  %v799_v43 = vand.u32 2147483648, %v787_v38  ;;  %v797_v45 = vand.u32 2147483647, %v787_v38 }
  0xdc   : > { %5184 = vpow2.f32 %v4783_v51  ;;  %v729_v51 = vpop.f32.mrf.mxu0 }
  0xdd   : > { %v800_v46 = vor.u32 1.1754944e-38, %v799_v43  ;;  %vm798_vm4 = vcmp.eq.f32.partialorder %v797_v45, 8.507059e+37  ;;  %v5117_v43 = vld [vmem:[%s5754_s30 + $0x4] sm:$0xf0] }
  0xe1   : > { %v5183_v39 = vpop.eup %5182 }
  0xe2   : > { %v789_v40 = vmul.f32 %v5183_v39, %v787_v38  ;;  %vm794_vm2 = vweird.f32 %v5183_v39  ;;  %v5185_v52 = vpop.eup %5184  ;;  %v4796_v38 = vld [vmem:[%s5754_s30 + $0x18] sm:$0xf0] }
  0xe3   : > { %vm795_vm3 = vmor %vm793_vm1, %vm794_vm2  ;;  %v807_v53 = vadd.f32 1.0, %v5185_v52  ;;  %v730_v52 = vadd.f32 %v729_v51, %v5709_v17 }
  0xe4   : > { %v790_v41 = vsub.f32 1.0, %v789_v40  ;;  %v5785_v40 = vor.u32 %v5118_v37, %v4796_v38 }
  0xe5   : > { %5186 = vrcp.f32 %v807_v53  ;;  %v819_v59 = vand.u32 2147483648, %v807_v53  ;;  %vm813_vm6 = vweird.f32 %v807_v53  ;;  %v817_v60 = vand.u32 2147483647, %v807_v53 }
  0xe6   : > { %v791_v42 = vmul.f32 %v5183_v39, %v790_v41  ;;  %934 = vmatpush.bf16.msra.mxu3 %v5785_v40  ;;  %1402 = vmatpush.bf16.msrb.mxu1 %v5785_v40 }
  0xe7   : > { %v820_v62 = vor.u32 1.1754944e-38, %v819_v59  ;;  %vm818_vm8 = vcmp.eq.f32.partialorder %v817_v60, 8.507059e+37 }
  0xe8   : > { %v792_v44 = vadd.f32 %v5183_v39, %v791_v42  ;;  %v4786_v42 = vld [vmem:[%s5754_s30] sm:$0xf] }
  0xe9   : > { %v5796_v45 = vor.u32 %v5117_v43, %v4786_v42 }
  0xea   : > { %v796_v47 = vsel %vm795_vm3, %v5183_v39, %v792_v44  ;;  %v5781_v39 = vor.u32 %v5119_v36, %v4794_v35  ;;  %v5116_v44 = vld [vmem:[%s5754_s30 + $0x4] sm:$0xf] }
  0xeb   : > { %v801_v49 = vsel %vm798_vm4, %v800_v46, %v796_v47  ;;  %v5187_v54 = vpop.eup %5186  ;;  %v4788_v46 = vld [vmem:[%s5754_s30 + $0x8] sm:$0xf0]  ;;  %s6081_s30 = scalar_lea.vmem %s6778_s5, %s5748_s24 }
  0xec   : > { %v809_v55 = vmul.f32 %v5187_v54, %v807_v53  ;;  %vm814_vm5 = vweird.f32 %v5187_v54  ;;  %v824_v2 = vmul.f32 0.0, %v801_v49  ;;  %921 = vmatpush.bf16.msra.mxu2 %v5781_v39  ;;  %1389 = vmatpush.bf16.msrb.mxu0 %v5781_v39  ;;  %v5799_v47 = vor.u32 %v5116_v44, %v4788_v46 }
  0xed   : > { %vm815_vm7 = vmor %vm813_vm6, %vm814_vm5 }
  0xee   : > { %v810_v56 = vsub.f32 1.0, %v809_v55  ;;  %935 = vmatpush.bf16.msra.mxu3 %v5799_v47  ;;  %1403 = vmatpush.bf16.msrb.mxu1 %v5799_v47 }
  0xf0   : > { %v811_v57 = vmul.f32 %v5187_v54, %v810_v56  ;;  %922 = vmatpush.bf16.msra.mxu2 %v5796_v45  ;;  %1390 = vmatpush.bf16.msrb.mxu0 %v5796_v45 }
  0xf2   : > { %v812_v58 = vadd.f32 %v5187_v54, %v811_v57  ;;  %1049 = vmatpush.bf16.msrb.mxu3 %v5764_v25  ;;  %1634 = vmatpush.bf16.msra.mxu1 %v5764_v25 }
  0xf4   : > { %v816_v61 = vsel %vm815_vm7, %v5187_v54, %v812_v58  ;;  %1036 = vmatpush.bf16.msrb.mxu2 %v5759_v19  ;;  %1621 = vmatpush.bf16.msra.mxu0 %v5759_v19 }
  0xf5   : > { %v821_v63 = vsel %vm818_vm8, %v820_v62, %v816_v61 }
  0xf6   : > { %v835_v6 = vmul.f32 0.0, %v821_v63  ;;  %1050 = vmatpush.bf16.msrb.mxu3 %v5773_v34  ;;  %1635 = vmatpush.bf16.msra.mxu1 %v5773_v34 }
  0xf8   : > { %1037 = vmatpush.bf16.msrb.mxu2 %v5769_v33  ;;  %1622 = vmatpush.bf16.msra.mxu0 %v5769_v33 }
  0xfa   : > { %1051 = vmatpush.bf16.msrb.mxu3 %v5785_v40  ;;  %1636 = vmatpush.bf16.msra.mxu1 %v5785_v40 }
  0xfc   : > { %1038 = vmatpush.bf16.msrb.mxu2 %v5781_v39  ;;  %1623 = vmatpush.bf16.msra.mxu0 %v5781_v39 }
  0xfe   : > { %1052 = vmatpush.bf16.msrb.mxu3 %v5799_v47  ;;  %1637 = vmatpush.bf16.msra.mxu1 %v5799_v47 }
 0x100   : > { %1039 = vmatpush.bf16.msrb.mxu2 %v5796_v45  ;;  %1624 = vmatpush.bf16.msra.mxu0 %v5796_v45 }
 0x111   : > { %v827_v48 = vpop.permute.xlu0 %826 }
 0x112   : > { %v829_v50 = vmul.f32 %v827_v48, %v801_v49 }
 0x114   : > { %831 = vrot.lane.b32.xlu1 %v829_v50, %s5600_s21 }
 0x14a   : > { %v838_v0 = vpop.permute.xlu0 %837 }
 0x14b   : > { %v840_v1 = vmul.f32 %v838_v0, %v821_v63 }
 0x14d   : > { %842 = vrot.lane.b32.xlu1 %v840_v1, %s5600_s21 }
 0x186   : > { %v832_v3 = vpop.permute.xlu1 %831 }
 0x187   : > { %v5737_v4 = vadd.f32 %v832_v3, %v824_v2 }
 0x189   : > { %5188 = vtanh.f32 %v5737_v4 }
 0x18f   : > { %v5189_v5 = vpop.eup %5188 }
 0x190   : > { %848 = vrot.lane.b32.xlu2 %v5189_v5, %s5600_s21 }
 0x1bf   : > { %v843_v7 = vpop.permute.xlu1 %842 }
 0x1c0   : > { %v5741_v8 = vadd.f32 %v843_v7, %v835_v6 }
 0x1c2   : > { %5190 = vtanh.f32 %v5741_v8 }
 0x1c8   : > { %v5191_v9 = vpop.eup %5190 }
 0x1c9   : > { %854 = vrot.lane.b32.xlu2 %v5191_v9, %s5600_s21 }
 0x1ea   : > { %v849_v10 = vpop.permute.xlu2 %848 }
 0x1eb   : > { %v851_v11 = vmul.f32 %v849_v10, %v801_v49 }
 0x1ed   : > { %859 = vrot.lane.b32.xlu0 %v851_v11, %s5601_s22 }
 0x223   : > { %v855_v12 = vpop.permute.xlu2 %854 }
 0x224   : > { %v857_v13 = vmul.f32 %v855_v12, %v821_v63 }
 0x226   : > { %863 = vrot.lane.b32.xlu1 %v857_v13, %s5602_s23 }
 0x25f   : > { %v860_v41 = vpop.permute.xlu0 %859 }
 0x260   : > { %867 = vst.msk [vmem:[#allocation2] sm:$0xff] %vm705_vm0, %v860_v41 }
 0x298   : > { %v864_v48 = vpop.permute.xlu1 %863 }
 0x299   : > { %v866_v49 = vsel %vm705_vm0, %v860_v41, %v864_v48  ;;  %869 = vst.msk [vmem:[#allocation2 + $0x38] sm:$0xff] %vm868_vm9, %v864_v48 }
 0x29a   : > { %v870_v50 = vpack.c.bf16 %v866_v49, %v866_v49 }
 0x29c   : > { %4816 = vmatmul.msk.bf16.vlgmr.msra.gmra.mxu2 %vm911_vm10, %v870_v50  ;;  %4817 = vmatmul.msk.bf16.vlgmr.msra.gmra.mxu3 %vm911_vm10, %v870_v50 }
 0x29d   : > { %1153 = vmatpush.bf16.msra.mxu2 %v5759_v19  ;;  %1166 = vmatpush.bf16.msra.mxu3 %v5764_v25 }
 0x2a1   : > { %1154 = vmatpush.bf16.msra.mxu2 %v5769_v33  ;;  %1167 = vmatpush.bf16.msra.mxu3 %v5773_v34 }
 0x2a5   : > { %1155 = vmatpush.bf16.msra.mxu2 %v5781_v39  ;;  %1168 = vmatpush.bf16.msra.mxu3 %v5785_v40 }
 0x2a9   : > { %1156 = vmatpush.bf16.msra.mxu2 %v5796_v45  ;;  %1169 = vmatpush.bf16.msra.mxu3 %v5799_v47 }
 0x31f   : > { %v924_v53 = vpop.f32.mrf.mxu2  ;;  %v937_v54 = vpop.f32.mrf.mxu3 }
 0x320   : > { %v941_v55 = vadd.f32 %v924_v53, %v730_v52  ;;  %v942_v56 = vadd.f32 %v937_v54, %v5731_v32 }
 0x322   : > { %5192 = vtanh.f32 %v941_v55  ;;  %v4818_v61 = vmul.f32 -1.442695, %v941_v55  ;;  %v4819_v1 = vmul.f32 -1.442695, %v942_v56 }
 0x323   : > { %5194 = vtanh.f32 %v942_v56 }
 0x324   : > { %5196 = vpow2.f32 %v4818_v61  ;;  %v769_v61 = vadd.f32 %v5728_v30, %v5711_v18 }
 0x327   : > { %v926_v57 = vpop.f32.mrf.mxu2  ;;  %v939_v58 = vpop.f32.mrf.mxu3 }
 0x328   : > { %v5193_v59 = vpop.eup %5192 }
 0x329   : > { %v5195_v60 = vpop.eup %5194  ;;  %985 = vrot.lane.b32.xlu2 %v5193_v59, %s5600_s21  ;;  %v732_v59 = vpop.f32.mrf.mxu0 }
 0x32a   : > { %996 = vrot.lane.b32.xlu0 %v5195_v60, %s5600_s21  ;;  %v5197_v62 = vpop.eup %5196  ;;  %v733_v60 = vadd.f32 %v732_v59, %v5709_v17 }
 0x32b   : > { %v946_v63 = vadd.f32 1.0, %v5197_v62 }
 0x32d   : > { %5198 = vrcp.f32 %v946_v63  ;;  %v958_v9 = vand.u32 2147483648, %v946_v63  ;;  %vm952_vm12 = vweird.f32 %v946_v63  ;;  %v956_v10 = vand.u32 2147483647, %v946_v63 }
 0x32e   : > { %5200 = vpow2.f32 %v4819_v1 }
 0x32f   : > { %v959_v12 = vor.u32 1.1754944e-38, %v958_v9  ;;  %vm957_vm14 = vcmp.eq.f32.partialorder %v956_v10, 8.507059e+37 }
 0x333   : > { %v5199_v0 = vpop.eup %5198 }
 0x334   : > { %v948_v2 = vmul.f32 %v5199_v0, %v946_v63  ;;  %v5201_v5 = vpop.eup %5200  ;;  %vm953_vm11 = vweird.f32 %v5199_v0 }
 0x335   : > { %v966_v6 = vadd.f32 1.0, %v5201_v5  ;;  %vm954_vm13 = vmor %vm952_vm12, %vm953_vm11 }
 0x336   : > { %v949_v32 = vsub.f32 1.0, %v948_v2 }
 0x337   : > { %5202 = vrcp.f32 %v966_v6  ;;  %v978_v31 = vand.u32 2147483648, %v966_v6  ;;  %vm972_vm1 = vweird.f32 %v966_v6  ;;  %v976_v35 = vand.u32 2147483647, %v966_v6 }
 0x338   : > { %v950_v3 = vmul.f32 %v5199_v0, %v949_v32 }
 0x339   : > { %v979_v37 = vor.u32 1.1754944e-38, %v978_v31  ;;  %vm977_vm3 = vcmp.eq.f32.partialorder %v976_v35, 8.507059e+37 }
 0x33a   : > { %v951_v7 = vadd.f32 %v5199_v0, %v950_v3 }
 0x33c   : > { %v955_v11 = vsel %vm954_vm13, %v5199_v0, %v951_v7 }
 0x33d   : > { %v960_v14 = vsel %vm957_vm14, %v959_v12, %v955_v11  ;;  %v5203_v16 = vpop.eup %5202 }
 0x33e   : > { %v968_v20 = vmul.f32 %v5203_v16, %v966_v6  ;;  %vm973_vm15 = vweird.f32 %v5203_v16  ;;  %v983_v43 = vmul.f32 %v960_v14, %v5737_v4 }
 0x33f   : > { %vm974_vm2 = vmor %vm972_vm1, %vm973_vm15 }
 0x340   : > { %v969_v21 = vsub.f32 1.0, %v968_v20 }
 0x342   : > { %v970_v23 = vmul.f32 %v5203_v16, %v969_v21 }
 0x344   : > { %v971_v28 = vadd.f32 %v5203_v16, %v970_v23 }
 0x346   : > { %v975_v36 = vsel %vm974_vm2, %v5203_v16, %v971_v28 }
 0x347   : > { %v980_v41 = vsel %vm977_vm3, %v979_v37, %v975_v36 }
 0x348   : > { %v994_v44 = vmul.f32 %v980_v41, %v5741_v8 }
 0x383   : > { %v986_v13 = vpop.permute.xlu2 %985 }
 0x384   : > { %v988_v15 = vmul.f32 %v986_v13, %v960_v14 }
 0x386   : > { %990 = vrot.lane.b32.xlu1 %v988_v15, %s5600_s21 }
 0x39c   : > { %v997_v38 = vpop.permute.xlu0 %996 }
 0x39d   : > { %v999_v42 = vmul.f32 %v997_v38, %v980_v41 }
 0x39f   : > { %1001 = vrot.lane.b32.xlu2 %v999_v42, %s5600_s21 }
 0x3f8   : > { %v991_v46 = vpop.permute.xlu1 %990 }
 0x3f9   : > { %v1002_v48 = vpop.permute.xlu2 %1001  ;;  %v5841_v49 = vadd.f32 %v991_v46, %v983_v43 }
 0x3fa   : > { %v5843_v50 = vadd.f32 %v1002_v48, %v994_v44 }
 0x3fb   : > { %5204 = vtanh.f32 %v5841_v49 }
 0x3fc   : > { %5206 = vtanh.f32 %v5843_v50 }
 0x401   : > { %v5205_v51 = vpop.eup %5204 }
 0x402   : > { %v5207_v52 = vpop.eup %5206  ;;  %1007 = vrot.lane.b32.xlu0 %v5205_v51, %s5600_s21 }
 0x403   : > { %1013 = vrot.lane.b32.xlu1 %v5207_v52, %s5600_s21 }
 0x474   : > { %v1008_v53 = vpop.permute.xlu0 %1007 }
 0x475   : > { %v1014_v4 = vpop.permute.xlu1 %1013  ;;  %v1010_v54 = vmul.f32 %v1008_v53, %v960_v14 }
 0x476   : > { %v1016_v8 = vmul.f32 %v1014_v4, %v980_v41 }
 0x477   : > { %1018 = vrot.lane.b32.xlu2 %v1010_v54, %s5601_s22 }
 0x478   : > { %1022 = vrot.lane.b32.xlu0 %v1016_v8, %s5602_s23 }
 0x4d1   : > { %v1019_v55 = vpop.permute.xlu2 %1018 }
 0x4d2   : > { %1026 = vst.msk [vmem:[#allocation2 + $0x8] sm:$0xff] %vm705_vm0, %v1019_v55 }
 0x4ea   : > { %v1023_v56 = vpop.permute.xlu0 %1022 }
 0x4eb   : > { %v1025_v57 = vsel %vm705_vm0, %v1019_v55, %v1023_v56  ;;  %1027 = vst.msk [vmem:[#allocation2 + $0x30] sm:$0xff] %vm868_vm9, %v1023_v56 }
 0x4ec   : > { %v1028_v58 = vpack.c.bf16 %v1025_v57, %v1025_v57 }
 0x4ee   : > { %4820 = vmatmul.msk.bf16.vlgmr.msrb.gmra.mxu2 %vm911_vm10, %v1028_v58  ;;  %4821 = vmatmul.msk.bf16.vlgmr.msrb.gmra.mxu3 %vm911_vm10, %v1028_v58 }
 0x4ef   : > { %1270 = vmatpush.bf16.msrb.mxu2 %v5759_v19  ;;  %1283 = vmatpush.bf16.msrb.mxu3 %v5764_v25 }
 0x4f3   : > { %1271 = vmatpush.bf16.msrb.mxu2 %v5769_v33  ;;  %1284 = vmatpush.bf16.msrb.mxu3 %v5773_v34 }
 0x4f7   : > { %1272 = vmatpush.bf16.msrb.mxu2 %v5781_v39  ;;  %1285 = vmatpush.bf16.msrb.mxu3 %v5785_v40 }
 0x4fb   : > { %1273 = vmatpush.bf16.msrb.mxu2 %v5796_v45  ;;  %1286 = vmatpush.bf16.msrb.mxu3 %v5799_v47 }
 0x571   : > { %v1041_v62 = vpop.f32.mrf.mxu2  ;;  %v1054_v63 = vpop.f32.mrf.mxu3 }
 0x572   : > { %v1058_v0 = vadd.f32 %v1041_v62, %v733_v60  ;;  %v1059_v1 = vadd.f32 %v1054_v63, %v769_v61 }
 0x574   : > { %5208 = vtanh.f32 %v1058_v0  ;;  %v4823_v6 = vmul.f32 -1.442695, %v1059_v1  ;;  %v4822_v10 = vmul.f32 -1.442695, %v1058_v0 }
 0x575   : > { %5210 = vtanh.f32 %v1059_v1 }
 0x576   : > { %5212 = vpow2.f32 %v4823_v6 }
 0x579   : > { %v1043_v2 = vpop.f32.mrf.mxu2  ;;  %v1056_v32 = vpop.f32.mrf.mxu3 }
 0x57a   : > { %v5209_v3 = vpop.eup %5208  ;;  %v734_v32 = vpop.f32.mrf.mxu0 }
 0x57b   : > { %v5211_v5 = vpop.eup %5210  ;;  %1102 = vrot.lane.b32.xlu1 %v5209_v3, %s5600_s21  ;;  %v735_v3 = vadd.f32 %v734_v32, %v5709_v17  ;;  %v764_v32 = vadd.f32 %v5723_v27, %v5711_v18 }
 0x57c   : > { %1113 = vrot.lane.b32.xlu2 %v5211_v5, %s5600_s21  ;;  %v5213_v7 = vpop.eup %5212 }
 0x57d   : > { %v1083_v9 = vadd.f32 1.0, %v5213_v7 }
 0x57f   : > { %5214 = vrcp.f32 %v1083_v9  ;;  %v1095_v20 = vand.u32 2147483648, %v1083_v9  ;;  %vm1089_vm5 = vweird.f32 %v1083_v9  ;;  %v1093_v21 = vand.u32 2147483647, %v1083_v9 }
 0x580   : > { %5216 = vpow2.f32 %v4822_v10 }
 0x581   : > { %v1096_v28 = vor.u32 1.1754944e-38, %v1095_v20  ;;  %vm1094_vm7 = vcmp.eq.f32.partialorder %v1093_v21, 8.507059e+37 }
 0x585   : > { %v5215_v30 = vpop.eup %5214 }
 0x586   : > { %v1085_v11 = vmul.f32 %v5215_v30, %v1083_v9  ;;  %v5217_v13 = vpop.eup %5216  ;;  %vm1090_vm4 = vweird.f32 %v5215_v30 }
 0x587   : > { %v1063_v15 = vadd.f32 1.0, %v5217_v13  ;;  %vm1091_vm6 = vmor %vm1089_vm5, %vm1090_vm4 }
 0x588   : > { %v1086_v12 = vsub.f32 1.0, %v1085_v11 }
 0x589   : > { %5218 = vrcp.f32 %v1063_v15  ;;  %v1075_v44 = vand.u32 2147483648, %v1063_v15  ;;  %vm1069_vm11 = vweird.f32 %v1063_v15  ;;  %v1073_v46 = vand.u32 2147483647, %v1063_v15 }
 0x58a   : > { %v1087_v14 = vmul.f32 %v5215_v30, %v1086_v12 }
 0x58b   : > { %v1076_v51 = vor.u32 1.1754944e-38, %v1075_v44  ;;  %vm1074_vm13 = vcmp.eq.f32.partialorder %v1073_v46, 8.507059e+37 }
 0x58c   : > { %v1088_v16 = vadd.f32 %v5215_v30, %v1087_v14 }
 0x58e   : > { %v1092_v23 = vsel %vm1091_vm6, %v5215_v30, %v1088_v16 }
 0x58f   : > { %v1097_v35 = vsel %vm1094_vm7, %v1096_v28, %v1092_v23  ;;  %v5219_v36 = vpop.eup %5218 }
 0x590   : > { %v1065_v38 = vmul.f32 %v5219_v36, %v1063_v15  ;;  %vm1070_vm8 = vweird.f32 %v5219_v36  ;;  %v1111_v54 = vmul.f32 %v1097_v35, %v5843_v50 }
 0x591   : > { %vm1071_vm12 = vmor %vm1069_vm11, %vm1070_vm8 }
 0x592   : > { %v1066_v41 = vsub.f32 1.0, %v1065_v38 }
 0x594   : > { %v1067_v42 = vmul.f32 %v5219_v36, %v1066_v41 }
 0x596   : > { %v1068_v43 = vadd.f32 %v5219_v36, %v1067_v42 }
 0x598   : > { %v1072_v48 = vsel %vm1071_vm12, %v5219_v36, %v1068_v43 }
 0x599   : > { %v1077_v53 = vsel %vm1074_vm13, %v1076_v51, %v1072_v48 }
 0x59a   : > { %v1100_v57 = vmul.f32 %v1077_v53, %v5841_v49 }
 0x5d6   : > { %v1114_v31 = vpop.permute.xlu2 %1113 }
 0x5d7   : > { %v1116_v37 = vmul.f32 %v1114_v31, %v1097_v35 }
 0x5d9   : > { %1118 = vrot.lane.b32.xlu1 %v1116_v37, %s5600_s21 }
 0x5ed   : > { %v1103_v52 = vpop.permute.xlu1 %1102 }
 0x5ee   : > { %v1105_v4 = vmul.f32 %v1103_v52, %v1077_v53 }
 0x5f0   : > { %1107 = vrot.lane.b32.xlu0 %v1105_v4, %s5600_s21 }
 0x64b   : > { %v1119_v8 = vpop.permute.xlu1 %1118 }
 0x64c   : > { %v5872_v55 = vadd.f32 %v1119_v8, %v1111_v54 }
 0x64e   : > { %5220 = vtanh.f32 %v5872_v55 }
 0x654   : > { %v5221_v56 = vpop.eup %5220 }
 0x655   : > { %1130 = vrot.lane.b32.xlu0 %v5221_v56, %s5600_s21 }
 0x662   : > { %v1108_v58 = vpop.permute.xlu0 %1107 }
 0x663   : > { %v5877_v59 = vadd.f32 %v1108_v58, %v1100_v57 }
 0x665   : > { %5222 = vtanh.f32 %v5877_v59 }
 0x66b   : > { %v5223_v60 = vpop.eup %5222 }
 0x66c   : > { %1124 = vrot.lane.b32.xlu2 %v5223_v60, %s5600_s21 }
 0x6c6   : > { %v1125_v61 = vpop.permute.xlu2 %1124 }
 0x6c7   : > { %v1131_v50 = vpop.permute.xlu0 %1130  ;;  %v1127_v62 = vmul.f32 %v1125_v61, %v1077_v53 }
 0x6c8   : > { %v1133_v63 = vmul.f32 %v1131_v50, %v1097_v35 }
 0x6c9   : > { %1135 = vrot.lane.b32.xlu1 %v1127_v62, %s5601_s22 }
 0x6ca   : > { %1139 = vrot.lane.b32.xlu2 %v1133_v63, %s5602_s23 }
 0x724   : > { %v1140_v0 = vpop.permute.xlu2 %1139 }
 0x725   : > { %1144 = vst.msk [vmem:[#allocation2 + $0x28] sm:$0xff] %vm868_vm9, %v1140_v0 }
 0x73b   : > { %v1136_v49 = vpop.permute.xlu1 %1135 }
 0x73c   : > { %v1142_v1 = vsel %vm705_vm0, %v1136_v49, %v1140_v0  ;;  %1143 = vst.msk [vmem:[#allocation2 + $0x10] sm:$0xff] %vm705_vm0, %v1136_v49 }
 0x73d   : > { %v1145_v2 = vpack.c.bf16 %v1142_v1, %v1142_v1  ;;  %v737_v1 = vpop.f32.mrf.mxu0 }
 0x73f   : > { %4824 = vmatmul.msk.bf16.vlgmr.msra.gmra.mxu2 %vm911_vm10, %v1145_v2  ;;  %4825 = vmatmul.msk.bf16.vlgmr.msra.gmra.mxu3 %vm911_vm10, %v1145_v2  ;;  %v738_v2 = vadd.f32 %v737_v1, %v5709_v17 }
 0x740   : > { %1504 = vmatpush.bf16.msra.mxu2 %v5759_v19  ;;  %1517 = vmatpush.bf16.msra.mxu3 %v5764_v25 }
 0x744   : > { %1505 = vmatpush.bf16.msra.mxu2 %v5769_v33  ;;  %1518 = vmatpush.bf16.msra.mxu3 %v5773_v34 }
 0x748   : > { %1506 = vmatpush.bf16.msra.mxu2 %v5781_v39  ;;  %1519 = vmatpush.bf16.msra.mxu3 %v5785_v40 }
 0x74c   : > { %1507 = vmatpush.bf16.msra.mxu2 %v5796_v45  ;;  %1520 = vmatpush.bf16.msra.mxu3 %v5799_v47 }
 0x7c2   : > { %v1158_v5 = vpop.f32.mrf.mxu2  ;;  %v1171_v6 = vpop.f32.mrf.mxu3 }
 0x7c3   : > { %v1175_v19 = vadd.f32 %v1158_v5, %v735_v3  ;;  %v1176_v25 = vadd.f32 %v1171_v6, %v5726_v29 }
 0x7c5   : > { %5224 = vtanh.f32 %v1175_v19  ;;  %v4826_v40 = vmul.f32 -1.442695, %v1175_v19  ;;  %v4827_v45 = vmul.f32 -1.442695, %v1176_v25 }
 0x7c6   : > { %5226 = vtanh.f32 %v1176_v25 }
 0x7c7   : > { %5228 = vpow2.f32 %v4826_v40 }
 0x7c8   : > { %5230 = vpow2.f32 %v4827_v45 }
 0x7ca   : > { %v1160_v33 = vpop.f32.mrf.mxu2  ;;  %v1173_v34 = vpop.f32.mrf.mxu3 }
 0x7cb   : > { %v5225_v7 = vpop.eup %5224 }
 0x7cc   : > { %v5227_v39 = vpop.eup %5226  ;;  %1219 = vrot.lane.b32.xlu0 %v5225_v7, %s5600_s21 }
 0x7cd   : > { %1230 = vrot.lane.b32.xlu1 %v5227_v39, %s5600_s21  ;;  %v5229_v47 = vpop.eup %5228 }
 0x7ce   : > { %v5231_v9 = vpop.eup %5230  ;;  %v1180_v30 = vadd.f32 1.0, %v5229_v47 }
 0x7cf   : > { %v1200_v10 = vadd.f32 1.0, %v5231_v9 }
 0x7d0   : > { %5232 = vrcp.f32 %v1180_v30  ;;  %v1192_v28 = vand.u32 2147483648, %v1180_v30  ;;  %vm1186_vm1 = vweird.f32 %v1180_v30  ;;  %v1190_v35 = vand.u32 2147483647, %v1180_v30 }
 0x7d1   : > { %5234 = vrcp.f32 %v1200_v10  ;;  %v1212_v31 = vand.u32 2147483648, %v1200_v10  ;;  %vm1206_vm2 = vweird.f32 %v1200_v10  ;;  %v1210_v36 = vand.u32 2147483647, %v1200_v10 }
 0x7d2   : > { %v1193_v41 = vor.u32 1.1754944e-38, %v1192_v28  ;;  %vm1191_vm5 = vcmp.eq.f32.partialorder %v1190_v35, 8.507059e+37 }
 0x7d3   : > { %v1213_v42 = vor.u32 1.1754944e-38, %v1212_v31  ;;  %vm1211_vm6 = vcmp.eq.f32.partialorder %v1210_v36, 8.507059e+37 }
 0x7d6   : > { %v5233_v29 = vpop.eup %5232 }
 0x7d7   : > { %v5235_v11 = vpop.eup %5234  ;;  %v1182_v12 = vmul.f32 %v5233_v29, %v1180_v30  ;;  %vm1187_vm14 = vweird.f32 %v5233_v29 }
 0x7d8   : > { %v1202_v13 = vmul.f32 %v5235_v11, %v1200_v10  ;;  %vm1207_vm15 = vweird.f32 %v5235_v11  ;;  %vm1188_vm3 = vmor %vm1186_vm1, %vm1187_vm14 }
 0x7d9   : > { %v1183_v14 = vsub.f32 1.0, %v1182_v12  ;;  %vm1208_vm4 = vmor %vm1206_vm2, %vm1207_vm15 }
 0x7da   : > { %v1203_v15 = vsub.f32 1.0, %v1202_v13 }
 0x7db   : > { %v1184_v16 = vmul.f32 %v5233_v29, %v1183_v14 }
 0x7dc   : > { %v1204_v20 = vmul.f32 %v5235_v11, %v1203_v15 }
 0x7dd   : > { %v1185_v21 = vadd.f32 %v5233_v29, %v1184_v16 }
 0x7de   : > { %v1205_v23 = vadd.f32 %v5235_v11, %v1204_v20 }
 0x7df   : > { %v1189_v37 = vsel %vm1188_vm3, %v5233_v29, %v1185_v21 }
 0x7e0   : > { %v1209_v38 = vsel %vm1208_vm4, %v5235_v11, %v1205_v23  ;;  %v1194_v44 = vsel %vm1191_vm5, %v1193_v41, %v1189_v37 }
 0x7e1   : > { %v1214_v48 = vsel %vm1211_vm6, %v1213_v42, %v1209_v38  ;;  %v1217_v53 = vmul.f32 %v1194_v44, %v5877_v59 }
 0x7e2   : > { %v1228_v56 = vmul.f32 %v1214_v48, %v5872_v55 }
 0x83e   : > { %v1220_v43 = vpop.permute.xlu0 %1219 }
 0x83f   : > { %v1231_v46 = vpop.permute.xlu1 %1230  ;;  %v1222_v51 = vmul.f32 %v1220_v43, %v1194_v44 }
 0x840   : > { %v1233_v52 = vmul.f32 %v1231_v46, %v1214_v48 }
 0x841   : > { %1224 = vrot.lane.b32.xlu2 %v1222_v51, %s5600_s21 }
 0x842   : > { %1235 = vrot.lane.b32.xlu0 %v1233_v52, %s5600_s21 }
 0x89b   : > { %v1225_v4 = vpop.permute.xlu2 %1224 }
 0x89c   : > { %v5903_v54 = vadd.f32 %v1225_v4, %v1217_v53 }
 0x89e   : > { %5236 = vtanh.f32 %v5903_v54 }
 0x8a4   : > { %v5237_v8 = vpop.eup %5236 }
 0x8a5   : > { %1241 = vrot.lane.b32.xlu1 %v5237_v8, %s5600_s21 }
 0x8b4   : > { %v1236_v57 = vpop.permute.xlu0 %1235 }
 0x8b5   : > { %v5908_v58 = vadd.f32 %v1236_v57, %v1228_v56 }
 0x8b7   : > { %5238 = vtanh.f32 %v5908_v58 }
 0x8bd   : > { %v5239_v60 = vpop.eup %5238 }
 0x8be   : > { %1247 = vrot.lane.b32.xlu2 %v5239_v60, %s5600_s21 }
 0x917   : > { %v1242_v61 = vpop.permute.xlu1 %1241 }
 0x918   : > { %v1248_v59 = vpop.permute.xlu2 %1247  ;;  %v1244_v50 = vmul.f32 %v1242_v61, %v1194_v44 }
 0x919   : > { %v1250_v62 = vmul.f32 %v1248_v59, %v1214_v48 }
 0x91a   : > { %1252 = vrot.lane.b32.xlu0 %v1244_v50, %s5601_s22 }
 0x91b   : > { %1256 = vrot.lane.b32.xlu1 %v1250_v62, %s5602_s23 }
 0x98c   : > { %v1253_v63 = vpop.permute.xlu0 %1252 }
 0x98d   : > { %1260 = vst.msk [vmem:[#allocation2 + $0x18] sm:$0xff] %vm705_vm0, %v1253_v63  ;;  %v1257_v55 = vpop.permute.xlu1 %1256 }
 0x98e   : > { %v1259_v0 = vsel %vm705_vm0, %v1253_v63, %v1257_v55  ;;  %1261 = vst.msk [vmem:[#allocation2 + $0x20] sm:$0xff] %vm868_vm9, %v1257_v55 }
 0x98f   : > { %v1262_v49 = vpack.c.bf16 %v1259_v0, %v1259_v0  ;;  %v739_v0 = vpop.f32.mrf.mxu0 }
 0x991   : > { %4828 = vmatmul.msk.bf16.vlgmr.msrb.gmra.mxu2 %vm911_vm10, %v1262_v49  ;;  %4829 = vmatmul.msk.bf16.vlgmr.msrb.gmra.mxu3 %vm911_vm10, %v1262_v49 }
 0x997   : > { %v5943_v49 = vpop.f32.mrf.mxu0 }
 0x99f   : > { %v5945_v1 = vpop.f32.mrf.mxu0 }
 0xa14   : > { %v1275_v3 = vpop.f32.mrf.mxu2  ;;  %v1288_v5 = vpop.f32.mrf.mxu3 }
 0xa15   : > { %v1292_v6 = vadd.f32 %v1275_v3, %v738_v2  ;;  %v1293_v19 = vadd.f32 %v1288_v5, %v764_v32  ;;  %v740_v2 = vadd.f32 %v739_v0, %v5709_v17 }
 0xa17   : > { %5240 = vtanh.f32 %v1292_v6  ;;  %v4830_v39 = vmul.f32 -1.442695, %v1292_v6  ;;  %v4831_v47 = vmul.f32 -1.442695, %v1293_v19 }
 0xa18   : > { %5242 = vtanh.f32 %v1293_v19 }
 0xa19   : > { %5244 = vpow2.f32 %v4830_v39 }
 0xa1c   : > { %v1277_v25 = vpop.f32.mrf.mxu2  ;;  %v1290_v33 = vpop.f32.mrf.mxu3 }
 0xa1d   : > { %v5241_v34 = vpop.eup %5240 }
 0xa1e   : > { %v5243_v7 = vpop.eup %5242  ;;  %1336 = vrot.lane.b32.xlu2 %v5241_v34, %s5600_s21 }
 0xa1f   : > { %1347 = vrot.lane.b32.xlu0 %v5243_v7, %s5600_s21  ;;  %v5245_v40 = vpop.eup %5244 }
 0xa20   : > { %v1297_v45 = vadd.f32 1.0, %v5245_v40 }
 0xa22   : > { %5246 = vrcp.f32 %v1297_v45  ;;  %v1309_v13 = vand.u32 2147483648, %v1297_v45  ;;  %vm1303_vm8 = vweird.f32 %v1297_v45  ;;  %v1307_v14 = vand.u32 2147483647, %v1297_v45 }
 0xa23   : > { %5248 = vpow2.f32 %v4831_v47 }
 0xa24   : > { %v1310_v16 = vor.u32 1.1754944e-38, %v1309_v13  ;;  %vm1308_vm12 = vcmp.eq.f32.partialorder %v1307_v14, 8.507059e+37 }
 0xa28   : > { %v5247_v27 = vpop.eup %5246 }
 0xa29   : > { %v1299_v9 = vmul.f32 %v5247_v27, %v1297_v45  ;;  %v5249_v29 = vpop.eup %5248  ;;  %vm1304_vm7 = vweird.f32 %v5247_v27 }
 0xa2a   : > { %v1317_v11 = vadd.f32 1.0, %v5249_v29  ;;  %vm1305_vm11 = vmor %vm1303_vm8, %vm1304_vm7 }
 0xa2b   : > { %v1300_v30 = vsub.f32 1.0, %v1299_v9 }
 0xa2c   : > { %5250 = vrcp.f32 %v1317_v11  ;;  %v1329_v38 = vand.u32 2147483648, %v1317_v11  ;;  %vm1323_vm14 = vweird.f32 %v1317_v11  ;;  %v1327_v41 = vand.u32 2147483647, %v1317_v11 }
 0xa2d   : > { %v1301_v10 = vmul.f32 %v5247_v27, %v1300_v30 }
 0xa2e   : > { %v1330_v43 = vor.u32 1.1754944e-38, %v1329_v38  ;;  %vm1328_vm1 = vcmp.eq.f32.partialorder %v1327_v41, 8.507059e+37 }
 0xa2f   : > { %v1302_v12 = vadd.f32 %v5247_v27, %v1301_v10 }
 0xa31   : > { %v1306_v15 = vsel %vm1305_vm11, %v5247_v27, %v1302_v12 }
 0xa32   : > { %v1311_v21 = vsel %vm1308_vm12, %v1310_v16, %v1306_v15  ;;  %v5251_v28 = vpop.eup %5250 }
 0xa33   : > { %v1319_v31 = vmul.f32 %v5251_v28, %v1317_v11  ;;  %vm1324_vm13 = vweird.f32 %v5251_v28  ;;  %v1334_v51 = vmul.f32 %v1311_v21, %v5903_v54 }
 0xa34   : > { %vm1325_vm15 = vmor %vm1323_vm14, %vm1324_vm13 }
 0xa35   : > { %v1320_v35 = vsub.f32 1.0, %v1319_v31 }
 0xa37   : > { %v1321_v36 = vmul.f32 %v5251_v28, %v1320_v35 }
 0xa39   : > { %v1322_v37 = vadd.f32 %v5251_v28, %v1321_v36 }
 0xa3b   : > { %v1326_v42 = vsel %vm1325_vm15, %v5251_v28, %v1322_v37 }
 0xa3c   : > { %v1331_v46 = vsel %vm1328_vm1, %v1330_v43, %v1326_v42 }
 0xa3d   : > { %v1345_v52 = vmul.f32 %v1331_v46, %v5908_v58 }
 0xa78   : > { %v1337_v20 = vpop.permute.xlu2 %1336 }
 0xa79   : > { %v1339_v23 = vmul.f32 %v1337_v20, %v1311_v21 }
 0xa7b   : > { %1341 = vrot.lane.b32.xlu1 %v1339_v23, %s5600_s21 }
 0xa91   : > { %v1348_v44 = vpop.permute.xlu0 %1347 }
 0xa92   : > { %v1350_v48 = vmul.f32 %v1348_v44, %v1331_v46 }
 0xa94   : > { %1352 = vrot.lane.b32.xlu2 %v1350_v48, %s5600_s21 }
 0xaed   : > { %v1342_v53 = vpop.permute.xlu1 %1341 }
 0xaee   : > { %v1353_v4 = vpop.permute.xlu2 %1352  ;;  %v5928_v8 = vadd.f32 %v1342_v53, %v1334_v51 }
 0xaef   : > { %v5930_v56 = vadd.f32 %v1353_v4, %v1345_v52 }
 0xaf0   : > { %5252 = vtanh.f32 %v5928_v8 }
 0xaf1   : > { %5254 = vtanh.f32 %v5930_v56 }
 0xaf6   : > { %v5253_v57 = vpop.eup %5252 }
 0xaf7   : > { %v5255_v60 = vpop.eup %5254  ;;  %1358 = vrot.lane.b32.xlu0 %v5253_v57, %s5600_s21 }
 0xaf8   : > { %1364 = vrot.lane.b32.xlu1 %v5255_v60, %s5600_s21 }
 0xb69   : > { %v1359_v61 = vpop.permute.xlu0 %1358 }
 0xb6a   : > { %v1365_v54 = vpop.permute.xlu1 %1364  ;;  %v1361_v59 = vmul.f32 %v1359_v61, %v1311_v21 }
 0xb6b   : > { %v1367_v58 = vmul.f32 %v1365_v54, %v1331_v46 }
 0xb6c   : > { %1369 = vrot.lane.b32.xlu2 %v1361_v59, %s5601_s22 }
 0xb6d   : > { %1373 = vrot.lane.b32.xlu0 %v1367_v58, %s5602_s23 }
 0xbc6   : > { %v1370_v50 = vpop.permute.xlu2 %1369 }
 0xbc7   : > { %1377 = vst.msk [vmem:[#allocation2 + $0x20] sm:$0xff] %vm705_vm0, %v1370_v50 }
 0xbdf   : > { %v1374_v62 = vpop.permute.xlu0 %1373 }
 0xbe0   : > { %v1376_v63 = vsel %vm705_vm0, %v1370_v50, %v1374_v62  ;;  %1378 = vst.msk [vmem:[#allocation2 + $0x18] sm:$0xff] %vm868_vm9, %v1374_v62 }
 0xbe1   : > { %v1379_v55 = vpack.c.bf16 %v1376_v63, %v1376_v63  ;;  %v759_v63 = vadd.f32 %v5717_v24, %v5711_v18 }
 0xbe3   : > { %4832 = vmatmul.msk.bf16.vlgmr.msrb.gmra.mxu0 %vm911_vm10, %v1379_v55  ;;  %4833 = vmatmul.msk.bf16.vlgmr.msrb.gmra.mxu1 %vm911_vm10, %v1379_v55  ;;  %v743_v55 = vadd.f32 %v5943_v49, %v5709_v17 }
 0xc60   : > { %v1392_v32 = vpop.f32.mrf.mxu0  ;;  %v1405_v3 = vpop.f32.mrf.mxu1 }
 0xc61   : > { %v1409_v5 = vadd.f32 %v1392_v32, %v740_v2  ;;  %v1410_v6 = vadd.f32 %v1405_v3, %v5721_v26 }
 0xc63   : > { %5256 = vtanh.f32 %v1409_v5  ;;  %v4835_v7 = vmul.f32 -1.442695, %v1410_v6  ;;  %v4834_v27 = vmul.f32 -1.442695, %v1409_v5 }
 0xc64   : > { %5258 = vtanh.f32 %v1410_v6 }
 0xc65   : > { %5260 = vpow2.f32 %v4835_v7 }
 0xc68   : > { %v1394_v19 = vpop.f32.mrf.mxu0  ;;  %v1407_v25 = vpop.f32.mrf.mxu1 }
 0xc69   : > { %v5257_v33 = vpop.eup %5256 }
 0xc6a   : > { %v5259_v34 = vpop.eup %5258  ;;  %1453 = vrot.lane.b32.xlu1 %v5257_v33, %s5600_s21 }
 0xc6b   : > { %1464 = vrot.lane.b32.xlu2 %v5259_v34, %s5600_s21  ;;  %v5261_v39 = vpop.eup %5260 }
 0xc6c   : > { %v1434_v40 = vadd.f32 1.0, %v5261_v39 }
 0xc6e   : > { %5262 = vrcp.f32 %v1434_v40  ;;  %v1446_v11 = vand.u32 2147483648, %v1434_v40  ;;  %vm1440_vm3 = vweird.f32 %v1434_v40  ;;  %v1444_v12 = vand.u32 2147483647, %v1434_v40 }
 0xc6f   : > { %5264 = vpow2.f32 %v4834_v27 }
 0xc70   : > { %v1447_v14 = vor.u32 1.1754944e-38, %v1446_v11  ;;  %vm1445_vm5 = vcmp.eq.f32.partialorder %v1444_v12, 8.507059e+37 }
 0xc74   : > { %v5263_v45 = vpop.eup %5262 }
 0xc75   : > { %v1436_v47 = vmul.f32 %v5263_v45, %v1434_v40  ;;  %v5265_v9 = vpop.eup %5264  ;;  %vm1441_vm2 = vweird.f32 %v5263_v45 }
 0xc76   : > { %v1414_v10 = vadd.f32 1.0, %v5265_v9  ;;  %vm1442_vm4 = vmor %vm1440_vm3, %vm1441_vm2 }
 0xc77   : > { %v1437_v26 = vsub.f32 1.0, %v1436_v47 }
 0xc78   : > { %5266 = vrcp.f32 %v1414_v10  ;;  %v1426_v36 = vand.u32 2147483648, %v1414_v10  ;;  %vm1420_vm7 = vweird.f32 %v1414_v10  ;;  %v1424_v37 = vand.u32 2147483647, %v1414_v10 }
 0xc79   : > { %v1438_v30 = vmul.f32 %v5263_v45, %v1437_v26 }
 0xc7a   : > { %v1427_v41 = vor.u32 1.1754944e-38, %v1426_v36  ;;  %vm1425_vm11 = vcmp.eq.f32.partialorder %v1424_v37, 8.507059e+37 }
 0xc7b   : > { %v1439_v29 = vadd.f32 %v5263_v45, %v1438_v30 }
 0xc7d   : > { %v1443_v13 = vsel %vm1442_vm4, %v5263_v45, %v1439_v29 }
 0xc7e   : > { %v1448_v16 = vsel %vm1445_vm5, %v1447_v14, %v1443_v13  ;;  %v5267_v20 = vpop.eup %5266 }
 0xc7f   : > { %v1416_v23 = vmul.f32 %v5267_v20, %v1414_v10  ;;  %vm1421_vm6 = vweird.f32 %v5267_v20  ;;  %v1462_v46 = vmul.f32 %v1448_v16, %v5930_v56 }
 0xc80   : > { %vm1422_vm8 = vmor %vm1420_vm7, %vm1421_vm6 }
 0xc81   : > { %v1417_v28 = vsub.f32 1.0, %v1416_v23 }
 0xc83   : > { %v1418_v31 = vmul.f32 %v5267_v20, %v1417_v28 }
 0xc85   : > { %v1419_v35 = vadd.f32 %v5267_v20, %v1418_v31 }
 0xc87   : > { %v1423_v38 = vsel %vm1422_vm8, %v5267_v20, %v1419_v35 }
 0xc88   : > { %v1428_v43 = vsel %vm1425_vm11, %v1427_v41, %v1423_v38 }
 0xc89   : > { %v1451_v53 = vmul.f32 %v1428_v43, %v5928_v8 }
 0xcc5   : > { %v1465_v15 = vpop.permute.xlu2 %1464 }
 0xcc6   : > { %v1467_v21 = vmul.f32 %v1465_v15, %v1448_v16 }
 0xcc8   : > { %1469 = vrot.lane.b32.xlu1 %v1467_v21, %s5600_s21 }
 0xcdc   : > { %v1454_v42 = vpop.permute.xlu1 %1453 }
 0xcdd   : > { %v1456_v44 = vmul.f32 %v1454_v42, %v1428_v43 }
 0xcdf   : > { %1458 = vrot.lane.b32.xlu0 %v1456_v44, %s5600_s21 }
 0xd3a   : > { %v1470_v48 = vpop.permute.xlu1 %1469 }
 0xd3b   : > { %v5954_v51 = vadd.f32 %v1470_v48, %v1462_v46 }
 0xd3d   : > { %5268 = vtanh.f32 %v5954_v51 }
 0xd43   : > { %v5269_v52 = vpop.eup %5268 }
 0xd44   : > { %1481 = vrot.lane.b32.xlu0 %v5269_v52, %s5600_s21 }
 0xd51   : > { %v1459_v4 = vpop.permute.xlu0 %1458 }
 0xd52   : > { %v5959_v57 = vadd.f32 %v1459_v4, %v1451_v53 }
 0xd54   : > { %5270 = vtanh.f32 %v5959_v57 }
 0xd5a   : > { %v5271_v60 = vpop.eup %5270 }
 0xd5b   : > { %1475 = vrot.lane.b32.xlu2 %v5271_v60, %s5600_s21 }
 0xdb5   : > { %v1476_v61 = vpop.permute.xlu2 %1475 }
 0xdb6   : > { %v1482_v56 = vpop.permute.xlu0 %1481  ;;  %v1478_v54 = vmul.f32 %v1476_v61, %v1428_v43 }
 0xdb7   : > { %v1484_v59 = vmul.f32 %v1482_v56, %v1448_v16 }
 0xdb8   : > { %1486 = vrot.lane.b32.xlu1 %v1478_v54, %s5601_s22 }
 0xdb9   : > { %1490 = vrot.lane.b32.xlu2 %v1484_v59, %s5602_s23  ;;  %v745_v59 = vadd.f32 %v5945_v1, %v5709_v17 }
 0xe13   : > { %v1491_v58 = vpop.permute.xlu2 %1490 }
 0xe14   : > { %1495 = vst.msk [vmem:[#allocation2 + $0x10] sm:$0xff] %vm868_vm9, %v1491_v58 }
 0xe2a   : > { %v1487_v8 = vpop.permute.xlu1 %1486 }
 0xe2b   : > { %v1493_v50 = vsel %vm705_vm0, %v1487_v8, %v1491_v58  ;;  %1494 = vst.msk [vmem:[#allocation2 + $0x28] sm:$0xff] %vm705_vm0, %v1487_v8 }
 0xe2c   : > { %v1496_v62 = vpack.c.bf16 %v1493_v50, %v1493_v50 }
 0xe2e   : > { %4836 = vmatmul.msk.bf16.vlgmr.msra.gmra.mxu2 %vm911_vm10, %v1496_v62  ;;  %4837 = vmatmul.msk.bf16.vlgmr.msra.gmra.mxu3 %vm911_vm10, %v1496_v62 }
 0xeb1   : > { %v1509_v0 = vpop.f32.mrf.mxu2  ;;  %v1522_v2 = vpop.f32.mrf.mxu3 }
 0xeb2   : > { %v1526_v32 = vadd.f32 %v1509_v0, %v743_v55  ;;  %v1527_v3 = vadd.f32 %v1522_v2, %v759_v63 }
 0xeb4   : > { %5272 = vtanh.f32 %v1526_v32  ;;  %v4838_v33 = vmul.f32 -1.442695, %v1526_v32  ;;  %v4839_v34 = vmul.f32 -1.442695, %v1527_v3 }
 0xeb5   : > { %5274 = vtanh.f32 %v1527_v3 }
 0xeb6   : > { %5276 = vpow2.f32 %v4838_v33 }
 0xeb7   : > { %5278 = vpow2.f32 %v4839_v34 }
 0xeb9   : > { %v1511_v5 = vpop.f32.mrf.mxu2  ;;  %v1524_v6 = vpop.f32.mrf.mxu3 }
 0xeba   : > { %v5273_v19 = vpop.eup %5272 }
 0xebb   : > { %v5275_v25 = vpop.eup %5274  ;;  %1570 = vrot.lane.b32.xlu0 %v5273_v19, %s5600_s21 }
 0xebc   : > { %1581 = vrot.lane.b32.xlu1 %v5275_v25, %s5600_s21  ;;  %v5277_v18 = vpop.eup %5276 }
 0xebd   : > { %v5279_v24 = vpop.eup %5278  ;;  %v1531_v49 = vadd.f32 1.0, %v5277_v18 }
 0xebe   : > { %v1551_v7 = vadd.f32 1.0, %v5279_v24 }
 0xebf   : > { %5280 = vrcp.f32 %v1531_v49  ;;  %v1543_v11 = vand.u32 2147483648, %v1531_v49  ;;  %vm1537_vm14 = vweird.f32 %v1531_v49  ;;  %v1541_v13 = vand.u32 2147483647, %v1531_v49 }
 0xec0   : > { %5282 = vrcp.f32 %v1551_v7  ;;  %v1563_v12 = vand.u32 2147483648, %v1551_v7  ;;  %vm1557_vm15 = vweird.f32 %v1551_v7  ;;  %v1561_v14 = vand.u32 2147483647, %v1551_v7 }
 0xec1   : > { %v1544_v20 = vor.u32 1.1754944e-38, %v1543_v11  ;;  %vm1542_vm3 = vcmp.eq.f32.partialorder %v1541_v13, 8.507059e+37 }
 0xec2   : > { %v1564_v21 = vor.u32 1.1754944e-38, %v1563_v12  ;;  %vm1562_vm4 = vcmp.eq.f32.partialorder %v1561_v14, 8.507059e+37 }
 0xec5   : > { %v5281_v39 = vpop.eup %5280 }
 0xec6   : > { %v5283_v40 = vpop.eup %5282  ;;  %v1533_v45 = vmul.f32 %v5281_v39, %v1531_v49  ;;  %vm1538_vm12 = vweird.f32 %v5281_v39 }
 0xec7   : > { %v1553_v27 = vmul.f32 %v5283_v40, %v1551_v7  ;;  %vm1558_vm13 = vweird.f32 %v5283_v40  ;;  %vm1539_vm1 = vmor %vm1537_vm14, %vm1538_vm12 }
 0xec8   : > { %v1534_v47 = vsub.f32 1.0, %v1533_v45  ;;  %vm1559_vm2 = vmor %vm1557_vm15, %vm1558_vm13 }
 0xec9   : > { %v1554_v26 = vsub.f32 1.0, %v1553_v27 }
 0xeca   : > { %v1535_v9 = vmul.f32 %v5281_v39, %v1534_v47 }
 0xecb   : > { %v1555_v30 = vmul.f32 %v5283_v40, %v1554_v26 }
 0xecc   : > { %v1536_v10 = vadd.f32 %v5281_v39, %v1535_v9 }
 0xecd   : > { %v1556_v29 = vadd.f32 %v5283_v40, %v1555_v30 }
 0xece   : > { %v1540_v15 = vsel %vm1539_vm1, %v5281_v39, %v1536_v10 }
 0xecf   : > { %v1560_v16 = vsel %vm1559_vm2, %v5283_v40, %v1556_v29  ;;  %v1545_v28 = vsel %vm1542_vm3, %v1544_v20, %v1540_v15 }
 0xed0   : > { %v1565_v35 = vsel %vm1562_vm4, %v1564_v21, %v1560_v16  ;;  %v1568_v38 = vmul.f32 %v1545_v28, %v5959_v57 }
 0xed1   : > { %v1579_v44 = vmul.f32 %v1565_v35, %v5954_v51 }
 0xf2d   : > { %v1571_v23 = vpop.permute.xlu0 %1570 }
 0xf2e   : > { %v1582_v31 = vpop.permute.xlu1 %1581  ;;  %v1573_v36 = vmul.f32 %v1571_v23, %v1545_v28 }
 0xf2f   : > { %v1584_v37 = vmul.f32 %v1582_v31, %v1565_v35 }
 0xf30   : > { %1575 = vrot.lane.b32.xlu2 %v1573_v36, %s5600_s21 }
 0xf31   : > { %1586 = vrot.lane.b32.xlu0 %v1584_v37, %s5600_s21 }
 0xf8a   : > { %v1576_v41 = vpop.permute.xlu2 %1575 }
 0xf8b   : > { %v5979_v42 = vadd.f32 %v1576_v41, %v1568_v38 }
 0xf8d   : > { %5284 = vtanh.f32 %v5979_v42 }
 0xf93   : > { %v5285_v43 = vpop.eup %5284 }
 0xf94   : > { %1592 = vrot.lane.b32.xlu1 %v5285_v43, %s5600_s21  ;;  %v4870_v43 = vld [vmem:[%s609_s16 + $0x30] sm:$0xf] }
 0xfa3   : > { %v1587_v46 = vpop.permute.xlu0 %1586 }
 0xfa4   : > { %v5984_v48 = vadd.f32 %v1587_v46, %v1579_v44  ;;  %v5131_v44 = vld [vmem:[%s609_s16 + $0x34] sm:$0xf0]  ;;  %v5130_v46 = vld [vmem:[%s609_s16 + $0x34] sm:$0xf] }
 0xfa6   : > { %5286 = vtanh.f32 %v5984_v48 }
 0xfac   : > { %v5287_v52 = vpop.eup %5286 }
 0xfad   : > { %1598 = vrot.lane.b32.xlu2 %v5287_v52, %s5600_s21  ;;  %v4872_v52 = vld [vmem:[%s609_s16 + $0x38] sm:$0xf0] }
0x1006   : > { %v1593_v53 = vpop.permute.xlu1 %1592 }
0x1007   : > { %v1599_v4 = vpop.permute.xlu2 %1598  ;;  %v1595_v57 = vmul.f32 %v1593_v53, %v1545_v28  ;;  %v4862_v53 = vld [vmem:[%s609_s16 + $0x20] sm:$0xf] }
0x1008   : > { %v1601_v60 = vmul.f32 %v1599_v4, %v1565_v35  ;;  %v5129_v4 = vld [vmem:[%s609_s16 + $0x24] sm:$0xf0] }
0x1009   : > { %1603 = vrot.lane.b32.xlu0 %v1595_v57, %s5601_s22  ;;  %v4875_v57 = vor.u32 %v5130_v46, %v4872_v52 }
0x100a   : > { %1607 = vrot.lane.b32.xlu1 %v1601_v60, %s5602_s23  ;;  %v5128_v60 = vld [vmem:[%s609_s16 + $0x24] sm:$0xf] }
0x100b   : > { %1840 = vmatpush.bf16.msrb.mxu3 %v4875_v57 }
0x107b   : > { %v1604_v61 = vpop.permute.xlu0 %1603 }
0x107c   : > { %1611 = vst.msk [vmem:[#allocation2 + $0x30] sm:$0xff] %vm705_vm0, %v1604_v61  ;;  %v1608_v51 = vpop.permute.xlu1 %1607 }
0x107d   : > { %v1610_v56 = vsel %vm705_vm0, %v1604_v61, %v1608_v51  ;;  %1612 = vst.msk [vmem:[#allocation2 + $0x8] sm:$0xff] %vm868_vm9, %v1608_v51  ;;  %v4864_v61 = vld [vmem:[%s609_s16 + $0x28] sm:$0xf0]  ;;  %v4863_v51 = vor.u32 %v5129_v4, %v4862_v53 }
0x107e   : > { %v1613_v54 = vpack.c.bf16 %v1610_v56, %v1610_v56  ;;  %v4867_v56 = vor.u32 %v5128_v60, %v4864_v61 }
0x1080   : > { %4840 = vmatmul.msk.bf16.vlgmr.msra.gmra.mxu0 %vm911_vm10, %v1613_v54  ;;  %4841 = vmatmul.msk.bf16.vlgmr.msra.gmra.mxu1 %vm911_vm10, %v1613_v54  ;;  %v4854_v54 = vld [vmem:[%s609_s16 + $0x10] sm:$0xf] }
0x1081   : > { %1841 = vmatpush.bf16.msrb.mxu3 %v4867_v56 }
0x10fd   : > { %v1626_v58 = vpop.f32.mrf.mxu0  ;;  %v1639_v8 = vpop.f32.mrf.mxu1 }
0x10fe   : > { %v1643_v50 = vadd.f32 %v1626_v58, %v745_v59  ;;  %v1644_v62 = vadd.f32 %v1639_v8, %v5715_v22  ;;  %v5127_v59 = vld [vmem:[%s609_s16 + $0x14] sm:$0xf0]  ;;  %v5126_v58 = vld [vmem:[%s609_s16 + $0x14] sm:$0xf] }
0x10ff   : > { %v4855_v8 = vor.u32 %v5127_v59, %v4854_v54 }
0x1100   : > { %5288 = vtanh.f32 %v1643_v50  ;;  %v4843_v32 = vmul.f32 -1.442695, %v1644_v62  ;;  %v4842_v1 = vmul.f32 -1.442695, %v1643_v50  ;;  %v4856_v50 = vld [vmem:[%s609_s16 + $0x18] sm:$0xf0] }
0x1101   : > { %5290 = vtanh.f32 %v1644_v62  ;;  %v4846_v62 = vld [vmem:[%s609_s16] sm:$0xf] }
0x1102   : > { %5292 = vpow2.f32 %v4843_v32 }
0x1105   : > { %v1628_v63 = vpop.f32.mrf.mxu0  ;;  %v1641_v55 = vpop.f32.mrf.mxu1 }
0x1106   : > { %v5289_v0 = vpop.eup %5288  ;;  %v5125_v63 = vld [vmem:[%s609_s16 + $0x4] sm:$0xf0]  ;;  %v4859_v55 = vor.u32 %v5126_v58, %v4856_v50 }
0x1107   : > { %v5291_v2 = vpop.eup %5290  ;;  %1687 = vrot.lane.b32.xlu1 %v5289_v0, %s5600_s21  ;;  %v5124_v0 = vld [vmem:[%s609_s16 + $0x4] sm:$0xf]  ;;  %v4847_v32 = vor.u32 %v5125_v63, %v4846_v62 }
0x1108   : > { %1698 = vrot.lane.b32.xlu2 %v5291_v2, %s5600_s21  ;;  %v5293_v3 = vpop.eup %5292  ;;  %v4848_v2 = vld [vmem:[%s609_s16 + $0x8] sm:$0xf0]  ;;  %1842 = vmatpush.bf16.msrb.mxu3 %v4859_v55  ;;  %s6339_s16 = scalar_lea.vmem %s6780_s7, %s5748_s24 }
0x1109   : > { %v1668_v5 = vadd.f32 1.0, %v5293_v3  ;;  %v4851_v3 = vor.u32 %v5124_v0, %v4848_v2 }
0x110b   : > { %5294 = vrcp.f32 %v1668_v5  ;;  %v1680_v18 = vand.u32 2147483648, %v1668_v5  ;;  %vm1674_vm6 = vweird.f32 %v1668_v5  ;;  %v1678_v24 = vand.u32 2147483647, %v1668_v5 }
0x110c   : > { %5296 = vpow2.f32 %v4842_v1  ;;  %1843 = vmatpush.bf16.msrb.mxu3 %v4851_v3 }
0x110d   : > { %v1681_v7 = vor.u32 1.1754944e-38, %v1680_v18  ;;  %vm1679_vm8 = vcmp.eq.f32.partialorder %v1678_v24, 8.507059e+37  ;;  %v1733_v18 = vld [vmem:[#allocation2 + $0x20] sm:$0xff] }
0x1111   : > { %v5295_v17 = vpop.eup %5294 }
0x1112   : > { %v1670_v6 = vmul.f32 %v5295_v17, %v1668_v5  ;;  %v5297_v19 = vpop.eup %5296  ;;  %vm1675_vm5 = vweird.f32 %v5295_v17 }
0x1113   : > { %v1648_v33 = vadd.f32 1.0, %v5297_v19  ;;  %vm1676_vm7 = vmor %vm1674_vm6, %vm1675_vm5  ;;  %v1731_v19 = vld [vmem:[#allocation2 + $0x10] sm:$0xff] }
0x1114   : > { %v1671_v22 = vsub.f32 1.0, %v1670_v6  ;;  %v1730_v6 = vld [vmem:[#allocation2 + $0x8] sm:$0xff] }
0x1115   : > { %5298 = vrcp.f32 %v1648_v33  ;;  %v1660_v10 = vand.u32 2147483648, %v1648_v33  ;;  %vm1654_vm12 = vweird.f32 %v1648_v33  ;;  %v1658_v29 = vand.u32 2147483647, %v1648_v33 }
0x1116   : > { %v1672_v25 = vmul.f32 %v5295_v17, %v1671_v22 }
0x1117   : > { %v1661_v12 = vor.u32 1.1754944e-38, %v1660_v10  ;;  %vm1659_vm14 = vcmp.eq.f32.partialorder %v1658_v29, 8.507059e+37 }
0x1118   : > { %v1673_v34 = vadd.f32 %v5295_v17, %v1672_v25  ;;  %v1732_v25 = vld [vmem:[#allocation2 + $0x18] sm:$0xff] }
0x111a   : > { %v1677_v49 = vsel %vm1676_vm7, %v5295_v17, %v1673_v34  ;;  %v1734_v34 = vld [vmem:[#allocation2 + $0x28] sm:$0xff] }
0x111b   : > { %v1682_v40 = vsel %vm1679_vm8, %v1681_v7, %v1677_v49  ;;  %v5299_v45 = vpop.eup %5298  ;;  %v1739_v24 = vpack.c.bf16 %v1734_v34, %v1733_v18  ;;  %v1735_v7 = vld [vmem:[#allocation2 + $0x30] sm:$0xff] }
0x111c   : > { %v1650_v47 = vmul.f32 %v5299_v45, %v1648_v33  ;;  %vm1655_vm11 = vweird.f32 %v5299_v45  ;;  %v1696_v20 = vmul.f32 %v1682_v40, %v5984_v48  ;;  %v4871_v48 = vor.u32 %v5131_v44, %v4870_v43 }
0x111d   : > { %vm1656_vm13 = vmor %vm1654_vm12, %vm1655_vm11  ;;  %v1738_v33 = vpack.c.bf16 %v1732_v25, %v1731_v19 }
0x111e   : > { %v1651_v26 = vsub.f32 1.0, %v1650_v47  ;;  %1811 = vmatpush.bf16.msrb.mxu2 %v4871_v48 }
0x1120   : > { %v1652_v9 = vmul.f32 %v5299_v45, %v1651_v26 }
0x1122   : > { %v1653_v30 = vadd.f32 %v5299_v45, %v1652_v9  ;;  %1812 = vmatpush.bf16.msrb.mxu2 %v4863_v51 }
0x1124   : > { %v1657_v11 = vsel %vm1656_vm13, %v5299_v45, %v1653_v30 }
0x1125   : > { %v1662_v14 = vsel %vm1659_vm14, %v1661_v12, %v1657_v11 }
0x1126   : > { %v1685_v16 = vmul.f32 %v1662_v14, %v5979_v42  ;;  %1813 = vmatpush.bf16.msrb.mxu2 %v4855_v8 }
0x112a   : > { %1814 = vmatpush.bf16.msrb.mxu2 %v4847_v32 }
0x1162   : > { %v1699_v39 = vpop.permute.xlu2 %1698 }
0x1163   : > { %v1701_v27 = vmul.f32 %v1699_v39, %v1682_v40 }
0x1165   : > { %1703 = vrot.lane.b32.xlu0 %v1701_v27, %s5600_s21 }
0x1179   : > { %v1688_v13 = vpop.permute.xlu1 %1687 }
0x117a   : > { %v1690_v15 = vmul.f32 %v1688_v13, %v1662_v14 }
0x117c   : > { %1692 = vrot.lane.b32.xlu2 %v1690_v15, %s5600_s21 }
0x11d6   : > { %v1693_v21 = vpop.permute.xlu2 %1692 }
0x11d7   : > { %v1704_v23 = vpop.permute.xlu0 %1703  ;;  %v1695_v28 = vadd.f32 %v1693_v21, %v1685_v16 }
0x11d8   : > { %v1706_v31 = vadd.f32 %v1704_v23, %v1696_v20 }
0x11d9   : > { %5300 = vtanh.f32 %v1695_v28 }
0x11da   : > { %5302 = vtanh.f32 %v1706_v31 }
0x11df   : > { %v5301_v35 = vpop.eup %5300 }
0x11e0   : > { %v5303_v36 = vpop.eup %5302  ;;  %1709 = vrot.lane.b32.xlu2 %v5301_v35, %s5600_s21 }
0x11e1   : > { %1715 = vrot.lane.b32.xlu0 %v5303_v36, %s5600_s21 }
0x123a   : > { %v1710_v37 = vpop.permute.xlu2 %1709 }
0x123b   : > { %v1712_v38 = vmul.f32 %v1710_v37, %v1662_v14 }
0x123d   : > { %1720 = vrot.lane.b32.xlu0 %v1712_v38, %s5601_s22 }
0x1253   : > { %v1716_v41 = vpop.permute.xlu0 %1715 }
0x1254   : > { %v1718_v42 = vmul.f32 %v1716_v41, %v1682_v40  ;;  %v1749_v40 = vld [vmem:[%s618_s20] sm:$0x3]  ;;  %s632_s20 = scalar_lea.vmem %s6782_s9, %s5703_s17 }
0x1255   : > { %v6026_v45 = vperm.slane %v1749_v40, 0  ;;  %v6028_v27 = vperm.slane %v1749_v40, 1 }
0x1256   : > { %1725 = vrot.lane.b32.xlu1 %v1718_v42, %s5602_s23 }
0x12af   : > { %v1721_v5 = vpop.permute.xlu0 %1720 }
0x12b0   : > { %1723 = vst.msk [vmem:[#allocation2 + $0x38] sm:$0xff] %vm705_vm0, %v1721_v5 }
0x12b7   : > { %v1736_v49 = vld [vmem:[#allocation2 + $0x38] sm:$0xff] }
0x12b8   : > { %v1740_v39 = vpack.c.bf16 %v1736_v49, %v1735_v7 }
0x12c8   : > { %v1726_v17 = vpop.permute.xlu1 %1725 }
0x12c9   : > { %1728 = vst.msk [vmem:[#allocation2] sm:$0xff] %vm868_vm9, %v1726_v17 }
0x12d0   : > { %v1729_v1 = vld [vmem:[#allocation2] sm:$0xff] }
0x12d1   : > { %v1737_v22 = vpack.c.bf16 %v1730_v6, %v1729_v1 }
0x12d3   : > { %4876 = vmatmul.msk.bf16.vlgmr.msrb.gmra.mxu2 %vm911_vm10, %v1737_v22  ;;  %4880 = vmatmul.msk.bf16.vlgmr.msrb.gmra.mxu3 %vm911_vm10, %v1737_v22 }
0x12e3   : > { %4877 = vmatmul.msk.bf16.gmra.mxu2 %vm911_vm10, %v1738_v33  ;;  %4881 = vmatmul.msk.bf16.gmra.mxu3 %vm911_vm10, %v1738_v33 }
0x12f3   : > { %4878 = vmatmul.msk.bf16.gmra.mxu2 %vm911_vm10, %v1739_v24  ;;  %4882 = vmatmul.msk.bf16.gmra.mxu3 %vm911_vm10, %v1739_v24 }
0x1303   : > { %4879 = vmatmul.msk.bf16.gmra.mxu2 %vm911_vm10, %v1740_v39  ;;  %4883 = vmatmul.msk.bf16.gmra.mxu3 %vm911_vm10, %v1740_v39 }
0x1356   : > { %v1816_v47 = vpop.f32.mrf.mxu2  ;;  %v1845_v26 = vpop.f32.mrf.mxu3 }
0x1357   : > { %v1817_v9 = vadd.f32 %v1816_v47, %v6026_v45  ;;  %v6032_v30 = vadd.f32 %v1845_v26, %v6028_v27 }
0x1359   : > { %5304 = vtanh.f32 %v1817_v9  ;;  %v4884_v44 = vmul.f32 -1.442695, %v1817_v9 }
0x135e   : > { %v6034_v10 = vpop.f32.mrf.mxu2  ;;  %v6036_v29 = vpop.f32.mrf.mxu3 }
0x135f   : > { %v5305_v11 = vpop.eup %5304 }
0x1360   : > { %1915 = vrot.lane.b32.xlu1 %v5305_v11, %s5600_s21 }
0x1366   : > { %v6039_v12 = vpop.f32.mrf.mxu2  ;;  %v1850_v13 = vpop.f32.mrf.mxu3 }
0x1367   : > { %v6042_v14 = vadd.f32 %v1850_v13, %v6028_v27  ;;  %v4912_v13 = vld [vmem:[%s6081_s30 + $0x30] sm:$0xf] }
0x136e   : > { %v6044_v15 = vpop.f32.mrf.mxu2  ;;  %v6046_v16 = vpop.f32.mrf.mxu3 }
0x1376   : > { %v6048_v20 = vpop.f32.mrf.mxu2  ;;  %v1855_v21 = vpop.f32.mrf.mxu3 }
0x1377   : > { %v6051_v23 = vadd.f32 %v1855_v21, %v6028_v27  ;;  %v5139_v21 = vld [vmem:[%s6081_s30 + $0x34] sm:$0xf0] }
0x137e   : > { %v6053_v28 = vpop.f32.mrf.mxu2  ;;  %v6055_v31 = vpop.f32.mrf.mxu3 }
0x1386   : > { %v1831_v35 = vpop.f32.mrf.mxu2  ;;  %v1860_v36 = vpop.f32.mrf.mxu3 }
0x1387   : > { %v6058_v37 = vadd.f32 %v1831_v35, %v6026_v45  ;;  %v6061_v38 = vadd.f32 %v1860_v36, %v6028_v27  ;;  %v5138_v35 = vld [vmem:[%s6081_s30 + $0x34] sm:$0xf]  ;;  %v6086_v36 = vor.u32 %v5139_v21, %v4912_v13 }
0x1389   : > { %2006 = vmatpush.bf16.msrb.mxu0 %v6086_v36  ;;  %2474 = vmatpush.bf16.msra.mxu2 %v6086_v36 }
0x138e   : > { %v1862_v41 = vpop.f32.mrf.mxu3 }
0x138f   : > { %v1863_v42 = vadd.f32 %v1862_v41, %v6028_v27  ;;  %v4914_v41 = vld [vmem:[%s6081_s30 + $0x38] sm:$0xf0] }
0x1391   : > { %5306 = vtanh.f32 %v1863_v42  ;;  %v4885_v57 = vmul.f32 -1.442695, %v1863_v42  ;;  %v4904_v42 = vld [vmem:[%s6081_s30 + $0x20] sm:$0xf] }
0x1392   : > { %5308 = vpow2.f32 %v4884_v44  ;;  %v6091_v44 = vor.u32 %v5138_v35, %v4914_v41 }
0x1394   : > { %2019 = vmatpush.bf16.msrb.mxu1 %v6091_v44  ;;  %2487 = vmatpush.bf16.msra.mxu3 %v6091_v44 }
0x1397   : > { %v5307_v43 = vpop.eup %5306 }
0x1398   : > { %1926 = vrot.lane.b32.xlu2 %v5307_v43, %s5600_s21  ;;  %v5309_v46 = vpop.eup %5308  ;;  %v5137_v43 = vld [vmem:[%s6081_s30 + $0x24] sm:$0xf0] }
0x1399   : > { %v1876_v48 = vadd.f32 1.0, %v5309_v46  ;;  %v5136_v46 = vld [vmem:[%s6081_s30 + $0x24] sm:$0xf] }
0x139b   : > { %5310 = vrcp.f32 %v1876_v48  ;;  %v1888_v51 = vand.u32 2147483648, %v1876_v48  ;;  %vm1882_vm1 = vweird.f32 %v1876_v48  ;;  %v1886_v56 = vand.u32 2147483647, %v1876_v48 }
0x139c   : > { %5312 = vpow2.f32 %v4885_v57  ;;  %v5135_v57 = vld [vmem:[%s6081_s30 + $0x14] sm:$0xf0] }
0x139d   : > { %v1889_v58 = vor.u32 1.1754944e-38, %v1888_v51  ;;  %vm1887_vm3 = vcmp.eq.f32.partialorder %v1886_v56, 8.507059e+37 }
0x13a1   : > { %v5311_v52 = vpop.eup %5310 }
0x13a2   : > { %v1878_v53 = vmul.f32 %v5311_v52, %v1876_v48  ;;  %vm1883_vm15 = vweird.f32 %v5311_v52  ;;  %v5313_v54 = vpop.eup %5312  ;;  %v4906_v48 = vld [vmem:[%s6081_s30 + $0x28] sm:$0xf0] }
0x13a3   : > { %vm1884_vm2 = vmor %vm1882_vm1, %vm1883_vm15  ;;  %v1896_v8 = vadd.f32 1.0, %v5313_v54  ;;  %v4888_v54 = vld [vmem:[%s6081_s30] sm:$0xf] }
0x13a4   : > { %v1879_v4 = vsub.f32 1.0, %v1878_v53  ;;  %v6100_v53 = vor.u32 %v5136_v46, %v4906_v48 }
0x13a5   : > { %5314 = vrcp.f32 %v1896_v8  ;;  %v1908_v5 = vand.u32 2147483648, %v1896_v8  ;;  %vm1902_vm5 = vweird.f32 %v1896_v8  ;;  %v1906_v17 = vand.u32 2147483647, %v1896_v8 }
0x13a6   : > { %v1880_v60 = vmul.f32 %v5311_v52, %v1879_v4  ;;  %v4896_v4 = vld [vmem:[%s6081_s30 + $0x10] sm:$0xf]  ;;  %2020 = vmatpush.bf16.msrb.mxu1 %v6100_v53  ;;  %2488 = vmatpush.bf16.msra.mxu3 %v6100_v53 }
0x13a7   : > { %v1909_v6 = vor.u32 1.1754944e-38, %v1908_v5  ;;  %vm1907_vm7 = vcmp.eq.f32.partialorder %v1906_v17, 8.507059e+37  ;;  %v6108_v51 = vor.u32 %v5135_v57, %v4896_v4 }
0x13a8   : > { %v1881_v61 = vadd.f32 %v5311_v52, %v1880_v60  ;;  %v5134_v60 = vld [vmem:[%s6081_s30 + $0x14] sm:$0xf] }
0x13aa   : > { %v1885_v59 = vsel %vm1884_vm2, %v5311_v52, %v1881_v61  ;;  %v6096_v52 = vor.u32 %v5137_v43, %v4904_v42  ;;  %v4898_v61 = vld [vmem:[%s6081_s30 + $0x18] sm:$0xf0] }
0x13ab   : > { %v1890_v62 = vsel %vm1887_vm3, %v1889_v58, %v1885_v59  ;;  %v5315_v55 = vpop.eup %5314  ;;  %v6112_v56 = vor.u32 %v5134_v60, %v4898_v61  ;;  %v5133_v59 = vld [vmem:[%s6081_s30 + $0x4] sm:$0xf0]  ;;  %v5132_v58 = vld [vmem:[%s6081_s30 + $0x4] sm:$0xf] }
0x13ac   : > { %v1898_v0 = vmul.f32 %v5315_v55, %v1896_v8  ;;  %vm1903_vm4 = vweird.f32 %v5315_v55  ;;  %v1913_v33 = vmul.f32 0.0, %v1890_v62  ;;  %2007 = vmatpush.bf16.msrb.mxu0 %v6096_v52  ;;  %2475 = vmatpush.bf16.msra.mxu2 %v6096_v52  ;;  %v6122_v8 = vor.u32 %v5133_v59, %v4888_v54 }
0x13ad   : > { %vm1904_vm6 = vmor %vm1902_vm5, %vm1903_vm4  ;;  %2021 = vmatpush.bf16.msrb.mxu1 %v6112_v56  ;;  %2489 = vmatpush.bf16.msra.mxu3 %v6112_v56 }
0x13ae   : > { %v1899_v2 = vsub.f32 1.0, %v1898_v0 }
0x13b0   : > { %v1900_v32 = vmul.f32 %v5315_v55, %v1899_v2  ;;  %2008 = vmatpush.bf16.msrb.mxu0 %v6108_v51  ;;  %2476 = vmatpush.bf16.msra.mxu2 %v6108_v51 }
0x13b2   : > { %v1901_v3 = vadd.f32 %v5315_v55, %v1900_v32  ;;  %v1819_v32 = vadd.f32 %v6034_v10, %v6026_v45 }
0x13b4   : > { %v1905_v1 = vsel %vm1904_vm6, %v5315_v55, %v1901_v3  ;;  %2009 = vmatpush.bf16.msrb.mxu0 %v6122_v8  ;;  %2477 = vmatpush.bf16.msra.mxu2 %v6122_v8 }
0x13b5   : > { %v1910_v19 = vsel %vm1907_vm7, %v1909_v6, %v1905_v1 }
0x13b6   : > { %v1924_v49 = vmul.f32 0.0, %v1910_v19 }
0x13b8   : > { %2123 = vmatpush.bf16.msra.mxu0 %v6086_v36  ;;  %2708 = vmatpush.bf16.msrb.mxu2 %v6086_v36 }
0x13bc   : > { %2124 = vmatpush.bf16.msra.mxu0 %v6096_v52  ;;  %2709 = vmatpush.bf16.msrb.mxu2 %v6096_v52 }
0x13c0   : > { %2125 = vmatpush.bf16.msra.mxu0 %v6108_v51  ;;  %2710 = vmatpush.bf16.msrb.mxu2 %v6108_v51 }
0x13c4   : > { %2126 = vmatpush.bf16.msra.mxu0 %v6122_v8  ;;  %2711 = vmatpush.bf16.msrb.mxu2 %v6122_v8 }
0x13d2   : > { %v1916_v50 = vpop.permute.xlu1 %1915 }
0x13d3   : > { %v1918_v63 = vmul.f32 %v1916_v50, %v1890_v62  ;;  %v4890_v50 = vld [vmem:[%s6081_s30 + $0x8] sm:$0xf0] }
0x13d5   : > { %1920 = vrot.lane.b32.xlu0 %v1918_v63, %s5600_s21  ;;  %v6125_v63 = vor.u32 %v5132_v58, %v4890_v50 }
0x13d7   : > { %2022 = vmatpush.bf16.msrb.mxu1 %v6125_v63  ;;  %2490 = vmatpush.bf16.msra.mxu3 %v6125_v63 }
0x13db   : > { %2136 = vmatpush.bf16.msra.mxu1 %v6091_v44  ;;  %2721 = vmatpush.bf16.msrb.mxu3 %v6091_v44 }
0x13df   : > { %2137 = vmatpush.bf16.msra.mxu1 %v6100_v53  ;;  %2722 = vmatpush.bf16.msrb.mxu3 %v6100_v53 }
0x13e3   : > { %2138 = vmatpush.bf16.msra.mxu1 %v6112_v56  ;;  %2723 = vmatpush.bf16.msrb.mxu3 %v6112_v56 }
0x13e7   : > { %2139 = vmatpush.bf16.msra.mxu1 %v6125_v63  ;;  %2724 = vmatpush.bf16.msrb.mxu3 %v6125_v63 }
0x13f2   : > { %v1927_v22 = vpop.permute.xlu2 %1926 }
0x13f3   : > { %v1929_v25 = vmul.f32 %v1927_v22, %v1910_v19 }
0x13f5   : > { %1931 = vrot.lane.b32.xlu1 %v1929_v25, %s5600_s21 }
0x1447   : > { %v1921_v34 = vpop.permute.xlu0 %1920 }
0x1448   : > { %v6067_v18 = vadd.f32 %v1921_v34, %v1913_v33 }
0x144a   : > { %5316 = vtanh.f32 %v6067_v18 }
0x1450   : > { %v5317_v24 = vpop.eup %5316 }
0x1451   : > { %1937 = vrot.lane.b32.xlu2 %v5317_v24, %s5600_s21 }
0x1467   : > { %v1932_v7 = vpop.permute.xlu1 %1931 }
0x1468   : > { %v6071_v39 = vadd.f32 %v1932_v7, %v1924_v49 }
0x146a   : > { %5318 = vtanh.f32 %v6071_v39 }
0x1470   : > { %v5319_v40 = vpop.eup %5318 }
0x1471   : > { %1943 = vrot.lane.b32.xlu0 %v5319_v40, %s5600_s21 }
0x14ab   : > { %v1938_v47 = vpop.permute.xlu2 %1937 }
0x14ac   : > { %v1940_v26 = vmul.f32 %v1938_v47, %v1890_v62 }
0x14ae   : > { %1948 = vrot.lane.b32.xlu1 %v1940_v26, %s5601_s22 }
0x14e3   : > { %v1944_v9 = vpop.permute.xlu0 %1943 }
0x14e4   : > { %v1946_v11 = vmul.f32 %v1944_v9, %v1910_v19 }
0x14e6   : > { %1952 = vrot.lane.b32.xlu2 %v1946_v11, %s5602_s23 }
0x1520   : > { %v1949_v62 = vpop.permute.xlu1 %1948 }
0x1521   : > { %1956 = vst.msk [vmem:[#allocation3] sm:$0xff] %vm705_vm0, %v1949_v62 }
0x1540   : > { %v1953_v55 = vpop.permute.xlu2 %1952 }
0x1541   : > { %v1955_v0 = vsel %vm705_vm0, %v1949_v62, %v1953_v55  ;;  %1957 = vst.msk [vmem:[#allocation3 + $0x38] sm:$0xff] %vm868_vm9, %v1953_v55 }
0x1542   : > { %v1958_v2 = vpack.c.bf16 %v1955_v0, %v1955_v0 }
0x1544   : > { %4918 = vmatmul.msk.bf16.vlgmr.msrb.gmra.mxu0 %vm911_vm10, %v1958_v2  ;;  %4919 = vmatmul.msk.bf16.vlgmr.msrb.gmra.mxu1 %vm911_vm10, %v1958_v2 }
0x1545   : > { %2240 = vmatpush.bf16.msrb.mxu0 %v6086_v36  ;;  %2253 = vmatpush.bf16.msrb.mxu1 %v6091_v44 }
0x1549   : > { %2241 = vmatpush.bf16.msrb.mxu0 %v6096_v52  ;;  %2254 = vmatpush.bf16.msrb.mxu1 %v6100_v53 }
0x154d   : > { %2242 = vmatpush.bf16.msrb.mxu0 %v6108_v51  ;;  %2255 = vmatpush.bf16.msrb.mxu1 %v6112_v56 }
0x1551   : > { %2243 = vmatpush.bf16.msrb.mxu0 %v6122_v8  ;;  %2256 = vmatpush.bf16.msrb.mxu1 %v6125_v63 }
0x15c1   : > { %v2011_v3 = vpop.f32.mrf.mxu0  ;;  %v2024_v5 = vpop.f32.mrf.mxu1 }
0x15c2   : > { %v2028_v17 = vadd.f32 %v2011_v3, %v1819_v32  ;;  %v2029_v1 = vadd.f32 %v2024_v5, %v6061_v38 }
0x15c4   : > { %5320 = vtanh.f32 %v2028_v17  ;;  %v4920_v33 = vmul.f32 -1.442695, %v2028_v17  ;;  %v4921_v34 = vmul.f32 -1.442695, %v2029_v1 }
0x15c5   : > { %5322 = vtanh.f32 %v2029_v1 }
0x15c6   : > { %5324 = vpow2.f32 %v4920_v33 }
0x15c7   : > { %5326 = vpow2.f32 %v4921_v34 }
0x15c9   : > { %v2013_v6 = vpop.f32.mrf.mxu0  ;;  %v2026_v22 = vpop.f32.mrf.mxu1 }
0x15ca   : > { %v5321_v19 = vpop.eup %5320 }
0x15cb   : > { %v5323_v25 = vpop.eup %5322  ;;  %2072 = vrot.lane.b32.xlu0 %v5321_v19, %s5600_s21 }
0x15cc   : > { %2083 = vrot.lane.b32.xlu1 %v5323_v25, %s5600_s21  ;;  %v5325_v10 = vpop.eup %5324 }
0x15cd   : > { %v5327_v24 = vpop.eup %5326  ;;  %v2033_v49 = vadd.f32 1.0, %v5325_v10 }
0x15ce   : > { %v2053_v7 = vadd.f32 1.0, %v5327_v24  ;;  %v1822_v24 = vadd.f32 %v6039_v12, %v6026_v45 }
0x15cf   : > { %5328 = vrcp.f32 %v2033_v49  ;;  %v2045_v42 = vand.u32 2147483648, %v2033_v49  ;;  %vm2039_vm12 = vweird.f32 %v2033_v49  ;;  %v2043_v46 = vand.u32 2147483647, %v2033_v49 }
0x15d0   : > { %5330 = vrcp.f32 %v2053_v7  ;;  %v2065_v43 = vand.u32 2147483648, %v2053_v7  ;;  %vm2059_vm13 = vweird.f32 %v2053_v7  ;;  %v2063_v48 = vand.u32 2147483647, %v2053_v7 }
0x15d1   : > { %v2046_v60 = vor.u32 1.1754944e-38, %v2045_v42  ;;  %vm2044_vm1 = vcmp.eq.f32.partialorder %v2043_v46, 8.507059e+37 }
0x15d2   : > { %v2066_v61 = vor.u32 1.1754944e-38, %v2065_v43  ;;  %vm2064_vm2 = vcmp.eq.f32.partialorder %v2063_v48, 8.507059e+37 }
0x15d5   : > { %v5329_v38 = vpop.eup %5328 }
0x15d6   : > { %v5331_v40 = vpop.eup %5330  ;;  %v2035_v47 = vmul.f32 %v5329_v38, %v2033_v49  ;;  %vm2040_vm8 = vweird.f32 %v5329_v38  ;;  %v1858_v49 = vadd.f32 %v6055_v31, %v6028_v27 }
0x15d7   : > { %v2055_v26 = vmul.f32 %v5331_v40, %v2053_v7  ;;  %vm2060_vm11 = vweird.f32 %v5331_v40  ;;  %vm2041_vm14 = vmor %vm2039_vm12, %vm2040_vm8 }
0x15d8   : > { %v2036_v9 = vsub.f32 1.0, %v2035_v47  ;;  %vm2061_vm15 = vmor %vm2059_vm13, %vm2060_vm11 }
0x15d9   : > { %v2056_v11 = vsub.f32 1.0, %v2055_v26 }
0x15da   : > { %v2037_v13 = vmul.f32 %v5329_v38, %v2036_v9 }
0x15db   : > { %v2057_v21 = vmul.f32 %v5331_v40, %v2056_v11 }
0x15dc   : > { %v2038_v35 = vadd.f32 %v5329_v38, %v2037_v13 }
0x15dd   : > { %v2058_v41 = vadd.f32 %v5331_v40, %v2057_v21 }
0x15de   : > { %v2042_v4 = vsel %vm2041_vm14, %v5329_v38, %v2038_v35 }
0x15df   : > { %v2062_v57 = vsel %vm2061_vm15, %v5331_v40, %v2058_v41  ;;  %v2047_v59 = vsel %vm2044_vm1, %v2046_v60, %v2042_v4 }
0x15e0   : > { %v2067_v50 = vsel %vm2064_vm2, %v2066_v61, %v2062_v57  ;;  %v2070_v0 = vmul.f32 %v2047_v59, %v6067_v18 }
0x15e1   : > { %v2081_v5 = vmul.f32 %v2067_v50, %v6071_v39 }
0x163d   : > { %v2073_v54 = vpop.permute.xlu0 %2072 }
0x163e   : > { %v2084_v58 = vpop.permute.xlu1 %2083  ;;  %v2075_v62 = vmul.f32 %v2073_v54, %v2047_v59 }
0x163f   : > { %v2086_v55 = vmul.f32 %v2084_v58, %v2067_v50 }
0x1640   : > { %2077 = vrot.lane.b32.xlu2 %v2075_v62, %s5600_s21 }
0x1641   : > { %2088 = vrot.lane.b32.xlu0 %v2086_v55, %s5600_s21 }
0x169a   : > { %v2078_v2 = vpop.permute.xlu2 %2077 }
0x169b   : > { %v6168_v32 = vadd.f32 %v2078_v2, %v2070_v0 }
0x169d   : > { %5332 = vtanh.f32 %v6168_v32 }
0x16a3   : > { %v5333_v3 = vpop.eup %5332 }
0x16a4   : > { %2094 = vrot.lane.b32.xlu1 %v5333_v3, %s5600_s21 }
0x16b3   : > { %v2089_v17 = vpop.permute.xlu0 %2088 }
0x16b4   : > { %v6173_v1 = vadd.f32 %v2089_v17, %v2081_v5 }
0x16b6   : > { %5334 = vtanh.f32 %v6173_v1 }
0x16bc   : > { %v5335_v6 = vpop.eup %5334 }
0x16bd   : > { %2100 = vrot.lane.b32.xlu2 %v5335_v6, %s5600_s21 }
0x1716   : > { %v2095_v22 = vpop.permute.xlu1 %2094 }
0x1717   : > { %v2101_v18 = vpop.permute.xlu2 %2100  ;;  %v2097_v19 = vmul.f32 %v2095_v22, %v2047_v59 }
0x1718   : > { %v2103_v25 = vmul.f32 %v2101_v18, %v2067_v50 }
0x1719   : > { %2105 = vrot.lane.b32.xlu0 %v2097_v19, %s5601_s22 }
0x171a   : > { %2109 = vrot.lane.b32.xlu1 %v2103_v25, %s5602_s23 }
0x178b   : > { %v2106_v33 = vpop.permute.xlu0 %2105 }
0x178c   : > { %2113 = vst.msk [vmem:[#allocation3 + $0x8] sm:$0xff] %vm705_vm0, %v2106_v33  ;;  %v2110_v39 = vpop.permute.xlu1 %2109 }
0x178d   : > { %v2112_v34 = vsel %vm705_vm0, %v2106_v33, %v2110_v39  ;;  %2114 = vst.msk [vmem:[#allocation3 + $0x30] sm:$0xff] %vm868_vm9, %v2110_v39 }
0x178e   : > { %v2115_v10 = vpack.c.bf16 %v2112_v34, %v2112_v34 }
0x1790   : > { %4922 = vmatmul.msk.bf16.vlgmr.msra.gmra.mxu0 %vm911_vm10, %v2115_v10  ;;  %4923 = vmatmul.msk.bf16.vlgmr.msra.gmra.mxu1 %vm911_vm10, %v2115_v10 }
0x1791   : > { %2357 = vmatpush.bf16.msra.mxu0 %v6086_v36  ;;  %2370 = vmatpush.bf16.msra.mxu1 %v6091_v44 }
0x1795   : > { %2358 = vmatpush.bf16.msra.mxu0 %v6096_v52  ;;  %2371 = vmatpush.bf16.msra.mxu1 %v6100_v53 }
0x1799   : > { %2359 = vmatpush.bf16.msra.mxu0 %v6108_v51  ;;  %2372 = vmatpush.bf16.msra.mxu1 %v6112_v56 }
0x179d   : > { %2360 = vmatpush.bf16.msra.mxu0 %v6122_v8  ;;  %2373 = vmatpush.bf16.msra.mxu1 %v6125_v63 }
0x180d   : > { %v2128_v7 = vpop.f32.mrf.mxu0  ;;  %v2141_v38 = vpop.f32.mrf.mxu1 }
0x180e   : > { %v2145_v40 = vadd.f32 %v2128_v7, %v1822_v24  ;;  %v2146_v47 = vadd.f32 %v2141_v38, %v1858_v49 }
0x1810   : > { %5336 = vtanh.f32 %v2145_v40  ;;  %v4924_v21 = vmul.f32 -1.442695, %v2145_v40  ;;  %v4925_v41 = vmul.f32 -1.442695, %v2146_v47 }
0x1811   : > { %5338 = vtanh.f32 %v2146_v47 }
0x1812   : > { %5340 = vpow2.f32 %v4924_v21 }
0x1815   : > { %v2130_v26 = vpop.f32.mrf.mxu0  ;;  %v2143_v9 = vpop.f32.mrf.mxu1 }
0x1816   : > { %v5337_v11 = vpop.eup %5336 }
0x1817   : > { %v5339_v13 = vpop.eup %5338  ;;  %2189 = vrot.lane.b32.xlu2 %v5337_v11, %s5600_s21 }
0x1818   : > { %2200 = vrot.lane.b32.xlu0 %v5339_v13, %s5600_s21  ;;  %v5341_v12 = vpop.eup %5340 }
0x1819   : > { %v2150_v35 = vadd.f32 1.0, %v5341_v12  ;;  %v1824_v12 = vadd.f32 %v6044_v15, %v6026_v45 }
0x181b   : > { %5342 = vrcp.f32 %v2150_v35  ;;  %v2162_v60 = vand.u32 2147483648, %v2150_v35  ;;  %vm2156_vm4 = vweird.f32 %v2150_v35  ;;  %v2160_v61 = vand.u32 2147483647, %v2150_v35 }
0x181c   : > { %5344 = vpow2.f32 %v4925_v41 }
0x181d   : > { %v2163_v59 = vor.u32 1.1754944e-38, %v2162_v60  ;;  %vm2161_vm6 = vcmp.eq.f32.partialorder %v2160_v61, 8.507059e+37 }
0x1821   : > { %v5343_v31 = vpop.eup %5342 }
0x1822   : > { %v2152_v42 = vmul.f32 %v5343_v31, %v2150_v35  ;;  %v5345_v48 = vpop.eup %5344  ;;  %vm2157_vm3 = vweird.f32 %v5343_v31 }
0x1823   : > { %v2170_v4 = vadd.f32 1.0, %v5345_v48  ;;  %vm2158_vm5 = vmor %vm2156_vm4, %vm2157_vm3 }
0x1824   : > { %v2153_v43 = vsub.f32 1.0, %v2152_v42 }
0x1825   : > { %5346 = vrcp.f32 %v2170_v4  ;;  %v2182_v17 = vand.u32 2147483648, %v2170_v4  ;;  %vm2176_vm8 = vweird.f32 %v2170_v4  ;;  %v2180_v6 = vand.u32 2147483647, %v2170_v4 }
0x1826   : > { %v2154_v46 = vmul.f32 %v5343_v31, %v2153_v43 }
0x1827   : > { %v2183_v18 = vor.u32 1.1754944e-38, %v2182_v17  ;;  %vm2181_vm12 = vcmp.eq.f32.partialorder %v2180_v6, 8.507059e+37 }
0x1828   : > { %v2155_v57 = vadd.f32 %v5343_v31, %v2154_v46 }
0x182a   : > { %v2159_v54 = vsel %vm2158_vm5, %v5343_v31, %v2155_v57 }
0x182b   : > { %v2164_v50 = vsel %vm2161_vm6, %v2163_v59, %v2159_v54  ;;  %v5347_v55 = vpop.eup %5346 }
0x182c   : > { %v2172_v0 = vmul.f32 %v5347_v55, %v2170_v4  ;;  %vm2177_vm7 = vweird.f32 %v5347_v55  ;;  %v2187_v39 = vmul.f32 %v2164_v50, %v6168_v32 }
0x182d   : > { %vm2178_vm11 = vmor %vm2176_vm8, %vm2177_vm7 }
0x182e   : > { %v2173_v2 = vsub.f32 1.0, %v2172_v0 }
0x1830   : > { %v2174_v3 = vmul.f32 %v5347_v55, %v2173_v2 }
0x1832   : > { %v2175_v5 = vadd.f32 %v5347_v55, %v2174_v3 }
0x1834   : > { %v2179_v22 = vsel %vm2178_vm11, %v5347_v55, %v2175_v5 }
0x1835   : > { %v2184_v25 = vsel %vm2181_vm12, %v2183_v18, %v2179_v22 }
0x1836   : > { %v2198_v34 = vmul.f32 %v2184_v25, %v6173_v1 }
0x1871   : > { %v2190_v58 = vpop.permute.xlu2 %2189 }
0x1872   : > { %v2192_v62 = vmul.f32 %v2190_v58, %v2164_v50 }
0x1874   : > { %2194 = vrot.lane.b32.xlu1 %v2192_v62, %s5600_s21 }
0x188a   : > { %v2201_v19 = vpop.permute.xlu0 %2200 }
0x188b   : > { %v2203_v33 = vmul.f32 %v2201_v19, %v2184_v25 }
0x188d   : > { %2205 = vrot.lane.b32.xlu2 %v2203_v33, %s5600_s21 }
0x18e6   : > { %v2195_v10 = vpop.permute.xlu1 %2194 }
0x18e7   : > { %v2206_v24 = vpop.permute.xlu2 %2205  ;;  %v6202_v49 = vadd.f32 %v2195_v10, %v2187_v39 }
0x18e8   : > { %v6204_v7 = vadd.f32 %v2206_v24, %v2198_v34 }
0x18e9   : > { %5348 = vtanh.f32 %v6202_v49 }
0x18ea   : > { %5350 = vtanh.f32 %v6204_v7 }
0x18ef   : > { %v5349_v38 = vpop.eup %5348 }
0x18f0   : > { %v5351_v40 = vpop.eup %5350  ;;  %2211 = vrot.lane.b32.xlu0 %v5349_v38, %s5600_s21 }
0x18f1   : > { %2217 = vrot.lane.b32.xlu1 %v5351_v40, %s5600_s21 }
0x1962   : > { %v2212_v47 = vpop.permute.xlu0 %2211 }
0x1963   : > { %v2218_v32 = vpop.permute.xlu1 %2217  ;;  %v2214_v26 = vmul.f32 %v2212_v47, %v2164_v50 }
0x1964   : > { %v2220_v1 = vmul.f32 %v2218_v32, %v2184_v25 }
0x1965   : > { %2222 = vrot.lane.b32.xlu2 %v2214_v26, %s5601_s22 }
0x1966   : > { %2226 = vrot.lane.b32.xlu0 %v2220_v1, %s5602_s23 }
0x19bf   : > { %v2223_v9 = vpop.permute.xlu2 %2222 }
0x19c0   : > { %2230 = vst.msk [vmem:[#allocation3 + $0x10] sm:$0xff] %vm705_vm0, %v2223_v9 }
0x19d8   : > { %v2227_v11 = vpop.permute.xlu0 %2226 }
0x19d9   : > { %v2229_v13 = vsel %vm705_vm0, %v2223_v9, %v2227_v11  ;;  %2231 = vst.msk [vmem:[#allocation3 + $0x28] sm:$0xff] %vm868_vm9, %v2227_v11 }
0x19da   : > { %v2232_v21 = vpack.c.bf16 %v2229_v13, %v2229_v13 }
0x19dc   : > { %4926 = vmatmul.msk.bf16.vlgmr.msrb.gmra.mxu0 %vm911_vm10, %v2232_v21  ;;  %4927 = vmatmul.msk.bf16.vlgmr.msrb.gmra.mxu1 %vm911_vm10, %v2232_v21 }
0x19dd   : > { %2591 = vmatpush.bf16.msrb.mxu0 %v6086_v36  ;;  %2604 = vmatpush.bf16.msrb.mxu1 %v6091_v44 }
0x19e1   : > { %2592 = vmatpush.bf16.msrb.mxu0 %v6096_v52  ;;  %2605 = vmatpush.bf16.msrb.mxu1 %v6100_v53 }
0x19e5   : > { %2593 = vmatpush.bf16.msrb.mxu0 %v6108_v51  ;;  %2606 = vmatpush.bf16.msrb.mxu1 %v6112_v56 }
0x19e9   : > { %2594 = vmatpush.bf16.msrb.mxu0 %v6122_v8  ;;  %2607 = vmatpush.bf16.msrb.mxu1 %v6125_v63 }
0x1a59   : > { %v2245_v35 = vpop.f32.mrf.mxu0  ;;  %v2258_v31 = vpop.f32.mrf.mxu1 }
0x1a5a   : > { %v2262_v36 = vadd.f32 %v2245_v35, %v1824_v12  ;;  %v2263_v44 = vadd.f32 %v2258_v31, %v6051_v23  ;;  %v1853_v12 = vadd.f32 %v6046_v16, %v6028_v27  ;;  %v1827_v35 = vadd.f32 %v6048_v20, %v6026_v45 }
0x1a5c   : > { %5352 = vtanh.f32 %v2262_v36  ;;  %v4929_v56 = vmul.f32 -1.442695, %v2263_v44  ;;  %v4928_v42 = vmul.f32 -1.442695, %v2262_v36 }
0x1a5d   : > { %5354 = vtanh.f32 %v2263_v44 }
0x1a5e   : > { %5356 = vpow2.f32 %v4929_v56 }
0x1a61   : > { %v2247_v52 = vpop.f32.mrf.mxu0  ;;  %v2260_v53 = vpop.f32.mrf.mxu1 }
0x1a62   : > { %v5353_v41 = vpop.eup %5352 }
0x1a63   : > { %v5355_v51 = vpop.eup %5354  ;;  %2306 = vrot.lane.b32.xlu1 %v5353_v41, %s5600_s21 }
0x1a64   : > { %2317 = vrot.lane.b32.xlu2 %v5355_v51, %s5600_s21  ;;  %v5357_v8 = vpop.eup %5356 }
0x1a65   : > { %v2287_v63 = vadd.f32 1.0, %v5357_v8 }
0x1a67   : > { %5358 = vrcp.f32 %v2287_v63  ;;  %v2299_v60 = vand.u32 2147483648, %v2287_v63  ;;  %vm2293_vm14 = vweird.f32 %v2287_v63  ;;  %v2297_v61 = vand.u32 2147483647, %v2287_v63 }
0x1a68   : > { %5360 = vpow2.f32 %v4928_v42 }
0x1a69   : > { %v2300_v59 = vor.u32 1.1754944e-38, %v2299_v60  ;;  %vm2298_vm1 = vcmp.eq.f32.partialorder %v2297_v61, 8.507059e+37 }
0x1a6d   : > { %v5359_v15 = vpop.eup %5358 }
0x1a6e   : > { %v2289_v43 = vmul.f32 %v5359_v15, %v2287_v63  ;;  %v5361_v46 = vpop.eup %5360  ;;  %vm2294_vm13 = vweird.f32 %v5359_v15 }
0x1a6f   : > { %v2267_v4 = vadd.f32 1.0, %v5361_v46  ;;  %vm2295_vm15 = vmor %vm2293_vm14, %vm2294_vm13 }
0x1a70   : > { %v2290_v23 = vsub.f32 1.0, %v2289_v43 }
0x1a71   : > { %5362 = vrcp.f32 %v2267_v4  ;;  %v2279_v17 = vand.u32 2147483648, %v2267_v4  ;;  %vm2273_vm3 = vweird.f32 %v2267_v4  ;;  %v2277_v6 = vand.u32 2147483647, %v2267_v4 }
0x1a72   : > { %v2291_v48 = vmul.f32 %v5359_v15, %v2290_v23 }
0x1a73   : > { %v2280_v18 = vor.u32 1.1754944e-38, %v2279_v17  ;;  %vm2278_vm5 = vcmp.eq.f32.partialorder %v2277_v6, 8.507059e+37 }
0x1a74   : > { %v2292_v57 = vadd.f32 %v5359_v15, %v2291_v48 }
0x1a76   : > { %v2296_v54 = vsel %vm2295_vm15, %v5359_v15, %v2292_v57 }
0x1a77   : > { %v2301_v50 = vsel %vm2298_vm1, %v2300_v59, %v2296_v54  ;;  %v5363_v62 = vpop.eup %5362 }
0x1a78   : > { %v2269_v0 = vmul.f32 %v5363_v62, %v2267_v4  ;;  %vm2274_vm2 = vweird.f32 %v5363_v62  ;;  %v2315_v39 = vmul.f32 %v2301_v50, %v6204_v7 }
0x1a79   : > { %vm2275_vm4 = vmor %vm2273_vm3, %vm2274_vm2 }
0x1a7a   : > { %v2270_v2 = vsub.f32 1.0, %v2269_v0 }
0x1a7c   : > { %v2271_v3 = vmul.f32 %v5363_v62, %v2270_v2 }
0x1a7e   : > { %v2272_v5 = vadd.f32 %v5363_v62, %v2271_v3 }
0x1a80   : > { %v2276_v22 = vsel %vm2275_vm4, %v5363_v62, %v2272_v5 }
0x1a81   : > { %v2281_v25 = vsel %vm2278_vm5, %v2280_v18, %v2276_v22 }
0x1a82   : > { %v2304_v38 = vmul.f32 %v2281_v25, %v6202_v49 }
0x1abe   : > { %v2318_v58 = vpop.permute.xlu2 %2317 }
0x1abf   : > { %v2320_v55 = vmul.f32 %v2318_v58, %v2301_v50 }
0x1ac1   : > { %2322 = vrot.lane.b32.xlu1 %v2320_v55, %s5600_s21 }
0x1ad5   : > { %v2307_v19 = vpop.permute.xlu1 %2306 }
0x1ad6   : > { %v2309_v33 = vmul.f32 %v2307_v19, %v2281_v25 }
0x1ad8   : > { %2311 = vrot.lane.b32.xlu0 %v2309_v33, %s5600_s21 }
0x1b33   : > { %v2323_v34 = vpop.permute.xlu1 %2322 }
0x1b34   : > { %v6233_v10 = vadd.f32 %v2323_v34, %v2315_v39 }
0x1b36   : > { %5364 = vtanh.f32 %v6233_v10 }
0x1b3c   : > { %v5365_v24 = vpop.eup %5364 }
0x1b3d   : > { %2334 = vrot.lane.b32.xlu0 %v5365_v24, %s5600_s21 }
0x1b4a   : > { %v2312_v40 = vpop.permute.xlu0 %2311 }
0x1b4b   : > { %v6238_v47 = vadd.f32 %v2312_v40, %v2304_v38 }
0x1b4d   : > { %5366 = vtanh.f32 %v6238_v47 }
0x1b53   : > { %v5367_v32 = vpop.eup %5366 }
0x1b54   : > { %2328 = vrot.lane.b32.xlu2 %v5367_v32, %s5600_s21 }
0x1bae   : > { %v2329_v26 = vpop.permute.xlu2 %2328 }
0x1baf   : > { %v2335_v7 = vpop.permute.xlu0 %2334  ;;  %v2331_v1 = vmul.f32 %v2329_v26, %v2281_v25 }
0x1bb0   : > { %v2337_v9 = vmul.f32 %v2335_v7, %v2301_v50 }
0x1bb1   : > { %2339 = vrot.lane.b32.xlu1 %v2331_v1, %s5601_s22 }
0x1bb2   : > { %2343 = vrot.lane.b32.xlu2 %v2337_v9, %s5602_s23 }
0x1c0c   : > { %v2344_v11 = vpop.permute.xlu2 %2343 }
0x1c0d   : > { %2348 = vst.msk [vmem:[#allocation3 + $0x20] sm:$0xff] %vm868_vm9, %v2344_v11 }
0x1c23   : > { %v2340_v49 = vpop.permute.xlu1 %2339 }
0x1c24   : > { %v2346_v13 = vsel %vm705_vm0, %v2340_v49, %v2344_v11  ;;  %2347 = vst.msk [vmem:[#allocation3 + $0x18] sm:$0xff] %vm705_vm0, %v2340_v49 }
0x1c25   : > { %v2349_v21 = vpack.c.bf16 %v2346_v13, %v2346_v13 }
0x1c27   : > { %4930 = vmatmul.msk.bf16.vlgmr.msra.gmra.mxu0 %vm911_vm10, %v2349_v21  ;;  %4931 = vmatmul.msk.bf16.vlgmr.msra.gmra.mxu1 %vm911_vm10, %v2349_v21  ;;  %v6274_v21 = vpop.f32.mrf.mxu2 }
0x1ca4   : > { %v2362_v31 = vpop.f32.mrf.mxu0  ;;  %v2375_v36 = vpop.f32.mrf.mxu1 }
0x1ca5   : > { %v2379_v44 = vadd.f32 %v2362_v31, %v1827_v35  ;;  %v2380_v52 = vadd.f32 %v2375_v36, %v1853_v12  ;;  %v1829_v12 = vadd.f32 %v6053_v28, %v6026_v45 }
0x1ca7   : > { %5368 = vtanh.f32 %v2379_v44  ;;  %v4932_v8 = vmul.f32 -1.442695, %v2379_v44  ;;  %v4933_v63 = vmul.f32 -1.442695, %v2380_v52 }
0x1ca8   : > { %5370 = vtanh.f32 %v2380_v52 }
0x1ca9   : > { %5372 = vpow2.f32 %v4932_v8 }
0x1caa   : > { %5374 = vpow2.f32 %v4933_v63 }
0x1cac   : > { %v2364_v53 = vpop.f32.mrf.mxu0  ;;  %v2377_v41 = vpop.f32.mrf.mxu1 }
0x1cad   : > { %v5369_v51 = vpop.eup %5368 }
0x1cae   : > { %v5371_v56 = vpop.eup %5370  ;;  %2423 = vrot.lane.b32.xlu0 %v5369_v51, %s5600_s21 }
0x1caf   : > { %2434 = vrot.lane.b32.xlu1 %v5371_v56, %s5600_s21  ;;  %v5373_v16 = vpop.eup %5372 }
0x1cb0   : > { %v5375_v20 = vpop.eup %5374  ;;  %v2384_v15 = vadd.f32 1.0, %v5373_v16 }
0x1cb1   : > { %v2404_v42 = vadd.f32 1.0, %v5375_v20 }
0x1cb2   : > { %5376 = vrcp.f32 %v2384_v15  ;;  %v2396_v58 = vand.u32 2147483648, %v2384_v15  ;;  %vm2390_vm8 = vweird.f32 %v2384_v15  ;;  %v2394_v62 = vand.u32 2147483647, %v2384_v15 }
0x1cb3   : > { %5378 = vrcp.f32 %v2404_v42  ;;  %v2416_v50 = vand.u32 2147483648, %v2404_v42  ;;  %vm2410_vm11 = vweird.f32 %v2404_v42  ;;  %v2414_v55 = vand.u32 2147483647, %v2404_v42 }
0x1cb4   : > { %v2397_v3 = vor.u32 1.1754944e-38, %v2396_v58  ;;  %vm2395_vm14 = vcmp.eq.f32.partialorder %v2394_v62, 8.507059e+37 }
0x1cb5   : > { %v2417_v5 = vor.u32 1.1754944e-38, %v2416_v50  ;;  %vm2415_vm15 = vcmp.eq.f32.partialorder %v2414_v55, 8.507059e+37 }
0x1cb8   : > { %v5377_v43 = vpop.eup %5376 }
0x1cb9   : > { %v5379_v23 = vpop.eup %5378  ;;  %v2386_v46 = vmul.f32 %v5377_v43, %v2384_v15  ;;  %vm2391_vm6 = vweird.f32 %v5377_v43 }
0x1cba   : > { %v2406_v48 = vmul.f32 %v5379_v23, %v2404_v42  ;;  %vm2411_vm7 = vweird.f32 %v5379_v23  ;;  %vm2392_vm12 = vmor %vm2390_vm8, %vm2391_vm6 }
0x1cbb   : > { %v2387_v4 = vsub.f32 1.0, %v2386_v46  ;;  %vm2412_vm13 = vmor %vm2410_vm11, %vm2411_vm7 }
0x1cbc   : > { %v2407_v57 = vsub.f32 1.0, %v2406_v48 }
0x1cbd   : > { %v2388_v60 = vmul.f32 %v5377_v43, %v2387_v4 }
0x1cbe   : > { %v2408_v61 = vmul.f32 %v5379_v23, %v2407_v57 }
0x1cbf   : > { %v2389_v54 = vadd.f32 %v5377_v43, %v2388_v60 }
0x1cc0   : > { %v2409_v59 = vadd.f32 %v5379_v23, %v2408_v61 }
0x1cc1   : > { %v2393_v0 = vsel %vm2392_vm12, %v5377_v43, %v2389_v54 }
0x1cc2   : > { %v2413_v2 = vsel %vm2412_vm13, %v5379_v23, %v2409_v59  ;;  %v2398_v6 = vsel %vm2395_vm14, %v2397_v3, %v2393_v0 }
0x1cc3   : > { %v2418_v18 = vsel %vm2415_vm15, %v2417_v5, %v2413_v2  ;;  %v2421_v33 = vmul.f32 %v2398_v6, %v6238_v47 }
0x1cc4   : > { %v2432_v38 = vmul.f32 %v2418_v18, %v6233_v10 }
0x1d20   : > { %v2424_v17 = vpop.permute.xlu0 %2423 }
0x1d21   : > { %v2435_v22 = vpop.permute.xlu1 %2434  ;;  %v2426_v19 = vmul.f32 %v2424_v17, %v2398_v6 }
0x1d22   : > { %v2437_v25 = vmul.f32 %v2435_v22, %v2418_v18 }
0x1d23   : > { %2428 = vrot.lane.b32.xlu2 %v2426_v19, %s5600_s21 }
0x1d24   : > { %2439 = vrot.lane.b32.xlu0 %v2437_v25, %s5600_s21 }
0x1d7d   : > { %v2429_v39 = vpop.permute.xlu2 %2428 }
0x1d7e   : > { %v6258_v34 = vadd.f32 %v2429_v39, %v2421_v33 }
0x1d80   : > { %5380 = vtanh.f32 %v6258_v34 }
0x1d86   : > { %v5381_v24 = vpop.eup %5380 }
0x1d87   : > { %2445 = vrot.lane.b32.xlu1 %v5381_v24, %s5600_s21 }
0x1d96   : > { %v2440_v40 = vpop.permute.xlu0 %2439 }
0x1d97   : > { %v6263_v32 = vadd.f32 %v2440_v40, %v2432_v38 }
0x1d99   : > { %5382 = vtanh.f32 %v6263_v32 }
0x1d9f   : > { %v5383_v26 = vpop.eup %5382 }
0x1da0   : > { %2451 = vrot.lane.b32.xlu2 %v5383_v26, %s5600_s21 }
0x1df9   : > { %v2446_v7 = vpop.permute.xlu1 %2445 }
0x1dfa   : > { %v2452_v47 = vpop.permute.xlu2 %2451  ;;  %v2448_v1 = vmul.f32 %v2446_v7, %v2398_v6 }
0x1dfb   : > { %v2454_v9 = vmul.f32 %v2452_v47, %v2418_v18 }
0x1dfc   : > { %2456 = vrot.lane.b32.xlu0 %v2448_v1, %s5601_s22 }
0x1dfd   : > { %2460 = vrot.lane.b32.xlu1 %v2454_v9, %s5602_s23 }
0x1e6e   : > { %v2457_v11 = vpop.permute.xlu0 %2456 }
0x1e6f   : > { %2464 = vst.msk [vmem:[#allocation3 + $0x20] sm:$0xff] %vm705_vm0, %v2457_v11  ;;  %v2461_v10 = vpop.permute.xlu1 %2460 }
0x1e70   : > { %v2463_v49 = vsel %vm705_vm0, %v2457_v11, %v2461_v10  ;;  %2465 = vst.msk [vmem:[#allocation3 + $0x18] sm:$0xff] %vm868_vm9, %v2461_v10  ;;  %v1848_v10 = vadd.f32 %v6036_v29, %v6028_v27 }
0x1e71   : > { %v2466_v13 = vpack.c.bf16 %v2463_v49, %v2463_v49 }
0x1e73   : > { %4934 = vmatmul.msk.bf16.vlgmr.msra.gmra.mxu2 %vm911_vm10, %v2466_v13  ;;  %4935 = vmatmul.msk.bf16.vlgmr.msra.gmra.mxu3 %vm911_vm10, %v2466_v13 }
0x1ef6   : > { %v2479_v35 = vpop.f32.mrf.mxu2  ;;  %v2492_v31 = vpop.f32.mrf.mxu3 }
0x1ef7   : > { %v2496_v36 = vadd.f32 %v2479_v35, %v1829_v12  ;;  %v2497_v44 = vadd.f32 %v2492_v31, %v6042_v14 }
0x1ef9   : > { %5384 = vtanh.f32 %v2496_v36  ;;  %v4936_v56 = vmul.f32 -1.442695, %v2496_v36  ;;  %v4937_v16 = vmul.f32 -1.442695, %v2497_v44 }
0x1efa   : > { %5386 = vtanh.f32 %v2497_v44 }
0x1efb   : > { %5388 = vpow2.f32 %v4936_v56 }
0x1efe   : > { %v2481_v52 = vpop.f32.mrf.mxu2  ;;  %v2494_v53 = vpop.f32.mrf.mxu3 }
0x1eff   : > { %v5385_v41 = vpop.eup %5384 }
0x1f00   : > { %v5387_v51 = vpop.eup %5386  ;;  %2540 = vrot.lane.b32.xlu2 %v5385_v41, %s5600_s21 }
0x1f01   : > { %2551 = vrot.lane.b32.xlu0 %v5387_v51, %s5600_s21  ;;  %v5389_v8 = vpop.eup %5388 }
0x1f02   : > { %v2501_v63 = vadd.f32 1.0, %v5389_v8 }
0x1f04   : > { %5390 = vrcp.f32 %v2501_v63  ;;  %v2513_v46 = vand.u32 2147483648, %v2501_v63  ;;  %vm2507_vm2 = vweird.f32 %v2501_v63  ;;  %v2511_v48 = vand.u32 2147483647, %v2501_v63 }
0x1f05   : > { %5392 = vpow2.f32 %v4937_v16 }
0x1f06   : > { %v2514_v57 = vor.u32 1.1754944e-38, %v2513_v46  ;;  %vm2512_vm4 = vcmp.eq.f32.partialorder %v2511_v48, 8.507059e+37 }
0x1f0a   : > { %v5391_v28 = vpop.eup %5390 }
0x1f0b   : > { %v2503_v20 = vmul.f32 %v5391_v28, %v2501_v63  ;;  %v5393_v42 = vpop.eup %5392  ;;  %vm2508_vm1 = vweird.f32 %v5391_v28 }
0x1f0c   : > { %v2521_v43 = vadd.f32 1.0, %v5393_v42  ;;  %vm2509_vm3 = vmor %vm2507_vm2, %vm2508_vm1 }
0x1f0d   : > { %v2504_v14 = vsub.f32 1.0, %v2503_v20 }
0x1f0e   : > { %5394 = vrcp.f32 %v2521_v43  ;;  %v2533_v0 = vand.u32 2147483648, %v2521_v43  ;;  %vm2527_vm6 = vweird.f32 %v2521_v43  ;;  %v2531_v2 = vand.u32 2147483647, %v2521_v43 }
0x1f0f   : > { %v2505_v15 = vmul.f32 %v5391_v28, %v2504_v14 }
0x1f10   : > { %v2534_v5 = vor.u32 1.1754944e-38, %v2533_v0  ;;  %vm2532_vm8 = vcmp.eq.f32.partialorder %v2531_v2, 8.507059e+37 }
0x1f11   : > { %v2506_v23 = vadd.f32 %v5391_v28, %v2505_v15 }
0x1f13   : > { %v2510_v4 = vsel %vm2509_vm3, %v5391_v28, %v2506_v23 }
0x1f14   : > { %v2515_v61 = vsel %vm2512_vm4, %v2514_v57, %v2510_v4  ;;  %v5395_v59 = vpop.eup %5394 }
0x1f15   : > { %v2523_v58 = vmul.f32 %v5395_v59, %v2521_v43  ;;  %vm2528_vm5 = vweird.f32 %v5395_v59  ;;  %v2538_v18 = vmul.f32 %v2515_v61, %v6258_v34 }
0x1f16   : > { %vm2529_vm7 = vmor %vm2527_vm6, %vm2528_vm5 }
0x1f17   : > { %v2524_v50 = vsub.f32 1.0, %v2523_v58 }
0x1f19   : > { %v2525_v62 = vmul.f32 %v5395_v59, %v2524_v50 }
0x1f1b   : > { %v2526_v55 = vadd.f32 %v5395_v59, %v2525_v62 }
0x1f1d   : > { %v2530_v3 = vsel %vm2529_vm7, %v5395_v59, %v2526_v55 }
0x1f1e   : > { %v2535_v6 = vsel %vm2532_vm8, %v2534_v5, %v2530_v3 }
0x1f1f   : > { %v2549_v19 = vmul.f32 %v2535_v6, %v6263_v32 }
0x1f5a   : > { %v2541_v60 = vpop.permute.xlu2 %2540 }
0x1f5b   : > { %v2543_v54 = vmul.f32 %v2541_v60, %v2515_v61 }
0x1f5d   : > { %2545 = vrot.lane.b32.xlu1 %v2543_v54, %s5600_s21 }
0x1f73   : > { %v2552_v17 = vpop.permute.xlu0 %2551 }
0x1f74   : > { %v2554_v22 = vmul.f32 %v2552_v17, %v2535_v6 }
0x1f76   : > { %2556 = vrot.lane.b32.xlu2 %v2554_v22, %s5600_s21 }
0x1fcf   : > { %v2546_v25 = vpop.permute.xlu1 %2545 }
0x1fd0   : > { %v2557_v33 = vpop.permute.xlu2 %2556  ;;  %v6285_v39 = vadd.f32 %v2546_v25, %v2538_v18 }
0x1fd1   : > { %v6287_v24 = vadd.f32 %v2557_v33, %v2549_v19 }
0x1fd2   : > { %5396 = vtanh.f32 %v6285_v39 }
0x1fd3   : > { %5398 = vtanh.f32 %v6287_v24 }
0x1fd8   : > { %v5397_v38 = vpop.eup %5396 }
0x1fd9   : > { %v5399_v40 = vpop.eup %5398  ;;  %2562 = vrot.lane.b32.xlu0 %v5397_v38, %s5600_s21 }
0x1fda   : > { %2568 = vrot.lane.b32.xlu1 %v5399_v40, %s5600_s21 }
0x204b   : > { %v2563_v26 = vpop.permute.xlu0 %2562 }
0x204c   : > { %v2569_v34 = vpop.permute.xlu1 %2568  ;;  %v2565_v7 = vmul.f32 %v2563_v26, %v2515_v61 }
0x204d   : > { %v2571_v32 = vmul.f32 %v2569_v34, %v2535_v6 }
0x204e   : > { %2573 = vrot.lane.b32.xlu2 %v2565_v7, %s5601_s22  ;;  %v1834_v7 = vadd.f32 %v6274_v21, %v6026_v45 }
0x204f   : > { %2577 = vrot.lane.b32.xlu0 %v2571_v32, %s5602_s23 }
0x20a8   : > { %v2574_v47 = vpop.permute.xlu2 %2573 }
0x20a9   : > { %2581 = vst.msk [vmem:[#allocation3 + $0x28] sm:$0xff] %vm705_vm0, %v2574_v47 }
0x20c1   : > { %v2578_v1 = vpop.permute.xlu0 %2577 }
0x20c2   : > { %v2580_v9 = vsel %vm705_vm0, %v2574_v47, %v2578_v1  ;;  %2582 = vst.msk [vmem:[#allocation3 + $0x10] sm:$0xff] %vm868_vm9, %v2578_v1 }
0x20c3   : > { %v2583_v11 = vpack.c.bf16 %v2580_v9, %v2580_v9 }
0x20c5   : > { %4938 = vmatmul.msk.bf16.vlgmr.msrb.gmra.mxu0 %vm911_vm10, %v2583_v11  ;;  %4939 = vmatmul.msk.bf16.vlgmr.msrb.gmra.mxu1 %vm911_vm10, %v2583_v11 }
0x2142   : > { %v2596_v49 = vpop.f32.mrf.mxu0  ;;  %v2609_v13 = vpop.f32.mrf.mxu1 }
0x2143   : > { %v2613_v12 = vadd.f32 %v2596_v49, %v6058_v37  ;;  %v2614_v35 = vadd.f32 %v2609_v13, %v1848_v10 }
0x2145   : > { %5400 = vtanh.f32 %v2613_v12  ;;  %v4941_v53 = vmul.f32 -1.442695, %v2614_v35  ;;  %v4940_v29 = vmul.f32 -1.442695, %v2613_v12 }
0x2146   : > { %5402 = vtanh.f32 %v2614_v35 }
0x2147   : > { %5404 = vpow2.f32 %v4941_v53 }
0x214a   : > { %v2598_v31 = vpop.f32.mrf.mxu0  ;;  %v2611_v36 = vpop.f32.mrf.mxu1 }
0x214b   : > { %v5401_v44 = vpop.eup %5400 }
0x214c   : > { %v5403_v52 = vpop.eup %5402  ;;  %2657 = vrot.lane.b32.xlu1 %v5401_v44, %s5600_s21 }
0x214d   : > { %2668 = vrot.lane.b32.xlu2 %v5403_v52, %s5600_s21  ;;  %v5405_v41 = vpop.eup %5404 }
0x214e   : > { %v2638_v51 = vadd.f32 1.0, %v5405_v41 }
0x2150   : > { %5406 = vrcp.f32 %v2638_v51  ;;  %v2650_v20 = vand.u32 2147483648, %v2638_v51  ;;  %vm2644_vm12 = vweird.f32 %v2638_v51  ;;  %v2648_v14 = vand.u32 2147483647, %v2638_v51 }
0x2151   : > { %5408 = vpow2.f32 %v4940_v29 }
0x2152   : > { %v2651_v42 = vor.u32 1.1754944e-38, %v2650_v20  ;;  %vm2649_vm14 = vcmp.eq.f32.partialorder %v2648_v14, 8.507059e+37 }
0x2156   : > { %v5407_v27 = vpop.eup %5406 }
0x2157   : > { %v2640_v56 = vmul.f32 %v5407_v27, %v2638_v51  ;;  %v5409_v8 = vpop.eup %5408  ;;  %vm2645_vm11 = vweird.f32 %v5407_v27 }
0x2158   : > { %v2618_v28 = vadd.f32 1.0, %v5409_v8  ;;  %vm2646_vm13 = vmor %vm2644_vm12, %vm2645_vm11 }
0x2159   : > { %v2641_v37 = vsub.f32 1.0, %v2640_v56 }
0x215a   : > { %5410 = vrcp.f32 %v2618_v28  ;;  %v2630_v54 = vand.u32 2147483648, %v2618_v28  ;;  %vm2624_vm1 = vweird.f32 %v2618_v28  ;;  %v2628_v59 = vand.u32 2147483647, %v2618_v28 }
0x215b   : > { %v2642_v63 = vmul.f32 %v5407_v27, %v2641_v37 }
0x215c   : > { %v2631_v50 = vor.u32 1.1754944e-38, %v2630_v54  ;;  %vm2629_vm3 = vcmp.eq.f32.partialorder %v2628_v59, 8.507059e+37 }
0x215d   : > { %v2643_v16 = vadd.f32 %v5407_v27, %v2642_v63 }
0x215f   : > { %v2647_v15 = vsel %vm2646_vm13, %v5407_v27, %v2643_v16 }
0x2160   : > { %v2652_v23 = vsel %vm2649_vm14, %v2651_v42, %v2647_v15  ;;  %v5411_v46 = vpop.eup %5410 }
0x2161   : > { %v2620_v4 = vmul.f32 %v5411_v46, %v2618_v28  ;;  %vm2625_vm15 = vweird.f32 %v5411_v46  ;;  %v2666_v2 = vmul.f32 %v2652_v23, %v6287_v24 }
0x2162   : > { %vm2626_vm2 = vmor %vm2624_vm1, %vm2625_vm15 }
0x2163   : > { %v2621_v57 = vsub.f32 1.0, %v2620_v4 }
0x2165   : > { %v2622_v60 = vmul.f32 %v5411_v46, %v2621_v57 }
0x2167   : > { %v2623_v61 = vadd.f32 %v5411_v46, %v2622_v60 }
0x2169   : > { %v2627_v58 = vsel %vm2626_vm2, %v5411_v46, %v2623_v61 }
0x216a   : > { %v2632_v55 = vsel %vm2629_vm3, %v2631_v50, %v2627_v58 }
0x216b   : > { %v2655_v6 = vmul.f32 %v2632_v55, %v6285_v39 }
0x21a7   : > { %v2669_v43 = vpop.permute.xlu2 %2668 }
0x21a8   : > { %v2671_v48 = vmul.f32 %v2669_v43, %v2652_v23 }
0x21aa   : > { %2673 = vrot.lane.b32.xlu1 %v2671_v48, %s5600_s21 }
0x21be   : > { %v2658_v62 = vpop.permute.xlu1 %2657 }
0x21bf   : > { %v2660_v0 = vmul.f32 %v2658_v62, %v2632_v55 }
0x21c1   : > { %2662 = vrot.lane.b32.xlu0 %v2660_v0, %s5600_s21  ;;  %v4972_v0 = vld [vmem:[%s6339_s16 + $0x30] sm:$0xf] }
0x221c   : > { %v2674_v3 = vpop.permute.xlu1 %2673 }
0x221d   : > { %v6308_v5 = vadd.f32 %v2674_v3, %v2666_v2  ;;  %v5147_v2 = vld [vmem:[%s6339_s16 + $0x34] sm:$0xf0]  ;;  %v5146_v3 = vld [vmem:[%s6339_s16 + $0x34] sm:$0xf] }
0x221f   : > { %5412 = vtanh.f32 %v6308_v5 }
0x2225   : > { %v5413_v17 = vpop.eup %5412 }
0x2226   : > { %2685 = vrot.lane.b32.xlu0 %v5413_v17, %s5600_s21  ;;  %v4974_v17 = vld [vmem:[%s6339_s16 + $0x38] sm:$0xf0] }
0x2233   : > { %v2663_v22 = vpop.permute.xlu0 %2662 }
0x2234   : > { %v6313_v18 = vadd.f32 %v2663_v22, %v2655_v6  ;;  %v4964_v6 = vld [vmem:[%s6339_s16 + $0x20] sm:$0xf]  ;;  %v5145_v22 = vld [vmem:[%s6339_s16 + $0x24] sm:$0xf0] }
0x2236   : > { %5414 = vtanh.f32 %v6313_v18 }
0x223c   : > { %v5415_v19 = vpop.eup %5414 }
0x223d   : > { %2679 = vrot.lane.b32.xlu2 %v5415_v19, %s5600_s21  ;;  %v5144_v19 = vld [vmem:[%s6339_s16 + $0x24] sm:$0xf] }
0x2297   : > { %v2680_v25 = vpop.permute.xlu2 %2679 }
0x2298   : > { %v2686_v33 = vpop.permute.xlu0 %2685  ;;  %v2682_v24 = vmul.f32 %v2680_v25, %v2632_v55  ;;  %v4966_v25 = vld [vmem:[%s6339_s16 + $0x28] sm:$0xf0] }
0x2299   : > { %v2688_v38 = vmul.f32 %v2686_v33, %v2652_v23  ;;  %v4965_v33 = vor.u32 %v5145_v22, %v4964_v6 }
0x229a   : > { %2690 = vrot.lane.b32.xlu1 %v2682_v24, %s5601_s22 }
0x229b   : > { %2694 = vrot.lane.b32.xlu2 %v2688_v38, %s5602_s23  ;;  %v4969_v38 = vor.u32 %v5144_v19, %v4966_v25 }
0x22f5   : > { %v2695_v40 = vpop.permute.xlu2 %2694 }
0x22f6   : > { %2699 = vst.msk [vmem:[#allocation3 + $0x8] sm:$0xff] %vm868_vm9, %v2695_v40 }
0x230c   : > { %v2691_v39 = vpop.permute.xlu1 %2690 }
0x230d   : > { %v2697_v26 = vsel %vm705_vm0, %v2691_v39, %v2695_v40  ;;  %2698 = vst.msk [vmem:[#allocation3 + $0x30] sm:$0xff] %vm705_vm0, %v2691_v39 }
0x230e   : > { %v2700_v34 = vpack.c.bf16 %v2697_v26, %v2697_v26 }
0x2310   : > { %4942 = vmatmul.msk.bf16.vlgmr.msrb.gmra.mxu2 %vm911_vm10, %v2700_v34  ;;  %4943 = vmatmul.msk.bf16.vlgmr.msrb.gmra.mxu3 %vm911_vm10, %v2700_v34  ;;  %v4956_v34 = vld [vmem:[%s6339_s16 + $0x10] sm:$0xf] }
0x2393   : > { %v2713_v32 = vpop.f32.mrf.mxu2  ;;  %v2726_v47 = vpop.f32.mrf.mxu3 }
0x2394   : > { %v2730_v1 = vadd.f32 %v2713_v32, %v1834_v7  ;;  %v2731_v9 = vadd.f32 %v2726_v47, %v6032_v30  ;;  %v5143_v7 = vld [vmem:[%s6339_s16 + $0x14] sm:$0xf0]  ;;  %v5142_v32 = vld [vmem:[%s6339_s16 + $0x14] sm:$0xf] }
0x2395   : > { %v4957_v47 = vor.u32 %v5143_v7, %v4956_v34 }
0x2396   : > { %5416 = vtanh.f32 %v2730_v1  ;;  %v4944_v12 = vmul.f32 -1.442695, %v2730_v1  ;;  %v4945_v21 = vmul.f32 -1.442695, %v2731_v9  ;;  %v4958_v1 = vld [vmem:[%s6339_s16 + $0x18] sm:$0xf0] }
0x2397   : > { %5418 = vtanh.f32 %v2731_v9  ;;  %v4948_v9 = vld [vmem:[%s6339_s16] sm:$0xf] }
0x2398   : > { %5420 = vpow2.f32 %v4944_v12 }
0x239b   : > { %v2715_v11 = vpop.f32.mrf.mxu2  ;;  %v2728_v10 = vpop.f32.mrf.mxu3 }
0x239c   : > { %v5417_v49 = vpop.eup %5416  ;;  %v5141_v11 = vld [vmem:[%s6339_s16 + $0x4] sm:$0xf0]  ;;  %v4961_v10 = vor.u32 %v5142_v32, %v4958_v1 }
0x239d   : > { %v5419_v13 = vpop.eup %5418  ;;  %2774 = vrot.lane.b32.xlu2 %v5417_v49, %s5600_s21  ;;  %v5140_v49 = vld [vmem:[%s6339_s16 + $0x4] sm:$0xf]  ;;  %v4949_v12 = vor.u32 %v5141_v11, %v4948_v9 }
0x239e   : > { %2785 = vrot.lane.b32.xlu0 %v5419_v13, %s5600_s21  ;;  %v5421_v35 = vpop.eup %5420  ;;  %v4950_v13 = vld [vmem:[%s6339_s16 + $0x8] sm:$0xf0] }
0x239f   : > { %v2735_v31 = vadd.f32 1.0, %v5421_v35  ;;  %v4953_v35 = vor.u32 %v5140_v49, %v4950_v13 }
0x23a1   : > { %5422 = vrcp.f32 %v2735_v31  ;;  %v2747_v51 = vand.u32 2147483648, %v2735_v31  ;;  %vm2741_vm5 = vweird.f32 %v2735_v31  ;;  %v2745_v27 = vand.u32 2147483647, %v2735_v31 }
0x23a2   : > { %5424 = vpow2.f32 %v4945_v21 }
0x23a3   : > { %v2748_v56 = vor.u32 1.1754944e-38, %v2747_v51  ;;  %vm2746_vm7 = vcmp.eq.f32.partialorder %v2745_v27, 8.507059e+37  ;;  %v2820_v51 = vld [vmem:[#allocation3 + $0x20] sm:$0xff] }
0x23a7   : > { %v5423_v45 = vpop.eup %5422 }
0x23a8   : > { %v2737_v36 = vmul.f32 %v5423_v45, %v2735_v31  ;;  %v5425_v52 = vpop.eup %5424  ;;  %vm2742_vm4 = vweird.f32 %v5423_v45 }
0x23a9   : > { %v2755_v53 = vadd.f32 1.0, %v5425_v52  ;;  %vm2743_vm6 = vmor %vm2741_vm5, %vm2742_vm4  ;;  %v2819_v52 = vld [vmem:[#allocation3 + $0x18] sm:$0xff] }
0x23aa   : > { %v2738_v30 = vsub.f32 1.0, %v2737_v36  ;;  %v2817_v36 = vld [vmem:[#allocation3 + $0x8] sm:$0xff] }
0x23ab   : > { %5426 = vrcp.f32 %v2755_v53  ;;  %v2767_v42 = vand.u32 2147483648, %v2755_v53  ;;  %vm2761_vm11 = vweird.f32 %v2755_v53  ;;  %v2765_v43 = vand.u32 2147483647, %v2755_v53 }
0x23ac   : > { %v2739_v44 = vmul.f32 %v5423_v45, %v2738_v30 }
0x23ad   : > { %v2768_v46 = vor.u32 1.1754944e-38, %v2767_v42  ;;  %vm2766_vm13 = vcmp.eq.f32.partialorder %v2765_v43, 8.507059e+37 }
0x23ae   : > { %v2740_v41 = vadd.f32 %v5423_v45, %v2739_v44  ;;  %v2818_v44 = vld [vmem:[#allocation3 + $0x10] sm:$0xff] }
0x23b0   : > { %v2744_v29 = vsel %vm2743_vm6, %v5423_v45, %v2740_v41  ;;  %v2821_v41 = vld [vmem:[#allocation3 + $0x28] sm:$0xff] }
0x23b1   : > { %v2749_v8 = vsel %vm2746_vm7, %v2748_v56, %v2744_v29  ;;  %v5427_v28 = vpop.eup %5426  ;;  %v2826_v27 = vpack.c.bf16 %v2821_v41, %v2820_v51  ;;  %v2822_v56 = vld [vmem:[#allocation3 + $0x30] sm:$0xff] }
0x23b2   : > { %v2757_v16 = vmul.f32 %v5427_v28, %v2755_v53  ;;  %vm2762_vm8 = vweird.f32 %v5427_v28  ;;  %v2772_v60 = vmul.f32 %v2749_v8, %v6313_v18  ;;  %v4977_v18 = vor.u32 %v5146_v3, %v4974_v17 }
0x23b3   : > { %vm2763_vm12 = vmor %vm2761_vm11, %vm2762_vm8  ;;  %v2825_v53 = vpack.c.bf16 %v2819_v52, %v2818_v44 }
0x23b4   : > { %v2758_v20 = vsub.f32 1.0, %v2757_v16  ;;  %2927 = vmatpush.bf16.msra.mxu1 %v4977_v18 }
0x23b6   : > { %v2759_v14 = vmul.f32 %v5427_v28, %v2758_v20 }
0x23b8   : > { %v2760_v15 = vadd.f32 %v5427_v28, %v2759_v14  ;;  %2928 = vmatpush.bf16.msra.mxu1 %v4969_v38 }
0x23ba   : > { %v2764_v23 = vsel %vm2763_vm12, %v5427_v28, %v2760_v15 }
0x23bb   : > { %v2769_v4 = vsel %vm2766_vm13, %v2768_v46, %v2764_v23 }
0x23bc   : > { %v2783_v58 = vmul.f32 %v2769_v4, %v6308_v5  ;;  %v4973_v5 = vor.u32 %v5147_v2, %v4972_v0  ;;  %2929 = vmatpush.bf16.msra.mxu1 %v4961_v10 }
0x23be   : > { %2898 = vmatpush.bf16.msra.mxu0 %v4973_v5 }
0x23c0   : > { %2930 = vmatpush.bf16.msra.mxu1 %v4953_v35 }
0x23c2   : > { %2899 = vmatpush.bf16.msra.mxu0 %v4965_v33 }
0x23c6   : > { %2900 = vmatpush.bf16.msra.mxu0 %v4957_v47 }
0x23ca   : > { %2901 = vmatpush.bf16.msra.mxu0 %v4949_v12 }
0x23f7   : > { %v2775_v37 = vpop.permute.xlu2 %2774 }
0x23f8   : > { %v2777_v63 = vmul.f32 %v2775_v37, %v2749_v8 }
0x23fa   : > { %2779 = vrot.lane.b32.xlu0 %v2777_v63, %s5600_s21 }
0x2410   : > { %v2786_v48 = vpop.permute.xlu0 %2785 }
0x2411   : > { %v2788_v57 = vmul.f32 %v2786_v48, %v2769_v4 }
0x2413   : > { %2790 = vrot.lane.b32.xlu1 %v2788_v57, %s5600_s21 }
0x246c   : > { %v2780_v61 = vpop.permute.xlu0 %2779 }
0x246d   : > { %v2782_v54 = vadd.f32 %v2780_v61, %v2772_v60 }
0x246f   : > { %5428 = vtanh.f32 %v2782_v54 }
0x2475   : > { %v5429_v59 = vpop.eup %5428 }
0x2476   : > { %2796 = vrot.lane.b32.xlu0 %v5429_v59, %s5600_s21 }
0x2485   : > { %v2791_v50 = vpop.permute.xlu1 %2790 }
0x2486   : > { %v2793_v62 = vadd.f32 %v2791_v50, %v2783_v58 }
0x2488   : > { %5430 = vtanh.f32 %v2793_v62 }
0x248e   : > { %v5431_v55 = vpop.eup %5430 }
0x248f   : > { %2802 = vrot.lane.b32.xlu1 %v5431_v55, %s5600_s21 }
0x24e8   : > { %v2797_v24 = vpop.permute.xlu0 %2796 }
0x24e9   : > { %v2799_v40 = vmul.f32 %v2797_v24, %v2749_v8  ;;  %v2836_v8 = vld [vmem:[%s632_s20] sm:$0x3] }
0x24ea   : > { %v6373_v63 = vperm.slane %v2836_v8, 0  ;;  %v2839_v28 = vperm.slane %v2836_v8, 1 }
0x24eb   : > { %2807 = vrot.lane.b32.xlu1 %v2799_v40, %s5601_s22 }
0x2501   : > { %v2803_v39 = vpop.permute.xlu1 %2802 }
0x2502   : > { %v2805_v26 = vmul.f32 %v2803_v39, %v2769_v4 }
0x2504   : > { %2812 = vrot.lane.b32.xlu2 %v2805_v26, %s5602_s23 }
0x255d   : > { %v2808_v31 = vpop.permute.xlu1 %2807 }
0x255e   : > { %v2813_v45 = vpop.permute.xlu2 %2812  ;;  %2810 = vst.msk [vmem:[#allocation3 + $0x38] sm:$0xff] %vm705_vm0, %v2808_v31 }
0x255f   : > { %2815 = vst.msk [vmem:[#allocation3] sm:$0xff] %vm868_vm9, %v2813_v45 }
0x2565   : > { %v2823_v29 = vld [vmem:[#allocation3 + $0x38] sm:$0xff] }
0x2566   : > { %v2816_v21 = vld [vmem:[#allocation3] sm:$0xff]  ;;  %v2827_v37 = vpack.c.bf16 %v2823_v29, %v2822_v56 }
0x2567   : > { %v2824_v30 = vpack.c.bf16 %v2817_v36, %v2816_v21 }
0x2569   : > { %4978 = vmatmul.msk.bf16.vlgmr.msra.gmra.mxu0 %vm911_vm10, %v2824_v30  ;;  %4982 = vmatmul.msk.bf16.vlgmr.msra.gmra.mxu1 %vm911_vm10, %v2824_v30 }
0x2579   : > { %4979 = vmatmul.msk.bf16.gmra.mxu0 %vm911_vm10, %v2825_v53  ;;  %4983 = vmatmul.msk.bf16.gmra.mxu1 %vm911_vm10, %v2825_v53 }
0x2589   : > { %4980 = vmatmul.msk.bf16.gmra.mxu0 %vm911_vm10, %v2826_v27  ;;  %4984 = vmatmul.msk.bf16.gmra.mxu1 %vm911_vm10, %v2826_v27 }
0x2599   : > { %4981 = vmatmul.msk.bf16.gmra.mxu0 %vm911_vm10, %v2827_v37  ;;  %4985 = vmatmul.msk.bf16.gmra.mxu1 %vm911_vm10, %v2827_v37 }
0x25e6   : > { %v2903_v16 = vpop.f32.mrf.mxu0  ;;  %v2932_v20 = vpop.f32.mrf.mxu1 }
0x25e7   : > { %v2904_v14 = vadd.f32 %v2903_v16, %v6373_v63  ;;  %v6376_v15 = vadd.f32 %v2932_v20, %v2839_v28 }
0x25e9   : > { %5432 = vtanh.f32 %v2904_v14  ;;  %v4986_v6 = vmul.f32 -1.442695, %v2904_v14 }
0x25eb   : > { %5434 = vpow2.f32 %v4986_v6  ;;  %v5006_v6 = vld [vmem:[%s6420_s29 + $0x20] sm:$0xf] }
0x25ee   : > { %v6378_v42 = vpop.f32.mrf.mxu0  ;;  %v2934_v43 = vpop.f32.mrf.mxu1 }
0x25ef   : > { %v5433_v23 = vpop.eup %5432  ;;  %v6380_v46 = vadd.f32 %v2934_v43, %v2839_v28 }
0x25f0   : > { %3002 = vrot.lane.b32.xlu2 %v5433_v23, %s5600_s21 }
0x25f1   : > { %v5435_v19 = vpop.eup %5434 }
0x25f2   : > { %v2963_v33 = vadd.f32 1.0, %v5435_v19  ;;  %v5152_v19 = vld [vmem:[%s6420_s29 + $0x24] sm:$0xf] }
0x25f4   : > { %v2975_v34 = vand.u32 2147483648, %v2963_v33  ;;  %vm2969_vm15 = vweird.f32 %v2963_v33  ;;  %v2973_v7 = vand.u32 2147483647, %v2963_v33 }
0x25f6   : > { %v6383_v48 = vpop.f32.mrf.mxu0  ;;  %v2937_v4 = vpop.f32.mrf.mxu1  ;;  %v2976_v47 = vor.u32 1.1754944e-38, %v2975_v34  ;;  %vm2974_vm2 = vcmp.eq.f32.partialorder %v2973_v7, 8.507059e+37 }
0x25f7   : > { %v6385_v57 = vadd.f32 %v2937_v4, %v2839_v28 }
0x25fe   : > { %v6387_v60 = vpop.f32.mrf.mxu0  ;;  %v2939_v61 = vpop.f32.mrf.mxu1 }
0x25ff   : > { %v6389_v54 = vadd.f32 %v2939_v61, %v2839_v28  ;;  %v5014_v61 = vld [vmem:[%s6420_s29 + $0x30] sm:$0xf] }
0x2606   : > { %v6391_v59 = vpop.f32.mrf.mxu0  ;;  %v2942_v58 = vpop.f32.mrf.mxu1 }
0x2607   : > { %v6393_v50 = vadd.f32 %v2942_v58, %v2839_v28  ;;  %v5155_v58 = vld [vmem:[%s6420_s29 + $0x34] sm:$0xf0] }
0x260e   : > { %v6395_v62 = vpop.f32.mrf.mxu0  ;;  %v2944_v55 = vpop.f32.mrf.mxu1 }
0x260f   : > { %v6397_v0 = vadd.f32 %v2944_v55, %v2839_v28  ;;  %v5154_v55 = vld [vmem:[%s6420_s29 + $0x34] sm:$0xf] }
0x2616   : > { %v2918_v2 = vpop.f32.mrf.mxu0  ;;  %v2947_v3 = vpop.f32.mrf.mxu1 }
0x2617   : > { %v6400_v5 = vadd.f32 %v2918_v2, %v6373_v63  ;;  %v6402_v17 = vadd.f32 %v2947_v3, %v2839_v28  ;;  %v6426_v2 = vor.u32 %v5155_v58, %v5014_v61  ;;  %v5016_v3 = vld [vmem:[%s6420_s29 + $0x38] sm:$0xf0] }
0x2619   : > { %3093 = vmatpush.bf16.msra.mxu2 %v6426_v2  ;;  %3561 = vmatpush.bf16.msrb.mxu0 %v6426_v2 }
0x261e   : > { %v2949_v22 = vpop.f32.mrf.mxu1 }
0x261f   : > { %v2950_v18 = vadd.f32 %v2949_v22, %v2839_v28  ;;  %v5153_v22 = vld [vmem:[%s6420_s29 + $0x24] sm:$0xf0] }
0x2621   : > { %5436 = vtanh.f32 %v2950_v18  ;;  %v4987_v10 = vmul.f32 -1.442695, %v2950_v18  ;;  %v6431_v18 = vor.u32 %v5154_v55, %v5016_v3 }
0x2622   : > { %5438 = vrcp.f32 %v2963_v33 }
0x2623   : > { %5440 = vpow2.f32 %v4987_v10  ;;  %3106 = vmatpush.bf16.msra.mxu3 %v6431_v18  ;;  %3574 = vmatpush.bf16.msrb.mxu1 %v6431_v18  ;;  %v4992_v10 = vld [vmem:[%s6420_s29 + $0x8] sm:$0xf0] }
0x2627   : > { %v5437_v25 = vpop.eup %5436 }
0x2628   : > { %3013 = vrot.lane.b32.xlu0 %v5437_v25, %s5600_s21  ;;  %v5439_v24 = vpop.eup %5438  ;;  %v5008_v25 = vld [vmem:[%s6420_s29 + $0x28] sm:$0xf0] }
0x2629   : > { %v2965_v38 = vmul.f32 %v5439_v24, %v2963_v33  ;;  %vm2970_vm14 = vweird.f32 %v5439_v24  ;;  %v5441_v49 = vpop.eup %5440  ;;  %v6436_v33 = vor.u32 %v5153_v22, %v5006_v6 }
0x262a   : > { %vm2971_vm1 = vmor %vm2969_vm15, %vm2970_vm14  ;;  %v2983_v13 = vadd.f32 1.0, %v5441_v49 }
0x262b   : > { %v2966_v40 = vsub.f32 1.0, %v2965_v38  ;;  %v4998_v38 = vld [vmem:[%s6420_s29 + $0x10] sm:$0xf]  ;;  %3094 = vmatpush.bf16.msra.mxu2 %v6436_v33  ;;  %3562 = vmatpush.bf16.msrb.mxu0 %v6436_v33 }
0x262c   : > { %5442 = vrcp.f32 %v2983_v13  ;;  %v2995_v36 = vand.u32 2147483648, %v2983_v13  ;;  %vm2989_vm4 = vweird.f32 %v2983_v13  ;;  %v2993_v30 = vand.u32 2147483647, %v2983_v13 }
0x262d   : > { %v2967_v39 = vmul.f32 %v5439_v24, %v2966_v40  ;;  %v5151_v40 = vld [vmem:[%s6420_s29 + $0x14] sm:$0xf0] }
0x262e   : > { %v2996_v52 = vor.u32 1.1754944e-38, %v2995_v36  ;;  %vm2994_vm6 = vcmp.eq.f32.partialorder %v2993_v30, 8.507059e+37  ;;  %v6448_v34 = vor.u32 %v5151_v40, %v4998_v38 }
0x262f   : > { %v2968_v26 = vadd.f32 %v5439_v24, %v2967_v39  ;;  %v5150_v39 = vld [vmem:[%s6420_s29 + $0x14] sm:$0xf] }
0x2630   : > { %3095 = vmatpush.bf16.msra.mxu2 %v6448_v34  ;;  %3563 = vmatpush.bf16.msrb.mxu0 %v6448_v34 }
0x2631   : > { %v2972_v32 = vsel %vm2971_vm1, %v5439_v24, %v2968_v26  ;;  %v6440_v24 = vor.u32 %v5152_v19, %v5008_v25  ;;  %v5000_v26 = vld [vmem:[%s6420_s29 + $0x18] sm:$0xf0] }
0x2632   : > { %v2977_v9 = vsel %vm2974_vm2, %v2976_v47, %v2972_v32  ;;  %v5443_v12 = vpop.eup %5442  ;;  %v6452_v7 = vor.u32 %v5150_v39, %v5000_v26  ;;  %v4990_v47 = vld [vmem:[%s6420_s29] sm:$0xf] }
0x2633   : > { %v2985_v35 = vmul.f32 %v5443_v12, %v2983_v13  ;;  %vm2990_vm3 = vweird.f32 %v5443_v12  ;;  %v3000_v27 = vmul.f32 0.0, %v2977_v9  ;;  %3107 = vmatpush.bf16.msra.mxu3 %v6440_v24  ;;  %3575 = vmatpush.bf16.msrb.mxu1 %v6440_v24 }
0x2634   : > { %vm2991_vm5 = vmor %vm2989_vm4, %vm2990_vm3 }
0x2635   : > { %v2986_v31 = vsub.f32 1.0, %v2985_v35 }
0x2637   : > { %v2987_v45 = vmul.f32 %v5443_v12, %v2986_v31  ;;  %3108 = vmatpush.bf16.msra.mxu3 %v6452_v7  ;;  %3576 = vmatpush.bf16.msrb.mxu1 %v6452_v7  ;;  %v2906_v31 = vadd.f32 %v6378_v42, %v6373_v63 }
0x2639   : > { %v2988_v21 = vadd.f32 %v5443_v12, %v2987_v45 }
0x263b   : > { %v2992_v44 = vsel %vm2991_vm5, %v5443_v12, %v2988_v21 }
0x263c   : > { %v2997_v41 = vsel %vm2994_vm6, %v2996_v52, %v2992_v44 }
0x263d   : > { %v3011_v8 = vmul.f32 0.0, %v2997_v41 }
0x264a   : > { %v3003_v1 = vpop.permute.xlu2 %3002 }
0x264b   : > { %v3005_v11 = vmul.f32 %v3003_v1, %v2977_v9  ;;  %v5149_v1 = vld [vmem:[%s6420_s29 + $0x4] sm:$0xf0] }
0x264d   : > { %3007 = vrot.lane.b32.xlu1 %v3005_v11, %s5600_s21  ;;  %v6463_v11 = vor.u32 %v5149_v1, %v4990_v47 }
0x264f   : > { %3096 = vmatpush.bf16.msra.mxu2 %v6463_v11  ;;  %3564 = vmatpush.bf16.msrb.mxu0 %v6463_v11 }
0x2653   : > { %3210 = vmatpush.bf16.msrb.mxu2 %v6426_v2  ;;  %3795 = vmatpush.bf16.msra.mxu0 %v6426_v2 }
0x2657   : > { %3211 = vmatpush.bf16.msrb.mxu2 %v6436_v33  ;;  %3796 = vmatpush.bf16.msra.mxu0 %v6436_v33 }
0x265b   : > { %3212 = vmatpush.bf16.msrb.mxu2 %v6448_v34  ;;  %3797 = vmatpush.bf16.msra.mxu0 %v6448_v34 }
0x265f   : > { %3213 = vmatpush.bf16.msrb.mxu2 %v6463_v11  ;;  %3798 = vmatpush.bf16.msra.mxu0 %v6463_v11 }
0x269a   : > { %v3014_v53 = vpop.permute.xlu0 %3013 }
0x269b   : > { %v3016_v51 = vmul.f32 %v3014_v53, %v2997_v41 }
0x269d   : > { %3018 = vrot.lane.b32.xlu2 %v3016_v51, %s5600_s21 }
0x26bf   : > { %v3008_v29 = vpop.permute.xlu1 %3007 }
0x26c0   : > { %v6407_v56 = vadd.f32 %v3008_v29, %v3000_v27 }
0x26c2   : > { %5444 = vtanh.f32 %v6407_v56 }
0x26c8   : > { %v5445_v37 = vpop.eup %5444 }
0x26c9   : > { %3024 = vrot.lane.b32.xlu0 %v5445_v37, %s5600_s21 }
0x26f7   : > { %v3019_v28 = vpop.permute.xlu2 %3018 }
0x26f8   : > { %v6411_v16 = vadd.f32 %v3019_v28, %v3011_v8 }
0x26fa   : > { %5446 = vtanh.f32 %v6411_v16 }
0x2700   : > { %v5447_v20 = vpop.eup %5446 }
0x2701   : > { %3030 = vrot.lane.b32.xlu1 %v5447_v20, %s5600_s21 }
0x273b   : > { %v3025_v14 = vpop.permute.xlu0 %3024 }
0x273c   : > { %v3027_v43 = vmul.f32 %v3025_v14, %v2977_v9  ;;  %v5148_v9 = vld [vmem:[%s6420_s29 + $0x4] sm:$0xf] }
0x273d   : > { %v6466_v49 = vor.u32 %v5148_v9, %v4992_v10 }
0x273e   : > { %3035 = vrot.lane.b32.xlu2 %v3027_v43, %s5601_s22 }
0x273f   : > { %3109 = vmatpush.bf16.msra.mxu3 %v6466_v49  ;;  %3577 = vmatpush.bf16.msrb.mxu1 %v6466_v49 }
0x2743   : > { %3223 = vmatpush.bf16.msrb.mxu3 %v6431_v18  ;;  %3808 = vmatpush.bf16.msra.mxu1 %v6431_v18 }
0x2747   : > { %3224 = vmatpush.bf16.msrb.mxu3 %v6440_v24  ;;  %3809 = vmatpush.bf16.msra.mxu1 %v6440_v24 }
0x274b   : > { %3225 = vmatpush.bf16.msrb.mxu3 %v6452_v7  ;;  %3810 = vmatpush.bf16.msra.mxu1 %v6452_v7 }
0x274f   : > { %3226 = vmatpush.bf16.msrb.mxu3 %v6466_v49  ;;  %3811 = vmatpush.bf16.msra.mxu1 %v6466_v49 }
0x2773   : > { %v3031_v23 = vpop.permute.xlu1 %3030 }
0x2774   : > { %v3033_v4 = vmul.f32 %v3031_v23, %v2997_v41 }
0x2776   : > { %3039 = vrot.lane.b32.xlu0 %v3033_v4, %s5602_s23 }
0x2798   : > { %v3036_v32 = vpop.permute.xlu2 %3035 }
0x2799   : > { %3043 = vst.msk [vmem:[#allocation2] sm:$0xff] %vm705_vm0, %v3036_v32 }
0x27e8   : > { %v3040_v13 = vpop.permute.xlu0 %3039 }
0x27e9   : > { %v3042_v12 = vsel %vm705_vm0, %v3036_v32, %v3040_v13  ;;  %3044 = vst.msk [vmem:[#allocation2 + $0x38] sm:$0xff] %vm868_vm9, %v3040_v13 }
0x27ea   : > { %v3045_v35 = vpack.c.bf16 %v3042_v12, %v3042_v12 }
0x27ec   : > { %5020 = vmatmul.msk.bf16.vlgmr.msra.gmra.mxu2 %vm911_vm10, %v3045_v35  ;;  %5021 = vmatmul.msk.bf16.vlgmr.msra.gmra.mxu3 %vm911_vm10, %v3045_v35 }
0x27ed   : > { %3327 = vmatpush.bf16.msra.mxu2 %v6426_v2  ;;  %3340 = vmatpush.bf16.msra.mxu3 %v6431_v18 }
0x27f1   : > { %3328 = vmatpush.bf16.msra.mxu2 %v6436_v33  ;;  %3341 = vmatpush.bf16.msra.mxu3 %v6440_v24 }
0x27f5   : > { %3329 = vmatpush.bf16.msra.mxu2 %v6448_v34  ;;  %3342 = vmatpush.bf16.msra.mxu3 %v6452_v7 }
0x27f9   : > { %3330 = vmatpush.bf16.msra.mxu2 %v6463_v11  ;;  %3343 = vmatpush.bf16.msra.mxu3 %v6466_v49 }
0x286f   : > { %v3098_v45 = vpop.f32.mrf.mxu2  ;;  %v3111_v21 = vpop.f32.mrf.mxu3 }
0x2870   : > { %v3115_v36 = vadd.f32 %v3098_v45, %v2906_v31  ;;  %v3116_v30 = vadd.f32 %v3111_v21, %v6402_v17 }
0x2872   : > { %5448 = vtanh.f32 %v3115_v36  ;;  %v5023_v51 = vmul.f32 -1.442695, %v3116_v30  ;;  %v5022_v37 = vmul.f32 -1.442695, %v3115_v36 }
0x2873   : > { %5450 = vtanh.f32 %v3116_v30 }
0x2874   : > { %5452 = vpow2.f32 %v5023_v51 }
0x2877   : > { %v3100_v44 = vpop.f32.mrf.mxu2  ;;  %v3113_v52 = vpop.f32.mrf.mxu3 }
0x2878   : > { %v5449_v53 = vpop.eup %5448 }
0x2879   : > { %v5451_v41 = vpop.eup %5450  ;;  %3159 = vrot.lane.b32.xlu1 %v5449_v53, %s5600_s21 }
0x287a   : > { %3170 = vrot.lane.b32.xlu2 %v5451_v41, %s5600_s21  ;;  %v5453_v27 = vpop.eup %5452 }
0x287b   : > { %v3140_v29 = vadd.f32 1.0, %v5453_v27 }
0x287d   : > { %5454 = vrcp.f32 %v3140_v29  ;;  %v3152_v23 = vand.u32 2147483648, %v3140_v29  ;;  %vm3146_vm8 = vweird.f32 %v3140_v29  ;;  %v3150_v4 = vand.u32 2147483647, %v3140_v29 }
0x287e   : > { %5456 = vpow2.f32 %v5022_v37 }
0x287f   : > { %v3153_v58 = vor.u32 1.1754944e-38, %v3152_v23  ;;  %vm3151_vm12 = vcmp.eq.f32.partialorder %v3150_v4, 8.507059e+37 }
0x2883   : > { %v5455_v42 = vpop.eup %5454 }
0x2884   : > { %v3142_v8 = vmul.f32 %v5455_v42, %v3140_v29  ;;  %v5457_v28 = vpop.eup %5456  ;;  %vm3147_vm7 = vweird.f32 %v5455_v42  ;;  %v2909_v29 = vadd.f32 %v6383_v48, %v6373_v63 }
0x2885   : > { %v3120_v14 = vadd.f32 1.0, %v5457_v28  ;;  %vm3148_vm11 = vmor %vm3146_vm8, %vm3147_vm7 }
0x2886   : > { %v3143_v17 = vsub.f32 1.0, %v3142_v8 }
0x2887   : > { %5458 = vrcp.f32 %v3120_v14  ;;  %v3132_v39 = vand.u32 2147483648, %v3120_v14  ;;  %vm3126_vm14 = vweird.f32 %v3120_v14  ;;  %v3130_v26 = vand.u32 2147483647, %v3120_v14 }
0x2888   : > { %v3144_v20 = vmul.f32 %v5455_v42, %v3143_v17 }
0x2889   : > { %v3133_v47 = vor.u32 1.1754944e-38, %v3132_v39  ;;  %vm3131_vm1 = vcmp.eq.f32.partialorder %v3130_v26, 8.507059e+37 }
0x288a   : > { %v3145_v43 = vadd.f32 %v5455_v42, %v3144_v20 }
0x288c   : > { %v3149_v61 = vsel %vm3148_vm11, %v5455_v42, %v3145_v43 }
0x288d   : > { %v3154_v3 = vsel %vm3151_vm12, %v3153_v58, %v3149_v61  ;;  %v5459_v6 = vpop.eup %5458 }
0x288e   : > { %v3122_v19 = vmul.f32 %v5459_v6, %v3120_v14  ;;  %vm3127_vm13 = vweird.f32 %v5459_v6  ;;  %v3168_v13 = vmul.f32 %v3154_v3, %v6411_v16 }
0x288f   : > { %vm3128_vm15 = vmor %vm3126_vm14, %vm3127_vm13 }
0x2890   : > { %v3123_v25 = vsub.f32 1.0, %v3122_v19 }
0x2892   : > { %v3124_v38 = vmul.f32 %v5459_v6, %v3123_v25 }
0x2894   : > { %v3125_v40 = vadd.f32 %v5459_v6, %v3124_v38 }
0x2896   : > { %v3129_v32 = vsel %vm3128_vm15, %v5459_v6, %v3125_v40 }
0x2897   : > { %v3134_v9 = vsel %vm3131_vm1, %v3133_v47, %v3129_v32 }
0x2898   : > { %v3157_v45 = vmul.f32 %v3134_v9, %v6407_v56 }
0x28d4   : > { %v3171_v55 = vpop.permute.xlu2 %3170 }
0x28d5   : > { %v3173_v22 = vmul.f32 %v3171_v55, %v3154_v3 }
0x28d7   : > { %3175 = vrot.lane.b32.xlu1 %v3173_v22, %s5600_s21 }
0x28eb   : > { %v3160_v1 = vpop.permute.xlu1 %3159 }
0x28ec   : > { %v3162_v10 = vmul.f32 %v3160_v1, %v3134_v9 }
0x28ee   : > { %3164 = vrot.lane.b32.xlu0 %v3162_v10, %s5600_s21 }
0x2949   : > { %v3176_v12 = vpop.permute.xlu1 %3175 }
0x294a   : > { %v6508_v35 = vadd.f32 %v3176_v12, %v3168_v13 }
0x294c   : > { %5460 = vtanh.f32 %v6508_v35 }
0x2952   : > { %v5461_v31 = vpop.eup %5460 }
0x2953   : > { %3187 = vrot.lane.b32.xlu0 %v5461_v31, %s5600_s21 }
0x2960   : > { %v3165_v21 = vpop.permute.xlu0 %3164 }
0x2961   : > { %v6513_v36 = vadd.f32 %v3165_v21, %v3157_v45 }
0x2963   : > { %5462 = vtanh.f32 %v6513_v36 }
0x2969   : > { %v5463_v30 = vpop.eup %5462 }
0x296a   : > { %3181 = vrot.lane.b32.xlu2 %v5463_v30, %s5600_s21 }
0x29c4   : > { %v3182_v44 = vpop.permute.xlu2 %3181 }
0x29c5   : > { %v3188_v16 = vpop.permute.xlu0 %3187  ;;  %v3184_v52 = vmul.f32 %v3182_v44, %v3134_v9 }
0x29c6   : > { %v3190_v53 = vmul.f32 %v3188_v16, %v3154_v3 }
0x29c7   : > { %3192 = vrot.lane.b32.xlu1 %v3184_v52, %s5601_s22 }
0x29c8   : > { %3196 = vrot.lane.b32.xlu2 %v3190_v53, %s5602_s23 }
0x2a22   : > { %v3197_v41 = vpop.permute.xlu2 %3196 }
0x2a23   : > { %3201 = vst.msk [vmem:[#allocation2 + $0x30] sm:$0xff] %vm868_vm9, %v3197_v41 }
0x2a39   : > { %v3193_v56 = vpop.permute.xlu1 %3192 }
0x2a3a   : > { %v3199_v51 = vsel %vm705_vm0, %v3193_v56, %v3197_v41  ;;  %3200 = vst.msk [vmem:[#allocation2 + $0x8] sm:$0xff] %vm705_vm0, %v3193_v56 }
0x2a3b   : > { %v3202_v27 = vpack.c.bf16 %v3199_v51, %v3199_v51 }
0x2a3d   : > { %5024 = vmatmul.msk.bf16.vlgmr.msrb.gmra.mxu2 %vm911_vm10, %v3202_v27  ;;  %5025 = vmatmul.msk.bf16.vlgmr.msrb.gmra.mxu3 %vm911_vm10, %v3202_v27 }
0x2a3e   : > { %3444 = vmatpush.bf16.msrb.mxu2 %v6426_v2  ;;  %3457 = vmatpush.bf16.msrb.mxu3 %v6431_v18 }
0x2a42   : > { %3445 = vmatpush.bf16.msrb.mxu2 %v6436_v33  ;;  %3458 = vmatpush.bf16.msrb.mxu3 %v6440_v24 }
0x2a46   : > { %3446 = vmatpush.bf16.msrb.mxu2 %v6448_v34  ;;  %3459 = vmatpush.bf16.msrb.mxu3 %v6452_v7 }
0x2a4a   : > { %3447 = vmatpush.bf16.msrb.mxu2 %v6463_v11  ;;  %3460 = vmatpush.bf16.msrb.mxu3 %v6466_v49 }
0x2ac0   : > { %v3215_v42 = vpop.f32.mrf.mxu2  ;;  %v3228_v37 = vpop.f32.mrf.mxu3 }
0x2ac1   : > { %v3232_v8 = vadd.f32 %v3215_v42, %v2909_v29  ;;  %v3233_v17 = vadd.f32 %v3228_v37, %v6397_v0 }
0x2ac3   : > { %5464 = vtanh.f32 %v3232_v8  ;;  %v5026_v23 = vmul.f32 -1.442695, %v3232_v8  ;;  %v5027_v4 = vmul.f32 -1.442695, %v3233_v17 }
0x2ac4   : > { %5466 = vtanh.f32 %v3233_v17 }
0x2ac5   : > { %5468 = vpow2.f32 %v5026_v23  ;;  %v2911_v23 = vadd.f32 %v6387_v60, %v6373_v63 }
0x2ac6   : > { %5470 = vpow2.f32 %v5027_v4 }
0x2ac8   : > { %v3217_v28 = vpop.f32.mrf.mxu2  ;;  %v3230_v20 = vpop.f32.mrf.mxu3 }
0x2ac9   : > { %v5465_v14 = vpop.eup %5464 }
0x2aca   : > { %v5467_v43 = vpop.eup %5466  ;;  %3276 = vrot.lane.b32.xlu0 %v5465_v14, %s5600_s21 }
0x2acb   : > { %3287 = vrot.lane.b32.xlu1 %v5467_v43, %s5600_s21  ;;  %v5469_v48 = vpop.eup %5468 }
0x2acc   : > { %v5471_v61 = vpop.eup %5470  ;;  %v3237_v58 = vadd.f32 1.0, %v5469_v48 }
0x2acd   : > { %v3257_v55 = vadd.f32 1.0, %v5471_v61 }
0x2ace   : > { %5472 = vrcp.f32 %v3237_v58  ;;  %v3249_v32 = vand.u32 2147483648, %v3237_v58  ;;  %vm3243_vm4 = vweird.f32 %v3237_v58  ;;  %v3247_v1 = vand.u32 2147483647, %v3237_v58 }
0x2acf   : > { %5474 = vrcp.f32 %v3257_v55  ;;  %v3269_v47 = vand.u32 2147483648, %v3257_v55  ;;  %vm3263_vm5 = vweird.f32 %v3257_v55  ;;  %v3267_v9 = vand.u32 2147483647, %v3257_v55 }
0x2ad0   : > { %v3250_v12 = vor.u32 1.1754944e-38, %v3249_v32  ;;  %vm3248_vm8 = vcmp.eq.f32.partialorder %v3247_v1, 8.507059e+37 }
0x2ad1   : > { %v3270_v31 = vor.u32 1.1754944e-38, %v3269_v47  ;;  %vm3268_vm11 = vcmp.eq.f32.partialorder %v3267_v9, 8.507059e+37 }
0x2ad4   : > { %v5473_v0 = vpop.eup %5472 }
0x2ad5   : > { %v5475_v3 = vpop.eup %5474  ;;  %v3239_v6 = vmul.f32 %v5473_v0, %v3237_v58  ;;  %vm3244_vm2 = vweird.f32 %v5473_v0 }
0x2ad6   : > { %v3259_v22 = vmul.f32 %v5475_v3, %v3257_v55  ;;  %vm3264_vm3 = vweird.f32 %v5475_v3  ;;  %vm3245_vm6 = vmor %vm3243_vm4, %vm3244_vm2 }
0x2ad7   : > { %v3240_v19 = vsub.f32 1.0, %v3239_v6  ;;  %vm3265_vm7 = vmor %vm3263_vm5, %vm3264_vm3 }
0x2ad8   : > { %v3260_v25 = vsub.f32 1.0, %v3259_v22 }
0x2ad9   : > { %v3241_v38 = vmul.f32 %v5473_v0, %v3240_v19 }
0x2ada   : > { %v3261_v40 = vmul.f32 %v5475_v3, %v3260_v25 }
0x2adb   : > { %v3242_v39 = vadd.f32 %v5473_v0, %v3241_v38 }
0x2adc   : > { %v3262_v26 = vadd.f32 %v5475_v3, %v3261_v40 }
0x2add   : > { %v3246_v10 = vsel %vm3245_vm6, %v5473_v0, %v3242_v39 }
0x2ade   : > { %v3266_v13 = vsel %vm3265_vm7, %v5475_v3, %v3262_v26  ;;  %v3251_v21 = vsel %vm3248_vm8, %v3250_v12, %v3246_v10 }
0x2adf   : > { %v3271_v44 = vsel %vm3268_vm11, %v3270_v31, %v3266_v13  ;;  %v3274_v53 = vmul.f32 %v3251_v21, %v6513_v36 }
0x2ae0   : > { %v3285_v27 = vmul.f32 %v3271_v44, %v6508_v35 }
0x2b3c   : > { %v3277_v45 = vpop.permute.xlu0 %3276 }
0x2b3d   : > { %v3288_v30 = vpop.permute.xlu1 %3287  ;;  %v3279_v16 = vmul.f32 %v3277_v45, %v3251_v21 }
0x2b3e   : > { %v3290_v52 = vmul.f32 %v3288_v30, %v3271_v44 }
0x2b3f   : > { %3281 = vrot.lane.b32.xlu2 %v3279_v16, %s5600_s21 }
0x2b40   : > { %3292 = vrot.lane.b32.xlu0 %v3290_v52, %s5600_s21 }
0x2b99   : > { %v3282_v41 = vpop.permute.xlu2 %3281 }
0x2b9a   : > { %v6540_v56 = vadd.f32 %v3282_v41, %v3274_v53 }
0x2b9c   : > { %5476 = vtanh.f32 %v6540_v56 }
0x2ba2   : > { %v5477_v51 = vpop.eup %5476 }
0x2ba3   : > { %3298 = vrot.lane.b32.xlu1 %v5477_v51, %s5600_s21 }
0x2bb2   : > { %v3293_v29 = vpop.permute.xlu0 %3292 }
0x2bb3   : > { %v6545_v42 = vadd.f32 %v3293_v29, %v3285_v27 }
0x2bb5   : > { %5478 = vtanh.f32 %v6545_v42 }
0x2bbb   : > { %v5479_v37 = vpop.eup %5478 }
0x2bbc   : > { %3304 = vrot.lane.b32.xlu2 %v5479_v37, %s5600_s21 }
0x2c15   : > { %v3299_v8 = vpop.permute.xlu1 %3298 }
0x2c16   : > { %v3305_v36 = vpop.permute.xlu2 %3304  ;;  %v3301_v17 = vmul.f32 %v3299_v8, %v3251_v21 }
0x2c17   : > { %v3307_v28 = vmul.f32 %v3305_v36, %v3271_v44 }
0x2c18   : > { %3309 = vrot.lane.b32.xlu0 %v3301_v17, %s5601_s22 }
0x2c19   : > { %3313 = vrot.lane.b32.xlu1 %v3307_v28, %s5602_s23 }
0x2c8a   : > { %v3310_v20 = vpop.permute.xlu0 %3309 }
0x2c8b   : > { %3317 = vst.msk [vmem:[#allocation2 + $0x10] sm:$0xff] %vm705_vm0, %v3310_v20  ;;  %v3314_v35 = vpop.permute.xlu1 %3313 }
0x2c8c   : > { %v3316_v14 = vsel %vm705_vm0, %v3310_v20, %v3314_v35  ;;  %3318 = vst.msk [vmem:[#allocation2 + $0x28] sm:$0xff] %vm868_vm9, %v3314_v35 }
0x2c8d   : > { %v3319_v43 = vpack.c.bf16 %v3316_v14, %v3316_v14 }
0x2c8f   : > { %5028 = vmatmul.msk.bf16.vlgmr.msra.gmra.mxu2 %vm911_vm10, %v3319_v43  ;;  %5029 = vmatmul.msk.bf16.vlgmr.msra.gmra.mxu3 %vm911_vm10, %v3319_v43  ;;  %v2914_v43 = vadd.f32 %v6391_v59, %v6373_v63 }
0x2c90   : > { %3678 = vmatpush.bf16.msra.mxu2 %v6426_v2  ;;  %3691 = vmatpush.bf16.msra.mxu3 %v6431_v18 }
0x2c94   : > { %3679 = vmatpush.bf16.msra.mxu2 %v6436_v33  ;;  %3692 = vmatpush.bf16.msra.mxu3 %v6440_v24 }
0x2c98   : > { %3680 = vmatpush.bf16.msra.mxu2 %v6448_v34  ;;  %3693 = vmatpush.bf16.msra.mxu3 %v6452_v7 }
0x2c9c   : > { %3681 = vmatpush.bf16.msra.mxu2 %v6463_v11  ;;  %3694 = vmatpush.bf16.msra.mxu3 %v6466_v49 }
0x2d12   : > { %v3332_v4 = vpop.f32.mrf.mxu2  ;;  %v3345_v48 = vpop.f32.mrf.mxu3 }
0x2d13   : > { %v3349_v2 = vadd.f32 %v3332_v4, %v2911_v23  ;;  %v3350_v18 = vadd.f32 %v3345_v48, %v6393_v50 }
0x2d15   : > { %5480 = vtanh.f32 %v3349_v2  ;;  %v5030_v7 = vmul.f32 -1.442695, %v3349_v2  ;;  %v5031_v58 = vmul.f32 -1.442695, %v3350_v18 }
0x2d16   : > { %5482 = vtanh.f32 %v3350_v18 }
0x2d17   : > { %5484 = vpow2.f32 %v5030_v7 }
0x2d1a   : > { %v3334_v33 = vpop.f32.mrf.mxu2  ;;  %v3347_v24 = vpop.f32.mrf.mxu3 }
0x2d1b   : > { %v5481_v61 = vpop.eup %5480 }
0x2d1c   : > { %v5483_v34 = vpop.eup %5482  ;;  %3393 = vrot.lane.b32.xlu2 %v5481_v61, %s5600_s21 }
0x2d1d   : > { %3404 = vrot.lane.b32.xlu0 %v5483_v34, %s5600_s21  ;;  %v5485_v11 = vpop.eup %5484 }
0x2d1e   : > { %v3354_v49 = vadd.f32 1.0, %v5485_v11 }
0x2d20   : > { %5486 = vrcp.f32 %v3354_v49  ;;  %v3366_v19 = vand.u32 2147483648, %v3354_v49  ;;  %vm3360_vm13 = vweird.f32 %v3354_v49  ;;  %v3364_v25 = vand.u32 2147483647, %v3354_v49 }
0x2d21   : > { %5488 = vpow2.f32 %v5031_v58 }
0x2d22   : > { %v3367_v40 = vor.u32 1.1754944e-38, %v3366_v19  ;;  %vm3365_vm15 = vcmp.eq.f32.partialorder %v3364_v25, 8.507059e+37 }
0x2d26   : > { %v5487_v60 = vpop.eup %5486 }
0x2d27   : > { %v3356_v55 = vmul.f32 %v5487_v60, %v3354_v49  ;;  %v5489_v3 = vpop.eup %5488  ;;  %vm3361_vm12 = vweird.f32 %v5487_v60 }
0x2d28   : > { %v3374_v6 = vadd.f32 1.0, %v5489_v3  ;;  %vm3362_vm14 = vmor %vm3360_vm13, %vm3361_vm12 }
0x2d29   : > { %v3357_v50 = vsub.f32 1.0, %v3356_v55 }
0x2d2a   : > { %5490 = vrcp.f32 %v3374_v6  ;;  %v3386_v12 = vand.u32 2147483648, %v3374_v6  ;;  %vm3380_vm2 = vweird.f32 %v3374_v6  ;;  %v3384_v31 = vand.u32 2147483647, %v3374_v6 }
0x2d2b   : > { %v3358_v0 = vmul.f32 %v5487_v60, %v3357_v50 }
0x2d2c   : > { %v3387_v21 = vor.u32 1.1754944e-38, %v3386_v12  ;;  %vm3385_vm4 = vcmp.eq.f32.partialorder %v3384_v31, 8.507059e+37 }
0x2d2d   : > { %v3359_v22 = vadd.f32 %v5487_v60, %v3358_v0 }
0x2d2f   : > { %v3363_v38 = vsel %vm3362_vm14, %v5487_v60, %v3359_v22 }
0x2d30   : > { %v3368_v26 = vsel %vm3365_vm15, %v3367_v40, %v3363_v38  ;;  %v5491_v47 = vpop.eup %5490 }
0x2d31   : > { %v3376_v1 = vmul.f32 %v5491_v47, %v3374_v6  ;;  %vm3381_vm1 = vweird.f32 %v5491_v47  ;;  %v3391_v52 = vmul.f32 %v3368_v26, %v6540_v56 }
0x2d32   : > { %vm3382_vm3 = vmor %vm3380_vm2, %vm3381_vm1 }
0x2d33   : > { %v3377_v9 = vsub.f32 1.0, %v3376_v1 }
0x2d35   : > { %v3378_v10 = vmul.f32 %v5491_v47, %v3377_v9 }
0x2d37   : > { %v3379_v13 = vadd.f32 %v5491_v47, %v3378_v10 }
0x2d39   : > { %v3383_v45 = vsel %vm3382_vm3, %v5491_v47, %v3379_v13 }
0x2d3a   : > { %v3388_v44 = vsel %vm3385_vm4, %v3387_v21, %v3383_v45 }
0x2d3b   : > { %v3402_v53 = vmul.f32 %v3388_v44, %v6545_v42 }
0x2d76   : > { %v3394_v39 = vpop.permute.xlu2 %3393 }
0x2d77   : > { %v3396_v32 = vmul.f32 %v3394_v39, %v3368_v26 }
0x2d79   : > { %3398 = vrot.lane.b32.xlu1 %v3396_v32, %s5600_s21 }
0x2d8f   : > { %v3405_v30 = vpop.permute.xlu0 %3404 }
0x2d90   : > { %v3407_v16 = vmul.f32 %v3405_v30, %v3388_v44 }
0x2d92   : > { %3409 = vrot.lane.b32.xlu2 %v3407_v16, %s5600_s21 }
0x2deb   : > { %v3399_v41 = vpop.permute.xlu1 %3398 }
0x2dec   : > { %v3410_v51 = vpop.permute.xlu2 %3409  ;;  %v6573_v27 = vadd.f32 %v3399_v41, %v3391_v52 }
0x2ded   : > { %v6575_v29 = vadd.f32 %v3410_v51, %v3402_v53 }
0x2dee   : > { %5492 = vtanh.f32 %v6573_v27 }
0x2def   : > { %5494 = vtanh.f32 %v6575_v29 }
0x2df4   : > { %v5493_v37 = vpop.eup %5492 }
0x2df5   : > { %v5495_v8 = vpop.eup %5494  ;;  %3415 = vrot.lane.b32.xlu0 %v5493_v37, %s5600_s21 }
0x2df6   : > { %3421 = vrot.lane.b32.xlu1 %v5495_v8, %s5600_s21 }
0x2e67   : > { %v3416_v36 = vpop.permute.xlu0 %3415 }
0x2e68   : > { %v3422_v56 = vpop.permute.xlu1 %3421  ;;  %v3418_v17 = vmul.f32 %v3416_v36, %v3368_v26 }
0x2e69   : > { %v3424_v42 = vmul.f32 %v3422_v56, %v3388_v44 }
0x2e6a   : > { %3426 = vrot.lane.b32.xlu2 %v3418_v17, %s5601_s22 }
0x2e6b   : > { %3430 = vrot.lane.b32.xlu0 %v3424_v42, %s5602_s23 }
0x2ec4   : > { %v3427_v28 = vpop.permute.xlu2 %3426 }
0x2ec5   : > { %3434 = vst.msk [vmem:[#allocation2 + $0x18] sm:$0xff] %vm705_vm0, %v3427_v28 }
0x2edd   : > { %v3431_v20 = vpop.permute.xlu0 %3430 }
0x2ede   : > { %v3433_v35 = vsel %vm705_vm0, %v3427_v28, %v3431_v20  ;;  %3435 = vst.msk [vmem:[#allocation2 + $0x20] sm:$0xff] %vm868_vm9, %v3431_v20  ;;  %v6612_v20 = vpop.f32.mrf.mxu0 }
0x2edf   : > { %v3436_v14 = vpack.c.bf16 %v3433_v35, %v3433_v35  ;;  %v2916_v35 = vadd.f32 %v6395_v62, %v6373_v63 }
0x2ee1   : > { %5032 = vmatmul.msk.bf16.vlgmr.msrb.gmra.mxu2 %vm911_vm10, %v3436_v14  ;;  %5033 = vmatmul.msk.bf16.vlgmr.msrb.gmra.mxu3 %vm911_vm10, %v3436_v14 }
0x2f64   : > { %v3449_v23 = vpop.f32.mrf.mxu2  ;;  %v3462_v4 = vpop.f32.mrf.mxu3 }
0x2f65   : > { %v3466_v48 = vadd.f32 %v3449_v23, %v2914_v43  ;;  %v3467_v2 = vadd.f32 %v3462_v4, %v6389_v54 }
0x2f67   : > { %5496 = vtanh.f32 %v3466_v48  ;;  %v5035_v34 = vmul.f32 -1.442695, %v3467_v2  ;;  %v5034_v49 = vmul.f32 -1.442695, %v3466_v48 }
0x2f68   : > { %5498 = vtanh.f32 %v3467_v2 }
0x2f69   : > { %5500 = vpow2.f32 %v5035_v34 }
0x2f6c   : > { %v3451_v18 = vpop.f32.mrf.mxu2  ;;  %v3464_v33 = vpop.f32.mrf.mxu3 }
0x2f6d   : > { %v5497_v24 = vpop.eup %5496 }
0x2f6e   : > { %v5499_v61 = vpop.eup %5498  ;;  %3510 = vrot.lane.b32.xlu1 %v5497_v24, %s5600_s21 }
0x2f6f   : > { %3521 = vrot.lane.b32.xlu2 %v5499_v61, %s5600_s21  ;;  %v5501_v7 = vpop.eup %5500 }
0x2f70   : > { %v3491_v11 = vadd.f32 1.0, %v5501_v7 }
0x2f72   : > { %5502 = vrcp.f32 %v3491_v11  ;;  %v3503_v3 = vand.u32 2147483648, %v3491_v11  ;;  %vm3497_vm6 = vweird.f32 %v3491_v11  ;;  %v3501_v6 = vand.u32 2147483647, %v3491_v11 }
0x2f73   : > { %5504 = vpow2.f32 %v5034_v49 }
0x2f74   : > { %v3504_v19 = vor.u32 1.1754944e-38, %v3503_v3  ;;  %vm3502_vm8 = vcmp.eq.f32.partialorder %v3501_v6, 8.507059e+37 }
0x2f78   : > { %v5503_v59 = vpop.eup %5502 }
0x2f79   : > { %v3493_v60 = vmul.f32 %v5503_v59, %v3491_v11  ;;  %v5505_v58 = vpop.eup %5504  ;;  %vm3498_vm5 = vweird.f32 %v5503_v59 }
0x2f7a   : > { %v3471_v50 = vadd.f32 1.0, %v5505_v58  ;;  %vm3499_vm7 = vmor %vm3497_vm6, %vm3498_vm5 }
0x2f7b   : > { %v3494_v54 = vsub.f32 1.0, %v3493_v60 }
0x2f7c   : > { %5506 = vrcp.f32 %v3471_v50  ;;  %v3483_v9 = vand.u32 2147483648, %v3471_v50  ;;  %vm3477_vm12 = vweird.f32 %v3471_v50  ;;  %v3481_v10 = vand.u32 2147483647, %v3471_v50 }
0x2f7d   : > { %v3495_v55 = vmul.f32 %v5503_v59, %v3494_v54 }
0x2f7e   : > { %v3484_v12 = vor.u32 1.1754944e-38, %v3483_v9  ;;  %vm3482_vm14 = vcmp.eq.f32.partialorder %v3481_v10, 8.507059e+37 }
0x2f7f   : > { %v3496_v0 = vadd.f32 %v5503_v59, %v3495_v55 }
0x2f81   : > { %v3500_v22 = vsel %vm3499_vm7, %v5503_v59, %v3496_v0 }
0x2f82   : > { %v3505_v38 = vsel %vm3502_vm8, %v3504_v19, %v3500_v22  ;;  %v5507_v40 = vpop.eup %5506 }
0x2f83   : > { %v3473_v26 = vmul.f32 %v5507_v40, %v3471_v50  ;;  %vm3478_vm11 = vweird.f32 %v5507_v40  ;;  %v3519_v30 = vmul.f32 %v3505_v38, %v6575_v29 }
0x2f84   : > { %vm3479_vm13 = vmor %vm3477_vm12, %vm3478_vm11 }
0x2f85   : > { %v3474_v32 = vsub.f32 1.0, %v3473_v26 }
0x2f87   : > { %v3475_v47 = vmul.f32 %v5507_v40, %v3474_v32 }
0x2f89   : > { %v3476_v1 = vadd.f32 %v5507_v40, %v3475_v47 }
0x2f8b   : > { %v3480_v13 = vsel %vm3479_vm13, %v5507_v40, %v3476_v1 }
0x2f8c   : > { %v3485_v45 = vsel %vm3482_vm14, %v3484_v12, %v3480_v13 }
0x2f8d   : > { %v3508_v53 = vmul.f32 %v3485_v45, %v6573_v27 }
0x2fc9   : > { %v3522_v25 = vpop.permute.xlu2 %3521 }
0x2fca   : > { %v3524_v39 = vmul.f32 %v3522_v25, %v3505_v38 }
0x2fcc   : > { %3526 = vrot.lane.b32.xlu1 %v3524_v39, %s5600_s21 }
0x2fe0   : > { %v3511_v31 = vpop.permute.xlu1 %3510 }
0x2fe1   : > { %v3513_v21 = vmul.f32 %v3511_v31, %v3485_v45 }
0x2fe3   : > { %3515 = vrot.lane.b32.xlu0 %v3513_v21, %s5600_s21 }
0x303e   : > { %v3527_v44 = vpop.permute.xlu1 %3526 }
0x303f   : > { %v6596_v16 = vadd.f32 %v3527_v44, %v3519_v30 }
0x3041   : > { %5508 = vtanh.f32 %v6596_v16 }
0x3047   : > { %v5509_v52 = vpop.eup %5508 }
0x3048   : > { %3538 = vrot.lane.b32.xlu0 %v5509_v52, %s5600_s21 }
0x3055   : > { %v3516_v41 = vpop.permute.xlu0 %3515 }
0x3056   : > { %v6601_v51 = vadd.f32 %v3516_v41, %v3508_v53 }
0x3058   : > { %5510 = vtanh.f32 %v6601_v51 }
0x305e   : > { %v5511_v37 = vpop.eup %5510 }
0x305f   : > { %3532 = vrot.lane.b32.xlu2 %v5511_v37, %s5600_s21 }
0x30b9   : > { %v3533_v8 = vpop.permute.xlu2 %3532 }
0x30ba   : > { %v3539_v29 = vpop.permute.xlu0 %3538  ;;  %v3535_v36 = vmul.f32 %v3533_v8, %v3485_v45 }
0x30bb   : > { %v3541_v56 = vmul.f32 %v3539_v29, %v3505_v38 }
0x30bc   : > { %3543 = vrot.lane.b32.xlu1 %v3535_v36, %s5601_s22 }
0x30bd   : > { %3547 = vrot.lane.b32.xlu2 %v3541_v56, %s5602_s23 }
0x3117   : > { %v3548_v17 = vpop.permute.xlu2 %3547 }
0x3118   : > { %3552 = vst.msk [vmem:[#allocation2 + $0x18] sm:$0xff] %vm868_vm9, %v3548_v17 }
0x312e   : > { %v3544_v27 = vpop.permute.xlu1 %3543 }
0x312f   : > { %v3550_v42 = vsel %vm705_vm0, %v3544_v27, %v3548_v17  ;;  %3551 = vst.msk [vmem:[#allocation2 + $0x20] sm:$0xff] %vm705_vm0, %v3544_v27 }
0x3130   : > { %v3553_v28 = vpack.c.bf16 %v3550_v42, %v3550_v42 }
0x3132   : > { %5036 = vmatmul.msk.bf16.vlgmr.msrb.gmra.mxu0 %vm911_vm10, %v3553_v28  ;;  %5037 = vmatmul.msk.bf16.vlgmr.msrb.gmra.mxu1 %vm911_vm10, %v3553_v28 }
0x31af   : > { %v3566_v14 = vpop.f32.mrf.mxu0  ;;  %v3579_v43 = vpop.f32.mrf.mxu1 }
0x31b0   : > { %v3583_v23 = vadd.f32 %v3566_v14, %v2916_v35  ;;  %v3584_v4 = vadd.f32 %v3579_v43, %v6385_v57 }
0x31b2   : > { %5512 = vtanh.f32 %v3583_v23  ;;  %v5038_v24 = vmul.f32 -1.442695, %v3583_v23  ;;  %v5039_v61 = vmul.f32 -1.442695, %v3584_v4 }
0x31b3   : > { %5514 = vtanh.f32 %v3584_v4 }
0x31b4   : > { %5516 = vpow2.f32 %v5038_v24 }
0x31b5   : > { %5518 = vpow2.f32 %v5039_v61 }
0x31b7   : > { %v3568_v48 = vpop.f32.mrf.mxu0  ;;  %v3581_v2 = vpop.f32.mrf.mxu1 }
0x31b8   : > { %v5513_v18 = vpop.eup %5512 }
0x31b9   : > { %v5515_v33 = vpop.eup %5514  ;;  %3627 = vrot.lane.b32.xlu0 %v5513_v18, %s5600_s21 }
0x31ba   : > { %3638 = vrot.lane.b32.xlu1 %v5515_v33, %s5600_s21  ;;  %v5517_v62 = vpop.eup %5516 }
0x31bb   : > { %v5519_v34 = vpop.eup %5518  ;;  %v3588_v7 = vadd.f32 1.0, %v5517_v62 }
0x31bc   : > { %v3608_v11 = vadd.f32 1.0, %v5519_v34 }
0x31bd   : > { %5520 = vrcp.f32 %v3588_v7  ;;  %v3600_v6 = vand.u32 2147483648, %v3588_v7  ;;  %vm3594_vm2 = vweird.f32 %v3588_v7  ;;  %v3598_v19 = vand.u32 2147483647, %v3588_v7 }
0x31be   : > { %5522 = vrcp.f32 %v3608_v11  ;;  %v3620_v22 = vand.u32 2147483648, %v3608_v11  ;;  %vm3614_vm3 = vweird.f32 %v3608_v11  ;;  %v3618_v25 = vand.u32 2147483647, %v3608_v11 }
0x31bf   : > { %v3601_v39 = vor.u32 1.1754944e-38, %v3600_v6  ;;  %vm3599_vm6 = vcmp.eq.f32.partialorder %v3598_v19, 8.507059e+37 }
0x31c0   : > { %v3621_v26 = vor.u32 1.1754944e-38, %v3620_v22  ;;  %vm3619_vm7 = vcmp.eq.f32.partialorder %v3618_v25, 8.507059e+37 }
0x31c3   : > { %v5521_v57 = vpop.eup %5520 }
0x31c4   : > { %v5523_v59 = vpop.eup %5522  ;;  %v3590_v49 = vmul.f32 %v5521_v57, %v3588_v7  ;;  %vm3595_vm15 = vweird.f32 %v5521_v57 }
0x31c5   : > { %v3610_v60 = vmul.f32 %v5523_v59, %v3608_v11  ;;  %vm3615_vm1 = vweird.f32 %v5523_v59  ;;  %vm3596_vm4 = vmor %vm3594_vm2, %vm3595_vm15 }
0x31c6   : > { %v3591_v54 = vsub.f32 1.0, %v3590_v49  ;;  %vm3616_vm5 = vmor %vm3614_vm3, %vm3615_vm1 }
0x31c7   : > { %v3611_v58 = vsub.f32 1.0, %v3610_v60 }
0x31c8   : > { %v3592_v55 = vmul.f32 %v5521_v57, %v3591_v54 }
0x31c9   : > { %v3612_v50 = vmul.f32 %v5523_v59, %v3611_v58 }
0x31ca   : > { %v3593_v0 = vadd.f32 %v5521_v57, %v3592_v55 }
0x31cb   : > { %v3613_v3 = vadd.f32 %v5523_v59, %v3612_v50 }
0x31cc   : > { %v3597_v38 = vsel %vm3596_vm4, %v5521_v57, %v3593_v0 }
0x31cd   : > { %v3617_v40 = vsel %vm3616_vm5, %v5523_v59, %v3613_v3  ;;  %v3602_v47 = vsel %vm3599_vm6, %v3601_v39, %v3597_v38 }
0x31ce   : > { %v3622_v9 = vsel %vm3619_vm7, %v3621_v26, %v3617_v40  ;;  %v3625_v12 = vmul.f32 %v3602_v47, %v6601_v51 }
0x31cf   : > { %v3636_v30 = vmul.f32 %v3622_v9, %v6596_v16 }
0x322b   : > { %v3628_v32 = vpop.permute.xlu0 %3627 }
0x322c   : > { %v3639_v1 = vpop.permute.xlu1 %3638  ;;  %v3630_v10 = vmul.f32 %v3628_v32, %v3602_v47 }
0x322d   : > { %v3641_v13 = vmul.f32 %v3639_v1, %v3622_v9 }
0x322e   : > { %3632 = vrot.lane.b32.xlu2 %v3630_v10, %s5600_s21 }
0x322f   : > { %3643 = vrot.lane.b32.xlu0 %v3641_v13, %s5600_s21 }
0x3288   : > { %v3633_v31 = vpop.permute.xlu2 %3632 }
0x3289   : > { %v6622_v45 = vadd.f32 %v3633_v31, %v3625_v12 }
0x328b   : > { %5524 = vtanh.f32 %v6622_v45 }
0x3291   : > { %v5525_v21 = vpop.eup %5524 }
0x3292   : > { %3649 = vrot.lane.b32.xlu1 %v5525_v21, %s5600_s21 }
0x32a1   : > { %v3644_v44 = vpop.permute.xlu0 %3643 }
0x32a2   : > { %v6627_v52 = vadd.f32 %v3644_v44, %v3636_v30 }
0x32a4   : > { %5526 = vtanh.f32 %v6627_v52 }
0x32aa   : > { %v5527_v53 = vpop.eup %5526 }
0x32ab   : > { %3655 = vrot.lane.b32.xlu2 %v5527_v53, %s5600_s21 }
0x3304   : > { %v3650_v41 = vpop.permute.xlu1 %3649 }
0x3305   : > { %v3656_v51 = vpop.permute.xlu2 %3655  ;;  %v3652_v37 = vmul.f32 %v3650_v41, %v3602_v47 }
0x3306   : > { %v3658_v8 = vmul.f32 %v3656_v51, %v3622_v9  ;;  %v2921_v51 = vadd.f32 %v6612_v20, %v6373_v63 }
0x3307   : > { %3660 = vrot.lane.b32.xlu0 %v3652_v37, %s5601_s22 }
0x3308   : > { %3664 = vrot.lane.b32.xlu1 %v3658_v8, %s5602_s23 }
0x3379   : > { %v3661_v29 = vpop.permute.xlu0 %3660 }
0x337a   : > { %3668 = vst.msk [vmem:[#allocation2 + $0x28] sm:$0xff] %vm705_vm0, %v3661_v29  ;;  %v3665_v16 = vpop.permute.xlu1 %3664 }
0x337b   : > { %v3667_v36 = vsel %vm705_vm0, %v3661_v29, %v3665_v16  ;;  %3669 = vst.msk [vmem:[#allocation2 + $0x10] sm:$0xff] %vm868_vm9, %v3665_v16 }
0x337c   : > { %v3670_v56 = vpack.c.bf16 %v3667_v36, %v3667_v36 }
0x337e   : > { %5040 = vmatmul.msk.bf16.vlgmr.msra.gmra.mxu2 %vm911_vm10, %v3670_v56  ;;  %5041 = vmatmul.msk.bf16.vlgmr.msra.gmra.mxu3 %vm911_vm10, %v3670_v56 }
0x3401   : > { %v3683_v17 = vpop.f32.mrf.mxu2  ;;  %v3696_v27 = vpop.f32.mrf.mxu3 }
0x3402   : > { %v3700_v42 = vadd.f32 %v3683_v17, %v6400_v5  ;;  %v3701_v28 = vadd.f32 %v3696_v27, %v6380_v46 }
0x3404   : > { %5528 = vtanh.f32 %v3700_v42  ;;  %v5042_v4 = vmul.f32 -1.442695, %v3700_v42  ;;  %v5043_v33 = vmul.f32 -1.442695, %v3701_v28 }
0x3405   : > { %5530 = vtanh.f32 %v3701_v28 }
0x3406   : > { %5532 = vpow2.f32 %v5042_v4 }
0x3409   : > { %v3685_v35 = vpop.f32.mrf.mxu2  ;;  %v3698_v14 = vpop.f32.mrf.mxu3 }
0x340a   : > { %v5529_v43 = vpop.eup %5528 }
0x340b   : > { %v5531_v23 = vpop.eup %5530  ;;  %3744 = vrot.lane.b32.xlu2 %v5529_v43, %s5600_s21 }
0x340c   : > { %3755 = vrot.lane.b32.xlu0 %v5531_v23, %s5600_s21  ;;  %v5533_v48 = vpop.eup %5532 }
0x340d   : > { %v3705_v2 = vadd.f32 1.0, %v5533_v48 }
0x340f   : > { %5534 = vrcp.f32 %v3705_v2  ;;  %v3717_v7 = vand.u32 2147483648, %v3705_v2  ;;  %vm3711_vm11 = vweird.f32 %v3705_v2  ;;  %v3715_v11 = vand.u32 2147483647, %v3705_v2 }
0x3410   : > { %5536 = vpow2.f32 %v5043_v33 }
0x3411   : > { %v3718_v59 = vor.u32 1.1754944e-38, %v3717_v7  ;;  %vm3716_vm13 = vcmp.eq.f32.partialorder %v3715_v11, 8.507059e+37 }
0x3415   : > { %v5535_v18 = vpop.eup %5534 }
0x3416   : > { %v3707_v5 = vmul.f32 %v5535_v18, %v3705_v2  ;;  %v5537_v61 = vpop.eup %5536  ;;  %vm3712_vm8 = vweird.f32 %v5535_v18 }
0x3417   : > { %v3725_v62 = vadd.f32 1.0, %v5537_v61  ;;  %vm3713_vm12 = vmor %vm3711_vm11, %vm3712_vm8 }
0x3418   : > { %v3708_v46 = vsub.f32 1.0, %v3707_v5 }
0x3419   : > { %5538 = vrcp.f32 %v3725_v62  ;;  %v3737_v6 = vand.u32 2147483648, %v3725_v62  ;;  %vm3731_vm15 = vweird.f32 %v3725_v62  ;;  %v3735_v22 = vand.u32 2147483647, %v3725_v62 }
0x341a   : > { %v3709_v24 = vmul.f32 %v5535_v18, %v3708_v46 }
0x341b   : > { %v3738_v25 = vor.u32 1.1754944e-38, %v3737_v6  ;;  %vm3736_vm2 = vcmp.eq.f32.partialorder %v3735_v22, 8.507059e+37 }
0x341c   : > { %v3710_v34 = vadd.f32 %v5535_v18, %v3709_v24 }
0x341e   : > { %v3714_v57 = vsel %vm3713_vm12, %v5535_v18, %v3710_v34 }
0x341f   : > { %v3719_v60 = vsel %vm3716_vm13, %v3718_v59, %v3714_v57  ;;  %v5539_v58 = vpop.eup %5538 }
0x3420   : > { %v3727_v55 = vmul.f32 %v5539_v58, %v3725_v62  ;;  %vm3732_vm14 = vweird.f32 %v5539_v58  ;;  %v3742_v26 = vmul.f32 %v3719_v60, %v6622_v45 }
0x3421   : > { %vm3733_vm1 = vmor %vm3731_vm15, %vm3732_vm14 }
0x3422   : > { %v3728_v50 = vsub.f32 1.0, %v3727_v55 }
0x3424   : > { %v3729_v0 = vmul.f32 %v5539_v58, %v3728_v50 }
0x3426   : > { %v3730_v3 = vadd.f32 %v5539_v58, %v3729_v0 }
0x3428   : > { %v3734_v19 = vsel %vm3733_vm1, %v5539_v58, %v3730_v3 }
0x3429   : > { %v3739_v40 = vsel %vm3736_vm2, %v3738_v25, %v3734_v19 }
0x342a   : > { %v3753_v32 = vmul.f32 %v3739_v40, %v6627_v52 }
0x3465   : > { %v3745_v49 = vpop.permute.xlu2 %3744 }
0x3466   : > { %v3747_v54 = vmul.f32 %v3745_v49, %v3719_v60 }
0x3468   : > { %3749 = vrot.lane.b32.xlu1 %v3747_v54, %s5600_s21 }
0x347e   : > { %v3756_v38 = vpop.permute.xlu0 %3755 }
0x347f   : > { %v3758_v39 = vmul.f32 %v3756_v38, %v3739_v40 }
0x3481   : > { %3760 = vrot.lane.b32.xlu2 %v3758_v39, %s5600_s21 }
0x34da   : > { %v3750_v47 = vpop.permute.xlu1 %3749 }
0x34db   : > { %v3761_v1 = vpop.permute.xlu2 %3760  ;;  %v6646_v9 = vadd.f32 %v3750_v47, %v3742_v26 }
0x34dc   : > { %v6648_v10 = vadd.f32 %v3761_v1, %v3753_v32 }
0x34dd   : > { %5540 = vtanh.f32 %v6646_v9 }
0x34de   : > { %5542 = vtanh.f32 %v6648_v10 }
0x34e3   : > { %v5541_v13 = vpop.eup %5540 }
0x34e4   : > { %v5543_v12 = vpop.eup %5542  ;;  %3766 = vrot.lane.b32.xlu0 %v5541_v13, %s5600_s21 }
0x34e5   : > { %3772 = vrot.lane.b32.xlu1 %v5543_v12, %s5600_s21 }
0x3556   : > { %v3767_v31 = vpop.permute.xlu0 %3766 }
0x3557   : > { %v3773_v45 = vpop.permute.xlu1 %3772  ;;  %v3769_v21 = vmul.f32 %v3767_v31, %v3719_v60  ;;  %v3908_v31 = vld [vmem:[#allocation2 + $0x28] sm:$0xff] }
0x3558   : > { %v3775_v30 = vmul.f32 %v3773_v45, %v3739_v40  ;;  %v3907_v45 = vld [vmem:[#allocation2 + $0x20] sm:$0xff] }
0x3559   : > { %3777 = vrot.lane.b32.xlu2 %v3769_v21, %s5601_s22  ;;  %v3913_v21 = vpack.c.bf16 %v3908_v31, %v3907_v45 }
0x355a   : > { %3781 = vrot.lane.b32.xlu0 %v3775_v30, %s5602_s23  ;;  %v3905_v30 = vld [vmem:[#allocation2 + $0x10] sm:$0xff] }
0x35b3   : > { %v3778_v44 = vpop.permute.xlu2 %3777 }
0x35b4   : > { %3785 = vst.msk [vmem:[#allocation2 + $0x30] sm:$0xff] %vm705_vm0, %v3778_v44 }
0x35cc   : > { %v3782_v52 = vpop.permute.xlu0 %3781 }
0x35cd   : > { %v3784_v53 = vsel %vm705_vm0, %v3778_v44, %v3782_v52  ;;  %3786 = vst.msk [vmem:[#allocation2 + $0x8] sm:$0xff] %vm868_vm9, %v3782_v52  ;;  %v3906_v44 = vld [vmem:[#allocation2 + $0x18] sm:$0xff] }
0x35ce   : > { %v3787_v41 = vpack.c.bf16 %v3784_v53, %v3784_v53  ;;  %v3912_v52 = vpack.c.bf16 %v3906_v44, %v3905_v30 }
0x35d0   : > { %5044 = vmatmul.msk.bf16.vlgmr.msra.gmra.mxu0 %vm911_vm10, %v3787_v41  ;;  %5045 = vmatmul.msk.bf16.vlgmr.msra.gmra.mxu1 %vm911_vm10, %v3787_v41 }
0x35d4   : > { %v3904_v41 = vld [vmem:[#allocation2 + $0x8] sm:$0xff] }
0x364d   : > { %v3800_v37 = vpop.f32.mrf.mxu0  ;;  %v3813_v8 = vpop.f32.mrf.mxu1 }
0x364e   : > { %v3817_v29 = vadd.f32 %v3800_v37, %v2921_v51  ;;  %v3818_v16 = vadd.f32 %v3813_v8, %v6376_v15  ;;  %v5156_v37 = vld [vmem:[%s6785_s12] sm:$0xff]  ;;  %v5162_v8 = vld [vmem:[%s637_s14 + $0x18] sm:$0xff] }
0x364f   : > { %4021 = vmatpush.bf16.msrb.mxu3 %v5162_v8 }
0x3650   : > { %5544 = vtanh.f32 %v3817_v29  ;;  %v5047_v42 = vmul.f32 -1.442695, %v3818_v16  ;;  %v5046_v20 = vmul.f32 -1.442695, %v3817_v29  ;;  %v5161_v29 = vld [vmem:[%s637_s14 + $0x10] sm:$0xff] }
0x3651   : > { %5546 = vtanh.f32 %v3818_v16  ;;  %v5160_v16 = vld [vmem:[%s637_s14 + $0x8] sm:$0xff] }
0x3652   : > { %5548 = vpow2.f32 %v5047_v42 }
0x3653   : > { %4022 = vmatpush.bf16.msrb.mxu3 %v5161_v29 }
0x3655   : > { %v3802_v36 = vpop.f32.mrf.mxu0  ;;  %v3815_v56 = vpop.f32.mrf.mxu1 }
0x3656   : > { %v5545_v17 = vpop.eup %5544  ;;  %v5157_v36 = vld [vmem:[%s6785_s12 + $0x8] sm:$0xff]  ;;  %v5158_v56 = vld [vmem:[%s6785_s12 + $0x10] sm:$0xff] }
0x3657   : > { %v5547_v27 = vpop.eup %5546  ;;  %3861 = vrot.lane.b32.xlu1 %v5545_v17, %s5600_s21  ;;  %4023 = vmatpush.bf16.msrb.mxu3 %v5160_v16  ;;  %v5159_v17 = vld [vmem:[%s637_s14] sm:$0xff] }
0x3658   : > { %3872 = vrot.lane.b32.xlu2 %v5547_v27, %s5600_s21  ;;  %v5549_v28 = vpop.eup %5548 }
0x3659   : > { %v3842_v35 = vadd.f32 1.0, %v5549_v28 }
0x365b   : > { %5550 = vrcp.f32 %v3842_v35  ;;  %v3854_v2 = vand.u32 2147483648, %v3842_v35  ;;  %vm3848_vm4 = vweird.f32 %v3842_v35  ;;  %v3852_v18 = vand.u32 2147483647, %v3842_v35  ;;  %4024 = vmatpush.bf16.msrb.mxu3 %v5159_v17 }
0x365c   : > { %5552 = vpow2.f32 %v5046_v20 }
0x365d   : > { %v3855_v5 = vor.u32 1.1754944e-38, %v3854_v2  ;;  %vm3853_vm6 = vcmp.eq.f32.partialorder %v3852_v18, 8.507059e+37  ;;  %v6700_v18 = vld [vmem:[%s640_s28] ss:$0 sm:$0xff] }
0x3661   : > { %v5551_v63 = vpop.eup %5550 }
0x3662   : > { %v3844_v14 = vmul.f32 %v5551_v63, %v3842_v35  ;;  %v5553_v43 = vpop.eup %5552  ;;  %vm3849_vm3 = vweird.f32 %v5551_v63 }
0x3663   : > { %v3822_v4 = vadd.f32 1.0, %v5553_v43  ;;  %vm3850_vm5 = vmor %vm3848_vm4, %vm3849_vm3 }
0x3664   : > { %v3845_v15 = vsub.f32 1.0, %v3844_v14 }
0x3665   : > { %5554 = vrcp.f32 %v3822_v4  ;;  %v3834_v59 = vand.u32 2147483648, %v3822_v4  ;;  %vm3828_vm8 = vweird.f32 %v3822_v4  ;;  %v3832_v49 = vand.u32 2147483647, %v3822_v4 }
0x3666   : > { %v3846_v23 = vmul.f32 %v5551_v63, %v3845_v15 }
0x3667   : > { %v3835_v54 = vor.u32 1.1754944e-38, %v3834_v59  ;;  %vm3833_vm12 = vcmp.eq.f32.partialorder %v3832_v49, 8.507059e+37 }
0x3668   : > { %v3847_v48 = vadd.f32 %v5551_v63, %v3846_v23 }
0x366a   : > { %v3851_v33 = vsel %vm3850_vm5, %v5551_v63, %v3847_v48 }
0x366b   : > { %v3856_v24 = vsel %vm3853_vm6, %v3855_v5, %v3851_v33  ;;  %v5555_v61 = vpop.eup %5554 }
0x366c   : > { %v3824_v34 = vmul.f32 %v5555_v61, %v3822_v4  ;;  %vm3829_vm7 = vweird.f32 %v5555_v61  ;;  %v3870_v0 = vmul.f32 %v3856_v24, %v6648_v10 }
0x366d   : > { %vm3830_vm11 = vmor %vm3828_vm8, %vm3829_vm7 }
0x366e   : > { %v3825_v7 = vsub.f32 1.0, %v3824_v34 }
0x3670   : > { %v3826_v11 = vmul.f32 %v5555_v61, %v3825_v7 }
0x3672   : > { %v3827_v57 = vadd.f32 %v5555_v61, %v3826_v11 }
0x3674   : > { %v3831_v60 = vsel %vm3830_vm11, %v5555_v61, %v3827_v57 }
0x3675   : > { %v3836_v55 = vsel %vm3833_vm12, %v3835_v54, %v3831_v60 }
0x3676   : > { %v3859_v19 = vmul.f32 %v3836_v55, %v6646_v9  ;;  %v3909_v9 = vld [vmem:[#allocation2 + $0x30] sm:$0xff] }
0x36b2   : > { %v3873_v46 = vpop.permute.xlu2 %3872 }
0x36b3   : > { %v3875_v62 = vmul.f32 %v3873_v46, %v3856_v24 }
0x36b5   : > { %3877 = vrot.lane.b32.xlu1 %v3875_v62, %s5600_s21 }
0x36c9   : > { %v3862_v58 = vpop.permute.xlu1 %3861 }
0x36ca   : > { %v3864_v50 = vmul.f32 %v3862_v58, %v3836_v55 }
0x36cc   : > { %3866 = vrot.lane.b32.xlu0 %v3864_v50, %s5600_s21 }
0x3727   : > { %v3878_v3 = vpop.permute.xlu1 %3877 }
0x3728   : > { %v3880_v6 = vadd.f32 %v3878_v3, %v3870_v0 }
0x372a   : > { %5556 = vtanh.f32 %v3880_v6 }
0x3730   : > { %v5557_v22 = vpop.eup %5556 }
0x3731   : > { %3889 = vrot.lane.b32.xlu0 %v5557_v22, %s5600_s21 }
0x373e   : > { %v3867_v25 = vpop.permute.xlu0 %3866 }
0x373f   : > { %v3869_v38 = vadd.f32 %v3867_v25, %v3859_v19 }
0x3741   : > { %5558 = vtanh.f32 %v3869_v38 }
0x3747   : > { %v5559_v40 = vpop.eup %5558 }
0x3748   : > { %3883 = vrot.lane.b32.xlu2 %v5559_v40, %s5600_s21  ;;  %s6746_s21 = scalar_lea.vmem %s6786_s13, %s5684_s27 }
0x37a2   : > { %v3884_v39 = vpop.permute.xlu2 %3883 }
0x37a3   : > { %v3890_v26 = vpop.permute.xlu0 %3889  ;;  %v3886_v32 = vmul.f32 %v3884_v39, %v3836_v55 }
0x37a4   : > { %v3892_v47 = vmul.f32 %v3890_v26, %v3856_v24 }
0x37a5   : > { %3894 = vrot.lane.b32.xlu1 %v3886_v32, %s5601_s22 }
0x37a6   : > { %3899 = vrot.lane.b32.xlu2 %v3892_v47, %s5602_s23 }
0x3800   : > { %v3900_v1 = vpop.permute.xlu2 %3899 }
0x3801   : > { %3902 = vst.msk [vmem:[#allocation2] sm:$0xff] %vm868_vm9, %v3900_v1  ;;  %vm4064_vm9 = vcmask 64512  }
0x3808   : > { %v3903_v53 = vld [vmem:[#allocation2] sm:$0xff] }
0x3809   : > { %v3911_v51 = vpack.c.bf16 %v3904_v41, %v3903_v53 }
0x3817   : > { %v3895_v10 = vpop.permute.xlu1 %3894 }
0x3818   : > { %3897 = vst.msk [vmem:[#allocation2 + $0x38] sm:$0xff] %vm705_vm0, %v3895_v10  ;;  %vm4094_vm0 = vcmask 1043456  }
0x381f   : > { %v3910_v13 = vld [vmem:[#allocation2 + $0x38] sm:$0xff] }
0x3820   : > { %v3914_v12 = vpack.c.bf16 %v3910_v13, %v3909_v9 }
0x3822   : > { %3949 = vmatpush.bf16.msrb.mxu2 %v3914_v12 }
0x3826   : > { %3950 = vmatpush.bf16.msrb.mxu2 %v3913_v21 }
0x382a   : > { %3951 = vmatpush.bf16.msrb.mxu2 %v3912_v52 }
0x382e   : > { %3952 = vmatpush.bf16.msrb.mxu2 %v3911_v51 }
0x3831   : > { %5060 = vmatmul.msk.bf16.vlgmr.msrb.gmra.mxu2 %vm911_vm10, %v5156_v37 }
0x3841   : > { %5061 = vmatmul.msk.bf16.gmra.mxu2 %vm911_vm10, %v5157_v36 }
0x3851   : > { %5062 = vmatmul.msk.bf16.gmra.mxu2 %vm911_vm10, %v5158_v56 }
0x38b4   : > { %v3954_v27 = vpop.f32.mrf.mxu2 }
0x38b5   : > { %v4043_v42 = vpack.c.bf16 %v3954_v27, %v3954_v27 }
0x38b7   : > { %v4095_v28 = vsel %vm4094_vm0, %v4043_v42, 0 }
0x38b8   : > { %4104 = vmatpush.bf16.msrb.mxu1 %v4095_v28  ;;  %4347 = vmatpush.bf16.msra.mxu3 %v4095_v28 }
0x38bc   : > { %v3956_v35 = vpop.f32.mrf.mxu2 }
0x38bd   : > { %v3969_v63 = vpack.c.bf16 %v3956_v35, %v3954_v27  ;;  %v6708_v54 = vpack.c.bf16 %v3956_v35, %v3956_v35 }
0x38bf   : > { %5079 = vmatmul.msk.bf16.vlgmr.msrb.gmra.mxu3 %vm911_vm10, %v3969_v63  ;;  %v4219_v50 = vsel %vm4094_vm0, %v6708_v54, 0 }
0x38c4   : > { %v3959_v20 = vpop.f32.mrf.mxu2 }
0x38cc   : > { %v3961_v14 = vpop.f32.mrf.mxu2 }
0x38cd   : > { %v3970_v15 = vpack.c.bf16 %v3961_v14, %v3959_v20 }
0x38cf   : > { %5080 = vmatmul.msk.bf16.gmra.mxu3 %vm911_vm10, %v3970_v15 }
0x38d4   : > { %v3964_v43 = vpop.f32.mrf.mxu2 }
0x38dc   : > { %v3966_v23 = vpop.f32.mrf.mxu2 }
0x38dd   : > { %v3971_v4 = vpack.c.bf16 %v3966_v23, %v3964_v43 }
0x38df   : > { %5081 = vmatmul.msk.bf16.gmra.mxu3 %vm911_vm10, %v3971_v4 }
0x3942   : > { %v4026_v48 = vpop.f32.mrf.mxu3 }
0x394a   : > { %v4027_v2 = vpop.f32.mrf.mxu3 }
0x3952   : > { %v4029_v33 = vpop.f32.mrf.mxu3 }
0x3953   : > { %v4030_v5 = vadd.f32 %v6700_v18, %v4029_v33 }
0x3955   : > { %5560 = vtanh.f32 %v4030_v5 }
0x395a   : > { %v4031_v46 = vpop.f32.mrf.mxu3 }
0x395b   : > { %v5561_v24 = vpop.eup %5560  ;;  %v4032_v61 = vadd.f32 %v6700_v18, %v4031_v46 }
0x395c   : > { %v4044_v62 = vpack.c.bf16 %v5561_v24, %v5561_v24 }
0x395d   : > { %5562 = vtanh.f32 %v4032_v61 }
0x395e   : > { %v4049_v34 = vsel %vm911_vm10, %v4044_v62, 0 }
0x395f   : > { %4058 = vmatpush.bf16.xpose.msrb.mxu0 %v4049_v34 }
0x3962   : > { %v4034_v7 = vpop.f32.mrf.mxu3 }
0x3963   : > { %v5563_v11 = vpop.eup %5562  ;;  %v4035_v57 = vadd.f32 %v6700_v18, %v4034_v7 }
0x3964   : > { %v4170_v59 = vpack.c.bf16 %v5563_v11, %v5563_v11 }
0x3965   : > { %5564 = vtanh.f32 %v4035_v57 }
0x3966   : > { %5082 = vmatmul.msk.bf16.vlgmr.msrb.gmra.mxu0 %vm911_vm10, %v4043_v42  ;;  %v4175_v49 = vsel %vm911_vm10, %v4170_v59, 0 }
0x3967   : > { %4184 = vmatpush.bf16.xpose.msra.mxu1 %v4175_v49 }
0x396b   : > { %v5565_v60 = vpop.eup %5564 }
0x396c   : > { %v4294_v58 = vpack.c.bf16 %v5565_v60, %v5565_v60 }
0x396e   : > { %v4296_v55 = vsel %vm911_vm10, %v4294_v58, 0 }
0x396f   : > { %4305 = vmatpush.bf16.xpose.msra.mxu2 %v4296_v55 }
0x3976   : > { %5089 = vmatmul.msk.bf16.vlgmr.msra.gmra.mxu2 %vm911_vm10, %v4043_v42 }
0x3977   : > { %4466 = vmatpush.bf16.msrb.mxu2 %v4219_v50 }
0x39e3   : > { %v4060_v0 = vpop.f32.mrf.mxu0 }
0x39e4   : > { %v4065_v3 = vsel %vm4064_vm9, %v4060_v0, -inf }
0x39e5   : > { %4066 = vmax.xlane.f32.xlu0 %v4065_v3 }
0x39eb   : > { %v4062_v6 = vpop.f32.mrf.mxu0 }
0x39f9   : > { %v6715_v22 = vpop.f32.mrf.mxu2 }
0x3a01   : > { %v4309_v19 = vpop.f32.mrf.mxu2 }
0x3a58   : > { %v4067_v25 = vpop.xlane.xlu0 %4066 }
0x3a59   : > { %v4068_v38 = vrot.slane %v4067_v25, 4 }
0x3a5b   : > { %v4069_v40 = vmax.f32 %v4067_v25, %v4068_v38 }
0x3a5d   : > { %v4070_v39 = vrot.slane %v4069_v40, 2 }
0x3a5f   : > { %v4071_v26 = vmax.f32 %v4069_v40, %v4070_v39 }
0x3a61   : > { %v4072_v32 = vrot.slane %v4071_v26, 1 }
0x3a63   : > { %v4073_v47 = vmax.f32 %v4071_v26, %v4072_v32 }
0x3a65   : > { %v4074_v1 = vsub.f32 %v4060_v0, %v4073_v47  ;;  %v4036_v0 = vpop.f32.mrf.mxu3 }
0x3a66   : > { %v4037_v3 = vadd.f32 %v6700_v18, %v4036_v0 }
0x3a67   : > { %v4075_v10 = vmul.f32 1.442695, %v4074_v1 }
0x3a69   : > { %5566 = vpow2.f32 %v4075_v10 }
0x3a6f   : > { %v5567_v9 = vpop.eup %5566 }
0x3a70   : > { %v4077_v13 = vsel %vm4064_vm9, %v5567_v9, 0.0 }
0x3a71   : > { %4078 = vadd.xlane.f32.xlu1 %v4077_v13  ;;  %v4081_v12 = vrot.slane %v4077_v13, 4 }
0x3a73   : > { %v4082_v31 = vadd.f32 %v4081_v12, %v4077_v13  ;;  %v4311_v12 = vsel %vm4064_vm9, %v6715_v22, -inf }
0x3a75   : > { %v4083_v45 = vrot.slane %v4082_v31, 2 }
0x3a77   : > { %v4084_v21 = vadd.f32 %v4083_v45, %v4082_v31 }
0x3a79   : > { %v4085_v30 = vrot.slane %v4084_v21, 1 }
0x3a7b   : > { %v4086_v44 = vadd.f32 %v4085_v30, %v4084_v21 }
0x3a7d   : > { %5568 = vrcp.f32 %v4086_v44 }
0x3a83   : > { %v5569_v52 = vpop.eup %5568 }
0x3a84   : > { %v4089_v53 = vmul.f32 %v5569_v52, %v5567_v9 }
0x3a86   : > { %4110 = vxpose.xlu0.b32.start.end [1/1] (short) (narrow) %v4089_v53, 8 }
0x3ae4   : > { %v4079_v41 = vpop.xlane.xlu1 %4078 }
0x3ae5   : > { %5570 = vrcp.f32 %v4079_v41 }
0x3aeb   : > { %v5571_v51 = vpop.eup %5570 }
0x3aec   : > { %v4088_v37 = vmul.f32 %v5571_v51, %v5567_v9 }
0x3aee   : > { %v4090_v8 = vpack.c.bf16 %v4088_v37, %v4088_v37 }
0x3af0   : > { %5083 = vmatmul.msk.bf16.vlgmr.msrb.gmra.mxu1 %vm4064_vm9, %v4090_v8 }
0x3b00   : > { %5085 = vmatmul.msk.bf16.vlgmr.msra.gmra.mxu1 %vm911_vm10, %v6708_v54 }
0x3b2a   : > { %v4126_v4 = vpop.trf.xlu0 }
0x3b2b   : > { %v4142_v2 = vpack.c.bf16 %v4126_v4, %v4126_v4 }
0x3b6d   : > { %v6721_v29 = vpop.f32.mrf.mxu1 }
0x3b6e   : > { %v4143_v16 = vpack.c.bf16 %v6721_v29, %v6721_v29 }
0x3b70   : > { %v4148_v36 = vsel %vm4094_vm0, %v4143_v16, 0 }
0x3b71   : > { %4157 = vmatpush.bf16.msra.mxu0 %v4148_v36 }
0x3b74   : > { %5084 = vmatmul.msk.bf16.vlgmr.msra.gmra.mxu0 %vm4064_vm9, %v4142_v2 }
0x3b75   : > { %4228 = vmatpush.bf16.msrb.mxu0 %v4219_v50  ;;  %v4108_v56 = vpop.f32.mrf.mxu1 }
0x3b7d   : > { %v4186_v17 = vpop.f32.mrf.mxu1 }
0x3b7e   : > { %v4190_v27 = vsel %vm4064_vm9, %v4186_v17, -inf }
0x3b7f   : > { %4191 = vmax.xlane.f32.xlu2 %v4190_v27 }
0x3b85   : > { %v4188_v42 = vpop.f32.mrf.mxu1 }
0x3bf1   : > { %v6729_v49 = vpop.f32.mrf.mxu0 }
0x3bf2   : > { %v4192_v28 = vpop.xlane.xlu2 %4191 }
0x3bf3   : > { %v4193_v35 = vrot.slane %v4192_v28, 4 }
0x3bf5   : > { %v4194_v63 = vmax.f32 %v4192_v28, %v4193_v35 }
0x3bf7   : > { %v4195_v20 = vrot.slane %v4194_v63, 2 }
0x3bf9   : > { %v4196_v14 = vmax.f32 %v4194_v63, %v4195_v20  ;;  %v4161_v50 = vpop.f32.mrf.mxu0 }
0x3bfb   : > { %v4197_v15 = vrot.slane %v4196_v14, 1 }
0x3bfd   : > { %v4198_v43 = vmax.f32 %v4196_v14, %v4197_v15 }
0x3bff   : > { %v4199_v23 = vsub.f32 %v4186_v17, %v4198_v43 }
0x3c01   : > { %v4200_v48 = vmul.f32 1.442695, %v4199_v23 }
0x3c03   : > { %5572 = vpow2.f32 %v4200_v48 }
0x3c09   : > { %v5573_v33 = vpop.eup %5572 }
0x3c0a   : > { %v4202_v5 = vsel %vm4064_vm9, %v5573_v33, 0.0 }
0x3c0b   : > { %4203 = vadd.xlane.f32.xlu2 %v4202_v5  ;;  %v4206_v46 = vrot.slane %v4202_v5, 4 }
0x3c0d   : > { %v4207_v24 = vadd.f32 %v4206_v46, %v4202_v5 }
0x3c0f   : > { %v4208_v61 = vrot.slane %v4207_v24, 2 }
0x3c11   : > { %v4209_v62 = vadd.f32 %v4208_v61, %v4207_v24 }
0x3c13   : > { %v4210_v34 = vrot.slane %v4209_v62, 1 }
0x3c15   : > { %v4211_v7 = vadd.f32 %v4210_v34, %v4209_v62 }
0x3c17   : > { %5574 = vrcp.f32 %v4211_v7 }
0x3c1d   : > { %v5575_v11 = vpop.eup %5574 }
0x3c1e   : > { %v4214_v57 = vmul.f32 %v5575_v11, %v5573_v33 }
0x3c20   : > { %4234 = vxpose.xlu1.b32.start.end [1/1] (short) (narrow) %v4214_v57, 8 }
0x3c7e   : > { %v4204_v59 = vpop.xlane.xlu2 %4203 }
0x3c7f   : > { %5576 = vrcp.f32 %v4204_v59 }
0x3c80   : > { %5578 = vtanh.f32 %v4037_v3 }
0x3c85   : > { %v5577_v60 = vpop.eup %5576 }
0x3c86   : > { %v4213_v58 = vmul.f32 %v5577_v60, %v5573_v33  ;;  %v5579_v6 = vpop.eup %5578 }
0x3c87   : > { %v4413_v19 = vpack.c.bf16 %v5579_v6, %v5579_v6 }
0x3c88   : > { %v4215_v55 = vpack.c.bf16 %v4213_v58, %v4213_v58 }
0x3c89   : > { %v4415_v32 = vsel %vm911_vm10, %v4413_v19, 0 }
0x3c8a   : > { %5086 = vmatmul.msk.bf16.vlgmr.msrb.gmra.mxu0 %vm4064_vm9, %v4215_v55 }
0x3cc4   : > { %v4250_v38 = vpop.trf.xlu1 }
0x3cc5   : > { %v4266_v39 = vpack.c.bf16 %v4250_v38, %v4250_v38 }
0x3d07   : > { %v4230_v25 = vpop.f32.mrf.mxu0 }
0x3d08   : > { %v4267_v40 = vpack.c.bf16 %v4230_v25, %v4230_v25 }
0x3d0a   : > { %v4272_v26 = vsel %vm4094_vm0, %v4267_v40, 0 }
0x3d0b   : > { %4281 = vmatpush.bf16.msrb.mxu1 %v4272_v26 }
0x3d0e   : > { %5087 = vmatmul.msk.bf16.vlgmr.msrb.gmra.mxu1 %vm4064_vm9, %v4266_v39 }
0x3d0f   : > { %4424 = vmatpush.bf16.xpose.msra.mxu1 %v4415_v32  ;;  %v4232_v47 = vpop.f32.mrf.mxu0 }
0x3d1e   : > { %5093 = vmatmul.msk.bf16.vlgmr.msra.gmra.mxu1 %vm911_vm10, %v6708_v54 }
0x3d8b   : > { %v4283_v18 = vpop.f32.mrf.mxu1 }
0x3d8c   : > { %4288 = vrot.lane.b32.xlu1 %v4283_v18, %s5601_s22 }
0x3d93   : > { %v4285_v1 = vpop.f32.mrf.mxu1 }
0x3d9b   : > { %v4426_v10 = vpop.f32.mrf.mxu1 }
0x3d9c   : > { %v4430_v9 = vsel %vm4064_vm9, %v4426_v10, -inf }
0x3d9d   : > { %4431 = vmax.xlane.f32.xlu2 %v4430_v9 }
0x3da3   : > { %v4428_v13 = vpop.f32.mrf.mxu1 }
0x3da5   : > { %4312 = vmax.xlane.f32.xlu2 %v4311_v12 }
0x3dfe   : > { %v4289_v54 = vpop.permute.xlu1 %4288 }
0x3dff   : > { %v4291_v31 = vsel %vm911_vm10, %v4230_v25, %v4289_v54 }
0x3e00   : > { %5088 = vst [vmem:[%s6746_s21 + $0x8] sm:$0xff] %v4291_v31 }
0x3e10   : > { %v4432_v45 = vpop.xlane.xlu2 %4431 }
0x3e11   : > { %v4433_v21 = vrot.slane %v4432_v45, 4 }
0x3e13   : > { %v4434_v30 = vmax.f32 %v4432_v45, %v4433_v21 }
0x3e15   : > { %v4435_v44 = vrot.slane %v4434_v30, 2 }
0x3e17   : > { %v4436_v52 = vmax.f32 %v4434_v30, %v4435_v44 }
0x3e18   : > { %v4313_v53 = vpop.xlane.xlu2 %4312 }
0x3e19   : > { %v4437_v41 = vrot.slane %v4436_v52, 1  ;;  %v4314_v51 = vrot.slane %v4313_v53, 4 }
0x3e1b   : > { %v4438_v37 = vmax.f32 %v4436_v52, %v4437_v41  ;;  %v4315_v8 = vmax.f32 %v4313_v53, %v4314_v51 }
0x3e1d   : > { %v4439_v16 = vsub.f32 %v4426_v10, %v4438_v37  ;;  %v4316_v36 = vrot.slane %v4315_v8, 2 }
0x3e1f   : > { %v4440_v56 = vmul.f32 1.442695, %v4439_v16  ;;  %v4317_v17 = vmax.f32 %v4315_v8, %v4316_v36 }
0x3e21   : > { %5580 = vpow2.f32 %v4440_v56  ;;  %v4318_v27 = vrot.slane %v4317_v17, 1 }
0x3e23   : > { %v4319_v42 = vmax.f32 %v4317_v17, %v4318_v27 }
0x3e25   : > { %v4320_v28 = vsub.f32 %v6715_v22, %v4319_v42 }
0x3e27   : > { %v5581_v35 = vpop.eup %5580  ;;  %v4321_v63 = vmul.f32 1.442695, %v4320_v28 }
0x3e28   : > { %v4442_v20 = vsel %vm4064_vm9, %v5581_v35, 0.0 }
0x3e29   : > { %5582 = vpow2.f32 %v4321_v63  ;;  %4443 = vadd.xlane.f32.xlu2 %v4442_v20  ;;  %v4446_v48 = vrot.slane %v4442_v20, 4 }
0x3e2b   : > { %v4447_v5 = vadd.f32 %v4446_v48, %v4442_v20 }
0x3e2d   : > { %v4448_v22 = vrot.slane %v4447_v5, 2 }
0x3e2f   : > { %v5583_v14 = vpop.eup %5582  ;;  %v4449_v61 = vadd.f32 %v4448_v22, %v4447_v5 }
0x3e30   : > { %v4323_v15 = vsel %vm4064_vm9, %v5583_v14, 0.0 }
0x3e31   : > { %4324 = vadd.xlane.f32.xlu2 %v4323_v15  ;;  %v4327_v43 = vrot.slane %v4323_v15, 4  ;;  %v4450_v34 = vrot.slane %v4449_v61, 1 }
0x3e33   : > { %v4328_v23 = vadd.f32 %v4327_v43, %v4323_v15  ;;  %v4451_v7 = vadd.f32 %v4450_v34, %v4449_v61 }
0x3e35   : > { %v4329_v4 = vrot.slane %v4328_v23, 2 }
0x3e37   : > { %v4330_v2 = vadd.f32 %v4329_v4, %v4328_v23 }
0x3e39   : > { %v4331_v33 = vrot.slane %v4330_v2, 1 }
0x3e3b   : > { %v4332_v46 = vadd.f32 %v4331_v33, %v4330_v2 }
0x3e3d   : > { %5584 = vrcp.f32 %v4332_v46 }
0x3e3e   : > { %5586 = vrcp.f32 %v4451_v7 }
0x3e43   : > { %v5585_v24 = vpop.eup %5584 }
0x3e44   : > { %v4335_v62 = vmul.f32 %v5585_v24, %v5583_v14  ;;  %v5587_v11 = vpop.eup %5586 }
0x3e45   : > { %v4454_v57 = vmul.f32 %v5587_v11, %v5581_v35 }
0x3e46   : > { %4353 = vxpose.xlu0.b32.start.end [1/1] (short) (narrow) %v4335_v62, 8 }
0x3e5a   : > { %4472 = vxpose.xlu2.b32.start.end [1/1] (short) (narrow) %v4454_v57, 8 }
0x3e9c   : > { %v4444_v59 = vpop.xlane.xlu2 %4443 }
0x3e9d   : > { %5588 = vrcp.f32 %v4444_v59 }
0x3ea3   : > { %v5589_v60 = vpop.eup %5588 }
0x3ea4   : > { %v4453_v58 = vmul.f32 %v5589_v60, %v5581_v35  ;;  %v4325_v55 = vpop.xlane.xlu2 %4324 }
0x3ea5   : > { %5590 = vrcp.f32 %v4325_v55 }
0x3ea6   : > { %v4455_v50 = vpack.c.bf16 %v4453_v58, %v4453_v58 }
0x3ea8   : > { %5094 = vmatmul.msk.bf16.vlgmr.msrb.gmra.mxu2 %vm4064_vm9, %v4455_v50 }
0x3eab   : > { %v5591_v0 = vpop.eup %5590 }
0x3eac   : > { %v4334_v3 = vmul.f32 %v5591_v0, %v5583_v14 }
0x3eae   : > { %v4336_v6 = vpack.c.bf16 %v4334_v3, %v4334_v3 }
0x3eb0   : > { %5090 = vmatmul.msk.bf16.vlgmr.msra.gmra.mxu3 %vm4064_vm9, %v4336_v6 }
0x3eb4   : > { %4164 = vrot.lane.b32.xlu0 %v6729_v49, %s5601_s22 }
0x3eea   : > { %v4369_v19 = vpop.trf.xlu0 }
0x3eeb   : > { %v4385_v49 = vpack.c.bf16 %v4369_v19, %v4369_v19 }
0x3ef3   : > { %v4488_v39 = vpop.trf.xlu2 }
0x3ef4   : > { %v4504_v32 = vpack.c.bf16 %v4488_v39, %v4488_v39 }
0x3f26   : > { %v4165_v25 = vpop.permute.xlu0 %4164 }
0x3f27   : > { %v4167_v38 = vsel %vm911_vm10, %v6721_v29, %v4165_v25 }
0x3f28   : > { %4168 = vst [vmem:[%s6746_s21] sm:$0xff] %v4167_v38 }
0x3f2b   : > { %v4468_v40 = vpop.f32.mrf.mxu2 }
0x3f2c   : > { %v4505_v26 = vpack.c.bf16 %v4468_v40, %v4468_v40 }
0x3f2e   : > { %v4510_v47 = vsel %vm4094_vm0, %v4505_v26, 0 }
0x3f2f   : > { %4519 = vmatpush.bf16.msrb.mxu3 %v4510_v47 }
0x3f32   : > { %5095 = vmatmul.msk.bf16.vlgmr.msrb.gmra.mxu3 %vm4064_vm9, %v4504_v32 }
0x3f33   : > { %v4349_v18 = vpop.f32.mrf.mxu3  ;;  %v4470_v1 = vpop.f32.mrf.mxu2 }
0x3f34   : > { %v4386_v10 = vpack.c.bf16 %v4349_v18, %v4349_v18 }
0x3f36   : > { %v4391_v9 = vsel %vm4094_vm0, %v4386_v10, 0 }
0x3f37   : > { %4400 = vmatpush.bf16.msra.mxu0 %v4391_v9 }
0x3f3a   : > { %5091 = vmatmul.msk.bf16.vlgmr.msra.gmra.mxu0 %vm4064_vm9, %v4385_v49 }
0x3f3b   : > { %v4351_v29 = vpop.f32.mrf.mxu3 }
0x3fb5   : > { %v4521_v13 = vpop.f32.mrf.mxu3 }
0x3fb6   : > { %4526 = vrot.lane.b32.xlu1 %v4521_v13, %s5601_s22 }
0x3fb7   : > { %v4402_v12 = vpop.f32.mrf.mxu0 }
0x3fb8   : > { %4407 = vrot.lane.b32.xlu2 %v4402_v12, %s5601_s22 }
0x3fbd   : > { %v4523_v54 = vpop.f32.mrf.mxu3 }
0x3fbf   : > { %v4404_v31 = vpop.f32.mrf.mxu0 }
0x4012   : > { %v4408_v45 = vpop.permute.xlu2 %4407 }
0x4013   : > { %v4410_v21 = vsel %vm911_vm10, %v4349_v18, %v4408_v45 }
0x4014   : > { %5092 = vst [vmem:[%s6746_s21 + $0x10] sm:$0xff] %v4410_v21 }
0x4028   : > { %v4527_v30 = vpop.permute.xlu1 %4526 }
0x4029   : > { %v4529_v44 = vsel %vm911_vm10, %v4468_v40, %v4527_v30 }
0x402a   : > { %5096 = vst [vmem:[%s6746_s21 + $0x18] sm:$0xff] %v4529_v44 }
0x402b PF: > { %s23_s25 = sadd.s32 1, %s5598_s25  }
0x402c   : > { %p20_p4 = scmp.ge.s32.totalorder %s23_s25, 4  }
0x402e   :  { %22 = sbr.rel (!%p20_p4) target bundleno = 1 (0x1), region = 138 }

</bundles_post_ra>
